<compile_context>
chip_gen: v5e
topology: v5e:2x2
jax: 0.10.0
libtpu: 0.0.40
codegen_flags: <defaults>
</compile_context>

<pallas_src>
import functools

import jax
import jax.numpy as jnp
from jax.experimental import pallas as pl
from jax.experimental.pallas import tpu as pltpu

LANE = 128            # TPU lane width; channel / feature dims are padded to this
_K = 5                # conv kernel size
_C1, _C2 = 6, 16      # conv output channels (un-padded)
_FC1, _FC2 = 120, 84  # fc hidden sizes (un-padded)


# ----------------------------------------------------------------------------
# Fused Pallas kernel
# ----------------------------------------------------------------------------
def _pool2x2_relu(a):
    """2x2/stride-2 max-pool followed by ReLU on a (TB, H, W, C) value."""
    tb, h, w, c = a.shape
    a = a.reshape(tb * (h // 2), 2, w, c)
    a = jnp.max(a, axis=1)                        # pool over H (row pairs)
    a = a.reshape(tb * (h // 2), w // 2, 2, c)
    a = jnp.max(a, axis=2)                        # pool over W (column pairs)
    a = a.reshape(tb, h // 2, w // 2, c)
    return jnp.maximum(a, 0.0)


def _mnist_fused_kernel(xp_ref, w1_ref, b1_ref, w2_ref, b2_ref,
                        fc1w_ref, fc1b_ref, fc2w_ref, fc2b_ref,
                        fc3w_ref, fc3b_ref, out_ref, *, tile_b, last_act):
    tb = tile_b
    bf16 = jnp.bfloat16

    # ---- conv1: single MXU matmul on pre-built im2col patches (bf16 x bf16,
    #      f32 accumulation).  Patches: (tb, 576, 32) with 25 live K rows.
    patches = xp_ref[...].reshape(tb * 576, 32)                  # bf16
    c1 = jnp.dot(patches, w1_ref[...], preferred_element_type=jnp.float32)
    c1 = (c1 + b1_ref[...]).reshape(tb, 24, 24, LANE)            # f32
    p1 = _pool2x2_relu(c1).astype(bf16)                          # (tb,12,12,128)

    # ---- conv2: 5x5, 6 -> 16 (padded to 128) channels as 25 bf16 tap-matmuls.
    acc2 = jnp.zeros((tb * 64, LANE), jnp.float32)
    for kh in range(_K):
        for kw in range(_K):
            tap = p1[:, kh:kh + 8, kw:kw + 8, :].reshape(tb * 64, LANE)
            acc2 = acc2 + jnp.dot(tap, w2_ref[kh * _K + kw],
                                  preferred_element_type=jnp.float32)
    c2 = (acc2 + b2_ref[...]).reshape(tb, 8, 8, LANE)
    p2 = _pool2x2_relu(c2).astype(bf16)                          # (tb,4,4,128)

    # ---- fc1: PyTorch's NCHW flatten is folded into per-position weight slabs.
    h = jnp.zeros((tb, LANE), jnp.float32)
    for p in range(16):
        h = h + jnp.dot(p2[:, p // 4, p % 4, :], fc1w_ref[p],
                        preferred_element_type=jnp.float32)
    h = jnp.maximum(h + fc1b_ref[...], 0.0).astype(bf16)         # (tb, 128)

    # ---- fc2
    h = jnp.maximum(jnp.dot(h, fc2w_ref[...],
                            preferred_element_type=jnp.float32) + fc2b_ref[...],
                    0.0).astype(bf16)

    # ---- fc3 (+ softmax / sigmoid).  The padded-lane mask is folded into the
    #      fc3 bias (-1e30 on padded lanes), so no iota/where is needed here.
    logits = (jnp.dot(h, fc3w_ref[...], preferred_element_type=jnp.float32)
              + fc3b_ref[...])
    if last_act == "softmax":                   # nn.Softmax(dim=1)
        m = jnp.max(logits, axis=-1, keepdims=True)
        e = jnp.exp(logits - m)
        out = e / jnp.sum(e, axis=-1, keepdims=True)   # exact division
    elif last_act == "sigmoid":                 # nn.Sigmoid() (N == 1 case)
        out = 1.0 / (1.0 + jnp.exp(-logits))
    else:
        out = logits
    out_ref[:, 0, :] = out.astype(out_ref.dtype)


# ----------------------------------------------------------------------------
# Parameter setup (PyTorch layout) and one-time packing to kernel layout
# ----------------------------------------------------------------------------
def init_params(key, N=10, size=16 * 4 * 4):
    ks = jax.random.split(key, 10)

    def u(k, shape, fan_in):
        bound = 1.0 / float(fan_in) ** 0.5   # mimic PyTorch default init range
        return jax.random.uniform(k, shape, jnp.float32, -bound, bound)

    return {
        "conv1_w": u(ks[0], (6, 1, 5, 5), 1 * 5 * 5),
        "conv1_b": u(ks[1], (6,), 1 * 5 * 5),
        "conv2_w": u(ks[2], (16, 6, 5, 5), 6 * 5 * 5),
        "conv2_b": u(ks[3], (16,), 6 * 5 * 5),
        "fc1_w": u(ks[4], (120, size), size),
        "fc1_b": u(ks[5], (120,), size),
        "fc2_w": u(ks[6], (84, 120), 120),
        "fc2_b": u(ks[7], (84,), 120),
        "fc3_w": u(ks[8], (N, 84), 84),
        "fc3_b": u(ks[9], (N,), 84),
    }


def pack_params(params, n_classes=10):
    """Pre-transpose / zero-pad every tensor once into the kernel's layout.

    Weight matrices are stored in bfloat16 (MXU operands); biases stay f32.
    The fc3 bias carries -1e30 on padded lanes to mask them out of the softmax.
    """
    f32, bf16 = jnp.float32, jnp.bfloat16

    def pad_bias(b, fill=0.0):
        b = jnp.asarray(b, f32).reshape(1, -1)
        out = jnp.full((1, LANE), fill, f32)
        return out.at[:, :b.shape[1]].set(b)

    # conv1: (6,1,5,5) -> rows (kh*5+kw), cols oc, padded to (32, 128)
    w1 = jnp.transpose(jnp.asarray(params["conv1_w"], f32),
                       (2, 3, 1, 0)).reshape(25, _C1)
    w1p = jnp.zeros((32, LANE), f32).at[:25, :_C1].set(w1).astype(bf16)

    # conv2: (16,6,5,5) -> (tap, ic, oc) padded to (25, 128, 128)
    w2 = jnp.transpose(jnp.asarray(params["conv2_w"], f32),
                       (2, 3, 1, 0)).reshape(25, _C1, _C2)
    w2p = jnp.zeros((25, LANE, LANE), f32).at[:, :_C1, :_C2].set(w2).astype(bf16)

    # fc1: (120, 256=c*16+h*4+w) -> (p=h*4+w, c, n) padded to (16, 128, 128)
    fw1 = jnp.asarray(params["fc1_w"], f32).reshape(_FC1, _C2, 4, 4)
    fw1 = jnp.transpose(fw1, (2, 3, 1, 0)).reshape(16, _C2, _FC1)
    fc1wp = jnp.zeros((16, LANE, LANE), f32).at[:, :_C2, :_FC1].set(fw1).astype(bf16)

    fc2wp = jnp.zeros((LANE, LANE), f32).at[:_FC1, :_FC2].set(
        jnp.asarray(params["fc2_w"], f32).T).astype(bf16)
    fc3wp = jnp.zeros((LANE, LANE), f32).at[:_FC2, :n_classes].set(
        jnp.asarray(params["fc3_w"], f32).T).astype(bf16)

    return (w1p, pad_bias(params["conv1_b"]),
            w2p, pad_bias(params["conv2_b"]),
            fc1wp, pad_bias(params["fc1_b"]),
            fc2wp, pad_bias(params["fc2_b"]),
            fc3wp, pad_bias(params["fc3_b"], fill=-1e30))


# ----------------------------------------------------------------------------
# Forward wrapper
# ----------------------------------------------------------------------------
def mnist_net_forward(packed, x_nchw, *, n_classes=10, with_softmax=True,
                      tile_b=16):
    assert x_nchw.shape[1:] == (1, 28, 28), "MNIST_Net expects (B, 1, 28, 28)"
    B = x_nchw.shape[0]

    # Batch tile: big enough to fill the MXU / amortize step overhead, but
    # guarantee >= 2 grid steps when B >= 2 so v7x can use both TensorCores.
    tb = max(1, min(int(tile_b), B))
    if B >= 2 and tb >= B:
        tb = max(1, B // 2)
    bp = ((B + tb - 1) // tb) * tb

    x = jnp.asarray(x_nchw, jnp.float32)[:, 0, :, :]            # (B, 28, 28)
    if bp != B:
        x = jnp.pad(x, ((0, bp - B), (0, 0), (0, 0)))

    # Wrapper-side im2col for conv1: (bp, 576, 32) bf16 patch form of the
    # input (layout plumbing so conv1 is a single MXU matmul in the kernel).
    taps = [x[:, kh:kh + 24, kw:kw + 24] for kh in range(_K) for kw in range(_K)]
    patches = jnp.stack(taps, axis=-1).reshape(bp, 576, 25)
    patches = jnp.pad(patches, ((0, 0), (0, 0), (0, 32 - 25))).astype(jnp.bfloat16)

    if with_softmax:
        last_act = "sigmoid" if n_classes == 1 else "softmax"
    else:
        last_act = "none"

    kernel = functools.partial(_mnist_fused_kernel, tile_b=tb, last_act=last_act)
    c2map = lambda b: (0, 0)
    c3map = lambda b: (0, 0, 0)

    out = pl.pallas_call(
        kernel,
        out_shape=jax.ShapeDtypeStruct((bp, 1, LANE), jnp.float32),
        grid=(bp // tb,),
        in_specs=[
            pl.BlockSpec((tb, 576, 32), lambda b: (b, 0, 0)),    # conv1 patches
            pl.BlockSpec((32, LANE), c2map),                     # conv1 w
            pl.BlockSpec((1, LANE), c2map),                      # conv1 b
            pl.BlockSpec((25, LANE, LANE), c3map),               # conv2 w
            pl.BlockSpec((1, LANE), c2map),                      # conv2 b
            pl.BlockSpec((16, LANE, LANE), c3map),               # fc1 w
            pl.BlockSpec((1, LANE), c2map),                      # fc1 b
            pl.BlockSpec((LANE, LANE), c2map),                   # fc2 w
            pl.BlockSpec((1, LANE), c2map),                      # fc2 b
            pl.BlockSpec((LANE, LANE), c2map),                   # fc3 w
            pl.BlockSpec((1, LANE), c2map),                      # fc3 b (-1e30 pad)
        ],
        out_specs=pl.BlockSpec((tb, 1, LANE), lambda b: (b, 0, 0)),
        compiler_params=pltpu.CompilerParams(
            dimension_semantics=("parallel",),
            vmem_limit_bytes=48 * 1024 * 1024,   # fits v7x's 64 MiB/TC VMEM
        ),
    )(patches, *packed)

    return out.reshape(bp, LANE)[:B, :n_classes]


# ----------------------------------------------------------------------------
# Pure-JAX reference (for correctness checking only; not on the hot path)
# ----------------------------------------------------------------------------
def _reference_forward(params, x_nchw, n_classes=10, with_softmax=True):
    x = jnp.asarray(x_nchw, jnp.float32)

    def conv(x, w, b):
        y = jax.lax.conv_general_dilated(
            x, jnp.asarray(w, jnp.float32), (1, 1), "VALID",
            dimension_numbers=("NCHW", "OIHW", "NCHW"))
        return y + jnp.asarray(b, jnp.float32).reshape(1, -1, 1, 1)

    def pool_relu(x):
        y = jax.lax.reduce_window(x, -jnp.inf, jax.lax.max,
                                  (1, 1, 2, 2), (1, 1, 2, 2), "VALID")
        return jnp.maximum(y, 0.0)

    x = pool_relu(conv(x, params["conv1_w"], params["conv1_b"]))
    x = pool_relu(conv(x, params["conv2_w"], params["conv2_b"]))
    x = x.reshape(x.shape[0], -1)                       # NCHW flatten (c,h,w)
    x = jnp.maximum(x @ params["fc1_w"].T + params["fc1_b"], 0.0)
    x = jnp.maximum(x @ params["fc2_w"].T + params["fc2_b"], 0.0)
    x = x @ params["fc3_w"].T + params["fc3_b"]
    if with_softmax:
        x = jax.nn.sigmoid(x) if n_classes == 1 else jax.nn.softmax(x, axis=1)
    return x


if __name__ == "__main__":
    key = jax.random.PRNGKey(0)
    pkey, xkey = jax.random.split(key)

    n_classes = 10
    params = init_params(pkey, N=n_classes)
    packed = pack_params(params, n_classes=n_classes)

    # MNIST-sized input: batch=2, 1 channel, 28x28 so the flattened encoder
    # output matches size = 16 * 4 * 4 = 256.
    x = jax.random.normal(xkey, (2, 1, 28, 28), jnp.float32)

    fwd = jax.jit(functools.partial(mnist_net_forward, n_classes=n_classes,
                                    with_softmax=True, tile_b=16))
    out = jax.block_until_ready(fwd(packed, x))

    assert out.shape == (2, n_classes)
    assert bool(jnp.all(jnp.isfinite(out)))
    # Exact-division softmax: rows sum to 1 up to f32 rounding.
    assert bool(jnp.allclose(jnp.sum(out, axis=1), 1.0, atol=1e-3))

    ref = _reference_forward(params, x, n_classes=n_classes, with_softmax=True)
    # Kernel uses bf16 matmul operands (f32 accumulation) -> allow bf16 slack.
    assert bool(jnp.allclose(out, ref, atol=2e-2, rtol=2e-2))

    print("KERNEL_OK")
</pallas_src>

<mosaic_0001>
module attributes {stable_mosaic.version = 11 : i64} {
  func.func @_mnist_fused_kernel(%arg0: i32, %arg1: memref<1x576x32xbf16, #tpu.memory_space<vmem>>, %arg2: memref<32x128xbf16, #tpu.memory_space<vmem>>, %arg3: memref<1x128xf32, #tpu.memory_space<vmem>>, %arg4: memref<25x128x128xbf16, #tpu.memory_space<vmem>>, %arg5: memref<1x128xf32, #tpu.memory_space<vmem>>, %arg6: memref<16x128x128xbf16, #tpu.memory_space<vmem>>, %arg7: memref<1x128xf32, #tpu.memory_space<vmem>>, %arg8: memref<128x128xbf16, #tpu.memory_space<vmem>>, %arg9: memref<1x128xf32, #tpu.memory_space<vmem>>, %arg10: memref<128x128xbf16, #tpu.memory_space<vmem>>, %arg11: memref<1x128xf32, #tpu.memory_space<vmem>>, %arg12: memref<1x1x128xf32, #tpu.memory_space<vmem>>) attributes {dimension_semantics = [#tpu.dimension_semantics<parallel>], iteration_bounds = array<i64: 2>, scalar_prefetch = 0 : i64, scratch_operands = 0 : i64, tpu.core_type = #tpu.core_type<tc>, window_params = [{transform_indices = @transform_0, window_bounds = array<i64: 1, 576, 32>}, {pipeline_mode = #tpu.pipeline_mode<synchronous>, transform_indices = @transform_1, window_bounds = array<i64: 32, 128>}, {pipeline_mode = #tpu.pipeline_mode<synchronous>, transform_indices = @transform_2, window_bounds = array<i64: 1, 128>}, {pipeline_mode = #tpu.pipeline_mode<synchronous>, transform_indices = @transform_3, window_bounds = array<i64: 25, 128, 128>}, {pipeline_mode = #tpu.pipeline_mode<synchronous>, transform_indices = @transform_4, window_bounds = array<i64: 1, 128>}, {pipeline_mode = #tpu.pipeline_mode<synchronous>, transform_indices = @transform_5, window_bounds = array<i64: 16, 128, 128>}, {pipeline_mode = #tpu.pipeline_mode<synchronous>, transform_indices = @transform_6, window_bounds = array<i64: 1, 128>}, {pipeline_mode = #tpu.pipeline_mode<synchronous>, transform_indices = @transform_7, window_bounds = array<i64: 128, 128>}, {pipeline_mode = #tpu.pipeline_mode<synchronous>, transform_indices = @transform_8, window_bounds = array<i64: 1, 128>}, {pipeline_mode = #tpu.pipeline_mode<synchronous>, transform_indices = @transform_9, window_bounds = array<i64: 128, 128>}, {pipeline_mode = #tpu.pipeline_mode<synchronous>, transform_indices = @transform_10, window_bounds = array<i64: 1, 128>}, {transform_indices = @transform_11, window_bounds = array<i64: 1, 1, 128>}]} {
    %c0 = arith.constant 0 : index
    %c0_0 = arith.constant 0 : index
    %c0_1 = arith.constant 0 : index
    %0 = vector.load %arg1[%c0, %c0_0, %c0_1] : memref<1x576x32xbf16, #tpu.memory_space<vmem>>, vector<1x576x32xbf16>
    %1 = vector.shape_cast %0 : vector<1x576x32xbf16> to vector<576x32xbf16>
    %c0_2 = arith.constant 0 : index
    %c0_3 = arith.constant 0 : index
    %2 = vector.load %arg2[%c0_2, %c0_3] : memref<32x128xbf16, #tpu.memory_space<vmem>>, vector<32x128xbf16>
    %cst = arith.constant dense<0.000000e+00> : vector<576x128xf32>
    %3 = tpu.matmul %1, %2, %cst {dimension_numbers = #tpu.dot_dimension_numbers<[1], [0], [0], [1], [0, 0, 1, 1], [], []>} : vector<576x32xbf16>, vector<32x128xbf16>, vector<576x128xf32> -> vector<576x128xf32>
    %c0_4 = arith.constant 0 : index
    %c0_5 = arith.constant 0 : index
    %4 = vector.load %arg3[%c0_4, %c0_5] : memref<1x128xf32, #tpu.memory_space<vmem>>, vector<1x128xf32>
    %5 = vector.broadcast %4 : vector<1x128xf32> to vector<576x128xf32>
    %6 = arith.addf %3, %5 : vector<576x128xf32>
    %7 = vector.shape_cast %6 : vector<576x128xf32> to vector<1x24x24x128xf32>
    %8 = vector.shape_cast %7 : vector<1x24x24x128xf32> to vector<12x2x24x128xf32>
    %cst_6 = arith.constant dense<0xFF800000> : vector<12x24x128xf32>
    %9 = vector.multi_reduction <maximumf>, %8, %cst_6 [1] : vector<12x2x24x128xf32> to vector<12x24x128xf32>
    %10 = vector.shape_cast %9 : vector<12x24x128xf32> to vector<12x12x2x128xf32>
    %cst_7 = arith.constant dense<0xFF800000> : vector<12x12x128xf32>
    %11 = vector.multi_reduction <maximumf>, %10, %cst_7 [2] : vector<12x12x2x128xf32> to vector<12x12x128xf32>
    %12 = vector.shape_cast %11 : vector<12x12x128xf32> to vector<1x12x12x128xf32>
    %cst_8 = arith.constant 0.000000e+00 : f32
    %13 = vector.broadcast %cst_8 : f32 to vector<1x12x12x128xf32>
    %14 = arith.maximumf %12, %13 : vector<1x12x12x128xf32>
    %15 = arith.truncf %14 : vector<1x12x12x128xf32> to vector<1x12x12x128xbf16>
    %cst_9 = arith.constant 0.000000e+00 : f32
    %16 = vector.broadcast %cst_9 : f32 to vector<64x128xf32>
    %17 = vector.extract_strided_slice %15 {offsets = [0, 0, 0, 0], sizes = [1, 8, 8, 128], strides = [1, 1, 1, 1]} : vector<1x12x12x128xbf16> to vector<1x8x8x128xbf16>
    %18 = vector.shape_cast %17 : vector<1x8x8x128xbf16> to vector<64x128xbf16>
    %c0_10 = arith.constant 0 : index
    %c0_11 = arith.constant 0 : index
    %c0_12 = arith.constant 0 : index
    %19 = vector.load %arg4[%c0_10, %c0_11, %c0_12] : memref<25x128x128xbf16, #tpu.memory_space<vmem>>, vector<1x128x128xbf16>
    %20 = vector.shape_cast %19 : vector<1x128x128xbf16> to vector<128x128xbf16>
    %cst_13 = arith.constant dense<0.000000e+00> : vector<64x128xf32>
    %21 = tpu.matmul %18, %20, %cst_13 {dimension_numbers = #tpu.dot_dimension_numbers<[1], [0], [0], [1], [0, 0, 1, 1], [], []>} : vector<64x128xbf16>, vector<128x128xbf16>, vector<64x128xf32> -> vector<64x128xf32>
    %22 = arith.addf %16, %21 : vector<64x128xf32>
    %23 = vector.extract_strided_slice %15 {offsets = [0, 0, 1, 0], sizes = [1, 8, 8, 128], strides = [1, 1, 1, 1]} : vector<1x12x12x128xbf16> to vector<1x8x8x128xbf16>
    %24 = vector.shape_cast %23 : vector<1x8x8x128xbf16> to vector<64x128xbf16>
    %c1 = arith.constant 1 : index
    %c0_14 = arith.constant 0 : index
    %c0_15 = arith.constant 0 : index
    %25 = vector.load %arg4[%c1, %c0_14, %c0_15] : memref<25x128x128xbf16, #tpu.memory_space<vmem>>, vector<1x128x128xbf16>
    %26 = vector.shape_cast %25 : vector<1x128x128xbf16> to vector<128x128xbf16>
    %cst_16 = arith.constant dense<0.000000e+00> : vector<64x128xf32>
    %27 = tpu.matmul %24, %26, %cst_16 {dimension_numbers = #tpu.dot_dimension_numbers<[1], [0], [0], [1], [0, 0, 1, 1], [], []>} : vector<64x128xbf16>, vector<128x128xbf16>, vector<64x128xf32> -> vector<64x128xf32>
    %28 = arith.addf %22, %27 : vector<64x128xf32>
    %29 = vector.extract_strided_slice %15 {offsets = [0, 0, 2, 0], sizes = [1, 8, 8, 128], strides = [1, 1, 1, 1]} : vector<1x12x12x128xbf16> to vector<1x8x8x128xbf16>
    %30 = vector.shape_cast %29 : vector<1x8x8x128xbf16> to vector<64x128xbf16>
    %c2 = arith.constant 2 : index
    %c0_17 = arith.constant 0 : index
    %c0_18 = arith.constant 0 : index
    %31 = vector.load %arg4[%c2, %c0_17, %c0_18] : memref<25x128x128xbf16, #tpu.memory_space<vmem>>, vector<1x128x128xbf16>
    %32 = vector.shape_cast %31 : vector<1x128x128xbf16> to vector<128x128xbf16>
    %cst_19 = arith.constant dense<0.000000e+00> : vector<64x128xf32>
    %33 = tpu.matmul %30, %32, %cst_19 {dimension_numbers = #tpu.dot_dimension_numbers<[1], [0], [0], [1], [0, 0, 1, 1], [], []>} : vector<64x128xbf16>, vector<128x128xbf16>, vector<64x128xf32> -> vector<64x128xf32>
    %34 = arith.addf %28, %33 : vector<64x128xf32>
    %35 = vector.extract_strided_slice %15 {offsets = [0, 0, 3, 0], sizes = [1, 8, 8, 128], strides = [1, 1, 1, 1]} : vector<1x12x12x128xbf16> to vector<1x8x8x128xbf16>
    %36 = vector.shape_cast %35 : vector<1x8x8x128xbf16> to vector<64x128xbf16>
    %c3 = arith.constant 3 : index
    %c0_20 = arith.constant 0 : index
    %c0_21 = arith.constant 0 : index
    %37 = vector.load %arg4[%c3, %c0_20, %c0_21] : memref<25x128x128xbf16, #tpu.memory_space<vmem>>, vector<1x128x128xbf16>
    %38 = vector.shape_cast %37 : vector<1x128x128xbf16> to vector<128x128xbf16>
    %cst_22 = arith.constant dense<0.000000e+00> : vector<64x128xf32>
    %39 = tpu.matmul %36, %38, %cst_22 {dimension_numbers = #tpu.dot_dimension_numbers<[1], [0], [0], [1], [0, 0, 1, 1], [], []>} : vector<64x128xbf16>, vector<128x128xbf16>, vector<64x128xf32> -> vector<64x128xf32>
    %40 = arith.addf %34, %39 : vector<64x128xf32>
    %41 = vector.extract_strided_slice %15 {offsets = [0, 0, 4, 0], sizes = [1, 8, 8, 128], strides = [1, 1, 1, 1]} : vector<1x12x12x128xbf16> to vector<1x8x8x128xbf16>
    %42 = vector.shape_cast %41 : vector<1x8x8x128xbf16> to vector<64x128xbf16>
    %c4 = arith.constant 4 : index
    %c0_23 = arith.constant 0 : index
    %c0_24 = arith.constant 0 : index
    %43 = vector.load %arg4[%c4, %c0_23, %c0_24] : memref<25x128x128xbf16, #tpu.memory_space<vmem>>, vector<1x128x128xbf16>
    %44 = vector.shape_cast %43 : vector<1x128x128xbf16> to vector<128x128xbf16>
    %cst_25 = arith.constant dense<0.000000e+00> : vector<64x128xf32>
    %45 = tpu.matmul %42, %44, %cst_25 {dimension_numbers = #tpu.dot_dimension_numbers<[1], [0], [0], [1], [0, 0, 1, 1], [], []>} : vector<64x128xbf16>, vector<128x128xbf16>, vector<64x128xf32> -> vector<64x128xf32>
    %46 = arith.addf %40, %45 : vector<64x128xf32>
    %47 = vector.extract_strided_slice %15 {offsets = [0, 1, 0, 0], sizes = [1, 8, 8, 128], strides = [1, 1, 1, 1]} : vector<1x12x12x128xbf16> to vector<1x8x8x128xbf16>
    %48 = vector.shape_cast %47 : vector<1x8x8x128xbf16> to vector<64x128xbf16>
    %c5 = arith.constant 5 : index
    %c0_26 = arith.constant 0 : index
    %c0_27 = arith.constant 0 : index
    %49 = vector.load %arg4[%c5, %c0_26, %c0_27] : memref<25x128x128xbf16, #tpu.memory_space<vmem>>, vector<1x128x128xbf16>
    %50 = vector.shape_cast %49 : vector<1x128x128xbf16> to vector<128x128xbf16>
    %cst_28 = arith.constant dense<0.000000e+00> : vector<64x128xf32>
    %51 = tpu.matmul %48, %50, %cst_28 {dimension_numbers = #tpu.dot_dimension_numbers<[1], [0], [0], [1], [0, 0, 1, 1], [], []>} : vector<64x128xbf16>, vector<128x128xbf16>, vector<64x128xf32> -> vector<64x128xf32>
    %52 = arith.addf %46, %51 : vector<64x128xf32>
    %53 = vector.extract_strided_slice %15 {offsets = [0, 1, 1, 0], sizes = [1, 8, 8, 128], strides = [1, 1, 1, 1]} : vector<1x12x12x128xbf16> to vector<1x8x8x128xbf16>
    %54 = vector.shape_cast %53 : vector<1x8x8x128xbf16> to vector<64x128xbf16>
    %c6 = arith.constant 6 : index
    %c0_29 = arith.constant 0 : index
    %c0_30 = arith.constant 0 : index
    %55 = vector.load %arg4[%c6, %c0_29, %c0_30] : memref<25x128x128xbf16, #tpu.memory_space<vmem>>, vector<1x128x128xbf16>
    %56 = vector.shape_cast %55 : vector<1x128x128xbf16> to vector<128x128xbf16>
    %cst_31 = arith.constant dense<0.000000e+00> : vector<64x128xf32>
    %57 = tpu.matmul %54, %56, %cst_31 {dimension_numbers = #tpu.dot_dimension_numbers<[1], [0], [0], [1], [0, 0, 1, 1], [], []>} : vector<64x128xbf16>, vector<128x128xbf16>, vector<64x128xf32> -> vector<64x128xf32>
    %58 = arith.addf %52, %57 : vector<64x128xf32>
    %59 = vector.extract_strided_slice %15 {offsets = [0, 1, 2, 0], sizes = [1, 8, 8, 128], strides = [1, 1, 1, 1]} : vector<1x12x12x128xbf16> to vector<1x8x8x128xbf16>
    %60 = vector.shape_cast %59 : vector<1x8x8x128xbf16> to vector<64x128xbf16>
    %c7 = arith.constant 7 : index
    %c0_32 = arith.constant 0 : index
    %c0_33 = arith.constant 0 : index
    %61 = vector.load %arg4[%c7, %c0_32, %c0_33] : memref<25x128x128xbf16, #tpu.memory_space<vmem>>, vector<1x128x128xbf16>
    %62 = vector.shape_cast %61 : vector<1x128x128xbf16> to vector<128x128xbf16>
    %cst_34 = arith.constant dense<0.000000e+00> : vector<64x128xf32>
    %63 = tpu.matmul %60, %62, %cst_34 {dimension_numbers = #tpu.dot_dimension_numbers<[1], [0], [0], [1], [0, 0, 1, 1], [], []>} : vector<64x128xbf16>, vector<128x128xbf16>, vector<64x128xf32> -> vector<64x128xf32>
    %64 = arith.addf %58, %63 : vector<64x128xf32>
    %65 = vector.extract_strided_slice %15 {offsets = [0, 1, 3, 0], sizes = [1, 8, 8, 128], strides = [1, 1, 1, 1]} : vector<1x12x12x128xbf16> to vector<1x8x8x128xbf16>
    %66 = vector.shape_cast %65 : vector<1x8x8x128xbf16> to vector<64x128xbf16>
    %c8 = arith.constant 8 : index
    %c0_35 = arith.constant 0 : index
    %c0_36 = arith.constant 0 : index
    %67 = vector.load %arg4[%c8, %c0_35, %c0_36] : memref<25x128x128xbf16, #tpu.memory_space<vmem>>, vector<1x128x128xbf16>
    %68 = vector.shape_cast %67 : vector<1x128x128xbf16> to vector<128x128xbf16>
    %cst_37 = arith.constant dense<0.000000e+00> : vector<64x128xf32>
    %69 = tpu.matmul %66, %68, %cst_37 {dimension_numbers = #tpu.dot_dimension_numbers<[1], [0], [0], [1], [0, 0, 1, 1], [], []>} : vector<64x128xbf16>, vector<128x128xbf16>, vector<64x128xf32> -> vector<64x128xf32>
    %70 = arith.addf %64, %69 : vector<64x128xf32>
    %71 = vector.extract_strided_slice %15 {offsets = [0, 1, 4, 0], sizes = [1, 8, 8, 128], strides = [1, 1, 1, 1]} : vector<1x12x12x128xbf16> to vector<1x8x8x128xbf16>
    %72 = vector.shape_cast %71 : vector<1x8x8x128xbf16> to vector<64x128xbf16>
    %c9 = arith.constant 9 : index
    %c0_38 = arith.constant 0 : index
    %c0_39 = arith.constant 0 : index
    %73 = vector.load %arg4[%c9, %c0_38, %c0_39] : memref<25x128x128xbf16, #tpu.memory_space<vmem>>, vector<1x128x128xbf16>
    %74 = vector.shape_cast %73 : vector<1x128x128xbf16> to vector<128x128xbf16>
    %cst_40 = arith.constant dense<0.000000e+00> : vector<64x128xf32>
    %75 = tpu.matmul %72, %74, %cst_40 {dimension_numbers = #tpu.dot_dimension_numbers<[1], [0], [0], [1], [0, 0, 1, 1], [], []>} : vector<64x128xbf16>, vector<128x128xbf16>, vector<64x128xf32> -> vector<64x128xf32>
    %76 = arith.addf %70, %75 : vector<64x128xf32>
    %77 = vector.extract_strided_slice %15 {offsets = [0, 2, 0, 0], sizes = [1, 8, 8, 128], strides = [1, 1, 1, 1]} : vector<1x12x12x128xbf16> to vector<1x8x8x128xbf16>
    %78 = vector.shape_cast %77 : vector<1x8x8x128xbf16> to vector<64x128xbf16>
    %c10 = arith.constant 10 : index
    %c0_41 = arith.constant 0 : index
    %c0_42 = arith.constant 0 : index
    %79 = vector.load %arg4[%c10, %c0_41, %c0_42] : memref<25x128x128xbf16, #tpu.memory_space<vmem>>, vector<1x128x128xbf16>
    %80 = vector.shape_cast %79 : vector<1x128x128xbf16> to vector<128x128xbf16>
    %cst_43 = arith.constant dense<0.000000e+00> : vector<64x128xf32>
    %81 = tpu.matmul %78, %80, %cst_43 {dimension_numbers = #tpu.dot_dimension_numbers<[1], [0], [0], [1], [0, 0, 1, 1], [], []>} : vector<64x128xbf16>, vector<128x128xbf16>, vector<64x128xf32> -> vector<64x128xf32>
    %82 = arith.addf %76, %81 : vector<64x128xf32>
    %83 = vector.extract_strided_slice %15 {offsets = [0, 2, 1, 0], sizes = [1, 8, 8, 128], strides = [1, 1, 1, 1]} : vector<1x12x12x128xbf16> to vector<1x8x8x128xbf16>
    %84 = vector.shape_cast %83 : vector<1x8x8x128xbf16> to vector<64x128xbf16>
    %c11 = arith.constant 11 : index
    %c0_44 = arith.constant 0 : index
    %c0_45 = arith.constant 0 : index
    %85 = vector.load %arg4[%c11, %c0_44, %c0_45] : memref<25x128x128xbf16, #tpu.memory_space<vmem>>, vector<1x128x128xbf16>
    %86 = vector.shape_cast %85 : vector<1x128x128xbf16> to vector<128x128xbf16>
    %cst_46 = arith.constant dense<0.000000e+00> : vector<64x128xf32>
    %87 = tpu.matmul %84, %86, %cst_46 {dimension_numbers = #tpu.dot_dimension_numbers<[1], [0], [0], [1], [0, 0, 1, 1], [], []>} : vector<64x128xbf16>, vector<128x128xbf16>, vector<64x128xf32> -> vector<64x128xf32>
    %88 = arith.addf %82, %87 : vector<64x128xf32>
    %89 = vector.extract_strided_slice %15 {offsets = [0, 2, 2, 0], sizes = [1, 8, 8, 128], strides = [1, 1, 1, 1]} : vector<1x12x12x128xbf16> to vector<1x8x8x128xbf16>
    %90 = vector.shape_cast %89 : vector<1x8x8x128xbf16> to vector<64x128xbf16>
    %c12 = arith.constant 12 : index
    %c0_47 = arith.constant 0 : index
    %c0_48 = arith.constant 0 : index
    %91 = vector.load %arg4[%c12, %c0_47, %c0_48] : memref<25x128x128xbf16, #tpu.memory_space<vmem>>, vector<1x128x128xbf16>
    %92 = vector.shape_cast %91 : vector<1x128x128xbf16> to vector<128x128xbf16>
    %cst_49 = arith.constant dense<0.000000e+00> : vector<64x128xf32>
    %93 = tpu.matmul %90, %92, %cst_49 {dimension_numbers = #tpu.dot_dimension_numbers<[1], [0], [0], [1], [0, 0, 1, 1], [], []>} : vector<64x128xbf16>, vector<128x128xbf16>, vector<64x128xf32> -> vector<64x128xf32>
    %94 = arith.addf %88, %93 : vector<64x128xf32>
    %95 = vector.extract_strided_slice %15 {offsets = [0, 2, 3, 0], sizes = [1, 8, 8, 128], strides = [1, 1, 1, 1]} : vector<1x12x12x128xbf16> to vector<1x8x8x128xbf16>
    %96 = vector.shape_cast %95 : vector<1x8x8x128xbf16> to vector<64x128xbf16>
    %c13 = arith.constant 13 : index
    %c0_50 = arith.constant 0 : index
    %c0_51 = arith.constant 0 : index
    %97 = vector.load %arg4[%c13, %c0_50, %c0_51] : memref<25x128x128xbf16, #tpu.memory_space<vmem>>, vector<1x128x128xbf16>
    %98 = vector.shape_cast %97 : vector<1x128x128xbf16> to vector<128x128xbf16>
    %cst_52 = arith.constant dense<0.000000e+00> : vector<64x128xf32>
    %99 = tpu.matmul %96, %98, %cst_52 {dimension_numbers = #tpu.dot_dimension_numbers<[1], [0], [0], [1], [0, 0, 1, 1], [], []>} : vector<64x128xbf16>, vector<128x128xbf16>, vector<64x128xf32> -> vector<64x128xf32>
    %100 = arith.addf %94, %99 : vector<64x128xf32>
    %101 = vector.extract_strided_slice %15 {offsets = [0, 2, 4, 0], sizes = [1, 8, 8, 128], strides = [1, 1, 1, 1]} : vector<1x12x12x128xbf16> to vector<1x8x8x128xbf16>
    %102 = vector.shape_cast %101 : vector<1x8x8x128xbf16> to vector<64x128xbf16>
    %c14 = arith.constant 14 : index
    %c0_53 = arith.constant 0 : index
    %c0_54 = arith.constant 0 : index
    %103 = vector.load %arg4[%c14, %c0_53, %c0_54] : memref<25x128x128xbf16, #tpu.memory_space<vmem>>, vector<1x128x128xbf16>
    %104 = vector.shape_cast %103 : vector<1x128x128xbf16> to vector<128x128xbf16>
    %cst_55 = arith.constant dense<0.000000e+00> : vector<64x128xf32>
    %105 = tpu.matmul %102, %104, %cst_55 {dimension_numbers = #tpu.dot_dimension_numbers<[1], [0], [0], [1], [0, 0, 1, 1], [], []>} : vector<64x128xbf16>, vector<128x128xbf16>, vector<64x128xf32> -> vector<64x128xf32>
    %106 = arith.addf %100, %105 : vector<64x128xf32>
    %107 = vector.extract_strided_slice %15 {offsets = [0, 3, 0, 0], sizes = [1, 8, 8, 128], strides = [1, 1, 1, 1]} : vector<1x12x12x128xbf16> to vector<1x8x8x128xbf16>
    %108 = vector.shape_cast %107 : vector<1x8x8x128xbf16> to vector<64x128xbf16>
    %c15 = arith.constant 15 : index
    %c0_56 = arith.constant 0 : index
    %c0_57 = arith.constant 0 : index
    %109 = vector.load %arg4[%c15, %c0_56, %c0_57] : memref<25x128x128xbf16, #tpu.memory_space<vmem>>, vector<1x128x128xbf16>
    %110 = vector.shape_cast %109 : vector<1x128x128xbf16> to vector<128x128xbf16>
    %cst_58 = arith.constant dense<0.000000e+00> : vector<64x128xf32>
    %111 = tpu.matmul %108, %110, %cst_58 {dimension_numbers = #tpu.dot_dimension_numbers<[1], [0], [0], [1], [0, 0, 1, 1], [], []>} : vector<64x128xbf16>, vector<128x128xbf16>, vector<64x128xf32> -> vector<64x128xf32>
    %112 = arith.addf %106, %111 : vector<64x128xf32>
    %113 = vector.extract_strided_slice %15 {offsets = [0, 3, 1, 0], sizes = [1, 8, 8, 128], strides = [1, 1, 1, 1]} : vector<1x12x12x128xbf16> to vector<1x8x8x128xbf16>
    %114 = vector.shape_cast %113 : vector<1x8x8x128xbf16> to vector<64x128xbf16>
    %c16 = arith.constant 16 : index
    %c0_59 = arith.constant 0 : index
    %c0_60 = arith.constant 0 : index
    %115 = vector.load %arg4[%c16, %c0_59, %c0_60] : memref<25x128x128xbf16, #tpu.memory_space<vmem>>, vector<1x128x128xbf16>
    %116 = vector.shape_cast %115 : vector<1x128x128xbf16> to vector<128x128xbf16>
    %cst_61 = arith.constant dense<0.000000e+00> : vector<64x128xf32>
    %117 = tpu.matmul %114, %116, %cst_61 {dimension_numbers = #tpu.dot_dimension_numbers<[1], [0], [0], [1], [0, 0, 1, 1], [], []>} : vector<64x128xbf16>, vector<128x128xbf16>, vector<64x128xf32> -> vector<64x128xf32>
    %118 = arith.addf %112, %117 : vector<64x128xf32>
    %119 = vector.extract_strided_slice %15 {offsets = [0, 3, 2, 0], sizes = [1, 8, 8, 128], strides = [1, 1, 1, 1]} : vector<1x12x12x128xbf16> to vector<1x8x8x128xbf16>
    %120 = vector.shape_cast %119 : vector<1x8x8x128xbf16> to vector<64x128xbf16>
    %c17 = arith.constant 17 : index
    %c0_62 = arith.constant 0 : index
    %c0_63 = arith.constant 0 : index
    %121 = vector.load %arg4[%c17, %c0_62, %c0_63] : memref<25x128x128xbf16, #tpu.memory_space<vmem>>, vector<1x128x128xbf16>
    %122 = vector.shape_cast %121 : vector<1x128x128xbf16> to vector<128x128xbf16>
    %cst_64 = arith.constant dense<0.000000e+00> : vector<64x128xf32>
    %123 = tpu.matmul %120, %122, %cst_64 {dimension_numbers = #tpu.dot_dimension_numbers<[1], [0], [0], [1], [0, 0, 1, 1], [], []>} : vector<64x128xbf16>, vector<128x128xbf16>, vector<64x128xf32> -> vector<64x128xf32>
    %124 = arith.addf %118, %123 : vector<64x128xf32>
    %125 = vector.extract_strided_slice %15 {offsets = [0, 3, 3, 0], sizes = [1, 8, 8, 128], strides = [1, 1, 1, 1]} : vector<1x12x12x128xbf16> to vector<1x8x8x128xbf16>
    %126 = vector.shape_cast %125 : vector<1x8x8x128xbf16> to vector<64x128xbf16>
    %c18 = arith.constant 18 : index
    %c0_65 = arith.constant 0 : index
    %c0_66 = arith.constant 0 : index
    %127 = vector.load %arg4[%c18, %c0_65, %c0_66] : memref<25x128x128xbf16, #tpu.memory_space<vmem>>, vector<1x128x128xbf16>
    %128 = vector.shape_cast %127 : vector<1x128x128xbf16> to vector<128x128xbf16>
    %cst_67 = arith.constant dense<0.000000e+00> : vector<64x128xf32>
    %129 = tpu.matmul %126, %128, %cst_67 {dimension_numbers = #tpu.dot_dimension_numbers<[1], [0], [0], [1], [0, 0, 1, 1], [], []>} : vector<64x128xbf16>, vector<128x128xbf16>, vector<64x128xf32> -> vector<64x128xf32>
    %130 = arith.addf %124, %129 : vector<64x128xf32>
    %131 = vector.extract_strided_slice %15 {offsets = [0, 3, 4, 0], sizes = [1, 8, 8, 128], strides = [1, 1, 1, 1]} : vector<1x12x12x128xbf16> to vector<1x8x8x128xbf16>
    %132 = vector.shape_cast %131 : vector<1x8x8x128xbf16> to vector<64x128xbf16>
    %c19 = arith.constant 19 : index
    %c0_68 = arith.constant 0 : index
    %c0_69 = arith.constant 0 : index
    %133 = vector.load %arg4[%c19, %c0_68, %c0_69] : memref<25x128x128xbf16, #tpu.memory_space<vmem>>, vector<1x128x128xbf16>
    %134 = vector.shape_cast %133 : vector<1x128x128xbf16> to vector<128x128xbf16>
    %cst_70 = arith.constant dense<0.000000e+00> : vector<64x128xf32>
    %135 = tpu.matmul %132, %134, %cst_70 {dimension_numbers = #tpu.dot_dimension_numbers<[1], [0], [0], [1], [0, 0, 1, 1], [], []>} : vector<64x128xbf16>, vector<128x128xbf16>, vector<64x128xf32> -> vector<64x128xf32>
    %136 = arith.addf %130, %135 : vector<64x128xf32>
    %137 = vector.extract_strided_slice %15 {offsets = [0, 4, 0, 0], sizes = [1, 8, 8, 128], strides = [1, 1, 1, 1]} : vector<1x12x12x128xbf16> to vector<1x8x8x128xbf16>
    %138 = vector.shape_cast %137 : vector<1x8x8x128xbf16> to vector<64x128xbf16>
    %c20 = arith.constant 20 : index
    %c0_71 = arith.constant 0 : index
    %c0_72 = arith.constant 0 : index
    %139 = vector.load %arg4[%c20, %c0_71, %c0_72] : memref<25x128x128xbf16, #tpu.memory_space<vmem>>, vector<1x128x128xbf16>
    %140 = vector.shape_cast %139 : vector<1x128x128xbf16> to vector<128x128xbf16>
    %cst_73 = arith.constant dense<0.000000e+00> : vector<64x128xf32>
    %141 = tpu.matmul %138, %140, %cst_73 {dimension_numbers = #tpu.dot_dimension_numbers<[1], [0], [0], [1], [0, 0, 1, 1], [], []>} : vector<64x128xbf16>, vector<128x128xbf16>, vector<64x128xf32> -> vector<64x128xf32>
    %142 = arith.addf %136, %141 : vector<64x128xf32>
    %143 = vector.extract_strided_slice %15 {offsets = [0, 4, 1, 0], sizes = [1, 8, 8, 128], strides = [1, 1, 1, 1]} : vector<1x12x12x128xbf16> to vector<1x8x8x128xbf16>
    %144 = vector.shape_cast %143 : vector<1x8x8x128xbf16> to vector<64x128xbf16>
    %c21 = arith.constant 21 : index
    %c0_74 = arith.constant 0 : index
    %c0_75 = arith.constant 0 : index
    %145 = vector.load %arg4[%c21, %c0_74, %c0_75] : memref<25x128x128xbf16, #tpu.memory_space<vmem>>, vector<1x128x128xbf16>
    %146 = vector.shape_cast %145 : vector<1x128x128xbf16> to vector<128x128xbf16>
    %cst_76 = arith.constant dense<0.000000e+00> : vector<64x128xf32>
    %147 = tpu.matmul %144, %146, %cst_76 {dimension_numbers = #tpu.dot_dimension_numbers<[1], [0], [0], [1], [0, 0, 1, 1], [], []>} : vector<64x128xbf16>, vector<128x128xbf16>, vector<64x128xf32> -> vector<64x128xf32>
    %148 = arith.addf %142, %147 : vector<64x128xf32>
    %149 = vector.extract_strided_slice %15 {offsets = [0, 4, 2, 0], sizes = [1, 8, 8, 128], strides = [1, 1, 1, 1]} : vector<1x12x12x128xbf16> to vector<1x8x8x128xbf16>
    %150 = vector.shape_cast %149 : vector<1x8x8x128xbf16> to vector<64x128xbf16>
    %c22 = arith.constant 22 : index
    %c0_77 = arith.constant 0 : index
    %c0_78 = arith.constant 0 : index
    %151 = vector.load %arg4[%c22, %c0_77, %c0_78] : memref<25x128x128xbf16, #tpu.memory_space<vmem>>, vector<1x128x128xbf16>
    %152 = vector.shape_cast %151 : vector<1x128x128xbf16> to vector<128x128xbf16>
    %cst_79 = arith.constant dense<0.000000e+00> : vector<64x128xf32>
    %153 = tpu.matmul %150, %152, %cst_79 {dimension_numbers = #tpu.dot_dimension_numbers<[1], [0], [0], [1], [0, 0, 1, 1], [], []>} : vector<64x128xbf16>, vector<128x128xbf16>, vector<64x128xf32> -> vector<64x128xf32>
    %154 = arith.addf %148, %153 : vector<64x128xf32>
    %155 = vector.extract_strided_slice %15 {offsets = [0, 4, 3, 0], sizes = [1, 8, 8, 128], strides = [1, 1, 1, 1]} : vector<1x12x12x128xbf16> to vector<1x8x8x128xbf16>
    %156 = vector.shape_cast %155 : vector<1x8x8x128xbf16> to vector<64x128xbf16>
    %c23 = arith.constant 23 : index
    %c0_80 = arith.constant 0 : index
    %c0_81 = arith.constant 0 : index
    %157 = vector.load %arg4[%c23, %c0_80, %c0_81] : memref<25x128x128xbf16, #tpu.memory_space<vmem>>, vector<1x128x128xbf16>
    %158 = vector.shape_cast %157 : vector<1x128x128xbf16> to vector<128x128xbf16>
    %cst_82 = arith.constant dense<0.000000e+00> : vector<64x128xf32>
    %159 = tpu.matmul %156, %158, %cst_82 {dimension_numbers = #tpu.dot_dimension_numbers<[1], [0], [0], [1], [0, 0, 1, 1], [], []>} : vector<64x128xbf16>, vector<128x128xbf16>, vector<64x128xf32> -> vector<64x128xf32>
    %160 = arith.addf %154, %159 : vector<64x128xf32>
    %161 = vector.extract_strided_slice %15 {offsets = [0, 4, 4, 0], sizes = [1, 8, 8, 128], strides = [1, 1, 1, 1]} : vector<1x12x12x128xbf16> to vector<1x8x8x128xbf16>
    %162 = vector.shape_cast %161 : vector<1x8x8x128xbf16> to vector<64x128xbf16>
    %c24 = arith.constant 24 : index
    %c0_83 = arith.constant 0 : index
    %c0_84 = arith.constant 0 : index
    %163 = vector.load %arg4[%c24, %c0_83, %c0_84] : memref<25x128x128xbf16, #tpu.memory_space<vmem>>, vector<1x128x128xbf16>
    %164 = vector.shape_cast %163 : vector<1x128x128xbf16> to vector<128x128xbf16>
    %cst_85 = arith.constant dense<0.000000e+00> : vector<64x128xf32>
    %165 = tpu.matmul %162, %164, %cst_85 {dimension_numbers = #tpu.dot_dimension_numbers<[1], [0], [0], [1], [0, 0, 1, 1], [], []>} : vector<64x128xbf16>, vector<128x128xbf16>, vector<64x128xf32> -> vector<64x128xf32>
    %166 = arith.addf %160, %165 : vector<64x128xf32>
    %c0_86 = arith.constant 0 : index
    %c0_87 = arith.constant 0 : index
    %167 = vector.load %arg5[%c0_86, %c0_87] : memref<1x128xf32, #tpu.memory_space<vmem>>, vector<1x128xf32>
    %168 = vector.broadcast %167 : vector<1x128xf32> to vector<64x128xf32>
    %169 = arith.addf %166, %168 : vector<64x128xf32>
    %170 = vector.shape_cast %169 : vector<64x128xf32> to vector<1x8x8x128xf32>
    %171 = vector.shape_cast %170 : vector<1x8x8x128xf32> to vector<4x2x8x128xf32>
    %cst_88 = arith.constant dense<0xFF800000> : vector<4x8x128xf32>
    %172 = vector.multi_reduction <maximumf>, %171, %cst_88 [1] : vector<4x2x8x128xf32> to vector<4x8x128xf32>
    %173 = vector.shape_cast %172 : vector<4x8x128xf32> to vector<4x4x2x128xf32>
    %cst_89 = arith.constant dense<0xFF800000> : vector<4x4x128xf32>
    %174 = vector.multi_reduction <maximumf>, %173, %cst_89 [2] : vector<4x4x2x128xf32> to vector<4x4x128xf32>
    %175 = vector.shape_cast %174 : vector<4x4x128xf32> to vector<1x4x4x128xf32>
    %cst_90 = arith.constant 0.000000e+00 : f32
    %176 = vector.broadcast %cst_90 : f32 to vector<1x4x4x128xf32>
    %177 = arith.maximumf %175, %176 : vector<1x4x4x128xf32>
    %178 = arith.truncf %177 : vector<1x4x4x128xf32> to vector<1x4x4x128xbf16>
    %cst_91 = arith.constant 0.000000e+00 : f32
    %179 = vector.broadcast %cst_91 : f32 to vector<1x128xf32>
    %180 = vector.extract_strided_slice %178 {offsets = [0, 0, 0, 0], sizes = [1, 1, 1, 128], strides = [1, 1, 1, 1]} : vector<1x4x4x128xbf16> to vector<1x1x1x128xbf16>
    %181 = vector.shape_cast %180 : vector<1x1x1x128xbf16> to vector<1x128xbf16>
    %c0_92 = arith.constant 0 : index
    %c0_93 = arith.constant 0 : index
    %c0_94 = arith.constant 0 : index
    %182 = vector.load %arg6[%c0_92, %c0_93, %c0_94] : memref<16x128x128xbf16, #tpu.memory_space<vmem>>, vector<1x128x128xbf16>
    %183 = vector.shape_cast %182 : vector<1x128x128xbf16> to vector<128x128xbf16>
    %cst_95 = arith.constant dense<0.000000e+00> : vector<1x128xf32>
    %184 = tpu.matmul %181, %183, %cst_95 {dimension_numbers = #tpu.dot_dimension_numbers<[1], [0], [0], [1], [0, 0, 1, 1], [], []>} : vector<1x128xbf16>, vector<128x128xbf16>, vector<1x128xf32> -> vector<1x128xf32>
    %185 = arith.addf %179, %184 : vector<1x128xf32>
    %186 = vector.extract_strided_slice %178 {offsets = [0, 0, 1, 0], sizes = [1, 1, 1, 128], strides = [1, 1, 1, 1]} : vector<1x4x4x128xbf16> to vector<1x1x1x128xbf16>
    %187 = vector.shape_cast %186 : vector<1x1x1x128xbf16> to vector<1x128xbf16>
    %c1_96 = arith.constant 1 : index
    %c0_97 = arith.constant 0 : index
    %c0_98 = arith.constant 0 : index
    %188 = vector.load %arg6[%c1_96, %c0_97, %c0_98] : memref<16x128x128xbf16, #tpu.memory_space<vmem>>, vector<1x128x128xbf16>
    %189 = vector.shape_cast %188 : vector<1x128x128xbf16> to vector<128x128xbf16>
    %cst_99 = arith.constant dense<0.000000e+00> : vector<1x128xf32>
    %190 = tpu.matmul %187, %189, %cst_99 {dimension_numbers = #tpu.dot_dimension_numbers<[1], [0], [0], [1], [0, 0, 1, 1], [], []>} : vector<1x128xbf16>, vector<128x128xbf16>, vector<1x128xf32> -> vector<1x128xf32>
    %191 = arith.addf %185, %190 : vector<1x128xf32>
    %192 = vector.extract_strided_slice %178 {offsets = [0, 0, 2, 0], sizes = [1, 1, 1, 128], strides = [1, 1, 1, 1]} : vector<1x4x4x128xbf16> to vector<1x1x1x128xbf16>
    %193 = vector.shape_cast %192 : vector<1x1x1x128xbf16> to vector<1x128xbf16>
    %c2_100 = arith.constant 2 : index
    %c0_101 = arith.constant 0 : index
    %c0_102 = arith.constant 0 : index
    %194 = vector.load %arg6[%c2_100, %c0_101, %c0_102] : memref<16x128x128xbf16, #tpu.memory_space<vmem>>, vector<1x128x128xbf16>
    %195 = vector.shape_cast %194 : vector<1x128x128xbf16> to vector<128x128xbf16>
    %cst_103 = arith.constant dense<0.000000e+00> : vector<1x128xf32>
    %196 = tpu.matmul %193, %195, %cst_103 {dimension_numbers = #tpu.dot_dimension_numbers<[1], [0], [0], [1], [0, 0, 1, 1], [], []>} : vector<1x128xbf16>, vector<128x128xbf16>, vector<1x128xf32> -> vector<1x128xf32>
    %197 = arith.addf %191, %196 : vector<1x128xf32>
    %198 = vector.extract_strided_slice %178 {offsets = [0, 0, 3, 0], sizes = [1, 1, 1, 128], strides = [1, 1, 1, 1]} : vector<1x4x4x128xbf16> to vector<1x1x1x128xbf16>
    %199 = vector.shape_cast %198 : vector<1x1x1x128xbf16> to vector<1x128xbf16>
    %c3_104 = arith.constant 3 : index
    %c0_105 = arith.constant 0 : index
    %c0_106 = arith.constant 0 : index
    %200 = vector.load %arg6[%c3_104, %c0_105, %c0_106] : memref<16x128x128xbf16, #tpu.memory_space<vmem>>, vector<1x128x128xbf16>
    %201 = vector.shape_cast %200 : vector<1x128x128xbf16> to vector<128x128xbf16>
    %cst_107 = arith.constant dense<0.000000e+00> : vector<1x128xf32>
    %202 = tpu.matmul %199, %201, %cst_107 {dimension_numbers = #tpu.dot_dimension_numbers<[1], [0], [0], [1], [0, 0, 1, 1], [], []>} : vector<1x128xbf16>, vector<128x128xbf16>, vector<1x128xf32> -> vector<1x128xf32>
    %203 = arith.addf %197, %202 : vector<1x128xf32>
    %204 = vector.extract_strided_slice %178 {offsets = [0, 1, 0, 0], sizes = [1, 1, 1, 128], strides = [1, 1, 1, 1]} : vector<1x4x4x128xbf16> to vector<1x1x1x128xbf16>
    %205 = vector.shape_cast %204 : vector<1x1x1x128xbf16> to vector<1x128xbf16>
    %c4_108 = arith.constant 4 : index
    %c0_109 = arith.constant 0 : index
    %c0_110 = arith.constant 0 : index
    %206 = vector.load %arg6[%c4_108, %c0_109, %c0_110] : memref<16x128x128xbf16, #tpu.memory_space<vmem>>, vector<1x128x128xbf16>
    %207 = vector.shape_cast %206 : vector<1x128x128xbf16> to vector<128x128xbf16>
    %cst_111 = arith.constant dense<0.000000e+00> : vector<1x128xf32>
    %208 = tpu.matmul %205, %207, %cst_111 {dimension_numbers = #tpu.dot_dimension_numbers<[1], [0], [0], [1], [0, 0, 1, 1], [], []>} : vector<1x128xbf16>, vector<128x128xbf16>, vector<1x128xf32> -> vector<1x128xf32>
    %209 = arith.addf %203, %208 : vector<1x128xf32>
    %210 = vector.extract_strided_slice %178 {offsets = [0, 1, 1, 0], sizes = [1, 1, 1, 128], strides = [1, 1, 1, 1]} : vector<1x4x4x128xbf16> to vector<1x1x1x128xbf16>
    %211 = vector.shape_cast %210 : vector<1x1x1x128xbf16> to vector<1x128xbf16>
    %c5_112 = arith.constant 5 : index
    %c0_113 = arith.constant 0 : index
    %c0_114 = arith.constant 0 : index
    %212 = vector.load %arg6[%c5_112, %c0_113, %c0_114] : memref<16x128x128xbf16, #tpu.memory_space<vmem>>, vector<1x128x128xbf16>
    %213 = vector.shape_cast %212 : vector<1x128x128xbf16> to vector<128x128xbf16>
    %cst_115 = arith.constant dense<0.000000e+00> : vector<1x128xf32>
    %214 = tpu.matmul %211, %213, %cst_115 {dimension_numbers = #tpu.dot_dimension_numbers<[1], [0], [0], [1], [0, 0, 1, 1], [], []>} : vector<1x128xbf16>, vector<128x128xbf16>, vector<1x128xf32> -> vector<1x128xf32>
    %215 = arith.addf %209, %214 : vector<1x128xf32>
    %216 = vector.extract_strided_slice %178 {offsets = [0, 1, 2, 0], sizes = [1, 1, 1, 128], strides = [1, 1, 1, 1]} : vector<1x4x4x128xbf16> to vector<1x1x1x128xbf16>
    %217 = vector.shape_cast %216 : vector<1x1x1x128xbf16> to vector<1x128xbf16>
    %c6_116 = arith.constant 6 : index
    %c0_117 = arith.constant 0 : index
    %c0_118 = arith.constant 0 : index
    %218 = vector.load %arg6[%c6_116, %c0_117, %c0_118] : memref<16x128x128xbf16, #tpu.memory_space<vmem>>, vector<1x128x128xbf16>
    %219 = vector.shape_cast %218 : vector<1x128x128xbf16> to vector<128x128xbf16>
    %cst_119 = arith.constant dense<0.000000e+00> : vector<1x128xf32>
    %220 = tpu.matmul %217, %219, %cst_119 {dimension_numbers = #tpu.dot_dimension_numbers<[1], [0], [0], [1], [0, 0, 1, 1], [], []>} : vector<1x128xbf16>, vector<128x128xbf16>, vector<1x128xf32> -> vector<1x128xf32>
    %221 = arith.addf %215, %220 : vector<1x128xf32>
    %222 = vector.extract_strided_slice %178 {offsets = [0, 1, 3, 0], sizes = [1, 1, 1, 128], strides = [1, 1, 1, 1]} : vector<1x4x4x128xbf16> to vector<1x1x1x128xbf16>
    %223 = vector.shape_cast %222 : vector<1x1x1x128xbf16> to vector<1x128xbf16>
    %c7_120 = arith.constant 7 : index
    %c0_121 = arith.constant 0 : index
    %c0_122 = arith.constant 0 : index
    %224 = vector.load %arg6[%c7_120, %c0_121, %c0_122] : memref<16x128x128xbf16, #tpu.memory_space<vmem>>, vector<1x128x128xbf16>
    %225 = vector.shape_cast %224 : vector<1x128x128xbf16> to vector<128x128xbf16>
    %cst_123 = arith.constant dense<0.000000e+00> : vector<1x128xf32>
    %226 = tpu.matmul %223, %225, %cst_123 {dimension_numbers = #tpu.dot_dimension_numbers<[1], [0], [0], [1], [0, 0, 1, 1], [], []>} : vector<1x128xbf16>, vector<128x128xbf16>, vector<1x128xf32> -> vector<1x128xf32>
    %227 = arith.addf %221, %226 : vector<1x128xf32>
    %228 = vector.extract_strided_slice %178 {offsets = [0, 2, 0, 0], sizes = [1, 1, 1, 128], strides = [1, 1, 1, 1]} : vector<1x4x4x128xbf16> to vector<1x1x1x128xbf16>
    %229 = vector.shape_cast %228 : vector<1x1x1x128xbf16> to vector<1x128xbf16>
    %c8_124 = arith.constant 8 : index
    %c0_125 = arith.constant 0 : index
    %c0_126 = arith.constant 0 : index
    %230 = vector.load %arg6[%c8_124, %c0_125, %c0_126] : memref<16x128x128xbf16, #tpu.memory_space<vmem>>, vector<1x128x128xbf16>
    %231 = vector.shape_cast %230 : vector<1x128x128xbf16> to vector<128x128xbf16>
    %cst_127 = arith.constant dense<0.000000e+00> : vector<1x128xf32>
    %232 = tpu.matmul %229, %231, %cst_127 {dimension_numbers = #tpu.dot_dimension_numbers<[1], [0], [0], [1], [0, 0, 1, 1], [], []>} : vector<1x128xbf16>, vector<128x128xbf16>, vector<1x128xf32> -> vector<1x128xf32>
    %233 = arith.addf %227, %232 : vector<1x128xf32>
    %234 = vector.extract_strided_slice %178 {offsets = [0, 2, 1, 0], sizes = [1, 1, 1, 128], strides = [1, 1, 1, 1]} : vector<1x4x4x128xbf16> to vector<1x1x1x128xbf16>
    %235 = vector.shape_cast %234 : vector<1x1x1x128xbf16> to vector<1x128xbf16>
    %c9_128 = arith.constant 9 : index
    %c0_129 = arith.constant 0 : index
    %c0_130 = arith.constant 0 : index
    %236 = vector.load %arg6[%c9_128, %c0_129, %c0_130] : memref<16x128x128xbf16, #tpu.memory_space<vmem>>, vector<1x128x128xbf16>
    %237 = vector.shape_cast %236 : vector<1x128x128xbf16> to vector<128x128xbf16>
    %cst_131 = arith.constant dense<0.000000e+00> : vector<1x128xf32>
    %238 = tpu.matmul %235, %237, %cst_131 {dimension_numbers = #tpu.dot_dimension_numbers<[1], [0], [0], [1], [0, 0, 1, 1], [], []>} : vector<1x128xbf16>, vector<128x128xbf16>, vector<1x128xf32> -> vector<1x128xf32>
    %239 = arith.addf %233, %238 : vector<1x128xf32>
    %240 = vector.extract_strided_slice %178 {offsets = [0, 2, 2, 0], sizes = [1, 1, 1, 128], strides = [1, 1, 1, 1]} : vector<1x4x4x128xbf16> to vector<1x1x1x128xbf16>
    %241 = vector.shape_cast %240 : vector<1x1x1x128xbf16> to vector<1x128xbf16>
    %c10_132 = arith.constant 10 : index
    %c0_133 = arith.constant 0 : index
    %c0_134 = arith.constant 0 : index
    %242 = vector.load %arg6[%c10_132, %c0_133, %c0_134] : memref<16x128x128xbf16, #tpu.memory_space<vmem>>, vector<1x128x128xbf16>
    %243 = vector.shape_cast %242 : vector<1x128x128xbf16> to vector<128x128xbf16>
    %cst_135 = arith.constant dense<0.000000e+00> : vector<1x128xf32>
    %244 = tpu.matmul %241, %243, %cst_135 {dimension_numbers = #tpu.dot_dimension_numbers<[1], [0], [0], [1], [0, 0, 1, 1], [], []>} : vector<1x128xbf16>, vector<128x128xbf16>, vector<1x128xf32> -> vector<1x128xf32>
    %245 = arith.addf %239, %244 : vector<1x128xf32>
    %246 = vector.extract_strided_slice %178 {offsets = [0, 2, 3, 0], sizes = [1, 1, 1, 128], strides = [1, 1, 1, 1]} : vector<1x4x4x128xbf16> to vector<1x1x1x128xbf16>
    %247 = vector.shape_cast %246 : vector<1x1x1x128xbf16> to vector<1x128xbf16>
    %c11_136 = arith.constant 11 : index
    %c0_137 = arith.constant 0 : index
    %c0_138 = arith.constant 0 : index
    %248 = vector.load %arg6[%c11_136, %c0_137, %c0_138] : memref<16x128x128xbf16, #tpu.memory_space<vmem>>, vector<1x128x128xbf16>
    %249 = vector.shape_cast %248 : vector<1x128x128xbf16> to vector<128x128xbf16>
    %cst_139 = arith.constant dense<0.000000e+00> : vector<1x128xf32>
    %250 = tpu.matmul %247, %249, %cst_139 {dimension_numbers = #tpu.dot_dimension_numbers<[1], [0], [0], [1], [0, 0, 1, 1], [], []>} : vector<1x128xbf16>, vector<128x128xbf16>, vector<1x128xf32> -> vector<1x128xf32>
    %251 = arith.addf %245, %250 : vector<1x128xf32>
    %252 = vector.extract_strided_slice %178 {offsets = [0, 3, 0, 0], sizes = [1, 1, 1, 128], strides = [1, 1, 1, 1]} : vector<1x4x4x128xbf16> to vector<1x1x1x128xbf16>
    %253 = vector.shape_cast %252 : vector<1x1x1x128xbf16> to vector<1x128xbf16>
    %c12_140 = arith.constant 12 : index
    %c0_141 = arith.constant 0 : index
    %c0_142 = arith.constant 0 : index
    %254 = vector.load %arg6[%c12_140, %c0_141, %c0_142] : memref<16x128x128xbf16, #tpu.memory_space<vmem>>, vector<1x128x128xbf16>
    %255 = vector.shape_cast %254 : vector<1x128x128xbf16> to vector<128x128xbf16>
    %cst_143 = arith.constant dense<0.000000e+00> : vector<1x128xf32>
    %256 = tpu.matmul %253, %255, %cst_143 {dimension_numbers = #tpu.dot_dimension_numbers<[1], [0], [0], [1], [0, 0, 1, 1], [], []>} : vector<1x128xbf16>, vector<128x128xbf16>, vector<1x128xf32> -> vector<1x128xf32>
    %257 = arith.addf %251, %256 : vector<1x128xf32>
    %258 = vector.extract_strided_slice %178 {offsets = [0, 3, 1, 0], sizes = [1, 1, 1, 128], strides = [1, 1, 1, 1]} : vector<1x4x4x128xbf16> to vector<1x1x1x128xbf16>
    %259 = vector.shape_cast %258 : vector<1x1x1x128xbf16> to vector<1x128xbf16>
    %c13_144 = arith.constant 13 : index
    %c0_145 = arith.constant 0 : index
    %c0_146 = arith.constant 0 : index
    %260 = vector.load %arg6[%c13_144, %c0_145, %c0_146] : memref<16x128x128xbf16, #tpu.memory_space<vmem>>, vector<1x128x128xbf16>
    %261 = vector.shape_cast %260 : vector<1x128x128xbf16> to vector<128x128xbf16>
    %cst_147 = arith.constant dense<0.000000e+00> : vector<1x128xf32>
    %262 = tpu.matmul %259, %261, %cst_147 {dimension_numbers = #tpu.dot_dimension_numbers<[1], [0], [0], [1], [0, 0, 1, 1], [], []>} : vector<1x128xbf16>, vector<128x128xbf16>, vector<1x128xf32> -> vector<1x128xf32>
    %263 = arith.addf %257, %262 : vector<1x128xf32>
    %264 = vector.extract_strided_slice %178 {offsets = [0, 3, 2, 0], sizes = [1, 1, 1, 128], strides = [1, 1, 1, 1]} : vector<1x4x4x128xbf16> to vector<1x1x1x128xbf16>
    %265 = vector.shape_cast %264 : vector<1x1x1x128xbf16> to vector<1x128xbf16>
    %c14_148 = arith.constant 14 : index
    %c0_149 = arith.constant 0 : index
    %c0_150 = arith.constant 0 : index
    %266 = vector.load %arg6[%c14_148, %c0_149, %c0_150] : memref<16x128x128xbf16, #tpu.memory_space<vmem>>, vector<1x128x128xbf16>
    %267 = vector.shape_cast %266 : vector<1x128x128xbf16> to vector<128x128xbf16>
    %cst_151 = arith.constant dense<0.000000e+00> : vector<1x128xf32>
    %268 = tpu.matmul %265, %267, %cst_151 {dimension_numbers = #tpu.dot_dimension_numbers<[1], [0], [0], [1], [0, 0, 1, 1], [], []>} : vector<1x128xbf16>, vector<128x128xbf16>, vector<1x128xf32> -> vector<1x128xf32>
    %269 = arith.addf %263, %268 : vector<1x128xf32>
    %270 = vector.extract_strided_slice %178 {offsets = [0, 3, 3, 0], sizes = [1, 1, 1, 128], strides = [1, 1, 1, 1]} : vector<1x4x4x128xbf16> to vector<1x1x1x128xbf16>
    %271 = vector.shape_cast %270 : vector<1x1x1x128xbf16> to vector<1x128xbf16>
    %c15_152 = arith.constant 15 : index
    %c0_153 = arith.constant 0 : index
    %c0_154 = arith.constant 0 : index
    %272 = vector.load %arg6[%c15_152, %c0_153, %c0_154] : memref<16x128x128xbf16, #tpu.memory_space<vmem>>, vector<1x128x128xbf16>
    %273 = vector.shape_cast %272 : vector<1x128x128xbf16> to vector<128x128xbf16>
    %cst_155 = arith.constant dense<0.000000e+00> : vector<1x128xf32>
    %274 = tpu.matmul %271, %273, %cst_155 {dimension_numbers = #tpu.dot_dimension_numbers<[1], [0], [0], [1], [0, 0, 1, 1], [], []>} : vector<1x128xbf16>, vector<128x128xbf16>, vector<1x128xf32> -> vector<1x128xf32>
    %275 = arith.addf %269, %274 : vector<1x128xf32>
    %c0_156 = arith.constant 0 : index
    %c0_157 = arith.constant 0 : index
    %276 = vector.load %arg7[%c0_156, %c0_157] : memref<1x128xf32, #tpu.memory_space<vmem>>, vector<1x128xf32>
    %277 = arith.addf %275, %276 : vector<1x128xf32>
    %cst_158 = arith.constant 0.000000e+00 : f32
    %278 = vector.broadcast %cst_158 : f32 to vector<1x128xf32>
    %279 = arith.maximumf %277, %278 : vector<1x128xf32>
    %280 = arith.truncf %279 : vector<1x128xf32> to vector<1x128xbf16>
    %c0_159 = arith.constant 0 : index
    %c0_160 = arith.constant 0 : index
    %281 = vector.load %arg8[%c0_159, %c0_160] : memref<128x128xbf16, #tpu.memory_space<vmem>>, vector<128x128xbf16>
    %cst_161 = arith.constant dense<0.000000e+00> : vector<1x128xf32>
    %282 = tpu.matmul %280, %281, %cst_161 {dimension_numbers = #tpu.dot_dimension_numbers<[1], [0], [0], [1], [0, 0, 1, 1], [], []>} : vector<1x128xbf16>, vector<128x128xbf16>, vector<1x128xf32> -> vector<1x128xf32>
    %c0_162 = arith.constant 0 : index
    %c0_163 = arith.constant 0 : index
    %283 = vector.load %arg9[%c0_162, %c0_163] : memref<1x128xf32, #tpu.memory_space<vmem>>, vector<1x128xf32>
    %284 = arith.addf %282, %283 : vector<1x128xf32>
    %cst_164 = arith.constant 0.000000e+00 : f32
    %285 = vector.broadcast %cst_164 : f32 to vector<1x128xf32>
    %286 = arith.maximumf %284, %285 : vector<1x128xf32>
    %287 = arith.truncf %286 : vector<1x128xf32> to vector<1x128xbf16>
    %c0_165 = arith.constant 0 : index
    %c0_166 = arith.constant 0 : index
    %288 = vector.load %arg10[%c0_165, %c0_166] : memref<128x128xbf16, #tpu.memory_space<vmem>>, vector<128x128xbf16>
    %cst_167 = arith.constant dense<0.000000e+00> : vector<1x128xf32>
    %289 = tpu.matmul %287, %288, %cst_167 {dimension_numbers = #tpu.dot_dimension_numbers<[1], [0], [0], [1], [0, 0, 1, 1], [], []>} : vector<1x128xbf16>, vector<128x128xbf16>, vector<1x128xf32> -> vector<1x128xf32>
    %c0_168 = arith.constant 0 : index
    %c0_169 = arith.constant 0 : index
    %290 = vector.load %arg11[%c0_168, %c0_169] : memref<1x128xf32, #tpu.memory_space<vmem>>, vector<1x128xf32>
    %291 = arith.addf %289, %290 : vector<1x128xf32>
    %cst_170 = arith.constant dense<0xFF800000> : vector<1xf32>
    %292 = vector.multi_reduction <maximumf>, %291, %cst_170 [1] : vector<1x128xf32> to vector<1xf32>
    %293 = vector.shape_cast %292 : vector<1xf32> to vector<1x1xf32>
    %294 = vector.broadcast %293 : vector<1x1xf32> to vector<1x128xf32>
    %295 = arith.subf %291, %294 : vector<1x128xf32>
    %296 = math.exp %295 : vector<1x128xf32>
    %cst_171 = arith.constant dense<0.000000e+00> : vector<1xf32>
    %297 = vector.multi_reduction <add>, %296, %cst_171 [1] : vector<1x128xf32> to vector<1xf32>
    %298 = vector.shape_cast %297 : vector<1xf32> to vector<1x1xf32>
    %299 = vector.broadcast %298 : vector<1x1xf32> to vector<1x128xf32>
    %300 = arith.divf %296, %299 : vector<1x128xf32>
    %c0_172 = arith.constant 0 : index
    %c0_173 = arith.constant 0 : index
    %c0_174 = arith.constant 0 : index
    %301 = vector.load %arg12[%c0_172, %c0_173, %c0_174] : memref<1x1x128xf32, #tpu.memory_space<vmem>>, vector<1x1x128xf32>
    %302 = vector.shape_cast %301 : vector<1x1x128xf32> to vector<1x128xf32>
    %303 = vector.shape_cast %300 : vector<1x128xf32> to vector<1x1x128xf32>
    tpu.vector_store %arg12[%c0_172, %c0_173, %c0_174], %303 {strides = array<i32>} : memref<1x1x128xf32, #tpu.memory_space<vmem>>, vector<1x1x128xf32>,
    return
  }
  func.func @transform_0(%arg0: i32) -> (i32, i32, i32) {
    %c0_i32 = arith.constant 0 : i32
    %c0_i32_0 = arith.constant 0 : i32
    %c0_i32_1 = arith.constant 0 : i32
    return %arg0, %c0_i32, %c0_i32_0 : i32, i32, i32
  }
  func.func @transform_1(%arg0: i32) -> (i32, i32) {
    %c0_i32 = arith.constant 0 : i32
    %c0_i32_0 = arith.constant 0 : i32
    %c0_i32_1 = arith.constant 0 : i32
    return %c0_i32, %c0_i32_0 : i32, i32
  }
  func.func @transform_2(%arg0: i32) -> (i32, i32) {
    %c0_i32 = arith.constant 0 : i32
    %c0_i32_0 = arith.constant 0 : i32
    %c0_i32_1 = arith.constant 0 : i32
    return %c0_i32, %c0_i32_0 : i32, i32
  }
  func.func @transform_3(%arg0: i32) -> (i32, i32, i32) {
    %c0_i32 = arith.constant 0 : i32
    %c0_i32_0 = arith.constant 0 : i32
    %c0_i32_1 = arith.constant 0 : i32
    %c0_i32_2 = arith.constant 0 : i32
    return %c0_i32, %c0_i32_0, %c0_i32_1 : i32, i32, i32
  }
  func.func @transform_4(%arg0: i32) -> (i32, i32) {
    %c0_i32 = arith.constant 0 : i32
    %c0_i32_0 = arith.constant 0 : i32
    %c0_i32_1 = arith.constant 0 : i32
    return %c0_i32, %c0_i32_0 : i32, i32
  }
  func.func @transform_5(%arg0: i32) -> (i32, i32, i32) {
    %c0_i32 = arith.constant 0 : i32
    %c0_i32_0 = arith.constant 0 : i32
    %c0_i32_1 = arith.constant 0 : i32
    %c0_i32_2 = arith.constant 0 : i32
    return %c0_i32, %c0_i32_0, %c0_i32_1 : i32, i32, i32
  }
  func.func @transform_6(%arg0: i32) -> (i32, i32) {
    %c0_i32 = arith.constant 0 : i32
    %c0_i32_0 = arith.constant 0 : i32
    %c0_i32_1 = arith.constant 0 : i32
    return %c0_i32, %c0_i32_0 : i32, i32
  }
  func.func @transform_7(%arg0: i32) -> (i32, i32) {
    %c0_i32 = arith.constant 0 : i32
    %c0_i32_0 = arith.constant 0 : i32
    %c0_i32_1 = arith.constant 0 : i32
    return %c0_i32, %c0_i32_0 : i32, i32
  }
  func.func @transform_8(%arg0: i32) -> (i32, i32) {
    %c0_i32 = arith.constant 0 : i32
    %c0_i32_0 = arith.constant 0 : i32
    %c0_i32_1 = arith.constant 0 : i32
    return %c0_i32, %c0_i32_0 : i32, i32
  }
  func.func @transform_9(%arg0: i32) -> (i32, i32) {
    %c0_i32 = arith.constant 0 : i32
    %c0_i32_0 = arith.constant 0 : i32
    %c0_i32_1 = arith.constant 0 : i32
    return %c0_i32, %c0_i32_0 : i32, i32
  }
  func.func @transform_10(%arg0: i32) -> (i32, i32) {
    %c0_i32 = arith.constant 0 : i32
    %c0_i32_0 = arith.constant 0 : i32
    %c0_i32_1 = arith.constant 0 : i32
    return %c0_i32, %c0_i32_0 : i32, i32
  }
  func.func @transform_11(%arg0: i32) -> (i32, i32, i32) {
    %c0_i32 = arith.constant 0 : i32
    %c0_i32_0 = arith.constant 0 : i32
    %c0_i32_1 = arith.constant 0 : i32
    return %arg0, %c0_i32, %c0_i32_0 : i32, i32, i32
  }
}

</mosaic_0001>

<bundles_post_ra>
// kernel: mnist_net_forward.1
= control target key start
LH: loop header
LB: loop body
LE: loop exit
PB: predicated region body
PF: predicated region fallthrough
CT: control target
= control target key end

     0   :  { %s13964_s0 = inlined_call_operand.vmem [shape: bf16[2,576,32], index: 0, kind: input, shape index: {}]   ;;  %s13965_s1 = inlined_call_operand.vmem [shape: bf16[32,128], index: 1, kind: input, shape index: {}]   ;;  %s13966_s2 = inlined_call_operand.vmem [shape: f32[1,128], index: 2, kind: input, shape index: {}]   ;;  %s13967_s3 = inlined_call_operand.vmem [shape: bf16[25,128,128], index: 3, kind: input, shape index: {}]   ;;  %s13968_s4 = inlined_call_operand.vmem [shape: f32[1,128], index: 4, kind: input, shape index: {}]   ;;  %s13969_s5 = inlined_call_operand.vmem [shape: bf16[16,128,128], index: 5, kind: input, shape index: {}]   ;;  %s13970_s6 = inlined_call_operand.vmem [shape: f32[1,128], index: 6, kind: input, shape index: {}]   ;;  %s13971_s7 = inlined_call_operand.vmem [shape: bf16[128,128], index: 7, kind: input, shape index: {}]   ;;  %s13972_s8 = inlined_call_operand.vmem [shape: f32[1,128], index: 8, kind: input, shape index: {}]   ;;  %s13973_s9 = inlined_call_operand.vmem [shape: bf16[128,128], index: 9, kind: input, shape index: {}]   ;;  %s13974_s10 = inlined_call_operand.vmem [shape: f32[1,128], index: 10, kind: input, shape index: {}]   ;;  %s13975_s11 = inlined_call_operand.hbm [shape: f32[2,1,128], index: 11, kind: output, shape index: {}]  }
   0x1   :  { %14018 = sst [smem:[#allocation40_spill]] %s13964_s0 }
   0x2   :  { %16 = vsyncpa [#allocation3], 0 }
   0x3   :  { %18 = vsyncpa [#allocation3 + $0x1], 0  ;;  %s10499_s17 = smov 0   ;;  %s10501_s18 = smov 0  }
   0x4   :  { %s10503_s19 = smov 0   ;;  %s10505_s20 = smov 0  }
   0x5 LB: > { %s10520_s21 = sadd.s32 4294967295, %s10437_s20   ;;  %s7747_s22 = sadd.s32 4294967294, %s10437_s20   ;;  %s10437_s20 = sphi %s10505_s20, %s14124_s20   ;;  %s10433_s19 = sphi %s10503_s19, %s14123_s19   ;;  %s10429_s18 = sphi %s10501_s18, %s14122_s18   ;;  %s10425_s17 = sphi %s10499_s17, %s14121_s17  }
   0x6   : > { %s10524_s23 = sadd.s32 1, %s10437_s20   ;;  %s267_s24 = sadd.s32 1, %s10433_s19 }
   0x7   : > { %s264_s25 = ssub.s32 %s10437_s20, %s10524_s23  ;;  %p277_p0 = scmp.ne.s32.totalorder %s10433_s19, %s10429_s18 }
   0x8   : > { %p265_p1 = scmp.eq.s32.totalorder %s264_s25, 0  ;;  %p278_p2 = scmp.eq.s32.totalorder %s10520_s21, 1 }
   0x9   : > { %p283_p3 = scmp.ne.s32.totalorder %s10429_s18, %s10425_s17  ;;  %p284_p4 = scmp.eq.s32.totalorder %s7747_s22, 1 }
   0xa   : > { %s10535_s26 = scalar_select %p265_p1, %s10433_s19, %s267_s24  }
   0xb   : > { %p10537_p5 = por %p278_p2, %p277_p0  ;;  %p10541_p6 = por %p284_p4, %p283_p3 }
   0xc   : > { %p7750_p7 = scmp.ge.s32.totalorder %s10437_s20, 1  ;;  %p340_p8 = scmp.lt.s32.totalorder %s10437_s20, 3 }
   0xe   : > { %p341_p9 = pnand %p7750_p7, %p340_p8 }
  0x10   : > { %344 = sbr.rel (%p341_p9) target bundleno = 1957 (0x7a5), region = 64 }
  0x15   : > { %v9979_v0 = vld [vmem:[%s13965_s1 + $0x8] sm:$0xff]  ;;  %p379_p10 = scmp.lt.s32.totalorder %s10520_s21, 1  ;;  %v9978_v1 = vld [vmem:[%s13965_s1] sm:$0xff]  ;;  %s14021_s0 = sld [smem:[#allocation40_spill]]  ;;  %vm657_vm0 = vcmask 261120   ;;  %vm1243_vm1 = vcmask 1041408  }
  0x16   : > { %772 = vmatpush.bf16.msra.mxu0 %v9979_v0  ;;  %v10585_v15 = vld [vmem:[%s13966_s2] ss:$0 sm:$0xff]  ;;  %vm2765_vm2 = vcmask 1041409   ;;  %vm2767_vm3 = vcmask 1042434   ;;  %vm2769_vm4 = vcmask 1043459   ;;  %vm2771_vm5 = vcmask 1044484   ;;  %s7688_s22 = scalar_lea.hbm %s13975_s11, %s10520_s21 }
  0x17   : > { %s380_s14 = scalar_select %p379_p10, %s10520_s21, 1  ;;  %vm2773_vm6 = vcmask 1045509   ;;  %vm2775_vm7 = vcmask 1046534   ;;  %vm2777_vm8 = vcmask 1047559   ;;  %vm7653_vm9 = vcmask 1040384  }
  0x18   : > { %s7692_s30 = sshll.u32 %s7688_s22, 4  ;;  %s10395_s16 = scalar_lea.hbm %s13975_s11, 2  ;;  %s7693_s30 = int_to_ptr.hbm [resolvable:$true] %s7692_s30 }
  0x19   : > { %s10324_s15 = smul.u32 288, %s380_s14  ;;  %s10389_s13 = sshra.s32 %s7693_s30, 4  ;;  %s10390_s13 = int_to_ptr.hbm [resolvable:$true] %s10389_s13 }
  0x1a   : > { %773 = vmatpush.bf16.msra.mxu0 %v9978_v1  ;;  %s10391_s14 = scalar_lea.hbm %s10390_s13, 1  ;;  %p10396_p0 = scmp.lt.s32.totalorder %s10390_s13, %s13975_s11 }
  0x1b   : > { %s10558_s24 = scalar_lea.vmem %s14021_s0, %s10324_s15  ;;  %p10392_p11 = scmp.ne.s32.totalorder %s10390_s13, %s10391_s14 }
  0x1c   : > { %v9942_v2 = vld [vmem:[%s10558_s24] sm:$0xff]  ;;  %v9943_v3 = vld [vmem:[%s10558_s24 + $0x8] sm:$0xff]  ;;  %v9944_v4 = vld [vmem:[%s10558_s24 + $0x10] sm:$0xff]  ;;  %p10397_p1 = scmp.lt.s32.totalorder %s10395_s16, %s10391_s14 }
  0x1d   : > { %7904 = vmatmul.msk.bf16.vlgmr.msra.gmra.mxu0 %vm657_vm0, %v9942_v2  ;;  %v9945_v5 = vld [vmem:[%s10558_s24 + $0x18] sm:$0xff]  ;;  %v9946_v6 = vld [vmem:[%s10558_s24 + $0x20] sm:$0xff]  ;;  %v9947_v7 = vld [vmem:[%s10558_s24 + $0x28] sm:$0xff]  ;;  %p10393_p12 = pnand %p10392_p11, %p10537_p5 }
  0x1e   : > { %v9948_v8 = vld [vmem:[%s10558_s24 + $0x30] sm:$0xff]  ;;  %v9949_v9 = vld [vmem:[%s10558_s24 + $0x38] sm:$0xff]  ;;  %v9950_v10 = vld [vmem:[%s10558_s24 + $0x40] sm:$0xff]  ;;  %p10398_p2 = por %p10397_p1, %p10396_p0 }
  0x1f   : > { %v9951_v13 = vld [vmem:[%s10558_s24 + $0x48] sm:$0xff]  ;;  %v9952_v28 = vld [vmem:[%s10558_s24 + $0x50] sm:$0xff]  ;;  %p10394_p13 = pneg %p10393_p12 }
  0x21   : > { %p10399_p3 = pnand %p10398_p2, %p10394_p13 }
  0x2d   : > { %7905 = vmatmul.msk.bf16.gmra.mxu0 %vm657_vm0, %v9943_v3 }
  0x3d   : > { %7906 = vmatmul.msk.bf16.gmra.mxu0 %vm657_vm0, %v9944_v4 }
  0x4d   : > { %7907 = vmatmul.msk.bf16.gmra.mxu0 %vm657_vm0, %v9945_v5 }
  0x5d   : > { %7908 = vmatmul.msk.bf16.gmra.mxu0 %vm657_vm0, %v9946_v6 }
  0x6d   : > { %7909 = vmatmul.msk.bf16.gmra.mxu0 %vm657_vm0, %v9947_v7 }
  0x7d   : > { %7910 = vmatmul.msk.bf16.gmra.mxu0 %vm657_vm0, %v9948_v8 }
  0x8d   : > { %7911 = vmatmul.msk.bf16.gmra.mxu0 %vm657_vm0, %v9949_v9 }
  0x9a   : > { %v775_v11 = vpop.f32.mrf.mxu0 }
  0x9b   : > { %v776_v17 = vadd.f32 %v10585_v15, %v775_v11 }
  0x9d   : > { %7912 = vmatmul.msk.bf16.gmra.mxu0 %vm657_vm0, %v9950_v10 }
  0xa2   : > { %v777_v12 = vpop.f32.mrf.mxu0 }
  0xa3   : > { %v778_v34 = vadd.f32 %v10585_v15, %v777_v12 }
  0xaa   : > { %v10579_v14 = vpop.f32.mrf.mxu0 }
  0xad   : > { %7913 = vmatmul.msk.bf16.gmra.mxu0 %vm657_vm0, %v9951_v13 }
  0xb2   : > { %v782_v16 = vpop.f32.mrf.mxu0 }
  0xb3   : > { %v783_v18 = vadd.f32 %v10585_v15, %v782_v16 }
  0xb5   : > { %v955_v19 = vmax.f32 %v776_v17, %v783_v18 }
  0xb7   : > { %v1027_v20 = vrot.slane %v955_v19, 2  ;;  %v1028_v21 = vrot.slane %v955_v19, 4  ;;  %v1029_v22 = vrot.slane %v955_v19, 6  ;;  %v1244_v23 = vsel %vm1243_vm1, %v955_v19, -inf }
  0xb8   : > { %v1245_v24 = vrot.slane %v1244_v23, 4  ;;  %v781_v19 = vadd.f32 %v10585_v15, %v10579_v14 }
  0xb9   : > { %v1251_v25 = vsel %vm1243_vm1, %v1027_v20, -inf  ;;  %v1258_v26 = vsel %vm1243_vm1, %v1028_v21, -inf  ;;  %v1265_v27 = vsel %vm1243_vm1, %v1029_v22, -inf }
  0xba   : > { %v1246_v29 = vmax.f32 %v1244_v23, %v1245_v24  ;;  %v1252_v30 = vrot.slane %v1251_v25, 4  ;;  %v1259_v31 = vrot.slane %v1258_v26, 4  ;;  %v1266_v32 = vrot.slane %v1265_v27, 4  ;;  %v785_v33 = vpop.f32.mrf.mxu0 }
  0xbb   : > { %v786_v35 = vadd.f32 %v10585_v15, %v785_v33 }
  0xbc   : > { %v1247_v36 = vrot.slane %v1246_v29, 2  ;;  %v1253_v37 = vmax.f32 %v1251_v25, %v1252_v30  ;;  %v1260_v38 = vmax.f32 %v1258_v26, %v1259_v31  ;;  %v1267_v39 = vmax.f32 %v1265_v27, %v1266_v32  ;;  %v9953_v27 = vld [vmem:[%s10558_s24 + $0x58] sm:$0xff] }
  0xbd   : > { %v956_v40 = vmax.f32 %v778_v34, %v786_v35  ;;  %7914 = vmatmul.msk.bf16.gmra.mxu0 %vm657_vm0, %v9952_v28 }
  0xbe   : > { %v1248_v41 = vmax.f32 %v1246_v29, %v1247_v36  ;;  %v1254_v42 = vrot.slane %v1253_v37, 2  ;;  %v1261_v43 = vrot.slane %v1260_v38, 2  ;;  %v1268_v44 = vrot.slane %v1267_v39, 2 }
  0xbf   : > { %v1030_v45 = vrot.slane %v956_v40, 2  ;;  %v1031_v46 = vrot.slane %v956_v40, 4  ;;  %v1032_v47 = vrot.slane %v956_v40, 6  ;;  %v1272_v48 = vsel %vm1243_vm1, %v956_v40, -inf }
  0xc0   : > { %v1249_v49 = vrot.slane %v1248_v41, 1  ;;  %v1255_v50 = vmax.f32 %v1253_v37, %v1254_v42  ;;  %v1262_v51 = vmax.f32 %v1260_v38, %v1261_v43  ;;  %v1269_v52 = vmax.f32 %v1267_v39, %v1268_v44 }
  0xc1   : > { %v1273_v53 = vrot.slane %v1272_v48, 4  ;;  %v1279_v54 = vsel %vm1243_vm1, %v1030_v45, -inf  ;;  %v1286_v55 = vsel %vm1243_vm1, %v1031_v46, -inf  ;;  %v1293_v56 = vsel %vm1243_vm1, %v1032_v47, -inf }
  0xc2   : > { %v1250_v57 = vmax.f32 %v1248_v41, %v1249_v49  ;;  %v1256_v58 = vrot.slane %v1255_v50, 1  ;;  %v1263_v59 = vrot.slane %v1262_v51, 1  ;;  %v1270_v60 = vrot.slane %v1269_v52, 1  ;;  %v787_v61 = vpop.f32.mrf.mxu0 }
  0xc3   : > { %v1274_v62 = vmax.f32 %v1272_v48, %v1273_v53  ;;  %v1280_v63 = vrot.slane %v1279_v54, 4  ;;  %v1287_v0 = vrot.slane %v1286_v55, 4  ;;  %v1294_v1 = vrot.slane %v1293_v56, 4 }
  0xc4   : > { %v1257_v2 = vmax.f32 %v1255_v50, %v1256_v58  ;;  %v1264_v3 = vmax.f32 %v1262_v51, %v1263_v59  ;;  %v1271_v4 = vmax.f32 %v1269_v52, %v1270_v60  ;;  %v2252_v5 = vmax.f32 %v1250_v57, 0.0 }
  0xc5   : > { %v1275_v6 = vrot.slane %v1274_v62, 2  ;;  %v1281_v7 = vmax.f32 %v1279_v54, %v1280_v63  ;;  %v1288_v8 = vmax.f32 %v1286_v55, %v1287_v0  ;;  %v1295_v9 = vmax.f32 %v1293_v56, %v1294_v1  ;;  %v9987_v55 = vld [vmem:[%s13967_s3 + $0x38] sm:$0xff] }
  0xc6   : > { %v2253_v10 = vmax.f32 %v1257_v2, 0.0  ;;  %v2255_v11 = vmax.f32 %v1271_v4, 0.0  ;;  %v2396_v12 = vpack.c.bf16 %v2252_v5, %v2252_v5  ;;  %v2254_v20 = vmax.f32 %v1264_v3, 0.0  ;;  %3049 = vmatpush.bf16.msra.mxu2 %v9987_v55 }
  0xc7   : > { %v1276_v13 = vmax.f32 %v1274_v62, %v1275_v6  ;;  %v1282_v16 = vrot.slane %v1281_v7, 2  ;;  %v1289_v17 = vrot.slane %v1288_v8, 2  ;;  %v1296_v18 = vrot.slane %v1295_v9, 2 }
  0xc8   : > { %v2397_v21 = vpack.c.bf16 %v2253_v10, %v2253_v10  ;;  %v788_v22 = vadd.f32 %v10585_v15, %v787_v61  ;;  %v2399_v28 = vpack.c.bf16 %v2255_v11, %v2255_v11  ;;  %v2921_v30 = vperm.slane %v2396_v12, 0 }
  0xc9   : > { %v1277_v23 = vrot.slane %v1276_v13, 1  ;;  %v1283_v24 = vmax.f32 %v1281_v7, %v1282_v16  ;;  %v1290_v25 = vmax.f32 %v1288_v8, %v1289_v17  ;;  %v1297_v26 = vmax.f32 %v1295_v9, %v1296_v18  ;;  %v9995_v7 = vld [vmem:[%s13967_s3 + $0x78] sm:$0xff]  ;;  %v9986_v8 = vld [vmem:[%s13967_s3 + $0x30] sm:$0xff] }
  0xca   : > { %v2637_v29 = vperm.slane %v2397_v21, 0  ;;  %v957_v31 = vmax.f32 %v781_v19, %v788_v22  ;;  %v10605_v32 = vpop.f32.mrf.mxu0  ;;  %v2398_v47 = vpack.c.bf16 %v2254_v20, %v2254_v20  ;;  %v2929_v52 = vunpack.c.l.b16 %v2921_v30  ;;  %2884 = vmatpush.bf16.msra.mxu1 %v9995_v7  ;;  %3050 = vmatpush.bf16.msra.mxu2 %v9986_v8  ;;  %v10003_v17 = vld [vmem:[%s13967_s3 + $0xb8] sm:$0xff]  ;;  %v9954_v30 = vld [vmem:[%s10558_s24 + $0x60] sm:$0xff] }
  0xcb   : > { %v1278_v33 = vmax.f32 %v1276_v13, %v1277_v23  ;;  %v1284_v34 = vrot.slane %v1283_v24, 1  ;;  %v1291_v35 = vrot.slane %v1290_v25, 1  ;;  %v1298_v36 = vrot.slane %v1297_v26, 1  ;;  %3231 = vmatpush.bf16.msra.mxu3 %v10003_v17  ;;  %v10000_v8 = vld [vmem:[%s13967_s3 + $0xa0] sm:$0xff] }
  0xcc   : > { %v1033_v14 = vrot.slane %v957_v31, 2  ;;  %v1034_v37 = vrot.slane %v957_v31, 4  ;;  %v1035_v38 = vrot.slane %v957_v31, 6  ;;  %v1300_v39 = vsel %vm1243_vm1, %v957_v31, -inf }
  0xcd   : > { %v1285_v40 = vmax.f32 %v1283_v24, %v1284_v34  ;;  %v1292_v41 = vmax.f32 %v1290_v25, %v1291_v35  ;;  %v2256_v42 = vmax.f32 %v1278_v33, 0.0  ;;  %v1301_v43 = vrot.slane %v1300_v39, 4  ;;  %7915 = vmatmul.msk.bf16.gmra.mxu0 %vm657_vm0, %v9953_v27  ;;  %v9994_v24 = vld [vmem:[%s13967_s3 + $0x70] sm:$0xff]  ;;  %v9985_v25 = vld [vmem:[%s13967_s3 + $0x28] sm:$0xff] }
  0xce   : > { %v1307_v44 = vsel %vm1243_vm1, %v1033_v14, -inf  ;;  %v1314_v45 = vsel %vm1243_vm1, %v1034_v37, -inf  ;;  %v1321_v46 = vsel %vm1243_vm1, %v1035_v38, -inf  ;;  %v1299_v56 = vmax.f32 %v1297_v26, %v1298_v36  ;;  %2885 = vmatpush.bf16.msra.mxu1 %v9994_v24  ;;  %3051 = vmatpush.bf16.msra.mxu2 %v9985_v25  ;;  %v10002_v14 = vld [vmem:[%s13967_s3 + $0xb0] sm:$0xff] }
  0xcf   : > { %v2257_v48 = vmax.f32 %v1285_v40, 0.0  ;;  %v2258_v49 = vmax.f32 %v1292_v41, 0.0  ;;  %v2400_v50 = vpack.c.bf16 %v2256_v42, %v2256_v42  ;;  %v1302_v51 = vmax.f32 %v1300_v39, %v1301_v43  ;;  %3232 = vmatpush.bf16.msra.mxu3 %v10002_v14 }
  0xd0   : > { %v1315_v53 = vrot.slane %v1314_v45, 4  ;;  %v1322_v54 = vrot.slane %v1321_v46, 4  ;;  %v1308_v59 = vrot.slane %v1307_v44, 4  ;;  %v2259_v0 = vmax.f32 %v1299_v56, 0.0 }
  0xd1   : > { %v2401_v57 = vpack.c.bf16 %v2257_v48, %v2257_v48  ;;  %v2640_v58 = vperm.slane %v2400_v50, 0  ;;  %v2402_v60 = vpack.c.bf16 %v2258_v49, %v2258_v49  ;;  %v1303_v61 = vrot.slane %v1302_v51, 2 }
  0xd2   : > { %v10615_v62 = vmax.f32 %v1314_v45, %v1315_v53  ;;  %v10617_v63 = vpop.f32.mrf.mxu0  ;;  %v2638_v1 = vperm.slane %v2398_v47, 0  ;;  %v10621_v4 = vmax.f32 %v1321_v46, %v1322_v54  ;;  %v2639_v5 = vperm.slane %v2399_v28, 0  ;;  %v9984_v45 = vld [vmem:[%s13967_s3 + $0x20] sm:$0xff]  ;;  %v10001_v54 = vld [vmem:[%s13967_s3 + $0xa8] sm:$0xff] }
  0xd3   : > { %v2641_v2 = vperm.slane %v2401_v57, 0  ;;  %v10619_v3 = vunpack.c.l.b16 %v2640_v58  ;;  %v2403_v9 = vpack.c.bf16 %v2259_v0, %v2259_v0  ;;  %v2642_v10 = vperm.slane %v2402_v60, 0  ;;  %3052 = vmatpush.bf16.msra.mxu2 %v9984_v45  ;;  %3233 = vmatpush.bf16.msra.mxu3 %v10001_v54  ;;  %v9983_v0 = vld [vmem:[%s13967_s3 + $0x18] sm:$0xff] }
  0xd4   : > { %v1317_v6 = vrot.slane %v10615_v62, 2  ;;  %v2701_v11 = vunpack.c.l.b16 %v2637_v29  ;;  %v2702_v12 = vunpack.c.l.b16 %v2638_v1  ;;  %v10630_v13 = vunpack.c.l.b16 %v2639_v5 }
  0xd5   : > { %v10632_v16 = vunpack.c.l.b16 %v2641_v2  ;;  %v2643_v18 = vperm.slane %v2403_v9, 0  ;;  %v10637_v19 = vunpack.c.l.b16 %v2642_v10  ;;  %v1304_v21 = vmax.f32 %v1302_v51, %v1303_v61 }
  0xd6   : > { %v2937_v20 = vsel %vm2765_vm2, %v2701_v11, %v2929_v52  ;;  %v2766_v22 = vsel %vm2765_vm2, %v2702_v12, %v2701_v11  ;;  %v1309_v23 = vmax.f32 %v1307_v44, %v1308_v59  ;;  %v3119_v29 = vsel %vm2765_vm2, %v10630_v13, %v2702_v12  ;;  %v9993_v44 = vld [vmem:[%s13967_s3 + $0x68] sm:$0xff] }
  0xd7   : > { %v10647_v26 = vunpack.c.l.b16 %v2643_v18  ;;  %v2938_v27 = vsel %vm2767_vm3, %v2702_v12, %v2937_v20  ;;  %v2768_v28 = vsel %vm2767_vm3, %v10630_v13, %v2766_v22  ;;  %v1305_v33 = vrot.slane %v1304_v21, 1  ;;  %2886 = vmatpush.bf16.msra.mxu1 %v9993_v44  ;;  %3053 = vmatpush.bf16.msra.mxu2 %v9983_v0  ;;  %v9991_v20 = vld [vmem:[%s13967_s3 + $0x58] sm:$0xff] }
  0xd8   : > { %v2939_v31 = vsel %vm2769_vm4, %v10630_v13, %v2938_v27  ;;  %v2770_v34 = vsel %vm2769_vm4, %v10619_v3, %v2768_v28  ;;  %v1310_v35 = vrot.slane %v1309_v23, 2  ;;  %v3120_v39 = vsel %vm2767_vm3, %v10619_v3, %v3119_v29  ;;  %3234 = vmatpush.bf16.msra.mxu3 %v10000_v8  ;;  %v9981_v27 = vld [vmem:[%s13967_s3 + $0x8] sm:$0xff] }
  0xd9   : > { %v2940_v37 = vsel %vm2771_vm5, %v10619_v3, %v2939_v31  ;;  %v2772_v38 = vsel %vm2771_vm5, %v10632_v16, %v2770_v34  ;;  %v1324_v40 = vrot.slane %v10621_v4, 2  ;;  %v1306_v42 = vmax.f32 %v1304_v21, %v1305_v33  ;;  %v9982_v21 = vld [vmem:[%s13967_s3 + $0x10] sm:$0xff] }
  0xda   : > { %v10659_v36 = vpop.f32.mrf.mxu0  ;;  %v2941_v41 = vsel %vm2773_vm6, %v10632_v16, %v2940_v37  ;;  %v2774_v43 = vsel %vm2773_vm6, %v10637_v19, %v2772_v38  ;;  %v1311_v48 = vmax.f32 %v1309_v23, %v1310_v35  ;;  %v3121_v49 = vsel %vm2769_vm4, %v10632_v16, %v3120_v39  ;;  %v9998_v38 = vld [vmem:[%s13967_s3 + $0x90] sm:$0xff] }
  0xdb   : > { %v2942_v46 = vsel %vm2775_vm7, %v10637_v19, %v2941_v41  ;;  %v2776_v47 = vsel %vm2775_vm7, %v10647_v26, %v2774_v43  ;;  %v2260_v51 = vmax.f32 %v1306_v42, 0.0  ;;  %v3122_v52 = vsel %vm2771_vm5, %v10637_v19, %v3121_v49  ;;  %3054 = vmatpush.bf16.msra.mxu2 %v9982_v21  ;;  %v9955_v43 = vld [vmem:[%s10558_s24 + $0x68] sm:$0xff] }
  0xdc   : > { %v10690_v50 = vsel %vm2777_vm8, %v10647_v26, %v2942_v46  ;;  %v1318_v53 = vmax.f32 %v10615_v62, %v1317_v6  ;;  %v1312_v55 = vrot.slane %v1311_v48, 1  ;;  %v3123_v56 = vsel %vm2773_vm6, %v10647_v26, %v3122_v52  ;;  %v9992_v62 = vld [vmem:[%s13967_s3 + $0x60] sm:$0xff] }
  0xdd   : > { %7916 = vmatmul.msk.bf16.gmra.mxu0 %vm657_vm0, %v9954_v30  ;;  %v1325_v57 = vmax.f32 %v10621_v4, %v1324_v40  ;;  %v3499_v58 = vsel %vm2765_vm2, %v10632_v16, %v10619_v3  ;;  %v2404_v59 = vpack.c.bf16 %v2260_v51, %v2260_v51  ;;  %2887 = vmatpush.bf16.msra.mxu1 %v9992_v62  ;;  %v9989_v51 = vld [vmem:[%s13967_s3 + $0x48] sm:$0xff]  ;;  %v9980_v52 = vld [vmem:[%s13967_s3] sm:$0xff] }
  0xde   : > { %v1319_v60 = vrot.slane %v1318_v53, 1  ;;  %v3500_v61 = vsel %vm2767_vm3, %v10637_v19, %v3499_v58  ;;  %v1313_v1 = vmax.f32 %v1311_v48, %v1312_v55  ;;  %v791_v11 = vadd.f32 %v10585_v15, %v10605_v32  ;;  %v9999_v32 = vld [vmem:[%s13967_s3 + $0x98] sm:$0xff] }
  0xdf   : > { %v1326_v2 = vrot.slane %v1325_v57, 1  ;;  %v3501_v4 = vsel %vm2769_vm4, %v10647_v26, %v3500_v61  ;;  %v2644_v5 = vperm.slane %v2404_v59, 0  ;;  %v3309_v18 = vsel %vm2765_vm2, %v10619_v3, %v10630_v13  ;;  %v9990_v13 = vld [vmem:[%s13967_s3 + $0x50] sm:$0xff]  ;;  %3235 = vmatpush.bf16.msra.mxu3 %v9999_v32  ;;  %3055 = vmatpush.bf16.msra.mxu2 %v9981_v27 }
  0xe0   : > { %v1320_v6 = vmax.f32 %v1318_v53, %v1319_v60  ;;  %v2261_v9 = vmax.f32 %v1313_v1, 0.0  ;;  %v3310_v31 = vsel %vm2767_vm3, %v10632_v16, %v3309_v18  ;;  %v793_v53 = vadd.f32 %v10585_v15, %v10617_v63  ;;  %v9997_v60 = vld [vmem:[%s13967_s3 + $0x88] sm:$0xff] }
  0xe1   : > { %v1327_v10 = vmax.f32 %v1325_v57, %v1326_v2  ;;  %v10720_v17 = vunpack.c.l.b16 %v2644_v5  ;;  %2888 = vmatpush.bf16.msra.mxu1 %v9991_v20  ;;  %v3311_v44 = vsel %vm2769_vm4, %v10637_v19, %v3310_v31  ;;  %v9996_v20 = vld [vmem:[%s13967_s3 + $0x80] sm:$0xff] }
  0xe2   : > { %v797_v7 = vpop.f32.mrf.mxu0  ;;  %v2405_v22 = vpack.c.bf16 %v2261_v9, %v2261_v9  ;;  %v2262_v23 = vmax.f32 %v1320_v6, 0.0  ;;  %v10790_v0 = vsel %vm2771_vm5, %v10647_v26, %v3311_v44 }
  0xe3   : > { %v798_v12 = vadd.f32 %v10585_v15, %v797_v7  ;;  %v10736_v25 = vsel %vm2777_vm8, %v10720_v17, %v2776_v47  ;;  %v3124_v3 = vsel %vm2775_vm7, %v10720_v17, %v3123_v56  ;;  %v2263_v29 = vmax.f32 %v1327_v10, 0.0  ;;  %3236 = vmatpush.bf16.msra.mxu3 %v9998_v38  ;;  %3056 = vmatpush.bf16.msra.mxu2 %v9980_v52  ;;  %v9988_v10 = vld [vmem:[%s13967_s3 + $0x40] sm:$0xff] }
  0xe4   : > { %v3103_v28 = vperm.slane %v2405_v22, 0  ;;  %v3502_v30 = vsel %vm2771_vm5, %v10720_v17, %v3501_v4  ;;  %v10756_v40 = vpack.c.bf16 %v2262_v23, %v2262_v23 }
  0xe5   : > { %v958_v24 = vmax.f32 %v791_v11, %v798_v12  ;;  %2889 = vmatpush.bf16.msra.mxu1 %v9990_v13  ;;  %v10777_v55 = vpack.c.bf16 %v2263_v29, %v2263_v29 }
  0xe6   : > { %v10754_v39 = vunpack.c.l.b16 %v3103_v28  ;;  %v3293_v63 = vperm.slane %v10756_v40, 0 }
  0xe7   : > { %v1036_v33 = vrot.slane %v958_v24, 2  ;;  %v1037_v34 = vrot.slane %v958_v24, 4  ;;  %v1038_v35 = vrot.slane %v958_v24, 6  ;;  %v1328_v14 = vsel %vm1243_vm1, %v958_v24, -inf  ;;  %3237 = vmatpush.bf16.msra.mxu3 %v9997_v60 }
  0xe8   : > { %v1329_v37 = vrot.slane %v1328_v14, 4  ;;  %v10775_v54 = vsel %vm2777_vm8, %v10754_v39, %v3124_v3  ;;  %v10786_v62 = vsel %vm2773_vm6, %v10754_v39, %v3502_v30 }
  0xe9   : > { %v1335_v41 = vsel %vm1243_vm1, %v1036_v33, -inf  ;;  %v1342_v42 = vsel %vm1243_vm1, %v1037_v34, -inf  ;;  %v1349_v16 = vsel %vm1243_vm1, %v1038_v35, -inf  ;;  %2890 = vmatpush.bf16.msra.mxu1 %v9989_v51 }
  0xea   : > { %v1330_v45 = vmax.f32 %v1328_v14, %v1329_v37  ;;  %v1336_v46 = vrot.slane %v1335_v41, 4  ;;  %v1343_v47 = vrot.slane %v1342_v42, 4  ;;  %v1350_v48 = vrot.slane %v1349_v16, 4  ;;  %v800_v49 = vpop.f32.mrf.mxu0 }
  0xeb   : > { %v801_v19 = vadd.f32 %v10585_v15, %v800_v49  ;;  %3238 = vmatpush.bf16.msra.mxu3 %v9996_v20 }
  0xec   : > { %v1331_v56 = vrot.slane %v1330_v45, 2  ;;  %v1337_v57 = vmax.f32 %v1335_v41, %v1336_v46  ;;  %v1344_v58 = vmax.f32 %v1342_v42, %v1343_v47  ;;  %v1351_v59 = vmax.f32 %v1349_v16, %v1350_v48 }
  0xed   : > { %v959_v61 = vmax.f32 %v793_v53, %v801_v19  ;;  %7917 = vmatmul.msk.bf16.gmra.mxu0 %vm657_vm0, %v9955_v43  ;;  %2891 = vmatpush.bf16.msra.mxu1 %v9988_v10  ;;  %v796_v16 = vadd.f32 %v10585_v15, %v10659_v36  ;;  %v10805_v53 = vunpack.c.l.b16 %v3293_v63  ;;  %v3483_v19 = vperm.slane %v10777_v55, 0  ;;  %v9956_v36 = vld [vmem:[%s10558_s24 + $0x70] sm:$0xff] }
  0xee   : > { %v1332_v1 = vmax.f32 %v1330_v45, %v1331_v56  ;;  %v1338_v2 = vrot.slane %v1337_v57, 2  ;;  %v1345_v4 = vrot.slane %v1344_v58, 2  ;;  %v1352_v5 = vrot.slane %v1351_v59, 2 }
  0xef   : > { %v1039_v6 = vrot.slane %v959_v61, 2  ;;  %v1040_v7 = vrot.slane %v959_v61, 4  ;;  %v1041_v8 = vrot.slane %v959_v61, 6  ;;  %v1356_v9 = vsel %vm1243_vm1, %v959_v61, -inf }
  0xf0   : > { %v1333_v11 = vrot.slane %v1332_v1, 1  ;;  %v1339_v12 = vmax.f32 %v1337_v57, %v1338_v2  ;;  %v1346_v18 = vmax.f32 %v1344_v58, %v1345_v4  ;;  %v1353_v26 = vmax.f32 %v1351_v59, %v1352_v5 }
  0xf1   : > { %v1357_v21 = vrot.slane %v1356_v9, 4  ;;  %v1363_v32 = vsel %vm1243_vm1, %v1039_v6, -inf  ;;  %v1370_v22 = vsel %vm1243_vm1, %v1040_v7, -inf  ;;  %v1377_v23 = vsel %vm1243_vm1, %v1041_v8, -inf }
  0xf2   : > { %v1334_v24 = vmax.f32 %v1332_v1, %v1333_v11  ;;  %v1340_v3 = vrot.slane %v1339_v12, 1  ;;  %v1347_v13 = vrot.slane %v1346_v18, 1  ;;  %v1354_v27 = vrot.slane %v1353_v26, 1  ;;  %v802_v28 = vpop.f32.mrf.mxu0 }
  0xf3   : > { %v1358_v29 = vmax.f32 %v1356_v9, %v1357_v21  ;;  %v1364_v30 = vrot.slane %v1363_v32, 4  ;;  %v1371_v31 = vrot.slane %v1370_v22, 4  ;;  %v1378_v33 = vrot.slane %v1377_v23, 4 }
  0xf4   : > { %v1341_v34 = vmax.f32 %v1339_v12, %v1340_v3  ;;  %v1348_v35 = vmax.f32 %v1346_v18, %v1347_v13  ;;  %v1355_v14 = vmax.f32 %v1353_v26, %v1354_v27  ;;  %v2264_v37 = vmax.f32 %v1334_v24, 0.0 }
  0xf5   : > { %v1359_v38 = vrot.slane %v1358_v29, 2  ;;  %v1365_v40 = vmax.f32 %v1363_v32, %v1364_v30  ;;  %v1372_v41 = vmax.f32 %v1370_v22, %v1371_v31  ;;  %v1379_v42 = vmax.f32 %v1377_v23, %v1378_v33 }
  0xf6   : > { %v2265_v43 = vmax.f32 %v1341_v34, 0.0  ;;  %v2267_v44 = vmax.f32 %v1355_v14, 0.0  ;;  %v2408_v45 = vpack.c.bf16 %v2264_v37, %v2264_v37  ;;  %v2266_v51 = vmax.f32 %v1348_v35, 0.0 }
  0xf7   : > { %v1360_v46 = vmax.f32 %v1358_v29, %v1359_v38  ;;  %v1366_v47 = vrot.slane %v1365_v40, 2  ;;  %v1373_v48 = vrot.slane %v1372_v41, 2  ;;  %v1380_v49 = vrot.slane %v1379_v42, 2 }
  0xf8   : > { %v803_v52 = vadd.f32 %v10585_v15, %v802_v28  ;;  %v2409_v60 = vpack.c.bf16 %v2265_v43, %v2265_v43  ;;  %v2411_v61 = vpack.c.bf16 %v2267_v44, %v2267_v44  ;;  %v2922_v1 = vperm.slane %v2408_v45, 0 }
  0xf9   : > { %v1361_v56 = vrot.slane %v1360_v46, 1  ;;  %v1367_v57 = vmax.f32 %v1365_v40, %v1366_v47  ;;  %v1374_v58 = vmax.f32 %v1372_v41, %v1373_v48  ;;  %v1381_v59 = vmax.f32 %v1379_v42, %v1380_v49 }
  0xfa   : > { %v960_v2 = vmax.f32 %v796_v16, %v803_v52  ;;  %v10809_v4 = vpop.f32.mrf.mxu0  ;;  %v2410_v23 = vpack.c.bf16 %v2266_v51, %v2266_v51  ;;  %v2645_v28 = vperm.slane %v2409_v60, 0  ;;  %v2930_v16 = vunpack.c.l.b16 %v2922_v1 }
  0xfb   : > { %v1362_v5 = vmax.f32 %v1360_v46, %v1361_v56  ;;  %v1368_v6 = vrot.slane %v1367_v57, 1  ;;  %v1375_v7 = vrot.slane %v1374_v58, 1  ;;  %v1382_v8 = vrot.slane %v1381_v59, 1 }
  0xfc   : > { %v1042_v9 = vrot.slane %v960_v2, 2  ;;  %v1043_v63 = vrot.slane %v960_v2, 4  ;;  %v1044_v10 = vrot.slane %v960_v2, 6  ;;  %v1384_v11 = vsel %vm1243_vm1, %v960_v2, -inf }
  0xfd   : > { %v1369_v12 = vmax.f32 %v1367_v57, %v1368_v6  ;;  %v1376_v18 = vmax.f32 %v1374_v58, %v1375_v7  ;;  %v2268_v26 = vmax.f32 %v1362_v5, 0.0  ;;  %v1385_v20 = vrot.slane %v1384_v11, 4  ;;  %7918 = vmatmul.msk.bf16.gmra.mxu0 %vm657_vm0, %v9956_v36 }
  0xfe   : > { %v1391_v21 = vsel %vm1243_vm1, %v1042_v9, -inf  ;;  %v1398_v32 = vsel %vm1243_vm1, %v1043_v63, -inf  ;;  %v1405_v22 = vsel %vm1243_vm1, %v1044_v10, -inf  ;;  %v1383_v31 = vmax.f32 %v1381_v59, %v1382_v8  ;;  %v9957_v10 = vld [vmem:[%s10558_s24 + $0x78] sm:$0xff] }
  0xff   : > { %v2269_v24 = vmax.f32 %v1369_v12, 0.0  ;;  %v2270_v3 = vmax.f32 %v1376_v18, 0.0  ;;  %v2412_v13 = vpack.c.bf16 %v2268_v26, %v2268_v26  ;;  %v1386_v27 = vmax.f32 %v1384_v11, %v1385_v20 }
 0x100   : > { %v1399_v29 = vrot.slane %v1398_v32, 4  ;;  %v1406_v30 = vrot.slane %v1405_v22, 4  ;;  %v1392_v37 = vrot.slane %v1391_v21, 4  ;;  %v2271_v41 = vmax.f32 %v1383_v31, 0.0 }
 0x101   : > { %v2413_v33 = vpack.c.bf16 %v2269_v24, %v2269_v24  ;;  %v2648_v34 = vperm.slane %v2412_v13, 0  ;;  %v1387_v35 = vrot.slane %v1386_v27, 2  ;;  %v2414_v14 = vpack.c.bf16 %v2270_v3, %v2270_v3 }
 0x102   : > { %v1400_v38 = vmax.f32 %v1398_v32, %v1399_v29  ;;  %v10816_v40 = vpop.f32.mrf.mxu0  ;;  %v2646_v42 = vperm.slane %v2410_v23, 0  ;;  %v1407_v44 = vmax.f32 %v1405_v22, %v1406_v30  ;;  %v2647_v45 = vperm.slane %v2411_v61, 0 }
 0x103   : > { %v2649_v43 = vperm.slane %v2413_v33, 0  ;;  %v10818_v46 = vunpack.c.l.b16 %v2648_v34  ;;  %v2415_v47 = vpack.c.bf16 %v2271_v41, %v2271_v41  ;;  %v2650_v48 = vperm.slane %v2414_v14, 0 }
 0x104   : > { %v2709_v49 = vunpack.c.l.b16 %v2645_v28  ;;  %v1401_v51 = vrot.slane %v1400_v38, 2  ;;  %v2710_v52 = vunpack.c.l.b16 %v2646_v42  ;;  %v10820_v56 = vunpack.c.l.b16 %v2647_v45 }
 0x105   : > { %v1388_v57 = vmax.f32 %v1386_v27, %v1387_v35  ;;  %v2651_v58 = vperm.slane %v2415_v47, 0  ;;  %v10822_v59 = vunpack.c.l.b16 %v2649_v43  ;;  %v1393_v60 = vmax.f32 %v1391_v21, %v1392_v37 }
 0x106   : > { %v2944_v36 = vsel %vm2765_vm2, %v2709_v49, %v2930_v16  ;;  %v10825_v1 = vunpack.c.l.b16 %v2650_v48  ;;  %v2779_v5 = vsel %vm2765_vm2, %v2710_v52, %v2709_v49  ;;  %v3126_v9 = vsel %vm2765_vm2, %v10820_v56, %v2710_v52 }
 0x107   : > { %v2945_v61 = vsel %vm2767_vm3, %v2710_v52, %v2944_v36  ;;  %v1389_v2 = vrot.slane %v1388_v57, 1  ;;  %v2780_v7 = vsel %vm2767_vm3, %v10820_v56, %v2779_v5  ;;  %v1394_v8 = vrot.slane %v1393_v60, 2 }
 0x108   : > { %v2946_v6 = vsel %vm2769_vm4, %v10820_v56, %v2945_v61  ;;  %v2781_v12 = vsel %vm2769_vm4, %v10818_v46, %v2780_v7  ;;  %v3127_v18 = vsel %vm2767_vm3, %v10818_v46, %v3126_v9  ;;  %v10844_v20 = vunpack.c.l.b16 %v2651_v58 }
 0x109   : > { %v2947_v63 = vsel %vm2771_vm5, %v10818_v46, %v2946_v6  ;;  %v1390_v11 = vmax.f32 %v1388_v57, %v1389_v2  ;;  %v2782_v32 = vsel %vm2771_vm5, %v10822_v59, %v2781_v12  ;;  %v1395_v22 = vmax.f32 %v1393_v60, %v1394_v8 }
 0x10a   : > { %v10842_v26 = vpop.f32.mrf.mxu0  ;;  %v2948_v21 = vsel %vm2773_vm6, %v10822_v59, %v2947_v63  ;;  %v3128_v27 = vsel %vm2769_vm4, %v10822_v59, %v3127_v18  ;;  %v3491_v28 = vunpack.c.l.b16 %v3483_v19  ;;  %v2783_v31 = vsel %vm2773_vm6, %v10825_v1, %v2782_v32 }
 0x10b   : > { %v2949_v23 = vsel %vm2775_vm7, %v10825_v1, %v2948_v21  ;;  %v2272_v24 = vmax.f32 %v1390_v11, 0.0  ;;  %v1396_v13 = vrot.slane %v1395_v22, 1  ;;  %v1402_v33 = vmax.f32 %v1400_v38, %v1401_v51 }
 0x10c   : > { %v10854_v3 = vsel %vm2777_vm8, %v10844_v20, %v2949_v23  ;;  %v1408_v35 = vrot.slane %v1407_v44, 2  ;;  %v3504_v14 = vsel %vm2775_vm7, %v10805_v53, %v10786_v62  ;;  %v3313_v55 = vsel %vm2773_vm6, %v10720_v17, %v10790_v0 }
 0x10d   : > { %v2993_v29 = vpack.c.b16 %v10854_v3, %v10690_v50  ;;  %7919 = vmatmul.msk.bf16.gmra.mxu0 %vm657_vm0, %v9957_v10  ;;  %v2416_v30 = vpack.c.bf16 %v2272_v24, %v2272_v24  ;;  %v1397_v34 = vmax.f32 %v1395_v22, %v1396_v13  ;;  %v1403_v50 = vrot.slane %v1402_v33, 1 }
 0x10e   : > { %v10872_v37 = vsel %vm2777_vm8, %v3491_v28, %v3504_v14  ;;  %v3314_v41 = vsel %vm2775_vm7, %v10754_v39, %v3313_v55  ;;  %v1409_v42 = vmax.f32 %v1407_v44, %v1408_v35  ;;  %v3129_v17 = vsel %vm2771_vm5, %v10825_v1, %v3128_v27 }
 0x10f   : > { %3057 = vmatmul.bf16.vlgmr.msra.gmra.mxu2 %v2993_v29  ;;  %v2652_v19 = vperm.slane %v2416_v30, 0  ;;  %v2273_v38 = vmax.f32 %v1397_v34, 0.0  ;;  %v10878_v16 = vsel %vm2777_vm8, %v10805_v53, %v3314_v41  ;;  %v2784_v0 = vsel %vm2775_vm7, %v10844_v20, %v2783_v31 }
 0x110   : > { %v1404_v47 = vmax.f32 %v1402_v33, %v1403_v50  ;;  %v806_v39 = vadd.f32 %v10585_v15, %v10809_v4  ;;  %v3130_v51 = vsel %vm2773_vm6, %v10844_v20, %v3129_v17  ;;  %v1410_v52 = vrot.slane %v1409_v42, 1 }
 0x111   : > { %v10880_v62 = vunpack.c.l.b16 %v2652_v19  ;;  %v2417_v43 = vpack.c.bf16 %v2273_v38, %v2273_v38  ;;  %v3506_v4 = vsel %vm2765_vm2, %v10822_v59, %v10818_v46  ;;  %v3316_v61 = vsel %vm2765_vm2, %v10818_v46, %v10820_v56  ;;  %v9958_v56 = vld [vmem:[%s10558_s24 + $0x80] sm:$0xff] }
 0x112   : > { %v812_v45 = vpop.f32.mrf.mxu0  ;;  %v2274_v60 = vmax.f32 %v1404_v47, 0.0  ;;  %v1411_v63 = vmax.f32 %v1409_v42, %v1410_v52  ;;  %v808_v24 = vadd.f32 %v10585_v15, %v10816_v40  ;;  %v10932_v40 = vsel %vm2767_vm3, %v10822_v59, %v3316_v61 }
 0x113   : > { %v10890_v44 = vsel %vm2777_vm8, %v10880_v62, %v2784_v0  ;;  %v813_v53 = vadd.f32 %v10585_v15, %v812_v45  ;;  %v3104_v49 = vperm.slane %v2417_v43, 0  ;;  %v3131_v57 = vsel %vm2775_vm7, %v10880_v62, %v3130_v51 }
 0x114   : > { %14022 = vst [vmem:[#allocation5_spill] sm:$0xff] %v10890_v44  ;;  %v2828_v48 = vpack.c.b16 %v10890_v44, %v10736_v25  ;;  %v3507_v25 = vsel %vm2767_vm3, %v10825_v1, %v3506_v4  ;;  %v2418_v27 = vpack.c.bf16 %v2274_v60, %v2274_v60  ;;  %v2275_v34 = vmax.f32 %v1411_v63, 0.0 }
 0x115   : > { %v961_v58 = vmax.f32 %v806_v39, %v813_v53  ;;  %v10902_v36 = vunpack.c.l.b16 %v3104_v49 }
 0x116   : > { %2892 = vmatmul.bf16.vlgmr.msra.gmra.mxu1 %v2828_v48 }
 0x117   : > { %v1045_v2 = vrot.slane %v961_v58, 2  ;;  %v1046_v5 = vrot.slane %v961_v58, 4  ;;  %v1047_v6 = vrot.slane %v961_v58, 6  ;;  %v1412_v7 = vsel %vm1243_vm1, %v961_v58, -inf }
 0x118   : > { %v10912_v8 = vsel %vm2777_vm8, %v10902_v36, %v3131_v57  ;;  %v1413_v9 = vrot.slane %v1412_v7, 4 }
 0x119   : > { %v3175_v10 = vpack.c.b16 %v10912_v8, %v10775_v54  ;;  %v1419_v11 = vsel %vm1243_vm1, %v1045_v2, -inf  ;;  %v1426_v12 = vsel %vm1243_vm1, %v1046_v5, -inf  ;;  %v1433_v46 = vsel %vm1243_vm1, %v1047_v6, -inf }
 0x11a   : > { %v1414_v18 = vmax.f32 %v1412_v7, %v1413_v9  ;;  %v1420_v21 = vrot.slane %v1419_v11, 4  ;;  %v1427_v32 = vrot.slane %v1426_v12, 4  ;;  %v1434_v22 = vrot.slane %v1433_v46, 4  ;;  %v815_v23 = vpop.f32.mrf.mxu0 }
 0x11b   : > { %3239 = vmatmul.bf16.vlgmr.msra.gmra.mxu3 %v3175_v10  ;;  %v816_v13 = vadd.f32 %v10585_v15, %v815_v23  ;;  %v3508_v54 = vsel %vm2769_vm4, %v10844_v20, %v3507_v25  ;;  %v3294_v6 = vperm.slane %v2418_v27, 0  ;;  %v811_v23 = vadd.f32 %v10585_v15, %v10842_v26 }
 0x11c   : > { %v1415_v28 = vrot.slane %v1414_v18, 2  ;;  %v1421_v29 = vmax.f32 %v1419_v11, %v1420_v21  ;;  %v1428_v30 = vmax.f32 %v1426_v12, %v1427_v32  ;;  %v1435_v31 = vmax.f32 %v1433_v46, %v1434_v22 }
 0x11d   : > { %v962_v33 = vmax.f32 %v808_v24, %v816_v13  ;;  %7920 = vmatmul.msk.bf16.gmra.mxu0 %vm657_vm0, %v9958_v56  ;;  %v10928_v35 = vsel %vm2771_vm5, %v10880_v62, %v3508_v54  ;;  %v2419_v56 = vpack.c.bf16 %v2275_v34, %v2275_v34  ;;  %v10943_v13 = vld [vmem:[%s13966_s2] ss:$0 sm:$0xff]  ;;  %v10946_v54 = vunpack.c.l.b16 %v3294_v6 }
 0x11e   : > { %v1416_v14 = vmax.f32 %v1414_v18, %v1415_v28  ;;  %v1422_v55 = vrot.slane %v1421_v29, 2  ;;  %v1429_v19 = vrot.slane %v1428_v30, 2  ;;  %v1436_v50 = vrot.slane %v1435_v31, 2 }
 0x11f   : > { %v1048_v41 = vrot.slane %v962_v33, 2  ;;  %v1049_v38 = vrot.slane %v962_v33, 4  ;;  %v1050_v42 = vrot.slane %v962_v33, 6  ;;  %v1440_v17 = vsel %vm1243_vm1, %v962_v33, -inf  ;;  %v9959_v33 = vld [vmem:[%s10558_s24 + $0x88] sm:$0xff] }
 0x120   : > { %v1417_v0 = vrot.slane %v1416_v14, 1  ;;  %v1423_v43 = vmax.f32 %v1421_v29, %v1422_v55  ;;  %v1430_v45 = vmax.f32 %v1428_v30, %v1429_v19  ;;  %v1437_v47 = vmax.f32 %v1435_v31, %v1436_v50 }
 0x121   : > { %v1441_v39 = vrot.slane %v1440_v17, 4  ;;  %v1447_v53 = vsel %vm1243_vm1, %v1048_v41, -inf  ;;  %v1454_v48 = vsel %vm1243_vm1, %v1049_v38, -inf  ;;  %v1461_v59 = vsel %vm1243_vm1, %v1050_v42, -inf }
 0x122   : > { %v1418_v49 = vmax.f32 %v1416_v14, %v1417_v0  ;;  %v1424_v51 = vrot.slane %v1423_v43, 1  ;;  %v1431_v52 = vrot.slane %v1430_v45, 1  ;;  %v1438_v57 = vrot.slane %v1437_v47, 1  ;;  %v817_v58 = vpop.f32.mrf.mxu0 }
 0x123   : > { %v1442_v4 = vmax.f32 %v1440_v17, %v1441_v39  ;;  %v1448_v60 = vrot.slane %v1447_v53, 4  ;;  %v1455_v25 = vrot.slane %v1454_v48, 4  ;;  %v1462_v61 = vrot.slane %v1461_v59, 4 }
 0x124   : > { %v1425_v2 = vmax.f32 %v1423_v43, %v1424_v51  ;;  %v2276_v5 = vmax.f32 %v1418_v49, 0.0  ;;  %v1432_v11 = vmax.f32 %v1430_v45, %v1431_v52  ;;  %v1439_v12 = vmax.f32 %v1437_v47, %v1438_v57 }
 0x125   : > { %v1443_v7 = vrot.slane %v1442_v4, 2  ;;  %v1449_v9 = vmax.f32 %v1447_v53, %v1448_v60  ;;  %v1456_v63 = vmax.f32 %v1454_v48, %v1455_v25  ;;  %v1463_v10 = vmax.f32 %v1461_v59, %v1462_v61 }
 0x126   : > { %v2277_v46 = vmax.f32 %v1425_v2, 0.0  ;;  %v2420_v24 = vpack.c.bf16 %v2276_v5, %v2276_v5  ;;  %v818_v27 = vadd.f32 %v10943_v13, %v817_v58  ;;  %v2278_v34 = vmax.f32 %v1432_v11, 0.0 }
 0x127   : > { %v1444_v18 = vmax.f32 %v1442_v4, %v1443_v7  ;;  %v1450_v21 = vrot.slane %v1449_v9, 2  ;;  %v1457_v32 = vrot.slane %v1456_v63, 2  ;;  %v1464_v22 = vrot.slane %v1463_v10, 2 }
 0x128   : > { %v2279_v14 = vmax.f32 %v1439_v12, 0.0  ;;  %v10949_v55 = vmax.f32 %v811_v23, %v818_v27  ;;  %v3484_v26 = vperm.slane %v2419_v56, 0  ;;  %v2421_v19 = vpack.c.bf16 %v2277_v46, %v2277_v46 }
 0x129   : > { %v1445_v28 = vrot.slane %v1444_v18, 1  ;;  %v1451_v29 = vmax.f32 %v1449_v9, %v1450_v21  ;;  %v1458_v30 = vmax.f32 %v1456_v63, %v1457_v32  ;;  %v1465_v31 = vmax.f32 %v1463_v10, %v1464_v22 }
 0x12a   : > { %v10951_v15 = vpop.f32.mrf.mxu0  ;;  %v2923_v42 = vperm.slane %v2420_v24, 0  ;;  %v1051_v0 = vrot.slane %v10949_v55, 2  ;;  %v1468_v43 = vsel %vm1243_vm1, %v10949_v55, -inf  ;;  %v2423_v48 = vpack.c.bf16 %v2279_v14, %v2279_v14 }
 0x12b   : > { %v1446_v50 = vmax.f32 %v1444_v18, %v1445_v28  ;;  %v1452_v41 = vrot.slane %v1451_v29, 1  ;;  %v1459_v38 = vrot.slane %v1458_v30, 1  ;;  %v1466_v17 = vrot.slane %v1465_v31, 1 }
 0x12c   : > { %v1469_v53 = vrot.slane %v1468_v43, 4  ;;  %v1475_v59 = vsel %vm1243_vm1, %v1051_v0, -inf  ;;  %v2422_v49 = vpack.c.bf16 %v2278_v34, %v2278_v34  ;;  %v10958_v51 = vunpack.c.l.b16 %v3484_v26 }
 0x12d   : > { %v1453_v45 = vmax.f32 %v1451_v29, %v1452_v41  ;;  %v1460_v47 = vmax.f32 %v1458_v30, %v1459_v38  ;;  %v2280_v39 = vmax.f32 %v1446_v50, 0.0  ;;  %7921 = vmatmul.msk.bf16.gmra.mxu0 %vm657_vm0, %v9959_v33  ;;  %v2653_v60 = vperm.slane %v2421_v19, 0 }
 0x12e   : > { %v1470_v4 = vmax.f32 %v1468_v43, %v1469_v53  ;;  %v2931_v25 = vunpack.c.l.b16 %v2923_v42  ;;  %v1476_v61 = vrot.slane %v1475_v59, 4  ;;  %v1467_v2 = vmax.f32 %v1465_v31, %v1466_v17  ;;  %v9960_v43 = vld [vmem:[%s10558_s24 + $0x90] sm:$0xff] }
 0x12f   : > { %v2281_v52 = vmax.f32 %v1453_v45, 0.0  ;;  %v2282_v57 = vmax.f32 %v1460_v47, 0.0  ;;  %v2424_v58 = vpack.c.bf16 %v2280_v39, %v2280_v39  ;;  %v1052_v63 = vrot.slane %v10949_v55, 4 }
 0x130   : > { %v1471_v7 = vrot.slane %v1470_v4, 2  ;;  %v2283_v11 = vmax.f32 %v1467_v2, 0.0  ;;  %v2654_v12 = vperm.slane %v2422_v49, 0  ;;  %v2655_v46 = vperm.slane %v2423_v48, 0 }
 0x131   : > { %v2425_v5 = vpack.c.bf16 %v2281_v52, %v2281_v52  ;;  %v2656_v6 = vperm.slane %v2424_v58, 0  ;;  %v2426_v9 = vpack.c.bf16 %v2282_v57, %v2282_v57  ;;  %v1053_v21 = vrot.slane %v10949_v55, 6 }
 0x132   : > { %v10961_v10 = vpop.f32.mrf.mxu0  ;;  %v2427_v22 = vpack.c.bf16 %v2283_v11, %v2283_v11  ;;  %v2717_v23 = vunpack.c.l.b16 %v2653_v60  ;;  %v2718_v24 = vunpack.c.l.b16 %v2654_v12  ;;  %v10966_v27 = vunpack.c.l.b16 %v2655_v46 }
 0x133   : > { %v2657_v56 = vperm.slane %v2425_v5, 0  ;;  %v10963_v18 = vunpack.c.l.b16 %v2656_v6  ;;  %v2658_v32 = vperm.slane %v2426_v9, 0  ;;  %v1472_v30 = vmax.f32 %v1470_v4, %v1471_v7 }
 0x134   : > { %v1477_v31 = vmax.f32 %v1475_v59, %v1476_v61  ;;  %v2659_v33 = vperm.slane %v2427_v22, 0  ;;  %v2951_v34 = vsel %vm2765_vm2, %v2717_v23, %v2931_v25  ;;  %v2786_v14 = vsel %vm2765_vm2, %v2718_v24, %v2717_v23 }
 0x135   : > { %v10968_v28 = vunpack.c.l.b16 %v2657_v56  ;;  %v10970_v29 = vunpack.c.l.b16 %v2658_v32  ;;  %v3133_v55 = vsel %vm2765_vm2, %v10966_v27, %v2718_v24  ;;  %v2952_v26 = vsel %vm2767_vm3, %v2718_v24, %v2951_v34 }
 0x136   : > { %v1473_v19 = vrot.slane %v1472_v30, 1  ;;  %v2787_v50 = vsel %vm2767_vm3, %v10966_v27, %v2786_v14  ;;  %v1478_v41 = vrot.slane %v1477_v31, 2  ;;  %v10979_v38 = vunpack.c.l.b16 %v2659_v33 }
 0x137   : > { %v2953_v42 = vsel %vm2769_vm4, %v10966_v27, %v2952_v26  ;;  %v2788_v17 = vsel %vm2769_vm4, %v10963_v18, %v2787_v50  ;;  %v3134_v0 = vsel %vm2767_vm3, %v10963_v18, %v3133_v55  ;;  %v3510_v57 = vsel %vm2773_vm6, %v10902_v36, %v10928_v35 }
 0x138   : > { %v2954_v45 = vsel %vm2771_vm5, %v10963_v18, %v2953_v42  ;;  %v1474_v47 = vmax.f32 %v1472_v30, %v1473_v19  ;;  %v2789_v39 = vsel %vm2771_vm5, %v10968_v28, %v2788_v17  ;;  %v1479_v53 = vmax.f32 %v1477_v31, %v1478_v41 }
 0x139   : > { %v2955_v59 = vsel %vm2773_vm6, %v10968_v28, %v2954_v45  ;;  %v2790_v49 = vsel %vm2773_vm6, %v10970_v29, %v2789_v39  ;;  %v3135_v52 = vsel %vm2769_vm4, %v10968_v28, %v3134_v0  ;;  %v1482_v58 = vsel %vm1243_vm1, %v1052_v63, -inf }
 0x13a   : > { %v10992_v48 = vpop.f32.mrf.mxu0  ;;  %v2956_v4 = vsel %vm2775_vm7, %v10970_v29, %v2955_v59  ;;  %v2284_v60 = vmax.f32 %v1474_v47, 0.0  ;;  %v2791_v25 = vsel %vm2775_vm7, %v10979_v38, %v2790_v49  ;;  %v1480_v2 = vrot.slane %v1479_v53, 1  ;;  %v9961_v49 = vld [vmem:[%s10558_s24 + $0x98] sm:$0xff] }
 0x13b   : > { %v11010_v61 = vsel %vm2777_vm8, %v10979_v38, %v2956_v4  ;;  %v3136_v5 = vsel %vm2771_vm5, %v10970_v29, %v3135_v52  ;;  %v3511_v35 = vsel %vm2775_vm7, %v10946_v54, %v3510_v57  ;;  %v3318_v46 = vsel %vm2769_vm4, %v10825_v1, %v10932_v40 }
 0x13c   : > { %v2428_v7 = vpack.c.bf16 %v2284_v60, %v2284_v60  ;;  %v3137_v9 = vsel %vm2773_vm6, %v10979_v38, %v3136_v5  ;;  %v11023_v63 = vsel %vm2777_vm8, %v10958_v51, %v3511_v35  ;;  %v1481_v11 = vmax.f32 %v1479_v53, %v1480_v2 }
 0x13d   : > { %7922 = vmatmul.msk.bf16.gmra.mxu0 %vm657_vm0, %v9960_v43  ;;  %14023 = vst [vmem:[#allocation6_spill] sm:$0xff] %v11023_v63  ;;  %v3319_v32 = vsel %vm2771_vm5, %v10844_v20, %v3318_v46  ;;  %v1483_v22 = vrot.slane %v1482_v58, 4  ;;  %v1489_v51 = vsel %vm1243_vm1, %v1053_v21, -inf  ;;  %v821_v33 = vadd.f32 %v10943_v13, %v10951_v15 }
 0x13e   : > { %v2660_v56 = vperm.slane %v2428_v7, 0  ;;  %v2285_v23 = vmax.f32 %v1481_v11, 0.0  ;;  %v3320_v24 = vsel %vm2773_vm6, %v10880_v62, %v3319_v32  ;;  %v1490_v15 = vrot.slane %v1489_v51, 4 }
 0x13f   : > { %v3321_v31 = vsel %vm2775_vm7, %v10902_v36, %v3320_v24  ;;  %v1484_v14 = vmax.f32 %v1482_v58, %v1483_v22  ;;  %v823_v2 = vadd.f32 %v10943_v13, %v10961_v10  ;;  %v11076_v22 = vsel %vm2765_vm2, %v10968_v28, %v10963_v18 }
 0x140   : > { %v11035_v30 = vunpack.c.l.b16 %v2660_v56  ;;  %v2429_v40 = vpack.c.bf16 %v2285_v23, %v2285_v23  ;;  %v11043_v20 = vsel %vm2777_vm8, %v10946_v54, %v3321_v31  ;;  %v1491_v47 = vmax.f32 %v1489_v51, %v1490_v15 }
 0x141   : > { %v1485_v45 = vrot.slane %v1484_v14, 2 }
 0x142   : > { %v827_v1 = vpop.f32.mrf.mxu0  ;;  %v11048_v62 = vsel %vm2777_vm8, %v11035_v30, %v2791_v25  ;;  %v3138_v21 = vsel %vm2775_vm7, %v11035_v30, %v3137_v9  ;;  %v3105_v54 = vperm.slane %v2429_v40, 0  ;;  %v1492_v32 = vrot.slane %v1491_v47, 2 }
 0x143   : > { %v828_v34 = vadd.f32 %v10943_v13, %v827_v1  ;;  %v1486_v56 = vmax.f32 %v1484_v14, %v1485_v45 }
 0x144   : > { %v11056_v19 = vunpack.c.l.b16 %v3105_v54 }
 0x145   : > { %v964_v26 = vmax.f32 %v821_v33, %v828_v34 }
 0x146   : > { %v11061_v43 = vsel %vm2777_vm8, %v11056_v19, %v3138_v21 }
 0x147   : > { %v1054_v50 = vrot.slane %v964_v26, 2  ;;  %v1055_v41 = vrot.slane %v964_v26, 4  ;;  %v1056_v42 = vrot.slane %v964_v26, 6  ;;  %v1496_v17 = vsel %vm1243_vm1, %v964_v26, -inf }
 0x148   : > { %v1497_v0 = vrot.slane %v1496_v17, 4 }
 0x149   : > { %v1503_v39 = vsel %vm1243_vm1, %v1054_v50, -inf  ;;  %v1510_v53 = vsel %vm1243_vm1, %v1055_v41, -inf  ;;  %v1517_v59 = vsel %vm1243_vm1, %v1056_v42, -inf }
 0x14a   : > { %v1498_v57 = vmax.f32 %v1496_v17, %v1497_v0  ;;  %v1504_v58 = vrot.slane %v1503_v39, 4  ;;  %v1511_v4 = vrot.slane %v1510_v53, 4  ;;  %v1518_v60 = vrot.slane %v1517_v59, 4  ;;  %v830_v25 = vpop.f32.mrf.mxu0 }
 0x14b   : > { %v831_v5 = vadd.f32 %v10943_v13, %v830_v25 }
 0x14c   : > { %v1499_v35 = vrot.slane %v1498_v57, 2  ;;  %v1505_v7 = vmax.f32 %v1503_v39, %v1504_v58  ;;  %v1512_v9 = vmax.f32 %v1510_v53, %v1511_v4  ;;  %v1519_v11 = vmax.f32 %v1517_v59, %v1518_v60 }
 0x14d   : > { %v965_v46 = vmax.f32 %v823_v2, %v831_v5  ;;  %7923 = vmatmul.msk.bf16.gmra.mxu0 %vm657_vm0, %v9961_v49  ;;  %v1493_v4 = vmax.f32 %v1491_v47, %v1492_v32 }
 0x14e   : > { %v1500_v23 = vmax.f32 %v1498_v57, %v1499_v35  ;;  %v1506_v24 = vrot.slane %v1505_v7, 2  ;;  %v1513_v51 = vrot.slane %v1512_v9, 2  ;;  %v1520_v10 = vrot.slane %v1519_v11, 2 }
 0x14f   : > { %v1057_v31 = vrot.slane %v965_v46, 2  ;;  %v1058_v33 = vrot.slane %v965_v46, 4  ;;  %v1059_v1 = vrot.slane %v965_v46, 6  ;;  %v1524_v40 = vsel %vm1243_vm1, %v965_v46, -inf }
 0x150   : > { %v1501_v34 = vrot.slane %v1500_v23, 1  ;;  %v1507_v21 = vmax.f32 %v1505_v7, %v1506_v24  ;;  %v1514_v15 = vmax.f32 %v1512_v9, %v1513_v51  ;;  %v1521_v54 = vmax.f32 %v1519_v11, %v1520_v10 }
 0x151   : > { %v1525_v14 = vrot.slane %v1524_v40, 4  ;;  %v1531_v26 = vsel %vm1243_vm1, %v1057_v31, -inf  ;;  %v1538_v50 = vsel %vm1243_vm1, %v1058_v33, -inf  ;;  %v1545_v41 = vsel %vm1243_vm1, %v1059_v1, -inf }
 0x152   : > { %v1502_v42 = vmax.f32 %v1500_v23, %v1501_v34  ;;  %v1508_v17 = vrot.slane %v1507_v21, 1  ;;  %v1515_v0 = vrot.slane %v1514_v15, 1  ;;  %v1522_v45 = vrot.slane %v1521_v54, 1  ;;  %v832_v39 = vpop.f32.mrf.mxu0 }
 0x153   : > { %v1526_v53 = vmax.f32 %v1524_v40, %v1525_v14  ;;  %v1532_v59 = vrot.slane %v1531_v26, 4  ;;  %v1539_v49 = vrot.slane %v1538_v50, 4  ;;  %v1546_v57 = vrot.slane %v1545_v41, 4 }
 0x154   : > { %v1509_v58 = vmax.f32 %v1507_v21, %v1508_v17  ;;  %v1516_v35 = vmax.f32 %v1514_v15, %v1515_v0  ;;  %v1523_v7 = vmax.f32 %v1521_v54, %v1522_v45  ;;  %v2288_v9 = vmax.f32 %v1502_v42, 0.0  ;;  %v9962_v21 = vld [vmem:[%s10558_s24 + $0xa0] sm:$0xff] }
 0x155   : > { %v1527_v60 = vrot.slane %v1526_v53, 2  ;;  %v1533_v25 = vmax.f32 %v1531_v26, %v1532_v59  ;;  %v1540_v2 = vmax.f32 %v1538_v50, %v1539_v49  ;;  %v1547_v5 = vmax.f32 %v1545_v41, %v1546_v57 }
 0x156   : > { %v1487_v11 = vrot.slane %v1486_v56, 1  ;;  %v826_v10 = vadd.f32 %v10943_v13, %v10992_v48  ;;  %v2289_v31 = vmax.f32 %v1509_v58, 0.0  ;;  %v833_v33 = vadd.f32 %v10943_v13, %v832_v39 }
 0x157   : > { %v1528_v46 = vmax.f32 %v1526_v53, %v1527_v60  ;;  %v1534_v23 = vrot.slane %v1533_v25, 2  ;;  %v1541_v24 = vrot.slane %v1540_v2, 2  ;;  %v1548_v51 = vrot.slane %v1547_v5, 2 }
 0x158   : > { %v1494_v47 = vrot.slane %v1493_v4, 1  ;;  %v2290_v15 = vmax.f32 %v1516_v35, 0.0  ;;  %v2291_v54 = vmax.f32 %v1523_v7, 0.0  ;;  %v2432_v14 = vpack.c.bf16 %v2288_v9, %v2288_v9 }
 0x159   : > { %v1529_v32 = vrot.slane %v1528_v46, 1  ;;  %v1535_v1 = vmax.f32 %v1533_v25, %v1534_v23  ;;  %v1542_v40 = vmax.f32 %v1540_v2, %v1541_v24  ;;  %v1549_v34 = vmax.f32 %v1547_v5, %v1548_v51 }
 0x15a   : > { %v11086_v26 = vmax.f32 %v826_v10, %v833_v33  ;;  %v11088_v50 = vpop.f32.mrf.mxu0  ;;  %v11090_v48 = vmax.f32 %v1486_v56, %v1487_v11  ;;  %v2433_v0 = vpack.c.bf16 %v2289_v31, %v2289_v31  ;;  %v2435_v60 = vpack.c.bf16 %v2291_v54, %v2291_v54 }
 0x15b   : > { %v1530_v41 = vmax.f32 %v1528_v46, %v1529_v32  ;;  %v1536_v42 = vrot.slane %v1535_v1, 1  ;;  %v1543_v17 = vrot.slane %v1542_v40, 1  ;;  %v1550_v45 = vrot.slane %v1549_v34, 1 }
 0x15c   : > { %v1060_v39 = vrot.slane %v11086_v26, 2  ;;  %v1552_v53 = vsel %vm1243_vm1, %v11086_v26, -inf  ;;  %v2924_v25 = vperm.slane %v2432_v14, 0  ;;  %v2434_v5 = vpack.c.bf16 %v2290_v15, %v2290_v15 }
 0x15d   : > { %v1537_v59 = vmax.f32 %v1535_v1, %v1536_v42  ;;  %v1544_v49 = vmax.f32 %v1542_v40, %v1543_v17  ;;  %v2292_v57 = vmax.f32 %v1530_v41, 0.0  ;;  %v1553_v58 = vrot.slane %v1552_v53, 4  ;;  %7924 = vmatmul.msk.bf16.gmra.mxu0 %vm657_vm0, %v9962_v21 }
 0x15e   : > { %v1559_v2 = vsel %vm1243_vm1, %v1060_v39, -inf  ;;  %v2661_v11 = vperm.slane %v2433_v0, 0  ;;  %v1551_v23 = vmax.f32 %v1549_v34, %v1550_v45  ;;  %v1495_v24 = vmax.f32 %v1493_v4, %v1494_v47 }
 0x15f   : > { %v2293_v56 = vmax.f32 %v1537_v59, 0.0  ;;  %v2294_v35 = vmax.f32 %v1544_v49, 0.0  ;;  %v2436_v7 = vpack.c.bf16 %v2292_v57, %v2292_v57  ;;  %v1554_v9 = vmax.f32 %v1552_v53, %v1553_v58 }
 0x160   : > { %v1560_v46 = vrot.slane %v1559_v2, 4  ;;  %v2932_v32 = vunpack.c.l.b16 %v2924_v25  ;;  %v2295_v40 = vmax.f32 %v1551_v23, 0.0  ;;  %v2662_v21 = vperm.slane %v2434_v5, 0 }
 0x161   : > { %v2437_v51 = vpack.c.bf16 %v2293_v56, %v2293_v56  ;;  %v2664_v10 = vperm.slane %v2436_v7, 0  ;;  %v1555_v31 = vrot.slane %v1554_v9, 2  ;;  %v2438_v33 = vpack.c.bf16 %v2294_v35, %v2294_v35 }
 0x162   : > { %v11097_v1 = vpop.f32.mrf.mxu0  ;;  %v2663_v54 = vperm.slane %v2435_v60, 0  ;;  %v1061_v41 = vrot.slane %v11086_v26, 4  ;;  %v2439_v17 = vpack.c.bf16 %v2295_v40, %v2295_v40  ;;  %v2725_v0 = vunpack.c.l.b16 %v2661_v11 }
 0x163   : > { %v2665_v14 = vperm.slane %v2437_v51, 0  ;;  %v11099_v15 = vunpack.c.l.b16 %v2664_v10  ;;  %v2666_v42 = vperm.slane %v2438_v33, 0  ;;  %v2726_v34 = vunpack.c.l.b16 %v2662_v21 }
 0x164   : > { %v11102_v4 = vunpack.c.l.b16 %v2663_v54  ;;  %v1556_v39 = vmax.f32 %v1554_v9, %v1555_v31  ;;  %v1561_v53 = vmax.f32 %v1559_v2, %v1560_v46  ;;  %v2667_v59 = vperm.slane %v2439_v17, 0  ;;  %v9963_v46 = vld [vmem:[%s10558_s24 + $0xa8] sm:$0xff] }
 0x165   : > { %v11104_v47 = vunpack.c.l.b16 %v2665_v14  ;;  %v11106_v45 = vunpack.c.l.b16 %v2666_v42  ;;  %v2958_v49 = vsel %vm2765_vm2, %v2725_v0, %v2932_v32  ;;  %v2793_v57 = vsel %vm2765_vm2, %v2726_v34, %v2725_v0 }
 0x166   : > { %v3140_v58 = vsel %vm2765_vm2, %v11102_v4, %v2726_v34  ;;  %v2959_v60 = vsel %vm2767_vm3, %v2726_v34, %v2958_v49  ;;  %v1557_v25 = vrot.slane %v1556_v39, 1  ;;  %v2794_v5 = vsel %vm2767_vm3, %v11102_v4, %v2793_v57 }
 0x167   : > { %v1562_v56 = vrot.slane %v1561_v53, 2  ;;  %v1062_v35 = vrot.slane %v11086_v26, 6  ;;  %v2960_v2 = vsel %vm2769_vm4, %v11102_v4, %v2959_v60  ;;  %v2795_v7 = vsel %vm2769_vm4, %v11099_v15, %v2794_v5 }
 0x168   : > { %v3141_v9 = vsel %vm2767_vm3, %v11099_v15, %v3140_v58  ;;  %v2961_v11 = vsel %vm2771_vm5, %v11099_v15, %v2960_v2  ;;  %v1558_v23 = vmax.f32 %v1556_v39, %v1557_v25  ;;  %v2796_v51 = vsel %vm2771_vm5, %v11104_v47, %v2795_v7 }
 0x169   : > { %v1563_v10 = vmax.f32 %v1561_v53, %v1562_v56  ;;  %v11129_v26 = vunpack.c.l.b16 %v2667_v59  ;;  %v2962_v33 = vsel %vm2773_vm6, %v11104_v47, %v2961_v11  ;;  %v3142_v32 = vsel %vm2769_vm4, %v11104_v47, %v3141_v9 }
 0x16a   : > { %v11127_v31 = vpop.f32.mrf.mxu0  ;;  %v2286_v40 = vmax.f32 %v11090_v48, 0.0  ;;  %v1566_v21 = vsel %vm1243_vm1, %v1061_v41, -inf  ;;  %v836_v54 = vadd.f32 %v10943_v13, %v11088_v50  ;;  %v2963_v14 = vsel %vm2775_vm7, %v11106_v45, %v2962_v33 }
 0x16b   : > { %v2296_v42 = vmax.f32 %v1558_v23, 0.0  ;;  %v11143_v17 = vsel %vm2777_vm8, %v11129_v26, %v2963_v14  ;;  %v2797_v0 = vsel %vm2773_vm6, %v11106_v45, %v2796_v51  ;;  %v1564_v34 = vrot.slane %v1563_v10, 1 }
 0x16c   : > { %v2287_v39 = vmax.f32 %v1495_v24, 0.0  ;;  %v11149_v48 = vpack.c.b16 %v11143_v17, %v11010_v61  ;;  %v3143_v41 = vsel %vm2771_vm5, %v11106_v45, %v3142_v32  ;;  %v2430_v53 = vpack.c.bf16 %v2286_v40, %v2286_v40 }
 0x16d   : > { %7925 = vmatmul.msk.bf16.gmra.mxu0 %vm657_vm0, %v9963_v46  ;;  %v2440_v50 = vpack.c.bf16 %v2296_v42, %v2296_v42  ;;  %v1565_v59 = vmax.f32 %v1563_v10, %v1564_v34  ;;  %v3514_v57 = vsel %vm2767_vm3, %v10970_v29, %v11076_v22  ;;  %v3323_v24 = vsel %vm2765_vm2, %v10963_v18, %v10966_v27 }
 0x16e   : > { %14024 = vst [vmem:[#allocation7_spill] sm:$0xff] %v11149_v48  ;;  %v2431_v49 = vpack.c.bf16 %v2287_v39, %v2287_v39  ;;  %3062 = vmatmul.bf16.gmra.mxu2 %v11149_v48  ;;  %v3295_v60 = vperm.slane %v2430_v53, 0  ;;  %v3515_v25 = vsel %vm2769_vm4, %v10979_v38, %v3514_v57  ;;  %v3324_v5 = vsel %vm2767_vm3, %v10968_v28, %v3323_v24 }
 0x16f   : > { %v2668_v58 = vperm.slane %v2440_v50, 0  ;;  %v2297_v56 = vmax.f32 %v1565_v59, 0.0  ;;  %v3516_v7 = vsel %vm2771_vm5, %v11035_v30, %v3515_v25  ;;  %v3325_v22 = vsel %vm2769_vm4, %v10970_v29, %v3324_v5 }
 0x170   : > { %v3485_v2 = vperm.slane %v2431_v49, 0  ;;  %v3303_v18 = vunpack.c.l.b16 %v3295_v60  ;;  %v3517_v27 = vsel %vm2773_vm6, %v11056_v19, %v3516_v7  ;;  %v3326_v11 = vsel %vm2771_vm5, %v10979_v38, %v3325_v22  ;;  %v9964_v7 = vld [vmem:[%s10558_s24 + $0xb0] sm:$0xff] }
 0x171   : > { %v11169_v9 = vunpack.c.l.b16 %v2668_v58  ;;  %v1567_v46 = vrot.slane %v1566_v21, 4  ;;  %v2798_v28 = vsel %vm2775_vm7, %v11129_v26, %v2797_v0  ;;  %v2441_v23 = vpack.c.bf16 %v2297_v56, %v2297_v56 }
 0x172   : > { %v842_v51 = vpop.f32.mrf.mxu0  ;;  %v3327_v10 = vsel %vm2773_vm6, %v11035_v30, %v3326_v11  ;;  %v3144_v33 = vsel %vm2773_vm6, %v11129_v26, %v3143_v41  ;;  %v3493_v40 = vunpack.c.l.b16 %v3485_v2  ;;  %v3518_v42 = vsel %vm2775_vm7, %v3303_v18, %v3517_v27 }
 0x173   : > { %v11181_v29 = vsel %vm2777_vm8, %v11169_v9, %v2798_v28  ;;  %v843_v32 = vadd.f32 %v10943_v13, %v842_v51  ;;  %v3106_v14 = vperm.slane %v2441_v23, 0  ;;  %v3328_v30 = vsel %vm2775_vm7, %v11056_v19, %v3327_v10 }
 0x174   : > { %14025 = vst [vmem:[#allocation8_spill] sm:$0xff] %v11181_v29  ;;  %v11188_v38 = vpack.c.b16 %v11181_v29, %v11048_v62  ;;  %v1573_v0 = vsel %vm1243_vm1, %v1062_v35, -inf  ;;  %v3145_v34 = vsel %vm2775_vm7, %v11169_v9, %v3144_v33  ;;  %v11197_v50 = vsel %vm2777_vm8, %v3493_v40, %v3518_v42 }
 0x175   : > { %v967_v39 = vmax.f32 %v836_v54, %v843_v32  ;;  %14027 = vst [vmem:[#allocation10_spill] sm:$0xff] %v11197_v50  ;;  %v11200_v41 = vunpack.c.l.b16 %v3106_v14  ;;  %v11205_v59 = vsel %vm2777_vm8, %v3303_v18, %v3328_v30  ;;  %v11208_v54 = vmax.f32 %v1566_v21, %v1567_v46 }
 0x176   : > { %14026 = vst [vmem:[#allocation9_spill] sm:$0xff] %v11188_v38  ;;  %2897 = vmatmul.bf16.gmra.mxu1 %v11188_v38  ;;  %v1574_v24 = vrot.slane %v1573_v0, 4  ;;  %v838_v46 = vadd.f32 %v10943_v13, %v11097_v1  ;;  %v11233_v1 = vsel %vm2765_vm2, %v11104_v47, %v11099_v15 }
 0x177   : > { %14028 = vst [vmem:[#allocation11_spill] sm:$0xff] %v11205_v59  ;;  %v1063_v19 = vrot.slane %v967_v39, 2  ;;  %v1064_v35 = vrot.slane %v967_v39, 4  ;;  %v1065_v49 = vrot.slane %v967_v39, 6  ;;  %v1580_v57 = vsel %vm1243_vm1, %v967_v39, -inf }
 0x178   : > { %v11212_v58 = vsel %vm2777_vm8, %v11200_v41, %v3145_v34  ;;  %v1581_v60 = vrot.slane %v1580_v57, 4  ;;  %v1569_v14 = vrot.slane %v11208_v54, 2  ;;  %v1575_v42 = vmax.f32 %v1573_v0, %v1574_v24 }
 0x179   : > { %14029 = vst [vmem:[#allocation12_spill] sm:$0xff] %v11212_v58  ;;  %v11216_v25 = vpack.c.b16 %v11212_v58, %v11061_v43  ;;  %v1587_v5 = vsel %vm1243_vm1, %v1063_v19, -inf  ;;  %v1594_v56 = vsel %vm1243_vm1, %v1064_v35, -inf  ;;  %v1601_v2 = vsel %vm1243_vm1, %v1065_v49, -inf }
 0x17a   : > { %v1582_v22 = vmax.f32 %v1580_v57, %v1581_v60  ;;  %v1588_v21 = vrot.slane %v1587_v5, 4  ;;  %v1595_v18 = vrot.slane %v1594_v56, 4  ;;  %v1602_v27 = vrot.slane %v1601_v2, 4  ;;  %v845_v11 = vpop.f32.mrf.mxu0 }
 0x17b   : > { %14030 = vst [vmem:[#allocation13_spill] sm:$0xff] %v11216_v25  ;;  %3244 = vmatmul.bf16.gmra.mxu3 %v11216_v25  ;;  %v846_v28 = vadd.f32 %v10943_v13, %v845_v11 }
 0x17c   : > { %v1583_v51 = vrot.slane %v1582_v22, 2  ;;  %v1589_v10 = vmax.f32 %v1587_v5, %v1588_v21  ;;  %v1596_v33 = vmax.f32 %v1594_v56, %v1595_v18  ;;  %v1603_v32 = vmax.f32 %v1601_v2, %v1602_v27 }
 0x17d   : > { %v968_v40 = vmax.f32 %v838_v46, %v846_v28  ;;  %7926 = vmatmul.msk.bf16.gmra.mxu0 %vm657_vm0, %v9964_v7 }
 0x17e   : > { %v1584_v30 = vmax.f32 %v1582_v22, %v1583_v51  ;;  %v1590_v34 = vrot.slane %v1589_v10, 2  ;;  %v1597_v39 = vrot.slane %v1596_v33, 2  ;;  %v1604_v19 = vrot.slane %v1603_v32, 2 }
 0x17f   : > { %v1066_v35 = vrot.slane %v968_v40, 2  ;;  %v1067_v49 = vrot.slane %v968_v40, 4  ;;  %v1068_v57 = vrot.slane %v968_v40, 6  ;;  %v1608_v60 = vsel %vm1243_vm1, %v968_v40, -inf }
 0x180   : > { %v1585_v5 = vrot.slane %v1584_v30, 1  ;;  %v1591_v56 = vmax.f32 %v1589_v10, %v1590_v34  ;;  %v1598_v2 = vmax.f32 %v1596_v33, %v1597_v39  ;;  %v1605_v7 = vmax.f32 %v1603_v32, %v1604_v19 }
 0x181   : > { %v1609_v21 = vrot.slane %v1608_v60, 4  ;;  %v1615_v0 = vsel %vm1243_vm1, %v1066_v35, -inf  ;;  %v1622_v24 = vsel %vm1243_vm1, %v1067_v49, -inf  ;;  %v1629_v18 = vsel %vm1243_vm1, %v1068_v57, -inf }
 0x182   : > { %v1586_v22 = vmax.f32 %v1584_v30, %v1585_v5  ;;  %v1592_v27 = vrot.slane %v1591_v56, 1  ;;  %v1599_v11 = vrot.slane %v1598_v2, 1  ;;  %v1606_v46 = vrot.slane %v1605_v7, 1  ;;  %v847_v28 = vpop.f32.mrf.mxu0 }
 0x183   : > { %v1610_v51 = vmax.f32 %v1608_v60, %v1609_v21  ;;  %v1616_v53 = vrot.slane %v1615_v0, 4  ;;  %v1623_v23 = vrot.slane %v1622_v24, 4  ;;  %v1630_v40 = vrot.slane %v1629_v18, 4 }
 0x184   : > { %v1593_v55 = vmax.f32 %v1591_v56, %v1592_v27  ;;  %v1600_v10 = vmax.f32 %v1598_v2, %v1599_v11  ;;  %v1607_v33 = vmax.f32 %v1605_v7, %v1606_v46  ;;  %v1576_v32 = vrot.slane %v1575_v42, 2 }
 0x185   : > { %v1611_v34 = vrot.slane %v1610_v51, 2  ;;  %v1617_v39 = vmax.f32 %v1615_v0, %v1616_v53  ;;  %v1624_v19 = vmax.f32 %v1622_v24, %v1623_v23  ;;  %v1631_v35 = vmax.f32 %v1629_v18, %v1630_v40  ;;  %v9965_v53 = vld [vmem:[%s10558_s24 + $0xb8] sm:$0xff] }
 0x186   : > { %v2300_v49 = vmax.f32 %v1586_v22, 0.0  ;;  %v2301_v57 = vmax.f32 %v1593_v55, 0.0  ;;  %v2302_v30 = vmax.f32 %v1600_v10, 0.0  ;;  %v1570_v5 = vmax.f32 %v11208_v54, %v1569_v14 }
 0x187   : > { %v1612_v52 = vmax.f32 %v1610_v51, %v1611_v34  ;;  %v1618_v6 = vrot.slane %v1617_v39, 2  ;;  %v1625_v60 = vrot.slane %v1624_v19, 2  ;;  %v1632_v21 = vrot.slane %v1631_v35, 2 }
 0x188   : > { %v2303_v36 = vmax.f32 %v1607_v33, 0.0  ;;  %v2445_v12 = vpack.c.bf16 %v2301_v57, %v2301_v57  ;;  %v1577_v56 = vmax.f32 %v1575_v42, %v1576_v32  ;;  %v841_v23 = vadd.f32 %v10943_v13, %v11127_v31 }
 0x189   : > { %v1613_v2 = vrot.slane %v1612_v52, 1  ;;  %v1619_v7 = vmax.f32 %v1617_v39, %v1618_v6  ;;  %v1626_v27 = vmax.f32 %v1624_v19, %v1625_v60  ;;  %v1633_v11 = vmax.f32 %v1631_v35, %v1632_v21 }
 0x18a   : > { %v2444_v0 = vpack.c.bf16 %v2300_v49, %v2300_v49  ;;  %v2446_v55 = vpack.c.bf16 %v2302_v30, %v2302_v30  ;;  %v850_v24 = vpop.f32.mrf.mxu0  ;;  %v1571_v18 = vrot.slane %v1570_v5, 1  ;;  %v2447_v51 = vpack.c.bf16 %v2303_v36, %v2303_v36 }
 0x18b   : > { %v1614_v54 = vmax.f32 %v1612_v52, %v1613_v2  ;;  %v1620_v14 = vrot.slane %v1619_v7, 1  ;;  %v1627_v22 = vrot.slane %v1626_v27, 1  ;;  %v1634_v46 = vrot.slane %v1633_v11, 1 }
 0x18c   : > { %v2669_v40 = vperm.slane %v2445_v12, 0  ;;  %v848_v42 = vadd.f32 %v10943_v13, %v847_v28  ;;  %v1578_v10 = vrot.slane %v1577_v56, 1  ;;  %v2670_v31 = vperm.slane %v2446_v55, 0 }
 0x18d   : > { %v1621_v6 = vmax.f32 %v1619_v7, %v1620_v14  ;;  %v1628_v33 = vmax.f32 %v1626_v27, %v1627_v22  ;;  %v1635_v32 = vmax.f32 %v1633_v11, %v1634_v46  ;;  %v2304_v34 = vmax.f32 %v1614_v54, 0.0  ;;  %7927 = vmatmul.msk.bf16.gmra.mxu0 %vm657_vm0, %v9965_v53 }
 0x18e   : > { %v2925_v39 = vperm.slane %v2444_v0, 0  ;;  %v11245_v19 = vmax.f32 %v841_v23, %v848_v42  ;;  %v11247_v35 = vmax.f32 %v1570_v5, %v1571_v18  ;;  %v2671_v12 = vperm.slane %v2447_v51, 0 }
 0x18f   : > { %v2305_v52 = vmax.f32 %v1621_v6, 0.0  ;;  %v2306_v49 = vmax.f32 %v1628_v33, 0.0  ;;  %v2307_v57 = vmax.f32 %v1635_v32, 0.0  ;;  %v2448_v36 = vpack.c.bf16 %v2304_v34, %v2304_v34 }
 0x190   : > { %v2733_v30 = vunpack.c.l.b16 %v2669_v40  ;;  %v1069_v28 = vrot.slane %v11245_v19, 2  ;;  %v1636_v60 = vsel %vm1243_vm1, %v11245_v19, -inf  ;;  %v2933_v11 = vunpack.c.l.b16 %v2925_v39 }
 0x191   : > { %v2449_v21 = vpack.c.bf16 %v2305_v52, %v2305_v52  ;;  %v2450_v2 = vpack.c.bf16 %v2306_v49, %v2306_v49  ;;  %v2672_v7 = vperm.slane %v2448_v36, 0  ;;  %v1637_v27 = vrot.slane %v1636_v60, 4 }
 0x192   : > { %v1643_v53 = vsel %vm1243_vm1, %v1069_v28, -inf  ;;  %v3058_v5 = vpop.f32.mrf.mxu2  ;;  %v11253_v23 = vpop.f32.mrf.mxu0  ;;  %v2451_v0 = vpack.c.bf16 %v2307_v57, %v2307_v57  ;;  %v1579_v55 = vmax.f32 %v1577_v56, %v1578_v10  ;;  %v2734_v46 = vunpack.c.l.b16 %v2670_v31 }
 0x193   : > { %v2673_v18 = vperm.slane %v2449_v21, 0  ;;  %v2674_v54 = vperm.slane %v2450_v2, 0  ;;  %v1638_v14 = vmax.f32 %v1636_v60, %v1637_v27  ;;  %v2893_v22 = vpop.f32.mrf.mxu1  ;;  %v11255_v51 = vunpack.c.l.b16 %v2671_v12  ;;  %v9966_v2 = vld [vmem:[%s10558_s24 + $0xc0] sm:$0xff] }
 0x194   : > { %v1644_v40 = vrot.slane %v1643_v53, 4  ;;  %v3059_v42 = vadd.f32 %v3058_v5, %v2893_v22  ;;  %v2965_v6 = vsel %vm2765_vm2, %v2733_v30, %v2933_v11  ;;  %v11258_v33 = vunpack.c.l.b16 %v2672_v7 }
 0x195   : > { %v1639_v32 = vrot.slane %v1638_v14, 2  ;;  %v11261_v34 = vadd.f32 %v10943_v13, %v850_v24  ;;  %v2298_v56 = vmax.f32 %v11247_v35, 0.0  ;;  %v11264_v10 = vunpack.c.l.b16 %v2673_v18 }
 0x196   : > { %v1070_v39 = vrot.slane %v11245_v19, 4  ;;  %v1645_v31 = vmax.f32 %v1643_v53, %v1644_v40  ;;  %v2675_v52 = vperm.slane %v2451_v0, 0  ;;  %v11267_v49 = vunpack.c.l.b16 %v2674_v54 }
 0x197   : > { %v1640_v57 = vmax.f32 %v1638_v14, %v1639_v32  ;;  %v2966_v36 = vsel %vm2767_vm3, %v2734_v46, %v2965_v6  ;;  %v2800_v12 = vsel %vm2765_vm2, %v2734_v46, %v2733_v30  ;;  %v3147_v60 = vsel %vm2765_vm2, %v11255_v51, %v2734_v46 }
 0x198   : > { %v11271_v28 = vunpack.c.l.b16 %v2675_v52  ;;  %v2967_v24 = vsel %vm2769_vm4, %v11255_v51, %v2966_v36  ;;  %v2801_v35 = vsel %vm2767_vm3, %v11255_v51, %v2800_v12  ;;  %v1646_v30 = vrot.slane %v1645_v31, 2 }
 0x199   : > { %v1641_v21 = vrot.slane %v1640_v57, 1  ;;  %v2968_v7 = vsel %vm2771_vm5, %v11258_v33, %v2967_v24  ;;  %v2802_v27 = vsel %vm2769_vm4, %v11258_v33, %v2801_v35  ;;  %v3148_v0 = vsel %vm2767_vm3, %v11258_v33, %v3147_v60 }
 0x19a   : > { %v11284_v11 = vpop.f32.mrf.mxu0  ;;  %v2969_v53 = vsel %vm2773_vm6, %v11264_v10, %v2968_v7  ;;  %v2803_v5 = vsel %vm2771_vm5, %v11264_v10, %v2802_v27  ;;  %v2299_v18 = vmax.f32 %v1579_v55, 0.0  ;;  %v1071_v54 = vrot.slane %v11245_v19, 6 }
 0x19b   : > { %v2970_v14 = vsel %vm2775_vm7, %v11267_v49, %v2969_v53  ;;  %v1642_v22 = vmax.f32 %v1640_v57, %v1641_v21  ;;  %v2804_v46 = vsel %vm2773_vm6, %v11267_v49, %v2803_v5  ;;  %v1650_v40 = vsel %vm1243_vm1, %v1070_v39, -inf }
 0x19c   : > { %v11300_v6 = vsel %vm2777_vm8, %v11271_v28, %v2970_v14  ;;  %v2805_v32 = vsel %vm2775_vm7, %v11271_v28, %v2804_v46  ;;  %v1647_v52 = vmax.f32 %v1645_v31, %v1646_v30  ;;  %v3149_v55 = vsel %vm2769_vm4, %v11264_v10, %v3148_v0 }
 0x19d   : > { %7928 = vmatmul.msk.bf16.gmra.mxu0 %vm657_vm0, %v9966_v2  ;;  %v2308_v19 = vmax.f32 %v1642_v22, 0.0  ;;  %v2442_v57 = vpack.c.bf16 %v2298_v56, %v2298_v56  ;;  %v2443_v36 = vpack.c.bf16 %v2299_v18, %v2299_v18  ;;  %v3150_v39 = vsel %vm2771_vm5, %v11267_v49, %v3149_v55 }
 0x19e   : > { %v3240_v12 = vpop.f32.mrf.mxu3  ;;  %v1648_v24 = vrot.slane %v1647_v52, 1  ;;  %v3521_v35 = vsel %vm2767_vm3, %v11106_v45, %v11233_v1  ;;  %v3330_v31 = vsel %vm2765_vm2, %v11099_v15, %v11102_v4  ;;  %v3151_v56 = vsel %vm2773_vm6, %v11271_v28, %v3150_v39 }
 0x19f   : > { %v11315_v60 = vadd.f32 %v3240_v12, %v3059_v42  ;;  %v2452_v21 = vpack.c.bf16 %v2308_v19, %v2308_v19  ;;  %v3296_v2 = vperm.slane %v2442_v57, 0  ;;  %v3486_v27 = vperm.slane %v2443_v36, 0 }
 0x1a0   : > { %v1649_v7 = vmax.f32 %v1647_v52, %v1648_v24  ;;  %v3522_v30 = vsel %vm2769_vm4, %v11129_v26, %v3521_v35  ;;  %v3331_v53 = vsel %vm2767_vm3, %v11104_v47, %v3330_v31  ;;  %v1651_v55 = vrot.slane %v1650_v40, 4 }
 0x1a1   : > { %14031 = vst [vmem:[#allocation14_spill] sm:$0xff] %v11315_v60  ;;  %v2676_v1 = vperm.slane %v2452_v21, 0  ;;  %v3304_v5 = vunpack.c.l.b16 %v3296_v2  ;;  %v3523_v15 = vsel %vm2771_vm5, %v11169_v9, %v3522_v30  ;;  %v3332_v4 = vsel %vm2769_vm4, %v11106_v45, %v3331_v53  ;;  %v9967_v53 = vld [vmem:[%s10558_s24 + $0xc8] sm:$0xff] }
 0x1a2   : > { %v857_v42 = vpop.f32.mrf.mxu0  ;;  %v2309_v0 = vmax.f32 %v1649_v7, 0.0  ;;  %v3494_v18 = vunpack.c.l.b16 %v3486_v27  ;;  %v3524_v14 = vsel %vm2773_vm6, %v11200_v41, %v3523_v15  ;;  %v3333_v22 = vsel %vm2771_vm5, %v11129_v26, %v3332_v4 }
 0x1a3   : > { %v858_v46 = vadd.f32 %v10943_v13, %v857_v42  ;;  %v11332_v47 = vunpack.c.l.b16 %v2676_v1  ;;  %v3525_v52 = vsel %vm2775_vm7, %v3304_v5, %v3524_v14  ;;  %v3334_v19 = vsel %vm2773_vm6, %v11169_v9, %v3333_v22  ;;  %v11373_v42 = vld [vmem:[%s13966_s2] ss:$0 sm:$0xff] }
 0x1a4   : > { %v2453_v45 = vpack.c.bf16 %v2309_v0, %v2309_v0  ;;  %v11338_v57 = vsel %vm2777_vm8, %v3494_v18, %v3525_v52  ;;  %v3335_v36 = vsel %vm2775_vm7, %v11200_v41, %v3334_v19  ;;  %v1657_v12 = vsel %vm1243_vm1, %v1071_v54, -inf }
 0x1a5   : > { %v970_v26 = vmax.f32 %v11261_v34, %v858_v46  ;;  %v11346_v13 = vsel %vm2777_vm8, %v11332_v47, %v2805_v32  ;;  %v3152_v9 = vsel %vm2775_vm7, %v11332_v47, %v3151_v56  ;;  %v11352_v39 = vpack.c.b16 %v11338_v57, %v11197_v50 }
 0x1a6   : > { %14032 = vst [vmem:[#allocation15_spill] sm:$0xff] %v11346_v13  ;;  %v3107_v24 = vperm.slane %v2453_v45, 0  ;;  %v11355_v35 = vsel %vm2777_vm8, %v3304_v5, %v3335_v36  ;;  %v11357_v34 = vmax.f32 %v1650_v40, %v1651_v55  ;;  %v1658_v21 = vrot.slane %v1657_v12, 4 }
 0x1a7   : > { %14033 = vst [vmem:[#allocation16_spill] sm:$0xff] %v11352_v39  ;;  %v1072_v41 = vrot.slane %v970_v26, 2  ;;  %v1073_v54 = vrot.slane %v970_v26, 4  ;;  %v1074_v31 = vrot.slane %v970_v26, 6  ;;  %v1664_v32 = vsel %vm1243_vm1, %v970_v26, -inf }
 0x1a8   : > { %v11360_v2 = vunpack.c.l.b16 %v3107_v24  ;;  %v1665_v7 = vrot.slane %v1664_v32, 4  ;;  %v853_v0 = vadd.f32 %v11373_v42, %v11253_v23  ;;  %v11380_v19 = vpack.c.b16 %v11355_v35, %v11205_v59 }
 0x1a9   : > { %v1671_v56 = vsel %vm1243_vm1, %v1072_v41, -inf  ;;  %v1678_v27 = vsel %vm1243_vm1, %v1073_v54, -inf  ;;  %v1685_v30 = vsel %vm1243_vm1, %v1074_v31, -inf  ;;  %v1653_v55 = vrot.slane %v11357_v34, 2 }
 0x1aa   : > { %v1672_v1 = vrot.slane %v1671_v56, 4  ;;  %v1679_v5 = vrot.slane %v1678_v27, 4  ;;  %v1686_v15 = vrot.slane %v1685_v30, 4  ;;  %v860_v4 = vpop.f32.mrf.mxu0  ;;  %v11368_v40 = vsel %vm2777_vm8, %v11360_v2, %v3152_v9 }
 0x1ab   : > { %14034 = vst [vmem:[#allocation17_spill] sm:$0xff] %v11368_v40  ;;  %v1666_v18 = vmax.f32 %v1664_v32, %v1665_v7  ;;  %v861_v14 = vadd.f32 %v11373_v42, %v860_v4  ;;  %v11383_v45 = vmax.f32 %v1657_v12, %v1658_v21  ;;  %v11389_v41 = vsel %vm2765_vm2, %v11264_v10, %v11258_v33 }
 0x1ac   : > { %v1673_v22 = vmax.f32 %v1671_v56, %v1672_v1  ;;  %v1680_v46 = vmax.f32 %v1678_v27, %v1679_v5  ;;  %v1687_v52 = vmax.f32 %v1685_v30, %v1686_v15 }
 0x1ad   : > { %v1667_v36 = vrot.slane %v1666_v18, 2  ;;  %v971_v26 = vmax.f32 %v853_v0, %v861_v14  ;;  %7929 = vmatmul.msk.bf16.gmra.mxu0 %vm657_vm0, %v9967_v53 }
 0x1ae   : > { %v1674_v9 = vrot.slane %v1673_v22, 2  ;;  %v1681_v23 = vrot.slane %v1680_v46, 2  ;;  %v1688_v24 = vrot.slane %v1687_v52, 2 }
 0x1af   : > { %v1668_v54 = vmax.f32 %v1666_v18, %v1667_v36  ;;  %v1075_v31 = vrot.slane %v971_v26, 2  ;;  %v1076_v32 = vrot.slane %v971_v26, 4  ;;  %v1077_v7 = vrot.slane %v971_v26, 6 }
 0x1b0   : > { %v1675_v56 = vmax.f32 %v1673_v22, %v1674_v9  ;;  %v1682_v27 = vmax.f32 %v1680_v46, %v1681_v23  ;;  %v1689_v12 = vmax.f32 %v1687_v52, %v1688_v24  ;;  %v1692_v21 = vsel %vm1243_vm1, %v971_v26, -inf }
 0x1b1   : > { %v1669_v30 = vrot.slane %v1668_v54, 1  ;;  %v1693_v1 = vrot.slane %v1692_v21, 4  ;;  %v1699_v53 = vsel %vm1243_vm1, %v1075_v31, -inf  ;;  %v1706_v5 = vsel %vm1243_vm1, %v1076_v32, -inf }
 0x1b2   : > { %v1676_v15 = vrot.slane %v1675_v56, 1  ;;  %v1683_v4 = vrot.slane %v1682_v27, 1  ;;  %v1690_v0 = vrot.slane %v1689_v12, 1  ;;  %v1700_v14 = vrot.slane %v1699_v53, 4  ;;  %v862_v25 = vpop.f32.mrf.mxu0 }
 0x1b3   : > { %v1670_v18 = vmax.f32 %v1668_v54, %v1669_v30  ;;  %v1694_v36 = vmax.f32 %v1692_v21, %v1693_v1  ;;  %v1707_v38 = vrot.slane %v1706_v5, 4  ;;  %v1713_v22 = vsel %vm1243_vm1, %v1077_v7, -inf }
 0x1b4   : > { %v1677_v46 = vmax.f32 %v1675_v56, %v1676_v15  ;;  %v1684_v52 = vmax.f32 %v1682_v27, %v1683_v4  ;;  %v1691_v9 = vmax.f32 %v1689_v12, %v1690_v0  ;;  %v1701_v26 = vmax.f32 %v1699_v53, %v1700_v14  ;;  %v9968_v15 = vld [vmem:[%s10558_s24 + $0xd0] sm:$0xff] }
 0x1b5   : > { %v2312_v23 = vmax.f32 %v1670_v18, 0.0  ;;  %v1695_v24 = vrot.slane %v1694_v36, 2  ;;  %v1708_v50 = vmax.f32 %v1706_v5, %v1707_v38  ;;  %v1714_v31 = vrot.slane %v1713_v22, 4 }
 0x1b6   : > { %v2313_v32 = vmax.f32 %v1677_v46, 0.0  ;;  %v2314_v60 = vmax.f32 %v1684_v52, 0.0  ;;  %v2315_v48 = vmax.f32 %v1691_v9, 0.0  ;;  %v1702_v59 = vrot.slane %v1701_v26, 2 }
 0x1b7   : > { %v1696_v29 = vmax.f32 %v1694_v36, %v1695_v24  ;;  %v1709_v58 = vrot.slane %v1708_v50, 2  ;;  %v1715_v54 = vmax.f32 %v1713_v22, %v1714_v31  ;;  %v2456_v21 = vpack.c.bf16 %v2312_v23, %v2312_v23 }
 0x1b8   : > { %v2457_v30 = vpack.c.bf16 %v2313_v32, %v2313_v32  ;;  %v1703_v1 = vmax.f32 %v1701_v26, %v1702_v59  ;;  %v1660_v7 = vrot.slane %v11383_v45, 2  ;;  %v2458_v56 = vpack.c.bf16 %v2314_v60, %v2314_v60 }
 0x1b9   : > { %v1697_v27 = vrot.slane %v1696_v29, 1  ;;  %v1710_v12 = vmax.f32 %v1708_v50, %v1709_v58  ;;  %v1716_v53 = vrot.slane %v1715_v54, 2  ;;  %v856_v38 = vadd.f32 %v11373_v42, %v11284_v11 }
 0x1ba   : > { %v2459_v5 = vpack.c.bf16 %v2315_v48, %v2315_v48  ;;  %v1704_v4 = vrot.slane %v1703_v1, 1  ;;  %v11399_v0 = vpop.f32.mrf.mxu0  ;;  %v1654_v14 = vmax.f32 %v11357_v34, %v1653_v55  ;;  %v2677_v18 = vperm.slane %v2457_v30, 0 }
 0x1bb   : > { %v1698_v36 = vmax.f32 %v1696_v29, %v1697_v27  ;;  %v1711_v22 = vrot.slane %v1710_v12, 1  ;;  %v1717_v59 = vmax.f32 %v1715_v54, %v1716_v53  ;;  %v2926_v46 = vperm.slane %v2456_v21, 0 }
 0x1bc   : > { %v1705_v52 = vmax.f32 %v1703_v1, %v1704_v4  ;;  %v863_v60 = vadd.f32 %v11373_v42, %v862_v25  ;;  %v1661_v50 = vmax.f32 %v11383_v45, %v1660_v7  ;;  %v2678_v58 = vperm.slane %v2458_v56, 0 }
 0x1bd   : > { %v1712_v9 = vmax.f32 %v1710_v12, %v1711_v22  ;;  %v1718_v26 = vrot.slane %v1717_v59, 1  ;;  %v2316_v11 = vmax.f32 %v1698_v36, 0.0  ;;  %7930 = vmatmul.msk.bf16.gmra.mxu0 %vm657_vm0, %v9968_v15  ;;  %v2679_v48 = vperm.slane %v2459_v5, 0 }
 0x1be   : > { %v2317_v23 = vmax.f32 %v1705_v52, 0.0  ;;  %v11405_v24 = vmax.f32 %v856_v38, %v863_v60  ;;  %v1655_v34 = vrot.slane %v1654_v14, 1  ;;  %v2741_v29 = vunpack.c.l.b16 %v2677_v18 }
 0x1bf   : > { %v1719_v55 = vmax.f32 %v1717_v59, %v1718_v26  ;;  %v2318_v31 = vmax.f32 %v1712_v9, 0.0  ;;  %v2460_v32 = vpack.c.bf16 %v2316_v11, %v2316_v11  ;;  %v2934_v54 = vunpack.c.l.b16 %v2926_v46 }
 0x1c0   : > { %v2461_v21 = vpack.c.bf16 %v2317_v23, %v2317_v23  ;;  %v1078_v25 = vrot.slane %v11405_v24, 2  ;;  %v1662_v45 = vrot.slane %v1661_v50, 1  ;;  %v1720_v7 = vsel %vm1243_vm1, %v11405_v24, -inf }
 0x1c1   : > { %v2462_v30 = vpack.c.bf16 %v2318_v31, %v2318_v31  ;;  %v2680_v1 = vperm.slane %v2460_v32, 0  ;;  %v2742_v56 = vunpack.c.l.b16 %v2678_v58  ;;  %v2319_v27 = vmax.f32 %v1719_v55, 0.0 }
 0x1c2   : > { %v2681_v12 = vperm.slane %v2461_v21, 0  ;;  %v1721_v53 = vrot.slane %v1720_v7, 4  ;;  %v1727_v15 = vsel %vm1243_vm1, %v1078_v25, -inf  ;;  %v11411_v38 = vpop.f32.mrf.mxu0  ;;  %v11413_v5 = vunpack.c.l.b16 %v2679_v48  ;;  %v9969_v25 = vld [vmem:[%s10558_s24 + $0xd8] sm:$0xff] }
 0x1c3   : > { %v2682_v4 = vperm.slane %v2462_v30, 0  ;;  %v1728_v18 = vrot.slane %v1727_v15, 4  ;;  %v2972_v36 = vsel %vm2765_vm2, %v2741_v29, %v2934_v54  ;;  %v11416_v22 = vunpack.c.l.b16 %v2680_v1 }
 0x1c4   : > { %v1722_v59 = vmax.f32 %v1720_v7, %v1721_v53  ;;  %v11418_v46 = vunpack.c.l.b16 %v2681_v12  ;;  %v1656_v58 = vmax.f32 %v1654_v14, %v1655_v34  ;;  %v2463_v26 = vpack.c.bf16 %v2319_v27, %v2319_v27 }
 0x1c5   : > { %v11420_v52 = vunpack.c.l.b16 %v2682_v4  ;;  %v1729_v60 = vmax.f32 %v1727_v15, %v1728_v18  ;;  %v2973_v11 = vsel %vm2767_vm3, %v2742_v56, %v2972_v36  ;;  %v2807_v48 = vsel %vm2765_vm2, %v2742_v56, %v2741_v29 }
 0x1c6   : > { %v1723_v9 = vrot.slane %v1722_v59, 2  ;;  %v2974_v23 = vsel %vm2769_vm4, %v11413_v5, %v2973_v11  ;;  %v2808_v55 = vsel %vm2767_vm3, %v11413_v5, %v2807_v48  ;;  %v1663_v31 = vmax.f32 %v1661_v50, %v1662_v45 }
 0x1c7   : > { %v2683_v54 = vperm.slane %v2463_v26, 0  ;;  %v2975_v21 = vsel %vm2771_vm5, %v11416_v22, %v2974_v23  ;;  %v2809_v14 = vsel %vm2769_vm4, %v11416_v22, %v2808_v55  ;;  %v1730_v29 = vrot.slane %v1729_v60, 2 }
 0x1c8   : > { %v1724_v32 = vmax.f32 %v1722_v59, %v1723_v9  ;;  %v2976_v34 = vsel %vm2773_vm6, %v11418_v46, %v2975_v21  ;;  %v2310_v30 = vmax.f32 %v1656_v58, 0.0  ;;  %v3154_v45 = vsel %vm2765_vm2, %v11413_v5, %v2742_v56 }
 0x1c9   : > { %v11437_v27 = vunpack.c.l.b16 %v2683_v54  ;;  %v2977_v50 = vsel %vm2775_vm7, %v11420_v52, %v2976_v34  ;;  %v2810_v12 = vsel %vm2771_vm5, %v11418_v46, %v2809_v14  ;;  %v1731_v53 = vmax.f32 %v1729_v60, %v1730_v29 }
 0x1ca   : > { %v1725_v1 = vrot.slane %v1724_v32, 1  ;;  %v11435_v7 = vpop.f32.mrf.mxu0  ;;  %v3155_v15 = vsel %vm2767_vm3, %v11416_v22, %v3154_v45  ;;  %v2311_v4 = vmax.f32 %v1663_v31, 0.0  ;;  %v866_v58 = vadd.f32 %v11373_v42, %v11399_v0 }
 0x1cb   : > { %v11449_v18 = vsel %vm2777_vm8, %v11437_v27, %v2977_v50  ;;  %v3156_v59 = vsel %vm2769_vm4, %v11418_v46, %v3155_v15  ;;  %v1732_v60 = vrot.slane %v1731_v53, 1  ;;  %v2454_v9 = vpack.c.bf16 %v2310_v30, %v2310_v30 }
 0x1cc   : > { %v1726_v36 = vmax.f32 %v1724_v32, %v1725_v1  ;;  %v11457_v56 = vpack.c.b16 %v11449_v18, %v11300_v6  ;;  %v2811_v11 = vsel %vm2773_vm6, %v11420_v52, %v2810_v12  ;;  %v2455_v48 = vpack.c.bf16 %v2311_v4, %v2311_v4 }
 0x1cd   : > { %7931 = vmatmul.msk.bf16.gmra.mxu0 %vm657_vm0, %v9969_v25  ;;  %v3528_v23 = vsel %vm2767_vm3, %v11267_v49, %v11389_v41  ;;  %v1733_v0 = vmax.f32 %v1731_v53, %v1732_v60  ;;  %v3157_v55 = vsel %vm2771_vm5, %v11420_v52, %v3156_v59  ;;  %v3297_v31 = vperm.slane %v2454_v9, 0 }
 0x1ce   : > { %14035 = vst [vmem:[#allocation18_spill] sm:$0xff] %v11457_v56  ;;  %v2320_v26 = vmax.f32 %v1726_v36, 0.0  ;;  %3067 = vmatmul.bf16.gmra.mxu2 %v11457_v56  ;;  %v3529_v32 = vsel %vm2769_vm4, %v11271_v28, %v3528_v23  ;;  %v3487_v21 = vperm.slane %v2455_v48, 0  ;;  %v3337_v34 = vsel %vm2765_vm2, %v11258_v33, %v11255_v51 }
 0x1cf   : > { %v3530_v14 = vsel %vm2771_vm5, %v11332_v47, %v3529_v32  ;;  %v2321_v41 = vmax.f32 %v1733_v0, 0.0  ;;  %v3305_v25 = vunpack.c.l.b16 %v3297_v31  ;;  %v3338_v30 = vsel %vm2767_vm3, %v11264_v10, %v3337_v34 }
 0x1d0   : > { %v2464_v54 = vpack.c.bf16 %v2320_v26, %v2320_v26  ;;  %v3531_v29 = vsel %vm2773_vm6, %v11360_v2, %v3530_v14  ;;  %v2812_v50 = vsel %vm2775_vm7, %v11437_v27, %v2811_v11  ;;  %v3495_v12 = vunpack.c.l.b16 %v3487_v21 }
 0x1d1   : > { %v3339_v53 = vsel %vm2769_vm4, %v11267_v49, %v3338_v30  ;;  %v2465_v15 = vpack.c.bf16 %v2321_v41, %v2321_v41  ;;  %v3532_v33 = vsel %vm2775_vm7, %v3305_v25, %v3531_v29  ;;  %v3158_v10 = vsel %vm2773_vm6, %v11437_v27, %v3157_v55  ;;  %v9970_v41 = vld [vmem:[%s10558_s24 + $0xe0] sm:$0xff] }
 0x1d2   : > { %v2684_v1 = vperm.slane %v2464_v54, 0  ;;  %v872_v45 = vpop.f32.mrf.mxu0  ;;  %v3340_v4 = vsel %vm2771_vm5, %v11271_v28, %v3339_v53  ;;  %v11492_v59 = vsel %vm2777_vm8, %v3495_v12, %v3532_v33 }
 0x1d3   : > { %v873_v51 = vadd.f32 %v11373_v42, %v872_v45  ;;  %v3341_v60 = vsel %vm2773_vm6, %v11332_v47, %v3340_v4  ;;  %v3108_v49 = vperm.slane %v2465_v15, 0  ;;  %v11498_v26 = vpack.c.b16 %v11492_v59, %v11338_v57 }
 0x1d4   : > { %v11487_v36 = vunpack.c.l.b16 %v2684_v1  ;;  %v3342_v28 = vsel %vm2775_vm7, %v11360_v2, %v3341_v60  ;;  %v1079_v2 = vrot.slane %v11405_v24, 4  ;;  %v1080_v60 = vrot.slane %v11405_v24, 6 }
 0x1d5   : > { %v973_v9 = vmax.f32 %v866_v58, %v873_v51  ;;  %14036 = vst [vmem:[#allocation19_spill] sm:$0xff] %v11498_v26  ;;  %v11509_v23 = vsel %vm2777_vm8, %v3305_v25, %v3342_v28  ;;  %v11515_v57 = vunpack.c.l.b16 %v3108_v49 }
 0x1d6   : > { %v11504_v11 = vsel %vm2777_vm8, %v11487_v36, %v2812_v50  ;;  %v3159_v48 = vsel %vm2775_vm7, %v11487_v36, %v3158_v10  ;;  %v11521_v32 = vpack.c.b16 %v11509_v23, %v11355_v35  ;;  %v868_v50 = vadd.f32 %v11373_v42, %v11411_v38 }
 0x1d7   : > { %14037 = vst [vmem:[#allocation20_spill] sm:$0xff] %v11504_v11  ;;  %v11513_v47 = vpack.c.b16 %v11504_v11, %v11346_v13  ;;  %v1081_v58 = vrot.slane %v973_v9, 2  ;;  %v1082_v0 = vrot.slane %v973_v9, 4  ;;  %v1083_v55 = vrot.slane %v973_v9, 6 }
 0x1d8   : > { %v1748_v31 = vsel %vm1243_vm1, %v973_v9, -inf  ;;  %14039 = vst [vmem:[#allocation22_spill] sm:$0xff] %v11521_v32  ;;  %v11526_v54 = vsel %vm2777_vm8, %v11515_v57, %v3159_v48  ;;  %v1734_v53 = vsel %vm1243_vm1, %v1079_v2, -inf }
 0x1d9   : > { %14038 = vst [vmem:[#allocation21_spill] sm:$0xff] %v11513_v47  ;;  %2902 = vmatmul.bf16.gmra.mxu1 %v11513_v47  ;;  %v1749_v21 = vrot.slane %v1748_v31, 4  ;;  %v1755_v14 = vsel %vm1243_vm1, %v1081_v58, -inf  ;;  %v1762_v34 = vsel %vm1243_vm1, %v1082_v0, -inf  ;;  %v11533_v25 = vpack.c.b16 %v11526_v54, %v11368_v40 }
 0x1da   : > { %14040 = vst [vmem:[#allocation23_spill] sm:$0xff] %v11526_v54  ;;  %v1756_v29 = vrot.slane %v1755_v14, 4  ;;  %v1763_v30 = vrot.slane %v1762_v34, 4  ;;  %v1769_v35 = vsel %vm1243_vm1, %v1083_v55, -inf  ;;  %v875_v1 = vpop.f32.mrf.mxu0  ;;  %v1735_v28 = vrot.slane %v1734_v53, 4 }
 0x1db   : > { %14041 = vst [vmem:[#allocation24_spill] sm:$0xff] %v11533_v25  ;;  %v1770_v45 = vrot.slane %v1769_v35, 4  ;;  %v876_v12 = vadd.f32 %v11373_v42, %v875_v1  ;;  %3249 = vmatmul.bf16.gmra.mxu3 %v11533_v25  ;;  %v1750_v33 = vmax.f32 %v1748_v31, %v1749_v21  ;;  %v1741_v47 = vsel %vm1243_vm1, %v1080_v60, -inf }
 0x1dc   : > { %v1757_v15 = vmax.f32 %v1755_v14, %v1756_v29  ;;  %v1764_v51 = vmax.f32 %v1762_v34, %v1763_v30 }
 0x1dd   : > { %v1771_v4 = vmax.f32 %v1769_v35, %v1770_v45  ;;  %v974_v10 = vmax.f32 %v868_v50, %v876_v12  ;;  %7932 = vmatmul.msk.bf16.gmra.mxu0 %vm657_vm0, %v9970_v41  ;;  %v1751_v14 = vrot.slane %v1750_v33, 2 }
 0x1de   : > { %v1758_v49 = vrot.slane %v1757_v15, 2  ;;  %v1765_v9 = vrot.slane %v1764_v51, 2 }
 0x1df   : > { %v1772_v38 = vrot.slane %v1771_v4, 2  ;;  %v1084_v48 = vrot.slane %v974_v10, 2  ;;  %v1085_v58 = vrot.slane %v974_v10, 4  ;;  %v1086_v2 = vrot.slane %v974_v10, 6 }
 0x1e0   : > { %v1759_v0 = vmax.f32 %v1757_v15, %v1758_v49  ;;  %v1766_v55 = vmax.f32 %v1764_v51, %v1765_v9  ;;  %v1776_v1 = vsel %vm1243_vm1, %v974_v10, -inf  ;;  %v1752_v10 = vmax.f32 %v1750_v33, %v1751_v14  ;;  %v9971_v33 = vld [vmem:[%s10558_s24 + $0xe8] sm:$0xff]  ;;  %v11549_v14 = vpop.f32.mrf.mxu2 }
 0x1e1   : > { %v1773_v34 = vmax.f32 %v1771_v4, %v1772_v38  ;;  %v1777_v31 = vrot.slane %v1776_v1, 4  ;;  %v1783_v21 = vsel %vm1243_vm1, %v1084_v48, -inf  ;;  %v1790_v24 = vsel %vm1243_vm1, %v1085_v58, -inf  ;;  %14042 = vst [vmem:[#allocation25_spill] sm:$0xff] %v11549_v14 }
 0x1e2   : > { %v1760_v29 = vrot.slane %v1759_v0, 1  ;;  %v1767_v41 = vrot.slane %v1766_v55, 1  ;;  %v1784_v30 = vrot.slane %v1783_v21, 4  ;;  %v877_v35 = vpop.f32.mrf.mxu0  ;;  %v1791_v12 = vrot.slane %v1790_v24, 4 }
 0x1e3   : > { %v1774_v50 = vrot.slane %v1773_v34, 1  ;;  %v1778_v45 = vmax.f32 %v1776_v1, %v1777_v31  ;;  %v1797_v49 = vsel %vm1243_vm1, %v1086_v2, -inf  ;;  %v1736_v48 = vmax.f32 %v1734_v53, %v1735_v28 }
 0x1e4   : > { %v1761_v25 = vmax.f32 %v1759_v0, %v1760_v29  ;;  %v1768_v15 = vmax.f32 %v1766_v55, %v1767_v41  ;;  %v1785_v51 = vmax.f32 %v1783_v21, %v1784_v30  ;;  %v1792_v38 = vmax.f32 %v1790_v24, %v1791_v12 }
 0x1e5   : > { %v1775_v9 = vmax.f32 %v1773_v34, %v1774_v50  ;;  %v1779_v4 = vrot.slane %v1778_v45, 2  ;;  %v1798_v56 = vrot.slane %v1797_v49, 4  ;;  %v1753_v55 = vrot.slane %v1752_v10, 1 }
 0x1e6   : > { %v1786_v26 = vrot.slane %v1785_v51, 2  ;;  %v2325_v58 = vmax.f32 %v1761_v25, 0.0  ;;  %v2326_v32 = vmax.f32 %v1768_v15, 0.0  ;;  %v1793_v1 = vrot.slane %v1792_v38, 2 }
 0x1e7   : > { %v1780_v11 = vmax.f32 %v1778_v45, %v1779_v4  ;;  %v1799_v0 = vmax.f32 %v1797_v49, %v1798_v56  ;;  %v2327_v21 = vmax.f32 %v1775_v9, 0.0  ;;  %v1737_v34 = vrot.slane %v1736_v48, 2  ;;  %v11553_v45 = vpop.f32.mrf.mxu1 }
 0x1e8   : > { %v1787_v31 = vmax.f32 %v1785_v51, %v1786_v26  ;;  %v1794_v2 = vmax.f32 %v1792_v38, %v1793_v1  ;;  %v1742_v41 = vrot.slane %v1741_v47, 4  ;;  %v2469_v30 = vpack.c.bf16 %v2325_v58, %v2325_v58  ;;  %14043 = vst [vmem:[#allocation26_spill] sm:$0xff] %v11553_v45 }
 0x1e9   : > { %v1781_v29 = vrot.slane %v1780_v11, 1  ;;  %v1800_v28 = vrot.slane %v1799_v0, 2  ;;  %v2470_v25 = vpack.c.bf16 %v2326_v32, %v2326_v32  ;;  %v871_v56 = vadd.f32 %v11373_v42, %v11435_v7 }
 0x1ea   : > { %v1788_v53 = vrot.slane %v1787_v31, 1  ;;  %v11551_v60 = vpop.f32.mrf.mxu0  ;;  %v1795_v50 = vrot.slane %v1794_v2, 1  ;;  %v878_v15 = vadd.f32 %v11373_v42, %v877_v35  ;;  %v1754_v51 = vmax.f32 %v1752_v10, %v1753_v55 }
 0x1eb   : > { %v1782_v24 = vmax.f32 %v1780_v11, %v1781_v29  ;;  %v1801_v12 = vmax.f32 %v1799_v0, %v1800_v28  ;;  %v2471_v49 = vpack.c.bf16 %v2327_v21, %v2327_v21  ;;  %v1743_v38 = vmax.f32 %v1741_v47, %v1742_v41 }
 0x1ec   : > { %v1789_v26 = vmax.f32 %v1787_v31, %v1788_v53  ;;  %v1796_v9 = vmax.f32 %v1794_v2, %v1795_v50  ;;  %v11559_v11 = vmax.f32 %v871_v56, %v878_v15  ;;  %v2685_v1 = vperm.slane %v2469_v30, 0 }
 0x1ed   : > { %v2328_v4 = vmax.f32 %v1782_v24, 0.0  ;;  %7933 = vmatmul.msk.bf16.gmra.mxu0 %vm657_vm0, %v9971_v33  ;;  %v1802_v58 = vrot.slane %v1801_v12, 1  ;;  %v2686_v29 = vperm.slane %v2470_v25, 0  ;;  %v1738_v35 = vmax.f32 %v1736_v48, %v1737_v34 }
 0x1ee   : > { %v2329_v32 = vmax.f32 %v1789_v26, 0.0  ;;  %v2330_v14 = vmax.f32 %v1796_v9, 0.0  ;;  %v1087_v0 = vrot.slane %v11559_v11, 2  ;;  %v2324_v10 = vmax.f32 %v1754_v51, 0.0  ;;  %v11573_v51 = vpop.f32.mrf.mxu3 }
 0x1ef   : > { %v2472_v45 = vpack.c.bf16 %v2328_v4, %v2328_v4  ;;  %v1803_v7 = vmax.f32 %v1801_v12, %v1802_v58  ;;  %v2687_v55 = vperm.slane %v2471_v49, 0  ;;  %v1804_v2 = vsel %vm1243_vm1, %v11559_v11, -inf  ;;  %14044 = vst [vmem:[#allocation27_spill] sm:$0xff] %v11573_v51  ;;  %v10008_v51 = vld [vmem:[%s13967_s3 + $0xe0] sm:$0xff] }
 0x1f0   : > { %v2473_v31 = vpack.c.bf16 %v2329_v32, %v2329_v32  ;;  %v2474_v21 = vpack.c.bf16 %v2330_v14, %v2330_v14  ;;  %v1805_v41 = vrot.slane %v1804_v2, 4  ;;  %v1811_v53 = vsel %vm1243_vm1, %v1087_v0, -inf }
 0x1f1   : > { %v2331_v47 = vmax.f32 %v1803_v7, 0.0  ;;  %v2688_v33 = vperm.slane %v2472_v45, 0  ;;  %v3063_v28 = vpop.f32.mrf.mxu2  ;;  %v11567_v25 = vunpack.c.l.b16 %v2685_v1  ;;  %v1812_v50 = vrot.slane %v1811_v53, 4 }
 0x1f2   : > { %v11565_v30 = vpop.f32.mrf.mxu0  ;;  %v2689_v24 = vperm.slane %v2473_v31, 0  ;;  %v11569_v56 = vunpack.c.l.b16 %v2686_v29  ;;  %v2690_v48 = vperm.slane %v2474_v21, 0  ;;  %v1806_v34 = vmax.f32 %v1804_v2, %v1805_v41 }
 0x1f3   : > { %v2898_v14 = vpop.f32.mrf.mxu1  ;;  %v11571_v26 = vunpack.c.l.b16 %v2687_v55  ;;  %v1813_v12 = vmax.f32 %v1811_v53, %v1812_v50  ;;  %v1744_v45 = vrot.slane %v1743_v38, 2  ;;  %v11575_v49 = vunpack.c.l.b16 %v2688_v33 }
 0x1f4   : > { %v3064_v15 = vadd.f32 %v3063_v28, %v2898_v14  ;;  %v1807_v9 = vrot.slane %v1806_v34, 2  ;;  %v2475_v4 = vpack.c.bf16 %v2331_v47, %v2331_v47  ;;  %v1739_v58 = vrot.slane %v1738_v35, 1 }
 0x1f5   : > { %v11577_v32 = vpack.c.bf16 %v2324_v10, %v2324_v10  ;;  %v11579_v1 = vunpack.c.l.b16 %v2689_v24  ;;  %v2814_v29 = vsel %vm2765_vm2, %v11569_v56, %v11567_v25  ;;  %v1814_v7 = vrot.slane %v1813_v12, 2 }
 0x1f6   : > { %v11584_v31 = vunpack.c.l.b16 %v2690_v48  ;;  %v1808_v0 = vmax.f32 %v1806_v34, %v1807_v9  ;;  %v2691_v55 = vperm.slane %v2475_v4, 0  ;;  %v2815_v21 = vsel %vm2767_vm3, %v11571_v26, %v2814_v29 }
 0x1f7   : > { %v1815_v2 = vmax.f32 %v1813_v12, %v1814_v7  ;;  %v1745_v33 = vmax.f32 %v1743_v38, %v1744_v45  ;;  %v2816_v10 = vsel %vm2769_vm4, %v11575_v49, %v2815_v21  ;;  %v1740_v53 = vmax.f32 %v1738_v35, %v1739_v58 }
 0x1f8   : > { %v1809_v47 = vrot.slane %v1808_v0, 1  ;;  %v2927_v28 = vperm.slane %v11577_v32, 0  ;;  %v2817_v24 = vsel %vm2771_vm5, %v11579_v1, %v2816_v10  ;;  %v881_v48 = vadd.f32 %v11373_v42, %v11551_v60 }
 0x1f9   : > { %v1816_v50 = vrot.slane %v1815_v2, 1  ;;  %v2818_v38 = vsel %vm2773_vm6, %v11584_v31, %v2817_v24  ;;  %v3161_v14 = vsel %vm2765_vm2, %v11571_v26, %v11569_v56  ;;  %v11602_v12 = vunpack.c.l.b16 %v2691_v55 }
 0x1fa   : > { %v11588_v41 = vpop.f32.mrf.mxu0  ;;  %v1810_v34 = vmax.f32 %v1808_v0, %v1809_v47  ;;  %v3162_v45 = vsel %vm2767_vm3, %v11575_v49, %v3161_v14  ;;  %v1746_v9 = vrot.slane %v1745_v33, 1  ;;  %v2322_v32 = vmax.f32 %v1740_v53, 0.0 }
 0x1fb   : > { %v1817_v35 = vmax.f32 %v1815_v2, %v1816_v50  ;;  %v3163_v60 = vsel %vm2769_vm4, %v11579_v1, %v3162_v45  ;;  %v3534_v29 = vsel %vm2765_vm2, %v11418_v46, %v11416_v22  ;;  %v2819_v0 = vsel %vm2775_vm7, %v11602_v12, %v2818_v38 }
 0x1fc   : > { %v2332_v58 = vmax.f32 %v1810_v34, 0.0  ;;  %v1747_v21 = vmax.f32 %v1745_v33, %v1746_v9  ;;  %v3164_v47 = vsel %vm2771_vm5, %v11584_v31, %v3163_v60  ;;  %v2466_v10 = vpack.c.bf16 %v2322_v32, %v2322_v32 }
 0x1fd   : > { %v2333_v55 = vmax.f32 %v1817_v35, 0.0  ;;  %v3535_v24 = vsel %vm2767_vm3, %v11420_v52, %v3534_v29 }
 0x1fe   : > { %v3245_v4 = vpop.f32.mrf.mxu3  ;;  %v2476_v2 = vpack.c.bf16 %v2332_v58, %v2332_v58  ;;  %v2323_v50 = vmax.f32 %v1747_v21, 0.0  ;;  %v3536_v34 = vsel %vm2769_vm4, %v11437_v27, %v3535_v24  ;;  %v3298_v33 = vperm.slane %v2466_v10, 0 }
 0x1ff   : > { %v11611_v7 = vadd.f32 %v3245_v4, %v3064_v15  ;;  %v2477_v53 = vpack.c.bf16 %v2333_v55, %v2333_v55  ;;  %v3344_v15 = vsel %vm2765_vm2, %v11416_v22, %v11413_v5  ;;  %v3537_v35 = vsel %vm2771_vm5, %v11487_v36, %v3536_v34 }
 0x200   : > { %v2692_v14 = vperm.slane %v2476_v2, 0  ;;  %v3345_v45 = vsel %vm2767_vm3, %v11418_v46, %v3344_v15  ;;  %v2467_v58 = vpack.c.bf16 %v2323_v50, %v2323_v50  ;;  %v3538_v60 = vsel %vm2773_vm6, %v11515_v57, %v3537_v35 }
 0x201   : > { %14045 = vst [vmem:[#allocation28_spill] sm:$0xff] %v11611_v7  ;;  %v3109_v4 = vperm.slane %v2477_v53, 0  ;;  %v3165_v5 = vsel %vm2773_vm6, %v11602_v12, %v3164_v47  ;;  %v3306_v22 = vunpack.c.l.b16 %v3298_v33  ;;  %v3346_v29 = vsel %vm2769_vm4, %v11420_v52, %v3345_v45 }
 0x202   : > { %v887_v38 = vpop.f32.mrf.mxu0  ;;  %v11631_v32 = vunpack.c.l.b16 %v2692_v14  ;;  %v3488_v46 = vperm.slane %v2467_v58, 0  ;;  %v3347_v2 = vsel %vm2771_vm5, %v11437_v27, %v3346_v29  ;;  %v2935_v52 = vunpack.c.l.b16 %v2927_v28  ;;  %v10019_v27 = vld [vmem:[%s13967_s3 + $0x138] sm:$0xff] }
 0x203   : > { %v888_v9 = vadd.f32 %v11373_v42, %v887_v38  ;;  %v11637_v21 = vunpack.c.l.b16 %v3109_v4  ;;  %v3539_v47 = vsel %vm2775_vm7, %v3306_v22, %v3538_v60  ;;  %v3348_v53 = vsel %vm2773_vm6, %v11487_v36, %v3347_v2  ;;  %3611 = vmatpush.bf16.msrb.mxu2 %v10019_v27  ;;  %v10011_v60 = vld [vmem:[%s13967_s3 + $0xf8] sm:$0xff]  ;;  %v10017_v27 = vld [vmem:[%s13967_s3 + $0x128] sm:$0xff] }
 0x204   : > { %v11643_v10 = vsel %vm2777_vm8, %v11631_v32, %v2819_v0  ;;  %v3166_v24 = vsel %vm2775_vm7, %v11631_v32, %v3165_v5  ;;  %v3496_v38 = vunpack.c.l.b16 %v3488_v46  ;;  %v3349_v14 = vsel %vm2775_vm7, %v11515_v57, %v3348_v53  ;;  %v10018_v57 = vld [vmem:[%s13967_s3 + $0x130] sm:$0xff]  ;;  %v10027_v2 = vld [vmem:[%s13967_s3 + $0x178] sm:$0xff]  ;;  %3421 = vmatpush.bf16.msrb.mxu1 %v10011_v60 }
 0x205   : > { %v976_v55 = vmax.f32 %v881_v48, %v888_v9  ;;  %v11656_v0 = vsel %vm2777_vm8, %v11637_v21, %v3166_v24  ;;  %v883_v29 = vadd.f32 %v11373_v42, %v11565_v30  ;;  %v11679_v24 = vsel %vm2777_vm8, %v3306_v22, %v3349_v14  ;;  %3752 = vmatpush.bf16.msrb.mxu3 %v10027_v2  ;;  %v10026_v22 = vld [vmem:[%s13967_s3 + $0x170] sm:$0xff] }
 0x206   : > { %v11670_v5 = vsel %vm2777_vm8, %v3496_v38, %v3539_v47  ;;  %v10010_v47 = vld [vmem:[%s13967_s3 + $0xf0] sm:$0xff]  ;;  %v1088_v38 = vrot.slane %v11559_v11, 4 }
 0x207   : > { %v1090_v48 = vrot.slane %v976_v55, 2  ;;  %v1091_v50 = vrot.slane %v976_v55, 4  ;;  %v1092_v34 = vrot.slane %v976_v55, 6  ;;  %v1832_v15 = vsel %vm1243_vm1, %v976_v55, -inf  ;;  %3612 = vmatpush.bf16.msrb.mxu2 %v10018_v57 }
 0x208   : > { %v1833_v33 = vrot.slane %v1832_v15, 4  ;;  %3422 = vmatpush.bf16.msrb.mxu1 %v10010_v47 }
 0x209   : > { %v1839_v36 = vsel %vm1243_vm1, %v1090_v48, -inf  ;;  %v1846_v28 = vsel %vm1243_vm1, %v1091_v50, -inf  ;;  %v1853_v35 = vsel %vm1243_vm1, %v1092_v34, -inf  ;;  %3753 = vmatpush.bf16.msrb.mxu3 %v10026_v22 }
 0x20a   : > { %v1840_v45 = vrot.slane %v1839_v36, 4  ;;  %v1847_v9 = vrot.slane %v1846_v28, 4  ;;  %v1854_v4 = vrot.slane %v1853_v35, 4  ;;  %v890_v58 = vpop.f32.mrf.mxu0  ;;  %v1834_v55 = vmax.f32 %v1832_v15, %v1833_v33 }
 0x20b   : > { %v891_v46 = vadd.f32 %v11373_v42, %v890_v58  ;;  %v2979_v15 = vsel %vm2765_vm2, %v11567_v25, %v2935_v52  ;;  %3613 = vmatpush.bf16.msrb.mxu2 %v10017_v27 }
 0x20c   : > { %v1841_v53 = vmax.f32 %v1839_v36, %v1840_v45  ;;  %v1848_v48 = vmax.f32 %v1846_v28, %v1847_v9  ;;  %v1855_v50 = vmax.f32 %v1853_v35, %v1854_v4  ;;  %v1835_v34 = vrot.slane %v1834_v55, 2 }
 0x20d   : > { %v977_v30 = vmax.f32 %v883_v29, %v891_v46  ;;  %v10009_v29 = vld [vmem:[%s13967_s3 + $0xe8] sm:$0xff] }
 0x20e   : > { %v1842_v14 = vrot.slane %v1841_v53, 2  ;;  %v1849_v33 = vrot.slane %v1848_v48, 2  ;;  %v1856_v36 = vrot.slane %v1855_v50, 2  ;;  %v1836_v28 = vmax.f32 %v1834_v55, %v1835_v34  ;;  %v10016_v55 = vld [vmem:[%s13967_s3 + $0x120] sm:$0xff]  ;;  %3423 = vmatpush.bf16.msrb.mxu1 %v10009_v29 }
 0x20f   : > { %v1093_v35 = vrot.slane %v977_v30, 2  ;;  %v1094_v45 = vrot.slane %v977_v30, 4  ;;  %v1095_v9 = vrot.slane %v977_v30, 6  ;;  %v1860_v57 = vsel %vm1243_vm1, %v977_v30, -inf  ;;  %3614 = vmatpush.bf16.msrb.mxu2 %v10016_v55 }
 0x210   : > { %v1843_v4 = vmax.f32 %v1841_v53, %v1842_v14  ;;  %v1850_v58 = vmax.f32 %v1848_v48, %v1849_v33  ;;  %v1857_v60 = vmax.f32 %v1855_v50, %v1856_v36  ;;  %v1837_v25 = vrot.slane %v1836_v28, 1  ;;  %v10025_v53 = vld [vmem:[%s13967_s3 + $0x168] sm:$0xff] }
 0x211   : > { %v1861_v52 = vrot.slane %v1860_v57, 4  ;;  %v1867_v46 = vsel %vm1243_vm1, %v1093_v35, -inf  ;;  %v1874_v2 = vsel %vm1243_vm1, %v1094_v45, -inf  ;;  %v1881_v35 = vsel %vm1243_vm1, %v1095_v9, -inf  ;;  %3754 = vmatpush.bf16.msrb.mxu3 %v10025_v53  ;;  %v10024_v9 = vld [vmem:[%s13967_s3 + $0x160] sm:$0xff] }
 0x212   : > { %v1844_v48 = vrot.slane %v1843_v4, 1  ;;  %v1851_v50 = vrot.slane %v1850_v58, 1  ;;  %v1858_v47 = vrot.slane %v1857_v60, 1  ;;  %v1868_v34 = vrot.slane %v1867_v46, 4  ;;  %v892_v30 = vpop.f32.mrf.mxu0  ;;  %3424 = vmatpush.bf16.msrb.mxu1 %v10008_v51 }
 0x213   : > { %v1838_v14 = vmax.f32 %v1836_v28, %v1837_v25  ;;  %v1862_v33 = vmax.f32 %v1860_v57, %v1861_v52  ;;  %v1875_v36 = vrot.slane %v1874_v2, 4  ;;  %v1882_v44 = vrot.slane %v1881_v35, 4  ;;  %v10015_v28 = vld [vmem:[%s13967_s3 + $0x118] sm:$0xff] }
 0x214   : > { %v1845_v27 = vmax.f32 %v1843_v4, %v1844_v48  ;;  %v1852_v22 = vmax.f32 %v1850_v58, %v1851_v50  ;;  %v1859_v45 = vmax.f32 %v1857_v60, %v1858_v47  ;;  %v1869_v7 = vmax.f32 %v1867_v46, %v1868_v34  ;;  %3615 = vmatpush.bf16.msrb.mxu2 %v10015_v28 }
 0x215   : > { %v2336_v54 = vmax.f32 %v1838_v14, 0.0  ;;  %v1863_v13 = vrot.slane %v1862_v33, 2  ;;  %v1876_v40 = vmax.f32 %v1874_v2, %v1875_v36  ;;  %v1818_v4 = vsel %vm1243_vm1, %v1088_v38, -inf  ;;  %3755 = vmatpush.bf16.msrb.mxu3 %v10024_v9 }
 0x216   : > { %v2337_v58 = vmax.f32 %v1845_v27, 0.0  ;;  %v2338_v60 = vmax.f32 %v1852_v22, 0.0  ;;  %v1870_v57 = vrot.slane %v1869_v7, 2  ;;  %v1883_v52 = vmax.f32 %v1881_v35, %v1882_v44  ;;  %v10014_v44 = vld [vmem:[%s13967_s3 + $0x110] sm:$0xff] }
 0x217   : > { %v1864_v29 = vmax.f32 %v1862_v33, %v1863_v13  ;;  %v1877_v25 = vrot.slane %v1876_v40, 2  ;;  %v2980_v46 = vsel %vm2767_vm3, %v11569_v56, %v2979_v15  ;;  %v2339_v2 = vmax.f32 %v1859_v45, 0.0  ;;  %v10007_v13 = vld [vmem:[%s13967_s3 + $0xd8] sm:$0xff] }
 0x218   : > { %v2480_v55 = vpack.c.bf16 %v2336_v54, %v2336_v54  ;;  %v2481_v53 = vpack.c.bf16 %v2337_v58, %v2337_v58  ;;  %v1871_v48 = vmax.f32 %v1869_v7, %v1870_v57  ;;  %v2482_v50 = vpack.c.bf16 %v2338_v60, %v2338_v60  ;;  %3425 = vmatpush.bf16.msrb.mxu1 %v10007_v13  ;;  %v10023_v60 = vld [vmem:[%s13967_s3 + $0x158] sm:$0xff] }
 0x219   : > { %v1865_v47 = vrot.slane %v1864_v29, 1  ;;  %v1878_v34 = vmax.f32 %v1876_v40, %v1877_v25  ;;  %v1884_v14 = vrot.slane %v1883_v52, 2  ;;  %v1819_v56 = vrot.slane %v1818_v4, 4  ;;  %3616 = vmatpush.bf16.msrb.mxu2 %v10014_v44  ;;  %3756 = vmatpush.bf16.msrb.mxu3 %v10023_v60 }
 0x21a   : > { %v886_v54 = vadd.f32 %v11373_v42, %v11588_v41  ;;  %v1872_v7 = vrot.slane %v1871_v48, 1  ;;  %v11726_v51 = vpop.f32.mrf.mxu0  ;;  %v2981_v40 = vsel %vm2769_vm4, %v11571_v26, %v2980_v46  ;;  %v2693_v15 = vperm.slane %v2481_v53, 0  ;;  %v10013_v53 = vld [vmem:[%s13967_s3 + $0x108] sm:$0xff] }
 0x21b   : > { %v1866_v38 = vmax.f32 %v1864_v29, %v1865_v47  ;;  %v1879_v33 = vrot.slane %v1878_v34, 1  ;;  %v1885_v36 = vmax.f32 %v1883_v52, %v1884_v14  ;;  %v2483_v35 = vpack.c.bf16 %v2339_v2, %v2339_v2 }
 0x21c   : > { %v2928_v27 = vperm.slane %v2480_v55, 0  ;;  %v1873_v22 = vmax.f32 %v1871_v48, %v1872_v7  ;;  %v893_v45 = vadd.f32 %v11373_v42, %v892_v30  ;;  %v2694_v28 = vperm.slane %v2482_v50, 0  ;;  %v10006_v55 = vld [vmem:[%s13967_s3 + $0xd0] sm:$0xff] }
 0x21d   : > { %v1880_v9 = vmax.f32 %v1878_v34, %v1879_v33  ;;  %v1886_v58 = vrot.slane %v1885_v36, 1  ;;  %v2340_v41 = vmax.f32 %v1866_v38, 0.0  ;;  %v1820_v57 = vmax.f32 %v1818_v4, %v1819_v56  ;;  %3426 = vmatpush.bf16.msrb.mxu1 %v10006_v55  ;;  %3617 = vmatpush.bf16.msrb.mxu2 %v10013_v53  ;;  %v10022_v56 = vld [vmem:[%s13967_s3 + $0x150] sm:$0xff] }
 0x21e   : > { %v2341_v25 = vmax.f32 %v1873_v22, 0.0  ;;  %v11734_v29 = vmax.f32 %v886_v54, %v893_v45  ;;  %v2982_v52 = vsel %vm2771_vm5, %v11575_v49, %v2981_v40  ;;  %v2757_v46 = vunpack.c.l.b16 %v2693_v15  ;;  %3757 = vmatpush.bf16.msrb.mxu3 %v10022_v56  ;;  %v10005_v22 = vld [vmem:[%s13967_s3 + $0xc8] sm:$0xff]  ;;  %v10012_v45 = vld [vmem:[%s13967_s3 + $0x100] sm:$0xff] }
 0x21f   : > { %v1887_v2 = vmax.f32 %v1885_v36, %v1886_v58  ;;  %v2342_v42 = vmax.f32 %v1880_v9, 0.0  ;;  %v2484_v30 = vpack.c.bf16 %v2340_v41, %v2340_v41  ;;  %v2695_v4 = vperm.slane %v2483_v35, 0  ;;  %v9972_v58 = vld [vmem:[%s10558_s24 + $0xf0] sm:$0xff] }
 0x220   : > { %v2936_v48 = vunpack.c.l.b16 %v2928_v27  ;;  %v2485_v50 = vpack.c.bf16 %v2341_v25, %v2341_v25  ;;  %v1096_v47 = vrot.slane %v11734_v29, 2  ;;  %v1888_v13 = vsel %vm1243_vm1, %v11734_v29, -inf  ;;  %7934 = vmatmul.msk.bf16.gmra.mxu0 %vm657_vm0, %v9972_v58 }
 0x221   : > { %v2486_v34 = vpack.c.bf16 %v2342_v42, %v2342_v42  ;;  %v2696_v14 = vperm.slane %v2484_v30, 0  ;;  %v2758_v44 = vunpack.c.l.b16 %v2694_v28  ;;  %v2343_v54 = vmax.f32 %v1887_v2, 0.0  ;;  %3427 = vmatpush.bf16.msrb.mxu1 %v10005_v22  ;;  %3618 = vmatpush.bf16.msrb.mxu2 %v10012_v45  ;;  %v10021_v42 = vld [vmem:[%s13967_s3 + $0x148] sm:$0xff] }
 0x222   : > { %v2697_v7 = vperm.slane %v2485_v50, 0  ;;  %v1889_v40 = vrot.slane %v1888_v13, 4  ;;  %v1895_v15 = vsel %vm1243_vm1, %v1096_v47, -inf  ;;  %v11751_v38 = vpop.f32.mrf.mxu0  ;;  %v1821_v33 = vrot.slane %v1820_v57, 2  ;;  %3758 = vmatpush.bf16.msrb.mxu3 %v10021_v42 }
 0x223   : > { %v2698_v36 = vperm.slane %v2486_v34, 0  ;;  %v1896_v35 = vrot.slane %v1895_v15, 4  ;;  %v2986_v27 = vsel %vm2765_vm2, %v2757_v46, %v2936_v48  ;;  %v11760_v28 = vunpack.c.l.b16 %v2696_v14 }
 0x224   : > { %v1890_v9 = vmax.f32 %v1888_v13, %v1889_v40  ;;  %v11763_v41 = vunpack.c.l.b16 %v2695_v4  ;;  %v11765_v60 = vunpack.c.l.b16 %v2697_v7  ;;  %v2983_v2 = vsel %vm2773_vm6, %v11579_v1, %v2982_v52 }
 0x225   : > { %v1897_v25 = vmax.f32 %v1895_v15, %v1896_v35  ;;  %v11772_v30 = vunpack.c.l.b16 %v2698_v36  ;;  %v2487_v53 = vpack.c.bf16 %v2343_v54, %v2343_v54  ;;  %v2987_v48 = vsel %vm2767_vm3, %v2758_v44, %v2986_v27 }
 0x226   : > { %v1891_v55 = vrot.slane %v1890_v9, 2  ;;  %v2988_v4 = vsel %vm2769_vm4, %v11763_v41, %v2987_v48  ;;  %v2821_v50 = vsel %vm2765_vm2, %v2758_v44, %v2757_v46  ;;  %v1822_v52 = vmax.f32 %v1820_v57, %v1821_v33 }
 0x227   : > { %v2699_v34 = vperm.slane %v2487_v53, 0  ;;  %v2989_v14 = vsel %vm2771_vm5, %v11760_v28, %v2988_v4  ;;  %v2984_v13 = vsel %vm2775_vm7, %v11584_v31, %v2983_v2  ;;  %v1898_v54 = vrot.slane %v1897_v25, 2 }
 0x228   : > { %v1892_v47 = vmax.f32 %v1890_v9, %v1891_v55  ;;  %v2990_v56 = vsel %vm2773_vm6, %v11765_v60, %v2989_v14  ;;  %v2822_v46 = vsel %vm2767_vm3, %v11763_v41, %v2821_v50  ;;  %v3168_v35 = vsel %vm2765_vm2, %v11763_v41, %v2758_v44 }
 0x229   : > { %v11787_v15 = vunpack.c.l.b16 %v2699_v34  ;;  %v2991_v57 = vsel %vm2775_vm7, %v11772_v30, %v2990_v56  ;;  %v2823_v33 = vsel %vm2769_vm4, %v11760_v28, %v2822_v46  ;;  %v1899_v36 = vmax.f32 %v1897_v25, %v1898_v54 }
 0x22a   : > { %v1893_v7 = vrot.slane %v1892_v47, 1  ;;  %v11785_v40 = vpop.f32.mrf.mxu0  ;;  %v1823_v27 = vrot.slane %v1822_v52, 1  ;;  %v11799_v22 = vsel %vm2777_vm8, %v11602_v12, %v2984_v13  ;;  %v3169_v58 = vsel %vm2767_vm3, %v11760_v28, %v3168_v35 }
 0x22b   : > { %v11803_v45 = vsel %vm2777_vm8, %v11787_v15, %v2991_v57  ;;  %v1900_v25 = vrot.slane %v1899_v36, 1  ;;  %v2824_v55 = vsel %vm2771_vm5, %v11765_v60, %v2823_v33  ;;  %v3170_v48 = vsel %vm2769_vm4, %v11765_v60, %v3169_v58  ;;  %v10004_v33 = vld [vmem:[%s13967_s3 + $0xc0] sm:$0xff] }
 0x22c   : > { %v1894_v9 = vmax.f32 %v1892_v47, %v1893_v7  ;;  %v11809_v2 = vpack.c.b16 %v11803_v45, %v11799_v22  ;;  %v1824_v42 = vmax.f32 %v1822_v52, %v1823_v27  ;;  %v3351_v50 = vsel %vm2765_vm2, %v11575_v49, %v11571_v26  ;;  %3428 = vmatpush.bf16.msrb.mxu1 %v10004_v33  ;;  %v11885_v33 = vld [vmem:[%s13966_s2] ss:$0 sm:$0xff] }
 0x22d   : > { %v1901_v53 = vmax.f32 %v1899_v36, %v1900_v25  ;;  %v3352_v52 = vsel %vm2767_vm3, %v11579_v1, %v3351_v50  ;;  %v2825_v54 = vsel %vm2773_vm6, %v11772_v30, %v2824_v55  ;;  %v3171_v7 = vsel %vm2771_vm5, %v11772_v30, %v3170_v48  ;;  %v10020_v36 = vld [vmem:[%s13967_s3 + $0x140] sm:$0xff] }
 0x22e   : > { %14046 = vst [vmem:[#allocation29_spill] sm:$0xff] %v11809_v2  ;;  %v2344_v44 = vmax.f32 %v1894_v9, 0.0  ;;  %3072 = vmatmul.bf16.gmra.mxu2 %v11809_v2  ;;  %v2334_v4 = vmax.f32 %v1824_v42, 0.0  ;;  %v3353_v13 = vsel %vm2769_vm4, %v11584_v31, %v3352_v52  ;;  %v9973_v9 = vld [vmem:[%s10558_s24 + $0xf8] sm:$0xff]  ;;  %v2826_v42 = vsel %vm2775_vm7, %v11787_v15, %v2825_v54  ;;  %3759 = vmatpush.bf16.msrb.mxu3 %v10020_v36 }
 0x22f   : > { %v2345_v34 = vmax.f32 %v1901_v53, 0.0  ;;  %v3354_v26 = vsel %vm2771_vm5, %v11602_v12, %v3353_v13  ;;  %v3172_v55 = vsel %vm2773_vm6, %v11787_v15, %v3171_v7  ;;  %v1098_v54 = vrot.slane %v11734_v29, 6 }
 0x230   : > { %v2488_v47 = vpack.c.bf16 %v2344_v44, %v2344_v44  ;;  %v2478_v14 = vpack.c.bf16 %v2334_v4, %v2334_v4  ;;  %v3355_v35 = vsel %vm2773_vm6, %v11631_v32, %v3354_v26  ;;  %7935 = vmatmul.msk.bf16.gmra.mxu0 %vm657_vm0, %v9973_v9  ;;  %v1089_v7 = vrot.slane %v11559_v11, 6  ;;  %v10035_v11 = vld [vmem:[%s13967_s3 + $0x1b8] sm:$0xff] }
 0x231   : > { %v2489_v46 = vpack.c.bf16 %v2345_v34, %v2345_v34  ;;  %v3356_v25 = vsel %vm2775_vm7, %v11637_v21, %v3355_v35  ;;  %v1097_v34 = vrot.slane %v11734_v29, 4  ;;  %v896_v36 = vadd.f32 %v11885_v33, %v11726_v51  ;;  %3872 = vmatpush.bf16.msra.mxu1 %v10035_v11  ;;  %v10042_v11 = vld [vmem:[%s13967_s3 + $0x1f0] sm:$0xff] }
 0x232   : > { %v2700_v56 = vperm.slane %v2488_v47, 0  ;;  %v902_v57 = vpop.f32.mrf.mxu0  ;;  %v3299_v58 = vperm.slane %v2478_v14, 0  ;;  %v1909_v9 = vsel %vm1243_vm1, %v1098_v54, -inf }
 0x233   : > { %v3110_v44 = vperm.slane %v2489_v46, 0  ;;  %v1902_v26 = vsel %vm1243_vm1, %v1097_v34, -inf  ;;  %v14050_v46 = vpack.c.b16 %v11023_v63, %v10872_v37  ;;  %v903_v35 = vadd.f32 %v11885_v33, %v902_v57  ;;  %v10043_v34 = vld [vmem:[%s13967_s3 + $0x1f8] sm:$0xff] }
 0x234   : > { %v11837_v27 = vunpack.c.l.b16 %v2700_v56  ;;  %v11859_v47 = vunpack.c.l.b16 %v3299_v58  ;;  %v1903_v29 = vrot.slane %v1902_v26, 4  ;;  %v1825_v37 = vsel %vm1243_vm1, %v1089_v7, -inf  ;;  %3992 = vmatpush.bf16.msra.mxu2 %v10043_v34 }
 0x235   : > { %v11857_v50 = vunpack.c.l.b16 %v3110_v44  ;;  %v979_v44 = vmax.f32 %v896_v36, %v903_v35  ;;  %v14051_v7 = vpack.c.b16 %v11043_v20, %v10878_v16  ;;  %v10034_v36 = vld [vmem:[%s13967_s3 + $0x1b0] sm:$0xff]  ;;  %v898_v16 = vadd.f32 %v11885_v33, %v11751_v38 }
 0x236   : > { %v11848_v53 = vsel %vm2777_vm8, %v11837_v27, %v2826_v42  ;;  %v3173_v48 = vsel %vm2775_vm7, %v11837_v27, %v3172_v55  ;;  %v11874_v56 = vsel %vm2777_vm8, %v11859_v47, %v3356_v25  ;;  %v9974_v25 = vld [vmem:[%s10558_s24 + $0x100] sm:$0xff]  ;;  %v1910_v42 = vrot.slane %v1909_v9, 4  ;;  %3873 = vmatpush.bf16.msra.mxu1 %v10034_v36 }
 0x237   : > { %14047 = vst [vmem:[#allocation30_spill] sm:$0xff] %v11848_v53  ;;  %v11855_v4 = vpack.c.b16 %v11848_v53, %v11643_v10  ;;  %v11864_v52 = vsel %vm2777_vm8, %v11857_v50, %v3173_v48  ;;  %v1826_v55 = vrot.slane %v1825_v37, 4  ;;  %v1904_v48 = vmax.f32 %v1902_v26, %v1903_v29 }
 0x238   : > { %v11869_v14 = vpack.c.b16 %v11864_v52, %v11656_v0  ;;  %v1911_v51 = vmax.f32 %v1909_v9, %v1910_v42  ;;  %v1099_v57 = vrot.slane %v979_v44, 2  ;;  %v1100_v35 = vrot.slane %v979_v44, 4  ;;  %3993 = vmatpush.bf16.msra.mxu2 %v10042_v11 }
 0x239   : > { %14048 = vst [vmem:[#allocation31_spill] sm:$0xff] %v11855_v4  ;;  %2907 = vmatmul.bf16.gmra.mxu1 %v11855_v4  ;;  %v1905_v54 = vrot.slane %v1904_v48, 2  ;;  %v1101_v29 = vrot.slane %v979_v44, 6  ;;  %v1916_v9 = vsel %vm1243_vm1, %v979_v44, -inf  ;;  %v11923_v4 = vpop.f32.mrf.mxu1 }
 0x23a   : > { %14049 = vst [vmem:[#allocation32_spill] sm:$0xff] %v11869_v14  ;;  %v905_v13 = vpop.f32.mrf.mxu0  ;;  %3254 = vmatmul.bf16.gmra.mxu3 %v11869_v14  ;;  %v1912_v34 = vrot.slane %v1911_v51, 2  ;;  %v1917_v44 = vrot.slane %v1916_v9, 4  ;;  %v1930_v36 = vsel %vm1243_vm1, %v1100_v35, -inf }
 0x23b   : > { %v906_v42 = vadd.f32 %v11885_v33, %v905_v13  ;;  %v1906_v14 = vmax.f32 %v1904_v48, %v1905_v54  ;;  %14054 = vst [vmem:[#allocation34_spill] sm:$0xff] %v11923_v4  ;;  %v1937_v38 = vsel %vm1243_vm1, %v1101_v29, -inf  ;;  %v3358_v48 = vsel %vm2765_vm2, %v11760_v28, %v11763_v41 }
 0x23c   : > { %v1913_v13 = vmax.f32 %v1911_v51, %v1912_v34  ;;  %v3541_v51 = vsel %vm2765_vm2, %v11579_v1, %v11575_v49 }
 0x23e   : > { %3619 = vmatmul.bf16.vlgmr.msrb.gmra.mxu2 %v14050_v46  ;;  %v1827_v46 = vmax.f32 %v1825_v37, %v1826_v55  ;;  %v11914_v37 = vpop.f32.mrf.mxu2  ;;  %v14053_v55 = vpack.c.b16 %v11010_v61, %v10854_v3  ;;  %v1907_v3 = vrot.slane %v1906_v14, 1  ;;  %v1918_v61 = vmax.f32 %v1916_v9, %v1917_v44  ;;  %v11944_v44 = vpop.f32.mrf.mxu3 }
 0x23f   : > { %14052 = vst [vmem:[#allocation33_spill] sm:$0xff] %v11914_v37  ;;  %v1931_v37 = vrot.slane %v1930_v36, 4  ;;  %v1914_v29 = vrot.slane %v1913_v13, 1 }
 0x240   : > { %7936 = vmatmul.msk.bf16.gmra.mxu0 %vm657_vm0, %v9974_v25  ;;  %v1923_v25 = vsel %vm1243_vm1, %v1099_v57, -inf  ;;  %v980_v57 = vmax.f32 %v898_v16, %v906_v42  ;;  %v1908_v35 = vmax.f32 %v1906_v14, %v1907_v3 }
 0x241   : > { %v1924_v2 = vrot.slane %v1923_v25, 4  ;;  %v1932_v9 = vmax.f32 %v1930_v36, %v1931_v37 }
 0x242   : > { %v11895_v58 = vpop.f32.mrf.mxu0  ;;  %v1102_v11 = vrot.slane %v980_v57, 2  ;;  %v1103_v16 = vrot.slane %v980_v57, 4  ;;  %v1944_v1 = vsel %vm1243_vm1, %v980_v57, -inf  ;;  %v2346_v37 = vmax.f32 %v1908_v35, 0.0 }
 0x243   : > { %v1925_v54 = vmax.f32 %v1923_v25, %v1924_v2  ;;  %v1104_v2 = vrot.slane %v980_v57, 6  ;;  %v1945_v35 = vrot.slane %v1944_v1, 4 }
 0x244   : > { %v1951_v36 = vsel %vm1243_vm1, %v1102_v11, -inf }
 0x245   : > { %v1926_v49 = vrot.slane %v1925_v54, 2  ;;  %v1965_v11 = vsel %vm1243_vm1, %v1104_v2, -inf }
 0x249   : > { %3429 = vmatmul.bf16.vlgmr.msrb.gmra.mxu1 %v14051_v7  ;;  %v1828_v7 = vrot.slane %v1827_v46, 2 }
 0x24a   : > { %v11908_v26 = vpop.f32.mrf.mxu0  ;;  %3760 = vmatmul.bf16.vlgmr.msrb.gmra.mxu3 %v14053_v55  ;;  %v1938_v55 = vrot.slane %v1937_v38, 4 }
 0x24b   : > { %v1829_v63 = vmax.f32 %v1827_v46, %v1828_v7  ;;  %v3359_v46 = vsel %vm2767_vm3, %v11765_v60, %v3358_v48  ;;  %v1919_v7 = vrot.slane %v1918_v61, 2  ;;  %v11950_v48 = vpack.c.b16 %v11300_v6, %v11143_v17 }
 0x24c   : > { %v3360_v34 = vsel %vm2769_vm4, %v11772_v30, %v3359_v46  ;;  %v1939_v41 = vmax.f32 %v1937_v38, %v1938_v55  ;;  %v11954_v38 = vpack.c.b16 %v11670_v5, %v11492_v59  ;;  %v1915_v55 = vmax.f32 %v1913_v13, %v1914_v29 }
 0x24d   : > { %v1830_v42 = vrot.slane %v1829_v63, 1  ;;  %v11942_v25 = vsel %vm2771_vm5, %v11787_v15, %v3360_v34  ;;  %14055 = vst [vmem:[#allocation35_spill] sm:$0xff] %v11950_v48  ;;  %v1933_v46 = vrot.slane %v1932_v9, 2  ;;  %v1958_v34 = vsel %vm1243_vm1, %v1103_v16, -inf }
 0x24e   : > { %3624 = vmatmul.bf16.gmra.mxu2 %v11352_v39  ;;  %14056 = vst [vmem:[#allocation36_spill] sm:$0xff] %v11954_v38  ;;  %v1940_v57 = vrot.slane %v1939_v41, 2  ;;  %v3548_v6 = vsel %vm2765_vm2, %v11765_v60, %v11760_v28  ;;  %v1920_v59 = vmax.f32 %v1918_v61, %v1919_v7  ;;  %v1927_v13 = vmax.f32 %v1925_v54, %v1926_v49  ;;  %v10033_v54 = vld [vmem:[%s13967_s3 + $0x1a8] sm:$0xff] }
 0x24f   : > { %v1831_v39 = vmax.f32 %v1829_v63, %v1830_v42  ;;  %v1952_v29 = vrot.slane %v1951_v36, 4  ;;  %v2490_v16 = vpack.c.bf16 %v2346_v37, %v2346_v37  ;;  %v11969_v63 = vpack.c.b16 %v11679_v24, %v11509_v23  ;;  %3874 = vmatpush.bf16.msra.mxu1 %v10033_v54 }
 0x250   : > { %v2347_v28 = vmax.f32 %v1915_v55, 0.0  ;;  %v1966_v61 = vrot.slane %v1965_v11, 4  ;;  %v3549_v7 = vsel %vm2767_vm3, %v11772_v30, %v3548_v6  ;;  %v1934_v2 = vmax.f32 %v1932_v9, %v1933_v46  ;;  %v10040_v55 = vld [vmem:[%s13967_s3 + $0x1e0] sm:$0xff] }
 0x251   : > { %v3068_v4 = vpop.f32.mrf.mxu2  ;;  %14057 = vst [vmem:[#allocation37_spill] sm:$0xff] %v11969_v63  ;;  %v2335_v42 = vmax.f32 %v1831_v39, 0.0  ;;  %v1941_v49 = vmax.f32 %v1939_v41, %v1940_v57  ;;  %v1946_v37 = vmax.f32 %v1944_v1, %v1945_v35  ;;  %v1921_v39 = vrot.slane %v1920_v59, 1 }
 0x252   : > { %v11928_v53 = vpop.f32.mrf.mxu0  ;;  %v3300_v30 = vperm.slane %v2490_v16, 0  ;;  %v2491_v1 = vpack.c.bf16 %v2347_v28, %v2347_v28  ;;  %v3550_v46 = vsel %vm2769_vm4, %v11787_v15, %v3549_v7  ;;  %v1967_v57 = vmax.f32 %v1965_v11, %v1966_v61 }
 0x253   : > { %v911_v35 = vadd.f32 %v11885_v33, %v11908_v26  ;;  %v2479_v6 = vpack.c.bf16 %v2335_v42, %v2335_v42  ;;  %v12010_v42 = vpack.c.b16 %v11799_v22, %v11449_v18 }
 0x254   : > { %v12004_v11 = vunpack.c.l.b16 %v3300_v30  ;;  %v3490_v28 = vperm.slane %v2491_v1, 0  ;;  %v1968_v54 = vrot.slane %v1967_v57, 2  ;;  %v10048_v30 = vld [vmem:[%s13967_s3 + $0x220] sm:$0xff] }
 0x256   : > { %v2903_v14 = vpop.f32.mrf.mxu1 }
 0x257   : > { %v3069_v3 = vadd.f32 %v3068_v4, %v2903_v14  ;;  %v3542_v4 = vsel %vm2767_vm3, %v11584_v31, %v3541_v51  ;;  %v1959_v14 = vrot.slane %v1958_v34, 4  ;;  %v10051_v31 = vld [vmem:[%s13967_s3 + $0x238] sm:$0xff]  ;;  %v10041_v51 = vld [vmem:[%s13967_s3 + $0x1e8] sm:$0xff] }
 0x258   : > { %v3543_v60 = vsel %vm2769_vm4, %v11602_v12, %v3542_v4  ;;  %4112 = vmatpush.bf16.msra.mxu3 %v10051_v31  ;;  %3994 = vmatpush.bf16.msra.mxu2 %v10041_v51  ;;  %v10050_v12 = vld [vmem:[%s13967_s3 + $0x230] sm:$0xff]  ;;  %v1928_v4 = vrot.slane %v1927_v13, 1  ;;  %v1942_v31 = vrot.slane %v1941_v49, 1  ;;  %v1947_v51 = vrot.slane %v1946_v37, 2 }
 0x259   : > { %3434 = vmatmul.bf16.gmra.mxu1 %v11380_v19  ;;  %v3544_v23 = vsel %vm2771_vm5, %v11631_v32, %v3543_v60  ;;  %v1960_v9 = vmax.f32 %v1958_v34, %v1959_v14  ;;  %v1922_v34 = vmax.f32 %v1920_v59, %v1921_v39  ;;  %v3489_v59 = vperm.slane %v2479_v6, 0 }
 0x25a   : > { %v11961_v17 = vpop.f32.mrf.mxu0  ;;  %3765 = vmatmul.bf16.gmra.mxu3 %v11950_v48  ;;  %v1953_v48 = vmax.f32 %v1951_v36, %v1952_v29  ;;  %v3551_v36 = vsel %vm2771_vm5, %v11837_v27, %v3550_v46  ;;  %v1935_v29 = vrot.slane %v1934_v2, 1  ;;  %v1929_v26 = vmax.f32 %v1927_v13, %v1928_v4  ;;  %v10032_v13 = vld [vmem:[%s13967_s3 + $0x1a0] sm:$0xff] }
 0x25b   : > { %v1961_v14 = vrot.slane %v1960_v9, 2  ;;  %v3552_v61 = vsel %vm2773_vm6, %v11857_v50, %v3551_v36  ;;  %v1943_v18 = vmax.f32 %v1941_v49, %v1942_v31  ;;  %v1948_v22 = vmax.f32 %v1946_v37, %v1947_v51  ;;  %3875 = vmatpush.bf16.msra.mxu1 %v10032_v13 }
 0x25c   : > { %4113 = vmatpush.bf16.msra.mxu3 %v10050_v12  ;;  %3995 = vmatpush.bf16.msra.mxu2 %v10040_v55  ;;  %v1954_v16 = vrot.slane %v1953_v48, 2  ;;  %v901_v12 = vadd.f32 %v11885_v33, %v11785_v40  ;;  %v1936_v39 = vmax.f32 %v1934_v2, %v1935_v29  ;;  %v10031_v40 = vld [vmem:[%s13967_s3 + $0x198] sm:$0xff]  ;;  %v2348_v49 = vmax.f32 %v1922_v34, 0.0 }
 0x25d   : > { %v2349_v37 = vmax.f32 %v1929_v26, 0.0  ;;  %v1962_v1 = vmax.f32 %v1960_v9, %v1961_v14  ;;  %v3498_v46 = vunpack.c.l.b16 %v3490_v28  ;;  %v913_v2 = vadd.f32 %v11885_v33, %v11928_v53 }
 0x25e   : > { %v3250_v32 = vpop.f32.mrf.mxu3  ;;  %3629 = vmatmul.bf16.gmra.mxu2 %v11954_v38  ;;  %v1955_v4 = vmax.f32 %v1953_v48, %v1954_v16  ;;  %v1969_v48 = vmax.f32 %v1967_v57, %v1968_v54  ;;  %v3497_v6 = vunpack.c.l.b16 %v3489_v59  ;;  %v2351_v36 = vmax.f32 %v1943_v18, 0.0 }
 0x25f   : > { %v11993_v41 = vadd.f32 %v3250_v32, %v3069_v3  ;;  %v3545_v3 = vsel %vm2773_vm6, %v11637_v21, %v3544_v23  ;;  %v10049_v21 = vld [vmem:[%s13967_s3 + $0x228] sm:$0xff]  ;;  %v10039_v23 = vld [vmem:[%s13967_s3 + $0x1d8] sm:$0xff]  ;;  %v3553_v32 = vsel %vm2775_vm7, %v12004_v11, %v3552_v61  ;;  %v1949_v29 = vrot.slane %v1948_v22, 1  ;;  %3876 = vmatpush.bf16.msra.mxu1 %v10031_v40 }
 0x260   : > { %v3546_v55 = vsel %vm2775_vm7, %v11859_v47, %v3545_v3  ;;  %4114 = vmatpush.bf16.msra.mxu3 %v10049_v21  ;;  %3996 = vmatpush.bf16.msra.mxu2 %v10039_v23  ;;  %v10038_v47 = vld [vmem:[%s13967_s3 + $0x1d0] sm:$0xff]  ;;  %v12044_v51 = vsel %vm2777_vm8, %v3498_v46, %v3553_v32  ;;  %v1956_v3 = vrot.slane %v1955_v4, 1  ;;  %v2492_v53 = vpack.c.bf16 %v2348_v49, %v2348_v49 }
 0x261   : > { %v12048_v34 = vsel %vm2777_vm8, %v3497_v6, %v3546_v55  ;;  %v2493_v16 = vpack.c.bf16 %v2349_v37, %v2349_v37  ;;  %v908_v26 = vadd.f32 %v11885_v33, %v11895_v58  ;;  %v1970_v14 = vrot.slane %v1969_v48, 1 }
 0x262   : > { %v917_v60 = vpop.f32.mrf.mxu0  ;;  %v12056_v54 = vpack.c.b16 %v12044_v51, %v12048_v34  ;;  %v12058_v21 = vpack.c.bf16 %v2351_v36, %v2351_v36  ;;  %v1950_v59 = vmax.f32 %v1948_v22, %v1949_v29  ;;  %v1957_v58 = vmax.f32 %v1955_v4, %v1956_v3  ;;  %v10029_v3 = vld [vmem:[%s13967_s3 + $0x188] sm:$0xff] }
 0x263   : > { %v918_v15 = vadd.f32 %v11885_v33, %v917_v60  ;;  %v2350_v60 = vmax.f32 %v1936_v39, 0.0  ;;  %v3673_v39 = vperm.slane %v2492_v53, 0  ;;  %v1971_v46 = vmax.f32 %v1969_v48, %v1970_v14 }
 0x264   : > { %4115 = vmatpush.bf16.msra.mxu3 %v10048_v30  ;;  %3997 = vmatpush.bf16.msra.mxu2 %v10038_v47  ;;  %14058 = vst [vmem:[#allocation38_spill] sm:$0xff] %v12056_v54  ;;  %v2352_v47 = vmax.f32 %v1950_v59, 0.0  ;;  %v2353_v48 = vmax.f32 %v1957_v58, 0.0 }
 0x265   : > { %v12012_v7 = vmax.f32 %v911_v35, %v918_v15  ;;  %v1963_v15 = vrot.slane %v1962_v1, 1  ;;  %v2494_v4 = vpack.c.bf16 %v2350_v60, %v2350_v60  ;;  %v10046_v60 = vld [vmem:[%s13967_s3 + $0x210] sm:$0xff] }
 0x266   : > { %v2497_v59 = vpack.c.bf16 %v2353_v48, %v2353_v48 }
 0x267   : > { %v1109_v35 = vrot.slane %v12012_v7, 4  ;;  %v1110_v31 = vrot.slane %v12012_v7, 6  ;;  %v1964_v32 = vmax.f32 %v1962_v1, %v1963_v15  ;;  %v10047_v1 = vld [vmem:[%s13967_s3 + $0x218] sm:$0xff]  ;;  %v2355_v15 = vmax.f32 %v1971_v46, 0.0 }
 0x268   : > { %4116 = vmatpush.bf16.msra.mxu3 %v10047_v1  ;;  %v3678_v1 = vperm.slane %v2497_v59, 0 }
 0x269   : > { %3439 = vmatmul.bf16.gmra.mxu1 %v11969_v63  ;;  %v2014_v28 = vsel %vm1243_vm1, %v1109_v35, -inf  ;;  %v2021_v13 = vsel %vm1243_vm1, %v1110_v31, -inf  ;;  %v10037_v35 = vld [vmem:[%s13967_s3 + $0x1c8] sm:$0xff]  ;;  %v2354_v36 = vmax.f32 %v1964_v32, 0.0 }
 0x26a   : > { %v920_v9 = vpop.f32.mrf.mxu0  ;;  %3770 = vmatmul.bf16.gmra.mxu3 %v12010_v42  ;;  %v2015_v30 = vrot.slane %v2014_v28, 4  ;;  %v2022_v49 = vrot.slane %v2021_v13, 4  ;;  %3998 = vmatpush.bf16.msra.mxu2 %v10037_v35  ;;  %v10045_v32 = vld [vmem:[%s13967_s3 + $0x208] sm:$0xff]  ;;  %v12130_v59 = vunpack.c.l.b16 %v3678_v1 }
 0x26b   : > { %v921_v57 = vadd.f32 %v11885_v33, %v920_v9  ;;  %v3362_v33 = vsel %vm2773_vm6, %v11837_v27, %v11942_v25  ;;  %v12069_v27 = vmax.f32 %v901_v12, %v908_v26  ;;  %v2496_v26 = vpack.c.bf16 %v2352_v47, %v2352_v47 }
 0x26c   : > { %v3363_v37 = vsel %vm2775_vm7, %v11857_v50, %v3362_v33  ;;  %v3674_v50 = vperm.slane %v2493_v16, 0  ;;  %v2016_v29 = vmax.f32 %v2014_v28, %v2015_v30  ;;  %v2023_v53 = vmax.f32 %v2021_v13, %v2022_v49  ;;  %4117 = vmatpush.bf16.msra.mxu3 %v10046_v60  ;;  %v10028_v30 = vld [vmem:[%s13967_s3 + $0x180] sm:$0xff] }
 0x26d   : > { %v983_v61 = vmax.f32 %v913_v2, %v921_v57  ;;  %v10030_v2 = vld [vmem:[%s13967_s3 + $0x190] sm:$0xff]  ;;  %v12084_v9 = vsel %vm2777_vm8, %v12004_v11, %v3363_v37  ;;  %v3681_v57 = vunpack.c.l.b16 %v3673_v39  ;;  %v10036_v11 = vld [vmem:[%s13967_s3 + $0x1c0] sm:$0xff]  ;;  %v1972_v14 = vsel %vm1243_vm1, %v12069_v27, -inf }
 0x26e   : > { %3634 = vmatmul.bf16.gmra.mxu2 %v12056_v54  ;;  %3877 = vmatpush.bf16.msra.mxu1 %v10030_v2  ;;  %v12099_v58 = vpack.c.b16 %v12084_v9, %v11874_v56  ;;  %v12101_v13 = vunpack.c.l.b16 %v3674_v50  ;;  %v3676_v39 = vperm.slane %v12058_v21, 0  ;;  %v1973_v49 = vrot.slane %v1972_v14, 4 }
 0x26f   : > { %v1111_v23 = vrot.slane %v983_v61, 2  ;;  %v1112_v18 = vrot.slane %v983_v61, 4  ;;  %v1113_v55 = vrot.slane %v983_v61, 6  ;;  %v2028_v40 = vsel %vm1243_vm1, %v983_v61, -inf  ;;  %3999 = vmatpush.bf16.msra.mxu2 %v10036_v11 }
 0x270   : > { %v2029_v6 = vrot.slane %v2028_v40, 4  ;;  %v3675_v61 = vperm.slane %v2494_v4, 0  ;;  %14059 = vst [vmem:[#allocation39_spill] sm:$0xff] %v12099_v58  ;;  %v2024_v37 = vrot.slane %v2023_v53, 2  ;;  %v3677_v47 = vperm.slane %v2496_v26, 0  ;;  %4118 = vmatpush.bf16.msra.mxu3 %v10045_v32 }
 0x271   : > { %v2035_v22 = vsel %vm1243_vm1, %v1111_v23, -inf  ;;  %v2042_v25 = vsel %vm1243_vm1, %v1112_v18, -inf  ;;  %v2049_v12 = vsel %vm1243_vm1, %v1113_v55, -inf  ;;  %v2017_v23 = vrot.slane %v2016_v29, 2 }
 0x272   : > { %v2036_v31 = vrot.slane %v2035_v22, 4  ;;  %v2043_v16 = vrot.slane %v2042_v25, 4  ;;  %v2050_v28 = vrot.slane %v2049_v12, 4  ;;  %v2030_v33 = vmax.f32 %v2028_v40, %v2029_v6  ;;  %3878 = vmatpush.bf16.msra.mxu1 %v10029_v3  ;;  %v9975_v40 = vld [vmem:[%s10558_s24 + $0x108] sm:$0xff] }
 0x273   : > { %v2498_v55 = vpack.c.bf16 %v2354_v36, %v2354_v36  ;;  %v12112_v4 = vunpack.c.l.b16 %v3675_v61  ;;  %7937 = vmatmul.msk.bf16.gmra.mxu0 %vm657_vm0, %v9975_v40  ;;  %v1105_v2 = vrot.slane %v12069_v27, 2  ;;  %v3689_v50 = vsel %vm2765_vm2, %v12101_v13, %v3681_v57 }
 0x274   : > { %v2037_v18 = vmax.f32 %v2035_v22, %v2036_v31  ;;  %v2044_v46 = vmax.f32 %v2042_v25, %v2043_v16  ;;  %v2499_v22 = vpack.c.bf16 %v2355_v15, %v2355_v15  ;;  %v2051_v21 = vmax.f32 %v2049_v12, %v2050_v28  ;;  %v10044_v12 = vld [vmem:[%s13967_s3 + $0x200] sm:$0xff] }
 0x275   : > { %v2031_v35 = vrot.slane %v2030_v33, 2  ;;  %v2018_v48 = vmax.f32 %v2016_v29, %v2017_v23  ;;  %v3679_v25 = vperm.slane %v2498_v55, 0  ;;  %v12118_v36 = vunpack.c.l.b16 %v3676_v39  ;;  %4119 = vmatpush.bf16.msra.mxu3 %v10044_v12 }
 0x276   : > { %v2038_v6 = vrot.slane %v2037_v18, 2  ;;  %3879 = vmatpush.bf16.msra.mxu1 %v10028_v30  ;;  %v1974_v31 = vmax.f32 %v1972_v14, %v1973_v49  ;;  %v2025_v60 = vmax.f32 %v2023_v53, %v2024_v37  ;;  %v2045_v3 = vrot.slane %v2044_v46, 2 }
 0x277   : > { %v3680_v16 = vperm.slane %v2499_v22, 0  ;;  %v12123_v15 = vunpack.c.l.b16 %v3677_v47  ;;  %v1106_v11 = vrot.slane %v12069_v27, 4  ;;  %v2052_v57 = vrot.slane %v2051_v21, 2 }
 0x278   : > { %v3690_v29 = vsel %vm2767_vm3, %v12112_v4, %v3689_v50  ;;  %v1107_v26 = vrot.slane %v12069_v27, 6  ;;  %v1979_v28 = vsel %vm1243_vm1, %v1105_v2, -inf  ;;  %v2032_v61 = vmax.f32 %v2030_v33, %v2031_v35 }
 0x279   : > { %3444 = vmatmul.bf16.gmra.mxu1 %v12099_v58  ;;  %v14060_v53 = vpack.c.b16 %v11061_v43, %v10912_v8  ;;  %v2019_v14 = vrot.slane %v2018_v48, 1  ;;  %v2039_v23 = vmax.f32 %v2037_v18, %v2038_v6  ;;  %v12135_v55 = vunpack.c.l.b16 %v3679_v25 }
 0x27a   : > { %v3691_v39 = vsel %vm2769_vm4, %v12118_v36, %v3690_v29  ;;  %v1975_v32 = vrot.slane %v1974_v31, 2  ;;  %v2026_v30 = vrot.slane %v2025_v60, 1  ;;  %v2046_v27 = vmax.f32 %v2044_v46, %v2045_v3 }
 0x27b   : > { %v12139_v40 = vunpack.c.l.b16 %v3680_v16  ;;  %v2053_v33 = vmax.f32 %v2051_v21, %v2052_v57  ;;  %v3692_v49 = vsel %vm2771_vm5, %v12123_v15, %v3691_v39  ;;  %v1980_v37 = vrot.slane %v1979_v28, 4  ;;  %v9976_v57 = vld [vmem:[%s10558_s24 + $0x110] sm:$0xff] }
 0x27c   : > { %v1993_v8 = vsel %vm1243_vm1, %v1107_v26, -inf  ;;  %v2033_v43 = vrot.slane %v2032_v61, 1  ;;  %v3693_v18 = vsel %vm2773_vm6, %v12130_v59, %v3692_v49  ;;  %v1986_v22 = vsel %vm1243_vm1, %v1106_v11, -inf }
 0x27d   : > { %v2020_v47 = vmax.f32 %v2018_v48, %v2019_v14  ;;  %v2040_v1 = vrot.slane %v2039_v23, 1  ;;  %v3694_v46 = vsel %vm2775_vm7, %v12135_v55, %v3693_v18  ;;  %v1976_v2 = vmax.f32 %v1974_v31, %v1975_v32  ;;  %v10059_v31 = vld [vmem:[%s13967_s3 + $0x278] sm:$0xff] }
 0x27e   : > { %4000 = vmatmul.bf16.vlgmr.msra.gmra.mxu2 %v14060_v53  ;;  %v2027_v21 = vmax.f32 %v2025_v60, %v2026_v30  ;;  %v2047_v35 = vrot.slane %v2046_v27, 1  ;;  %v12151_v50 = vsel %vm2777_vm8, %v12139_v40, %v3694_v46  ;;  %v1994_v6 = vrot.slane %v1993_v8, 4  ;;  %v10219_v60 = vld [vmem:[%s13969_s5 + $0x138] sm:$0xff]  ;;  %4232 = vmatpush.bf16.msrb.mxu1 %v10059_v31  ;;  %v10058_v30 = vld [vmem:[%s13967_s3 + $0x270] sm:$0xff]  ;;  %v14064_v46 = vld [vmem:[#allocation17_spill] sm:$0xff] }
 0x27f   : > { %v2054_v25 = vrot.slane %v2053_v33, 1  ;;  %v12155_v12 = vpack.c.b16 %v12151_v50, %v11803_v45  ;;  %v1987_v3 = vrot.slane %v1986_v22, 4  ;;  %v2034_v16 = vmax.f32 %v2032_v61, %v2033_v43  ;;  %v14061_v45 = vld [vmem:[#allocation5_spill] sm:$0xff]  ;;  %v10067_v61 = vld [vmem:[%s13967_s3 + $0x2b8] sm:$0xff]  ;;  %6608 = vmatpush.bf16.msrb.mxu0 %v10219_v60 }
 0x280   : > { %v2362_v48 = vmax.f32 %v2020_v47, 0.0  ;;  %v2041_v11 = vmax.f32 %v2039_v23, %v2040_v1  ;;  %v2363_v29 = vmax.f32 %v2027_v21, 0.0  ;;  %v2048_v26 = vmax.f32 %v2046_v27, %v2047_v35  ;;  %4367 = vmatpush.bf16.msrb.mxu2 %v10067_v61  ;;  %v14063_v1 = vld [vmem:[#allocation12_spill] sm:$0xff] }
 0x281   : > { %3775 = vmatmul.bf16.gmra.mxu3 %v12155_v12  ;;  %v14062_v53 = vpack.c.b16 %v11048_v62, %v14061_v45  ;;  %v1977_v14 = vrot.slane %v1976_v2, 1  ;;  %v1981_v23 = vmax.f32 %v1979_v28, %v1980_v37  ;;  %v1995_v39 = vmax.f32 %v1993_v8, %v1994_v6 }
 0x282   : > { %v2055_v32 = vmax.f32 %v2053_v33, %v2054_v25  ;;  %v2364_v27 = vmax.f32 %v2034_v16, 0.0  ;;  %v1988_v43 = vmax.f32 %v1986_v22, %v1987_v3  ;;  %v2506_v18 = vpack.c.bf16 %v2362_v48, %v2362_v48  ;;  %v10066_v33 = vld [vmem:[%s13967_s3 + $0x2b0] sm:$0xff]  ;;  %4233 = vmatpush.bf16.msrb.mxu1 %v10058_v30 }
 0x283   : > { %7938 = vmatmul.msk.bf16.gmra.mxu0 %vm657_vm0, %v9976_v57  ;;  %v1978_v62 = vmax.f32 %v1976_v2, %v1977_v14  ;;  %v1982_v49 = vrot.slane %v1981_v23, 2  ;;  %v2365_v47 = vmax.f32 %v2041_v11, 0.0  ;;  %v12177_v28 = vpack.c.b16 %v14064_v46, %v14063_v1 }
 0x284   : > { %v2507_v37 = vpack.c.bf16 %v2363_v29, %v2363_v29  ;;  %v2366_v8 = vmax.f32 %v2048_v26, 0.0  ;;  %v2367_v6 = vmax.f32 %v2055_v32, 0.0  ;;  %v1989_v25 = vrot.slane %v1988_v43, 2  ;;  %4368 = vmatpush.bf16.msrb.mxu2 %v10066_v33 }
 0x285   : > { %v1983_v21 = vmax.f32 %v1981_v23, %v1982_v49  ;;  %v2356_v35 = vmax.f32 %v1978_v62, 0.0  ;;  %v1996_v2 = vrot.slane %v1995_v39, 2  ;;  %v2508_v16 = vpack.c.bf16 %v2364_v27, %v2364_v27 }
 0x286   : > { %v4296_v48 = vperm.slane %v2506_v18, 0  ;;  %v2509_v11 = vpack.c.bf16 %v2365_v47, %v2365_v47  ;;  %v1990_v57 = vmax.f32 %v1988_v43, %v1989_v25  ;;  %v4297_v31 = vperm.slane %v2507_v37, 0 }
 0x287   : > { %v1984_v22 = vrot.slane %v1983_v21, 1  ;;  %v2500_v3 = vpack.c.bf16 %v2356_v35, %v2356_v35  ;;  %v2510_v60 = vpack.c.bf16 %v2366_v8, %v2366_v8  ;;  %v2511_v26 = vpack.c.bf16 %v2367_v6, %v2367_v6  ;;  %v14066_v35 = vld [vmem:[#allocation15_spill] sm:$0xff] }
 0x288   : > { %v1997_v61 = vmax.f32 %v1995_v39, %v1996_v2  ;;  %v4298_v14 = vperm.slane %v2508_v16, 0  ;;  %v4169_v30 = vsel %vm2765_vm2, %v12130_v59, %v12123_v15  ;;  %v4299_v27 = vperm.slane %v2509_v11, 0  ;;  %v10065_v11 = vld [vmem:[%s13967_s3 + $0x2a8] sm:$0xff] }
 0x289   : > { %3880 = vmatmul.bf16.vlgmr.msra.gmra.mxu1 %v14062_v53  ;;  %v1985_v45 = vmax.f32 %v1983_v21, %v1984_v22  ;;  %v3807_v29 = vperm.slane %v2500_v3, 0  ;;  %v1991_v53 = vrot.slane %v1990_v57, 1  ;;  %v4170_v49 = vsel %vm2767_vm3, %v12135_v55, %v4169_v30  ;;  %v14065_v21 = vld [vmem:[#allocation8_spill] sm:$0xff]  ;;  %v14067_v22 = vld [vmem:[#allocation11_spill] sm:$0xff]  ;;  %4369 = vmatpush.bf16.msrb.mxu2 %v10065_v11 }
 0x28a   : > { %v12190_v43 = vunpack.c.l.b16 %v4296_v48  ;;  %v12192_v18 = vunpack.c.l.b16 %v4297_v31  ;;  %v4300_v47 = vperm.slane %v2510_v60, 0  ;;  %v4301_v1 = vperm.slane %v2511_v26, 0  ;;  %v10075_v48 = vld [vmem:[%s13967_s3 + $0x2f8] sm:$0xff] }
 0x28b   : > { %v2357_v23 = vmax.f32 %v1985_v45, 0.0  ;;  %v12183_v32 = vunpack.c.l.b16 %v3807_v29  ;;  %v1992_v62 = vmax.f32 %v1990_v57, %v1991_v53  ;;  %v1998_v33 = vrot.slane %v1997_v61, 1  ;;  %v9977_v57 = vld [vmem:[%s10558_s24 + $0x118] sm:$0xff]  ;;  %v10057_v29 = vld [vmem:[%s13967_s3 + $0x268] sm:$0xff]  ;;  %4481 = vmatpush.bf16.msrb.mxu3 %v10075_v48  ;;  %s377_s24 = sand.u32 1, %s10429_s18  }
 0x28c   : > { %v4171_v37 = vsel %vm2769_vm4, %v12139_v40, %v4170_v49  ;;  %v12196_v8 = vunpack.c.l.b16 %v4298_v14  ;;  %v12200_v6 = vpack.c.b16 %v14066_v35, %v14065_v21  ;;  %v12204_v16 = vunpack.c.l.b16 %v4299_v27  ;;  %v10074_v14 = vld [vmem:[%s13967_s3 + $0x2f0] sm:$0xff]  ;;  %4234 = vmatpush.bf16.msrb.mxu1 %v10057_v29  ;;  %v10063_v35 = vld [vmem:[%s13967_s3 + $0x298] sm:$0xff]  ;;  %s378_s25 = scalar_lea.vmem [#allocation2], %s377_s24  ;;  %s7680_s12 = scalar_lea.sflag [#allocation3], %s377_s24 }
 0x28d   : > { %v2501_v39 = vpack.c.bf16 %v2357_v23, %v2357_v23  ;;  %v2358_v46 = vmax.f32 %v1992_v62, 0.0  ;;  %v4172_v2 = vsel %vm2771_vm5, %v12183_v32, %v4171_v37  ;;  %v14068_v3 = vpack.c.b16 %v14067_v22, %v11043_v20  ;;  %v10064_v23 = vld [vmem:[%s13967_s3 + $0x2a0] sm:$0xff]  ;;  %v10073_v37 = vld [vmem:[%s13967_s3 + $0x2e8] sm:$0xff]  ;;  %s7690_s29 = sshll.u32 %s378_s25, 4  ;;  %s7691_s29 = int_to_ptr.vmem [resolvable:$true] %s7690_s29 }
 0x28e   : > { %4005 = vmatmul.bf16.gmra.mxu2 %v12177_v28  ;;  %v3929_v31 = vsel %vm2765_vm2, %v12118_v36, %v12112_v4  ;;  %v4538_v60 = vsel %vm2765_vm2, %v12192_v18, %v12190_v43  ;;  %v12222_v20 = vunpack.c.l.b16 %v4300_v47  ;;  %v12230_v53 = vunpack.c.l.b16 %v4301_v1 }
 0x28f   : > { %v3927_v25 = vperm.slane %v2501_v39, 0  ;;  %v2502_v45 = vpack.c.bf16 %v2358_v46, %v2358_v46  ;;  %v4539_v26 = vsel %vm2767_vm3, %v12196_v8, %v4538_v60  ;;  %v1999_v27 = vmax.f32 %v1997_v61, %v1998_v33  ;;  %v10056_v39 = vld [vmem:[%s13967_s3 + $0x260] sm:$0xff]  ;;  %v14069_v61 = vld [vmem:[#allocation23_spill] sm:$0xff]  ;;  %4482 = vmatpush.bf16.msrb.mxu3 %v10074_v14  ;;  %4370 = vmatpush.bf16.msrb.mxu2 %v10064_v23 }
 0x290   : > { %v4540_v30 = vsel %vm2769_vm4, %v12204_v16, %v4539_v26  ;;  %v3930_v49 = vsel %vm2767_vm3, %v12123_v15, %v3929_v31  ;;  %v12256_v33 = vpack.c.b16 %v11656_v0, %v14069_v61  ;;  %4235 = vmatpush.bf16.msrb.mxu1 %v10056_v39  ;;  %v10055_v0 = vld [vmem:[%s13967_s3 + $0x258] sm:$0xff]  ;;  %v3809_v31 = vsel %vm2765_vm2, %v12112_v4, %v12101_v13  ;;  %v10062_v60 = vld [vmem:[%s13967_s3 + $0x290] sm:$0xff]  ;;  %v12314_v61 = vpop.f32.mrf.mxu2 }
 0x291   : > { %4120 = vmatmul.bf16.vlgmr.msra.gmra.mxu3 %v14068_v3  ;;  %v12241_v62 = vunpack.c.l.b16 %v3927_v25  ;;  %v4541_v47 = vsel %vm2771_vm5, %v12222_v20, %v4540_v30  ;;  %v4047_v1 = vperm.slane %v2502_v45, 0  ;;  %v3931_v21 = vsel %vm2769_vm4, %v12130_v59, %v3930_v49  ;;  %v14070_v4 = vld [vmem:[#allocation20_spill] sm:$0xff]  ;;  %v10054_v39 = vld [vmem:[%s13967_s3 + $0x250] sm:$0xff] }
 0x292   : > { %v12252_v46 = vsel %vm2773_vm6, %v12230_v53, %v4541_v47  ;;  %v2359_v25 = vmax.f32 %v1999_v27, 0.0  ;;  %v3932_v11 = vsel %vm2771_vm5, %v12135_v55, %v3931_v21  ;;  %v3810_v14 = vsel %vm2767_vm3, %v12118_v36, %v3809_v31  ;;  %v14071_v27 = vld [vmem:[#allocation22_spill] sm:$0xff]  ;;  %v10071_v47 = vld [vmem:[%s13967_s3 + $0x2d8] sm:$0xff] }
 0x293   : > { %7939 = vmatmul.msk.bf16.gmra.mxu0 %vm657_vm0, %v9977_v57  ;;  %v12270_v22 = vunpack.c.l.b16 %v4047_v1  ;;  %v4173_v3 = vsel %vm2773_vm6, %v12241_v62, %v4172_v2  ;;  %4483 = vmatpush.bf16.msrb.mxu3 %v10073_v37  ;;  %v10072_v57 = vld [vmem:[%s13967_s3 + $0x2e0] sm:$0xff]  ;;  %v3933_v29 = vsel %vm2773_vm6, %v12139_v40, %v3932_v11  ;;  %v12296_v23 = vpack.c.b16 %v11643_v10, %v14070_v4  ;;  %v10061_v10 = vld [vmem:[%s13967_s3 + $0x288] sm:$0xff]  ;;  %v10070_v21 = vld [vmem:[%s13967_s3 + $0x2d0] sm:$0xff] }
 0x294   : > { %v2503_v48 = vpack.c.bf16 %v2359_v25, %v2359_v25  ;;  %4371 = vmatpush.bf16.msrb.mxu2 %v10063_v35  ;;  %4236 = vmatpush.bf16.msrb.mxu1 %v10055_v0  ;;  %v3934_v30 = vsel %vm2775_vm7, %v12183_v32, %v3933_v29  ;;  %v3811_v49 = vsel %vm2769_vm4, %v12123_v15, %v3810_v14  ;;  %v1108_v1 = vrot.slane %v12012_v7, 2  ;;  %v10053_v35 = vld [vmem:[%s13967_s3 + $0x248] sm:$0xff]  ;;  %v10068_v14 = vld [vmem:[%s13967_s3 + $0x2c0] sm:$0xff] }
 0x295   : > { %v4174_v2 = vsel %vm2775_vm7, %v12270_v22, %v4173_v3  ;;  %v12318_v37 = vsel %vm2777_vm8, %v12241_v62, %v3934_v30  ;;  %v3812_v25 = vsel %vm2771_vm5, %v12130_v59, %v3811_v49  ;;  %v2000_v0 = vsel %vm1243_vm1, %v12012_v7, -inf  ;;  %v10060_v3 = vld [vmem:[%s13967_s3 + $0x280] sm:$0xff]  ;;  %v10069_v7 = vld [vmem:[%s13967_s3 + $0x2c8] sm:$0xff] }
 0x296   : > { %v4167_v45 = vperm.slane %v2503_v48, 0  ;;  %v2007_v48 = vsel %vm1243_vm1, %v1108_v1, -inf  ;;  %v12336_v11 = vpack.c.b16 %v12318_v37, %v11864_v52  ;;  %v3813_v31 = vsel %vm2773_vm6, %v12135_v55, %v3812_v25 }
 0x297   : > { %4484 = vmatpush.bf16.msrb.mxu3 %v10072_v57  ;;  %v12338_v57 = vpop.f32.mrf.mxu1  ;;  %v2008_v52 = vrot.slane %v2007_v48, 4  ;;  %v4049_v29 = vsel %vm2765_vm2, %v12123_v15, %v12118_v36  ;;  %v12367_v15 = vpop.f32.mrf.mxu3 }
 0x298   : > { %v4168_v26 = vunpack.c.l.b16 %v4167_v45  ;;  %4372 = vmatpush.bf16.msrb.mxu2 %v10062_v60  ;;  %4237 = vmatpush.bf16.msrb.mxu1 %v10054_v39  ;;  %v10052_v60 = vld [vmem:[%s13967_s3 + $0x240] sm:$0xff]  ;;  %v2001_v45 = vrot.slane %v2000_v0, 4  ;;  %v12365_v39 = vpack.c.b16 %v11874_v56, %v11679_v24 }
 0x299   : > { %3885 = vmatmul.bf16.gmra.mxu1 %v12200_v6  ;;  %v2009_v30 = vmax.f32 %v2007_v48, %v2008_v52  ;;  %v14074_v52 = vld [vmem:[#allocation7_spill] sm:$0xff] }
 0x29a   : > { %v12292_v13 = vsel %vm2777_vm8, %v4168_v26, %v4174_v2  ;;  %v3814_v2 = vsel %vm2775_vm7, %v12139_v40, %v3813_v31  ;;  %v2002_v4 = vmax.f32 %v2000_v0, %v2001_v45  ;;  %14072 = vst [vmem:[#allocation5_spill] sm:$0xff] %v12365_v39 }
 0x29b   : > { %4485 = vmatpush.bf16.msrb.mxu3 %v10071_v47  ;;  %v12359_v49 = vsel %vm2777_vm8, %v12183_v32, %v3814_v2  ;;  %v4050_v47 = vsel %vm2767_vm3, %v12130_v59, %v4049_v29  ;;  %v2010_v0 = vrot.slane %v2009_v30, 2 }
 0x29c   : > { %4373 = vmatpush.bf16.msrb.mxu2 %v10061_v10  ;;  %4238 = vmatpush.bf16.msrb.mxu1 %v10053_v35  ;;  %v2003_v10 = vrot.slane %v2002_v4, 2  ;;  %v4051_v25 = vsel %vm2769_vm4, %v12135_v55, %v4050_v47  ;;  %v4766_v55 = vsel %vm2765_vm2, %v12204_v16, %v12196_v8 }
 0x29d   : > { %v4052_v24 = vsel %vm2771_vm5, %v12139_v40, %v4051_v25 }
 0x29e   : > { %4010 = vmatmul.bf16.gmra.mxu2 %v12256_v33  ;;  %v2004_v59 = vmax.f32 %v2002_v4, %v2003_v10  ;;  %v4053_v48 = vsel %vm2773_vm6, %v12183_v32, %v4052_v24 }
 0x29f   : > { %4486 = vmatpush.bf16.msrb.mxu3 %v10070_v21  ;;  %v14073_v21 = vld [vmem:[#allocation30_spill] sm:$0xff]  ;;  %v4054_v40 = vsel %vm2775_vm7, %v12241_v62, %v4053_v48 }
 0x2a0   : > { %4374 = vmatpush.bf16.msrb.mxu2 %v10060_v3  ;;  %4239 = vmatpush.bf16.msrb.mxu1 %v10052_v60  ;;  %v12371_v35 = vpack.c.b16 %v12359_v49, %v14073_v21  ;;  %v2011_v3 = vmax.f32 %v2009_v30, %v2010_v0  ;;  %v12397_v4 = vsel %vm2777_vm8, %v12270_v22, %v4054_v40  ;;  %v14077_v48 = vld [vmem:[#allocation10_spill] sm:$0xff] }
 0x2a1   : > { %4125 = vmatmul.bf16.gmra.mxu3 %v14071_v27  ;;  %v14078_v22 = vld [vmem:[#allocation6_spill] sm:$0xff] }
 0x2a2   : > { %v2012_v2 = vrot.slane %v2011_v3, 1  ;;  %v10090_v40 = vld [vmem:[%s13967_s3 + $0x370] sm:$0xff] }
 0x2a3   : > { %4487 = vmatpush.bf16.msrb.mxu3 %v10069_v7  ;;  %v2005_v7 = vrot.slane %v2004_v59, 1 }
 0x2a4   : > { %v2013_v47 = vmax.f32 %v2011_v3, %v2012_v2  ;;  %v10091_v3 = vld [vmem:[%s13967_s3 + $0x378] sm:$0xff]  ;;  %v10082_v2 = vld [vmem:[%s13967_s3 + $0x330] sm:$0xff] }
 0x2a5   : > { %v2006_v30 = vmax.f32 %v2004_v59, %v2005_v7  ;;  %v14080_v7 = vld [vmem:[#allocation26_spill] sm:$0xff]  ;;  %4709 = vmatpush.bf16.msra.mxu2 %v10091_v3 }
 0x2a6   : > { %v2361_v0 = vmax.f32 %v2013_v47, 0.0 }
 0x2a7   : > { %4488 = vmatpush.bf16.msrb.mxu3 %v10068_v14  ;;  %v2360_v25 = vmax.f32 %v2006_v30, 0.0  ;;  %v922_v30 = vpop.f32.mrf.mxu0 }
 0x2a9   : > { %3890 = vmatmul.bf16.gmra.mxu1 %v12296_v23  ;;  %4710 = vmatpush.bf16.msra.mxu2 %v10090_v40  ;;  %v10099_v40 = vld [vmem:[%s13967_s3 + $0x3b8] sm:$0xff] }
 0x2ab   : > { %4823 = vmatpush.bf16.msra.mxu3 %v10099_v40 }
 0x2ae   : > { %4015 = vmatmul.bf16.gmra.mxu2 %v12336_v11 }
 0x2b1   : > { %v3073_v26 = vpop.f32.mrf.mxu2  ;;  %4130 = vmatmul.bf16.gmra.mxu3 %v12365_v39 }
 0x2b6   : > { %v2908_v36 = vpop.f32.mrf.mxu1 }
 0x2b7   : > { %v3074_v1 = vadd.f32 %v3073_v26, %v2908_v36  ;;  %v4767_v26 = vsel %vm2767_vm3, %v12222_v20, %v4766_v55  ;;  %v12401_v36 = vpack.c.b16 %v12397_v4, %v12084_v9  ;;  %v10083_v9 = vld [vmem:[%s13967_s3 + $0x338] sm:$0xff]  ;;  %v2504_v55 = vpack.c.bf16 %v2360_v25, %v2360_v25  ;;  %v14083_v25 = vld [vmem:[#allocation18_spill] sm:$0xff] }
 0x2b8   : > { %v12393_v32 = vsel %vm2769_vm4, %v12230_v53, %v4767_v26  ;;  %4595 = vmatpush.bf16.msra.mxu1 %v10083_v9  ;;  %v14082_v26 = vld [vmem:[#allocation27_spill] sm:$0xff] }
 0x2b9   : > { %3895 = vmatmul.bf16.gmra.mxu1 %v12371_v35  ;;  %v3075_v56 = vpop.f32.mrf.mxu2  ;;  %14075 = vst [vmem:[#allocation12_spill] sm:$0xff] %v12401_v36 }
 0x2bc   : > { %4596 = vmatpush.bf16.msra.mxu1 %v10082_v2 }
 0x2bd   : > { %v3255_v60 = vpop.f32.mrf.mxu3 }
 0x2be   : > { %v2910_v31 = vpop.f32.mrf.mxu1  ;;  %4375 = vmatmul.bf16.vlgmr.msrb.gmra.mxu2 %v14074_v52  ;;  %v12387_v29 = vadd.f32 %v3255_v60, %v3074_v1  ;;  %v14076_v1 = vld [vmem:[#allocation14_spill] sm:$0xff]  ;;  %v14081_v60 = vld [vmem:[#allocation25_spill] sm:$0xff] }
 0x2bf   : > { %v3076_v45 = vadd.f32 %v3075_v56, %v2910_v31  ;;  %v14079_v31 = vpack.c.b16 %v14077_v48, %v14078_v22  ;;  %v3061_v52 = vadd.f32 %v14081_v60, %v14080_v7 }
 0x2c1   : > { %v3620_v14 = vpop.f32.mrf.mxu2  ;;  %4135 = vmatmul.bf16.gmra.mxu3 %v12401_v36 }
 0x2c5   : > { %v3257_v10 = vpop.f32.mrf.mxu3 }
 0x2c6   : > { %v3430_v62 = vpop.f32.mrf.mxu1  ;;  %v12405_v24 = vadd.f32 %v3257_v10, %v3076_v45  ;;  %v2505_v45 = vpack.c.bf16 %v2361_v0, %v2361_v0  ;;  %v4294_v0 = vperm.slane %v2504_v55, 0 }
 0x2c7   : > { %v3450_v21 = vadd.f32 %v3430_v62, %v14076_v1  ;;  %v12428_v62 = vld [vmem:[%s13966_s2] ss:$0 sm:$0xff] }
 0x2c8   : > { %v916_v10 = vadd.f32 %v12428_v62, %v11961_v17  ;;  %v4295_v48 = vperm.slane %v2505_v45, 0  ;;  %v923_v22 = vadd.f32 %v12428_v62, %v922_v30  ;;  %v4302_v7 = vunpack.c.l.b16 %v4294_v0  ;;  %v14085_v45 = vld [vmem:[#allocation9_spill] sm:$0xff] }
 0x2c9   : > { %v3640_v56 = vadd.f32 %v3620_v14, %v3450_v21  ;;  %4240 = vmatmul.bf16.vlgmr.msrb.gmra.mxu1 %v14079_v31  ;;  %v3622_v59 = vpop.f32.mrf.mxu2  ;;  %v3261_v14 = vadd.f32 %v14082_v26, %v3061_v52  ;;  %v14084_v26 = vld [vmem:[#allocation28_spill] sm:$0xff]  ;;  %v10089_v30 = vld [vmem:[%s13967_s3 + $0x368] sm:$0xff] }
 0x2ca   : > { %v12436_v60 = vunpack.c.l.b16 %v4295_v48  ;;  %v12438_v52 = vmax.f32 %v916_v10, %v923_v22  ;;  %v10098_v48 = vld [vmem:[%s13967_s3 + $0x3b0] sm:$0xff]  ;;  %4711 = vmatpush.bf16.msra.mxu2 %v10089_v30 }
 0x2cb   : > { %v14087_v22 = vld [vmem:[#allocation34_spill] sm:$0xff]  ;;  %4824 = vmatpush.bf16.msra.mxu3 %v10098_v48  ;;  %v10087_v48 = vld [vmem:[%s13967_s3 + $0x358] sm:$0xff] }
 0x2cc   : > { %v4310_v55 = vsel %vm2765_vm2, %v12436_v60, %v4302_v7 }
 0x2cd   : > { %v3761_v21 = vpop.f32.mrf.mxu3 }
 0x2ce   : > { %v3432_v47 = vpop.f32.mrf.mxu1  ;;  %4380 = vmatmul.bf16.gmra.mxu2 %v14083_v25  ;;  %v12434_v31 = vadd.f32 %v3761_v21, %v3640_v56  ;;  %v2056_v56 = vsel %vm1243_vm1, %v12438_v52, -inf  ;;  %v10081_v21 = vld [vmem:[%s13967_s3 + $0x328] sm:$0xff] }
 0x2cf   : > { %v3451_v1 = vadd.f32 %v3432_v47, %v3261_v14  ;;  %4597 = vmatpush.bf16.msra.mxu1 %v10081_v21 }
 0x2d1   : > { %v3641_v9 = vadd.f32 %v3622_v59, %v3451_v1  ;;  %v3625_v3 = vpop.f32.mrf.mxu2  ;;  %4489 = vmatmul.bf16.vlgmr.msrb.gmra.mxu3 %v14085_v45  ;;  %v10218_v59 = vld [vmem:[%s13969_s5 + $0x130] sm:$0xff]  ;;  %v12475_v45 = vpop.f32.mrf.mxu0 }
 0x2d2   : > { %v14086_v1 = vld [vmem:[#allocation19_spill] sm:$0xff]  ;;  %6609 = vmatpush.bf16.msrb.mxu0 %v10218_v59 }
 0x2d5   : > { %v3763_v47 = vpop.f32.mrf.mxu3 }
 0x2d6   : > { %v3435_v17 = vpop.f32.mrf.mxu1  ;;  %v12446_v2 = vadd.f32 %v3763_v47, %v3641_v9  ;;  %v14088_v9 = vld [vmem:[#allocation33_spill] sm:$0xff] }
 0x2d7   : > { %v3452_v14 = vadd.f32 %v3435_v17, %v14084_v26  ;;  %v3066_v7 = vadd.f32 %v14088_v9, %v14087_v22  ;;  %v4311_v17 = vsel %vm2767_vm3, %v12190_v43, %v4310_v55  ;;  %v10080_v26 = vld [vmem:[%s13967_s3 + $0x320] sm:$0xff]  ;;  %v10097_v55 = vld [vmem:[%s13967_s3 + $0x3a8] sm:$0xff] }
 0x2d8   : > { %v4312_v59 = vsel %vm2769_vm4, %v12192_v18, %v4311_v17  ;;  %v14089_v9 = vld [vmem:[#allocation29_spill] sm:$0xff]  ;;  %4598 = vmatpush.bf16.msra.mxu1 %v10080_v26  ;;  %4825 = vmatpush.bf16.msra.mxu3 %v10097_v55 }
 0x2d9   : > { %v3642_v10 = vadd.f32 %v3625_v3, %v3452_v14  ;;  %4245 = vmatmul.bf16.gmra.mxu1 %v14086_v1  ;;  %v3627_v0 = vpop.f32.mrf.mxu2  ;;  %v2057_v3 = vrot.slane %v2056_v56, 4  ;;  %v10088_v14 = vld [vmem:[%s13967_s3 + $0x360] sm:$0xff]  ;;  %v3263_v47 = vadd.f32 %v11944_v44, %v3066_v7  ;;  %v10079_v44 = vld [vmem:[%s13967_s3 + $0x318] sm:$0xff]  ;;  %v4313_v17 = vsel %vm2771_vm5, %v12196_v8, %v4312_v59  ;;  %v12503_v55 = vpop.f32.mrf.mxu0 }
 0x2da   : > { %4712 = vmatpush.bf16.msra.mxu2 %v10088_v14  ;;  %v10096_v26 = vld [vmem:[%s13967_s3 + $0x3a0] sm:$0xff]  ;;  %v10086_v14 = vld [vmem:[%s13967_s3 + $0x350] sm:$0xff] }
 0x2db   : > { %v2058_v30 = vmax.f32 %v2056_v56, %v2057_v3 }
 0x2dc   : > { %4599 = vmatpush.bf16.msra.mxu1 %v10079_v44  ;;  %4826 = vmatpush.bf16.msra.mxu3 %v10096_v26  ;;  %v12508_v44 = vpack.c.b16 %v12048_v34, %v11670_v5  ;;  %v10095_v26 = vld [vmem:[%s13967_s3 + $0x398] sm:$0xff]  ;;  %v3071_v5 = vadd.f32 %v12314_v61, %v12338_v57  ;;  %v10077_v57 = vld [vmem:[%s13967_s3 + $0x308] sm:$0xff] }
 0x2dd   : > { %v3766_v22 = vpop.f32.mrf.mxu3 }
 0x2de   : > { %v3437_v40 = vpop.f32.mrf.mxu1  ;;  %4385 = vmatmul.bf16.gmra.mxu2 %v14089_v9  ;;  %v12486_v7 = vadd.f32 %v3766_v22, %v3642_v10  ;;  %v4314_v10 = vsel %vm2773_vm6, %v12204_v16, %v4313_v17  ;;  %14090 = vst [vmem:[#allocation17_spill] sm:$0xff] %v12508_v44 }
 0x2df   : > { %v3453_v21 = vadd.f32 %v3437_v40, %v3263_v47  ;;  %v2059_v47 = vrot.slane %v2058_v30, 2  ;;  %4713 = vmatpush.bf16.msra.mxu2 %v10087_v48  ;;  %v14091_v48 = vld [vmem:[#allocation21_spill] sm:$0xff] }
 0x2e0   : > { %4827 = vmatpush.bf16.msra.mxu3 %v10095_v26 }
 0x2e1   : > { %v3643_v56 = vadd.f32 %v3627_v0, %v3453_v21  ;;  %v3630_v3 = vpop.f32.mrf.mxu2  ;;  %v4315_v0 = vsel %vm2775_vm7, %v12222_v20, %v4314_v10  ;;  %v2060_v59 = vmax.f32 %v2058_v30, %v2059_v47  ;;  %4494 = vmatmul.bf16.gmra.mxu3 %v14091_v48  ;;  %v10094_v47 = vld [vmem:[%s13967_s3 + $0x390] sm:$0xff] }
 0x2e3   : > { %4714 = vmatpush.bf16.msra.mxu2 %v10086_v14  ;;  %v2061_v34 = vrot.slane %v2060_v59, 1  ;;  %v3265_v14 = vadd.f32 %v12367_v15, %v3071_v5  ;;  %v4424_v5 = vsel %vm2765_vm2, %v12190_v43, %v12436_v60  ;;  %v1114_v43 = vrot.slane %v12438_v52, 2 }
 0x2e4   : > { %4828 = vmatpush.bf16.msra.mxu3 %v10094_v47  ;;  %v10092_v47 = vld [vmem:[%s13967_s3 + $0x380] sm:$0xff] }
 0x2e5   : > { %v3768_v22 = vpop.f32.mrf.mxu3 }
 0x2e6   : > { %v3440_v40 = vpop.f32.mrf.mxu1  ;;  %v12511_v17 = vadd.f32 %v3768_v22, %v3643_v56  ;;  %v10078_v56 = vld [vmem:[%s13967_s3 + $0x310] sm:$0xff] }
 0x2e7   : > { %v3454_v21 = vadd.f32 %v3440_v40, %v11993_v41  ;;  %v12519_v41 = vsel %vm2777_vm8, %v12230_v53, %v4315_v0  ;;  %4600 = vmatpush.bf16.msra.mxu1 %v10078_v56  ;;  %v10084_v0 = vld [vmem:[%s13967_s3 + $0x340] sm:$0xff]  ;;  %v12552_v56 = vpop.f32.mrf.mxu0 }
 0x2e8   : > { %v12535_v40 = vpack.c.b16 %v12519_v41, %v12151_v50  ;;  %v10093_v50 = vld [vmem:[%s13967_s3 + $0x388] sm:$0xff] }
 0x2e9   : > { %v3644_v10 = vadd.f32 %v3630_v3, %v3454_v21  ;;  %4250 = vmatmul.bf16.gmra.mxu1 %v12508_v44  ;;  %v3632_v30 = vpop.f32.mrf.mxu2  ;;  %v10085_v3 = vld [vmem:[%s13967_s3 + $0x348] sm:$0xff]  ;;  %v2062_v21 = vmax.f32 %v2060_v59, %v2061_v34  ;;  %4829 = vmatpush.bf16.msra.mxu3 %v10093_v50  ;;  %v4425_v34 = vsel %vm2767_vm3, %v12192_v18, %v4424_v5  ;;  %v2063_v50 = vsel %vm1243_vm1, %v1114_v43, -inf }
 0x2ea   : > { %14092 = vst [vmem:[#allocation8_spill] sm:$0xff] %v12535_v40  ;;  %4715 = vmatpush.bf16.msra.mxu2 %v10085_v3 }
 0x2eb   : > { %4601 = vmatpush.bf16.msra.mxu1 %v10077_v57  ;;  %v2368_v59 = vmax.f32 %v2062_v21, 0.0  ;;  %v14094_v21 = vld [vmem:[#allocation31_spill] sm:$0xff] }
 0x2ed   : > { %v3771_v26 = vpop.f32.mrf.mxu3  ;;  %4830 = vmatpush.bf16.msra.mxu3 %v10092_v47 }
 0x2ee   : > { %v3442_v61 = vpop.f32.mrf.mxu1  ;;  %4390 = vmatmul.bf16.gmra.mxu2 %v12535_v40  ;;  %v12547_v15 = vadd.f32 %v3771_v26, %v3644_v10  ;;  %v10076_v10 = vld [vmem:[%s13967_s3 + $0x300] sm:$0xff] }
 0x2ef   : > { %v3455_v22 = vadd.f32 %v3442_v61, %v3265_v14  ;;  %4716 = vmatpush.bf16.msra.mxu2 %v10084_v0  ;;  %4602 = vmatpush.bf16.msra.mxu1 %v10076_v10  ;;  %v4426_v14 = vsel %vm2769_vm4, %v12196_v8, %v4425_v34  ;;  %v12568_v0 = vpack.c.b16 %v12292_v13, %v12044_v51  ;;  %v932_v10 = vpop.f32.mrf.mxu0  ;;  %v2064_v51 = vrot.slane %v2063_v50, 4 }
 0x2f0   : > { %v4427_v5 = vsel %vm2771_vm5, %v12204_v16, %v4426_v14 }
 0x2f1   : > { %v3645_v3 = vadd.f32 %v3632_v30, %v3455_v22  ;;  %v3635_v48 = vpop.f32.mrf.mxu2  ;;  %v2512_v30 = vpack.c.bf16 %v2368_v59, %v2368_v59  ;;  %14093 = vst [vmem:[#allocation15_spill] sm:$0xff] %v12568_v0  ;;  %4499 = vmatmul.bf16.gmra.mxu3 %v14094_v21  ;;  %v4428_v47 = vsel %vm2773_vm6, %v12222_v20, %v4427_v5 }
 0x2f2   : > { %v4429_v43 = vsel %vm2775_vm7, %v12230_v53, %v4428_v47  ;;  %v2065_v14 = vmax.f32 %v2063_v50, %v2064_v51  ;;  %v14096_v51 = vld [vmem:[#allocation13_spill] sm:$0xff] }
 0x2f3   : > { %v4422_v34 = vperm.slane %v2512_v30, 0 }
 0x2f4   : > { %v2066_v5 = vrot.slane %v2065_v14, 2 }
 0x2f5   : > { %v3773_v57 = vpop.f32.mrf.mxu3 }
 0x2f6   : > { %v3445_v60 = vpop.f32.mrf.mxu1  ;;  %v12571_v22 = vadd.f32 %v3773_v57, %v3645_v3  ;;  %v2067_v50 = vmax.f32 %v2065_v14, %v2066_v5 }
 0x2f7   : > { %v3456_v61 = vadd.f32 %v3445_v60, %v12387_v29  ;;  %v1115_v29 = vrot.slane %v12438_v52, 4  ;;  %v935_v36 = vpop.f32.mrf.mxu0 }
 0x2f8   : > { %v2068_v14 = vrot.slane %v2067_v50, 1 }
 0x2f9   : > { %v3646_v26 = vadd.f32 %v3635_v48, %v3456_v61  ;;  %4255 = vmatmul.bf16.gmra.mxu1 %v12568_v0  ;;  %v3637_v59 = vpop.f32.mrf.mxu2  ;;  %v2070_v3 = vsel %vm1243_vm1, %v1115_v29, -inf  ;;  %v12581_v48 = vunpack.c.l.b16 %v4422_v34 }
 0x2fa   : > { %v2071_v30 = vrot.slane %v2070_v3, 4 }
 0x2fb   : > { %v12589_v40 = vsel %vm2777_vm8, %v12581_v48, %v4429_v43  ;;  %v936_v43 = vadd.f32 %v12428_v62, %v935_v36  ;;  %v2069_v36 = vmax.f32 %v2067_v50, %v2068_v14  ;;  %v10115_v50 = vld [vmem:[%s13967_s3 + $0x438] sm:$0xff] }
 0x2fc   : > { %v2072_v29 = vmax.f32 %v2070_v3, %v2071_v30  ;;  %v12593_v34 = vpack.c.b16 %v12589_v40, %v12359_v49  ;;  %v928_v3 = vadd.f32 %v12428_v62, %v12503_v55  ;;  %v933_v49 = vadd.f32 %v12428_v62, %v932_v10  ;;  %5072 = vmatpush.bf16.msrb.mxu2 %v10115_v50 }
 0x2fe   : > { %v3447_v60 = vpop.f32.mrf.mxu1  ;;  %4717 = vmatmul.bf16.vlgmr.msra.gmra.mxu2 %v11380_v19  ;;  %14095 = vst [vmem:[#allocation11_spill] sm:$0xff] %v12593_v34  ;;  %v2073_v47 = vrot.slane %v2072_v29, 2 }
 0x2ff   : > { %v3457_v61 = vadd.f32 %v3447_v60, %v12405_v24 }
 0x300   : > { %v2074_v5 = vmax.f32 %v2072_v29, %v2073_v47  ;;  %v931_v29 = vadd.f32 %v12428_v62, %v12552_v56 }
 0x301   : > { %v3647_v57 = vadd.f32 %v3637_v59, %v3457_v61  ;;  %v4001_v21 = vpop.f32.mrf.mxu2  ;;  %4504 = vmatmul.bf16.gmra.mxu3 %v12593_v34  ;;  %v926_v61 = vadd.f32 %v12428_v62, %v12475_v45  ;;  %v986_v45 = vmax.f32 %v928_v3, %v936_v43 }
 0x302   : > { %v2075_v34 = vrot.slane %v2074_v5, 1 }
 0x303   : > { %v1120_v3 = vrot.slane %v986_v45, 2  ;;  %v1121_v43 = vrot.slane %v986_v45, 4  ;;  %v1122_v56 = vrot.slane %v986_v45, 6  ;;  %v2112_v14 = vsel %vm1243_vm1, %v986_v45, -inf }
 0x306   : > { %v3881_v24 = vpop.f32.mrf.mxu1 }
 0x307   : > { %v3901_v19 = vadd.f32 %v3881_v24, %v12434_v31  ;;  %v3776_v31 = vpop.f32.mrf.mxu3 }
 0x308   : > { %v12606_v30 = vadd.f32 %v3776_v31, %v3646_v26  ;;  %v1116_v31 = vrot.slane %v12438_v52, 6  ;;  %v10106_v52 = vld [vmem:[%s13967_s3 + $0x3f0] sm:$0xff] }
 0x309   : > { %v12597_v59 = vadd.f32 %v4001_v21, %v3901_v19  ;;  %4603 = vmatmul.bf16.vlgmr.msra.gmra.mxu1 %v14096_v51  ;;  %v4003_v60 = vpop.f32.mrf.mxu2  ;;  %v10107_v21 = vld [vmem:[%s13967_s3 + $0x3f8] sm:$0xff]  ;;  %v12611_v19 = vmax.f32 %v926_v61, %v933_v49  ;;  %v937_v51 = vpop.f32.mrf.mxu0 }
 0x30a   : > { %4958 = vmatpush.bf16.msrb.mxu1 %v10107_v21  ;;  %v938_v47 = vadd.f32 %v12428_v62, %v937_v51  ;;  %v2076_v51 = vmax.f32 %v2074_v5, %v2075_v34  ;;  %v2126_v34 = vsel %vm1243_vm1, %v1121_v43, -inf  ;;  %v14097_v5 = vld [vmem:[#allocation16_spill] sm:$0xff] }
 0x30b   : > { %v1119_v26 = vrot.slane %v12611_v19, 6  ;;  %v2127_v0 = vrot.slane %v2126_v34, 4 }
 0x30d   : > { %v2105_v21 = vsel %vm1243_vm1, %v1119_v26, -inf  ;;  %v2119_v26 = vsel %vm1243_vm1, %v1120_v3, -inf  ;;  %v14098_v3 = vld [vmem:[#allocation24_spill] sm:$0xff] }
 0x30e   : > { %v3883_v24 = vpop.f32.mrf.mxu1  ;;  %4722 = vmatmul.bf16.gmra.mxu2 %v11969_v63  ;;  %4959 = vmatpush.bf16.msrb.mxu1 %v10106_v52  ;;  %v2106_v63 = vrot.slane %v2105_v21, 4 }
 0x30f   : > { %v3902_v55 = vadd.f32 %v3883_v24, %v12446_v2  ;;  %v3778_v49 = vpop.f32.mrf.mxu3  ;;  %v2077_v24 = vsel %vm1243_vm1, %v1116_v31, -inf  ;;  %v2113_v31 = vrot.slane %v2112_v14, 4 }
 0x310   : > { %v12622_v2 = vadd.f32 %v3778_v49, %v3647_v57  ;;  %v10114_v49 = vld [vmem:[%s13967_s3 + $0x430] sm:$0xff]  ;;  %v2078_v50 = vrot.slane %v2077_v24, 4 }
 0x311   : > { %v12616_v10 = vadd.f32 %v4003_v60, %v3902_v55  ;;  %v4006_v61 = vpop.f32.mrf.mxu2  ;;  %v2369_v60 = vmax.f32 %v2069_v36, 0.0  ;;  %v12633_v55 = vmax.f32 %v931_v29, %v938_v47  ;;  %v4652_v36 = vsel %vm2765_vm2, %v12196_v8, %v12192_v18  ;;  %4831 = vmatmul.bf16.vlgmr.msra.gmra.mxu3 %v14097_v5  ;;  %v12645_v29 = vpop.f32.mrf.mxu0  ;;  %v10123_v47 = vld [vmem:[%s13967_s3 + $0x478] sm:$0xff]  ;;  %5073 = vmatpush.bf16.msrb.mxu2 %v10114_v49  ;;  %v10105_v49 = vld [vmem:[%s13967_s3 + $0x3e8] sm:$0xff] }
 0x312   : > { %v2133_v18 = vsel %vm1243_vm1, %v1122_v56, -inf  ;;  %v4653_v43 = vsel %vm2767_vm3, %v12204_v16, %v4652_v36  ;;  %5186 = vmatpush.bf16.msrb.mxu3 %v10123_v47  ;;  %v2114_v25 = vmax.f32 %v2112_v14, %v2113_v31  ;;  %v10122_v16 = vld [vmem:[%s13967_s3 + $0x470] sm:$0xff]  ;;  %v10112_v47 = vld [vmem:[%s13967_s3 + $0x420] sm:$0xff]  ;;  %4960 = vmatpush.bf16.msrb.mxu1 %v10105_v49 }
 0x313   : > { %v2513_v52 = vpack.c.bf16 %v2369_v60, %v2369_v60  ;;  %v2140_v5 = vsel %vm1243_vm1, %v12633_v55, -inf  ;;  %v2107_v60 = vmax.f32 %v2105_v21, %v2106_v63  ;;  %v2134_v56 = vrot.slane %v2133_v18, 4 }
 0x314   : > { %v4654_v63 = vsel %vm2769_vm4, %v12222_v20, %v4653_v43  ;;  %v2141_v21 = vrot.slane %v2140_v5, 4  ;;  %v10121_v20 = vld [vmem:[%s13967_s3 + $0x468] sm:$0xff]  ;;  %v2128_v43 = vmax.f32 %v2126_v34, %v2127_v0 }
 0x315   : > { %v4536_v14 = vperm.slane %v2513_v52, 0  ;;  %v2135_v52 = vmax.f32 %v2133_v18, %v2134_v56 }
 0x316   : > { %v3886_v57 = vpop.f32.mrf.mxu1  ;;  %5187 = vmatpush.bf16.msrb.mxu3 %v10122_v16  ;;  %v2129_v49 = vrot.slane %v2128_v43, 2 }
 0x317   : > { %v3903_v45 = vadd.f32 %v3886_v57, %v12486_v7  ;;  %v2370_v7 = vmax.f32 %v2076_v51, 0.0  ;;  %v2120_v57 = vrot.slane %v2119_v26, 4  ;;  %v4121_v39 = vpop.f32.mrf.mxu3  ;;  %v10113_v51 = vld [vmem:[%s13967_s3 + $0x428] sm:$0xff] }
 0x318   : > { %5074 = vmatpush.bf16.msrb.mxu2 %v10113_v51  ;;  %v12687_v51 = vunpack.c.l.b16 %v4536_v14 }
 0x319   : > { %v12651_v8 = vadd.f32 %v4006_v61, %v3903_v45  ;;  %4608 = vmatmul.bf16.gmra.mxu1 %v14098_v3  ;;  %v4008_v9 = vpop.f32.mrf.mxu2  ;;  %v12659_v61 = vadd.f32 %v4121_v39, %v12597_v59  ;;  %v10217_v39 = vld [vmem:[%s13969_s5 + $0x128] sm:$0xff]  ;;  %v2079_v59 = vmax.f32 %v2077_v24, %v2078_v50  ;;  %v2514_v36 = vpack.c.bf16 %v2370_v7, %v2370_v7  ;;  %v12689_v0 = vpop.f32.mrf.mxu0 }
 0x31a   : > { %v2121_v45 = vmax.f32 %v2119_v26, %v2120_v57  ;;  %v4655_v24 = vsel %vm2771_vm5, %v12230_v53, %v4654_v63  ;;  %v2108_v26 = vrot.slane %v2107_v60, 2  ;;  %v2115_v50 = vrot.slane %v2114_v25, 2  ;;  %6610 = vmatpush.bf16.msrb.mxu0 %v10217_v39  ;;  %5188 = vmatpush.bf16.msrb.mxu3 %v10121_v20  ;;  %v10120_v39 = vld [vmem:[%s13967_s3 + $0x460] sm:$0xff] }
 0x31b   : > { %v2142_v7 = vmax.f32 %v2140_v5, %v2141_v21  ;;  %v4650_v16 = vperm.slane %v2514_v36, 0  ;;  %v2080_v34 = vrot.slane %v2079_v59, 2  ;;  %v4656_v53 = vsel %vm2773_vm6, %v12581_v48, %v4655_v24  ;;  %v10111_v21 = vld [vmem:[%s13967_s3 + $0x418] sm:$0xff] }
 0x31c   : > { %v2122_v44 = vrot.slane %v2121_v45, 2  ;;  %5075 = vmatpush.bf16.msrb.mxu2 %v10112_v47  ;;  %v2109_v18 = vmax.f32 %v2107_v60, %v2108_v26  ;;  %v2116_v56 = vmax.f32 %v2114_v25, %v2115_v50  ;;  %v2136_v5 = vrot.slane %v2135_v52, 2  ;;  %v10110_v47 = vld [vmem:[%s13967_s3 + $0x410] sm:$0xff] }
 0x31d   : > { %v2143_v14 = vrot.slane %v2142_v7, 2  ;;  %v12705_v36 = vunpack.c.l.b16 %v4650_v16  ;;  %v4657_v25 = vsel %vm2775_vm7, %v12687_v51, %v4656_v53  ;;  %v2081_v20 = vmax.f32 %v2079_v59, %v2080_v34  ;;  %v14099_v59 = vld [vmem:[#allocation32_spill] sm:$0xff] }
 0x31e   : > { %v3888_v31 = vpop.f32.mrf.mxu1  ;;  %4727 = vmatmul.bf16.gmra.mxu2 %v12099_v58  ;;  %v1117_v24 = vrot.slane %v12611_v19, 2  ;;  %v1118_v26 = vrot.slane %v12611_v19, 4  ;;  %v2130_v50 = vmax.f32 %v2128_v43, %v2129_v49  ;;  %5189 = vmatpush.bf16.msrb.mxu3 %v10120_v39  ;;  %v2137_v53 = vmax.f32 %v2135_v52, %v2136_v5 }
 0x31f   : > { %v3904_v3 = vadd.f32 %v3888_v31, %v12511_v17  ;;  %v4123_v63 = vpop.f32.mrf.mxu3  ;;  %v10103_v31 = vld [vmem:[%s13967_s3 + $0x3d8] sm:$0xff]  ;;  %v12727_v43 = vsel %vm2777_vm8, %v12705_v36, %v4657_v25 }
 0x320   : > { %5076 = vmatpush.bf16.msrb.mxu2 %v10111_v21  ;;  %14100 = vst [vmem:[#allocation23_spill] sm:$0xff] %v12727_v43  ;;  %v2091_v52 = vsel %vm1243_vm1, %v1117_v24, -inf  ;;  %v2098_v49 = vsel %vm1243_vm1, %v1118_v26, -inf  ;;  %v2131_v5 = vrot.slane %v2130_v50, 1  ;;  %v10118_v24 = vld [vmem:[%s13967_s3 + $0x450] sm:$0xff] }
 0x321   : > { %v12685_v57 = vadd.f32 %v4008_v9, %v3904_v3  ;;  %v4011_v17 = vpop.f32.mrf.mxu2  ;;  %v12694_v9 = vadd.f32 %v4123_v63, %v12616_v10  ;;  %v10104_v3 = vld [vmem:[%s13967_s3 + $0x3e0] sm:$0xff]  ;;  %v2123_v10 = vmax.f32 %v2121_v45, %v2122_v44  ;;  %v2110_v44 = vrot.slane %v2109_v18, 1  ;;  %4836 = vmatmul.bf16.gmra.mxu3 %v11954_v38  ;;  %v10119_v63 = vld [vmem:[%s13967_s3 + $0x458] sm:$0xff] }
 0x322   : > { %4961 = vmatpush.bf16.msrb.mxu1 %v10104_v3  ;;  %v2117_v45 = vrot.slane %v2116_v56, 1  ;;  %v2144_v3 = vmax.f32 %v2142_v7, %v2143_v14  ;;  %5190 = vmatpush.bf16.msrb.mxu3 %v10119_v63  ;;  %v2138_v14 = vrot.slane %v2137_v53, 1  ;;  %v2092_v26 = vrot.slane %v2091_v52, 4  ;;  %v10108_v63 = vld [vmem:[%s13967_s3 + $0x400] sm:$0xff] }
 0x323   : > { %v2111_v7 = vmax.f32 %v2109_v18, %v2110_v44  ;;  %v12747_v18 = vpack.c.b16 %v12727_v43, %v12397_v4  ;;  %v2132_v38 = vmax.f32 %v2130_v50, %v2131_v5 }
 0x324   : > { %5077 = vmatpush.bf16.msrb.mxu2 %v10110_v47  ;;  %v10109_v47 = vld [vmem:[%s13967_s3 + $0x408] sm:$0xff]  ;;  %v2093_v5 = vmax.f32 %v2091_v52, %v2092_v26  ;;  %v10116_v52 = vld [vmem:[%s13967_s3 + $0x440] sm:$0xff] }
 0x326   : > { %v3891_v60 = vpop.f32.mrf.mxu1  ;;  %4962 = vmatpush.bf16.msrb.mxu1 %v10103_v31  ;;  %v10102_v31 = vld [vmem:[%s13967_s3 + $0x3d0] sm:$0xff]  ;;  %5191 = vmatpush.bf16.msrb.mxu3 %v10118_v24 }
 0x327   : > { %v3905_v16 = vadd.f32 %v3891_v60, %v12547_v15  ;;  %v2124_v15 = vrot.slane %v2123_v10, 1  ;;  %v4126_v39 = vpop.f32.mrf.mxu3  ;;  %v2082_v60 = vrot.slane %v2081_v20, 1 }
 0x328   : > { %v12734_v25 = vadd.f32 %v4126_v39, %v12651_v8  ;;  %5078 = vmatpush.bf16.msrb.mxu2 %v10109_v47  ;;  %v2099_v39 = vrot.slane %v2098_v49, 4  ;;  %v2139_v47 = vmax.f32 %v2137_v53, %v2138_v14 }
 0x329   : > { %v12722_v21 = vadd.f32 %v4011_v17, %v3905_v16  ;;  %4613 = vmatmul.bf16.gmra.mxu1 %v14099_v59  ;;  %v4013_v34 = vpop.f32.mrf.mxu2  ;;  %v2118_v17 = vmax.f32 %v2116_v56, %v2117_v45  ;;  %v12731_v16 = vpop.f32.mrf.mxu0  ;;  %v2145_v56 = vrot.slane %v2144_v3, 1  ;;  %v2125_v8 = vmax.f32 %v2123_v10, %v2124_v15  ;;  %v10101_v45 = vld [vmem:[%s13967_s3 + $0x3c8] sm:$0xff] }
 0x32a   : > { %4963 = vmatpush.bf16.msrb.mxu1 %v10102_v31  ;;  %v2083_v4 = vmax.f32 %v2081_v20, %v2082_v60  ;;  %v10117_v10 = vld [vmem:[%s13967_s3 + $0x448] sm:$0xff]  ;;  %v4543_v15 = vsel %vm2775_vm7, %v12581_v48, %v12252_v46  ;;  %v2375_v31 = vmax.f32 %v2111_v7, 0.0  ;;  %v2378_v46 = vmax.f32 %v2132_v38, 0.0 }
 0x32b   : > { %v2376_v59 = vmax.f32 %v2118_v17, 0.0  ;;  %v2146_v50 = vmax.f32 %v2144_v3, %v2145_v56  ;;  %v2377_v20 = vmax.f32 %v2125_v8, 0.0  ;;  %v12769_v24 = vsel %vm2777_vm8, %v12687_v51, %v4543_v15  ;;  %5192 = vmatpush.bf16.msrb.mxu3 %v10117_v10 }
 0x32c   : > { %5079 = vmatpush.bf16.msrb.mxu2 %v10108_v63  ;;  %v2371_v53 = vmax.f32 %v2083_v4, 0.0  ;;  %v12782_v38 = vpack.c.b16 %v12769_v24, %v12318_v37  ;;  %v2094_v56 = vrot.slane %v2093_v5, 2 }
 0x32d   : > { %v2520_v3 = vpack.c.bf16 %v2376_v59, %v2376_v59  ;;  %v2521_v26 = vpack.c.bf16 %v2377_v20, %v2377_v20 }
 0x32e   : > { %v3893_v44 = vpop.f32.mrf.mxu1  ;;  %4732 = vmatmul.bf16.gmra.mxu2 %v12747_v18  ;;  %4964 = vmatpush.bf16.msrb.mxu1 %v10101_v45  ;;  %v2522_v45 = vpack.c.bf16 %v2378_v46, %v2378_v46  ;;  %v4769_v46 = vsel %vm2771_vm5, %v12581_v48, %v12393_v32 }
 0x32f   : > { %v3906_v58 = vadd.f32 %v3893_v44, %v12571_v22  ;;  %v2084_v22 = vsel %vm1243_vm1, %v12611_v19, -inf  ;;  %v2100_v44 = vmax.f32 %v2098_v49, %v2099_v39  ;;  %v4128_v7 = vpop.f32.mrf.mxu3  ;;  %v10100_v19 = vld [vmem:[%s13967_s3 + $0x3c0] sm:$0xff]  ;;  %v2380_v49 = vmax.f32 %v2146_v50, 0.0  ;;  %5193 = vmatpush.bf16.msrb.mxu3 %v10116_v52 }
 0x330   : > { %v12772_v17 = vadd.f32 %v4128_v7, %v12685_v57  ;;  %v2085_v14 = vrot.slane %v2084_v22, 4  ;;  %v2515_v39 = vpack.c.bf16 %v2371_v53, %v2371_v53  ;;  %v4889_v15 = vperm.slane %v2520_v3, 0 }
 0x331   : > { %v12763_v43 = vadd.f32 %v4013_v34, %v3906_v58  ;;  %v4016_v60 = vpop.f32.mrf.mxu2  ;;  %v2519_v58 = vpack.c.bf16 %v2375_v31, %v2375_v31  ;;  %v2379_v34 = vmax.f32 %v2139_v47, 0.0  ;;  %v12784_v59 = vpop.f32.mrf.mxu0  ;;  %v2101_v8 = vrot.slane %v2100_v44, 2  ;;  %4841 = vmatmul.bf16.gmra.mxu3 %v12056_v54 }
 0x332   : > { %4965 = vmatpush.bf16.msrb.mxu1 %v10100_v19  ;;  %v2086_v31 = vmax.f32 %v2084_v22, %v2085_v14  ;;  %v2524_v47 = vpack.c.bf16 %v2380_v49, %v2380_v49  ;;  %v2095_v50 = vmax.f32 %v2093_v5, %v2094_v56  ;;  %v4890_v20 = vperm.slane %v2521_v26, 0 }
 0x333   : > { %v4888_v4 = vperm.slane %v2519_v58, 0  ;;  %v2523_v10 = vpack.c.bf16 %v2379_v34, %v2379_v34  ;;  %v4891_v53 = vperm.slane %v2522_v45, 0  ;;  %v4764_v58 = vperm.slane %v2515_v39, 0 }
 0x334   : > { %v12794_v52 = vunpack.c.l.b16 %v4889_v15  ;;  %v4770_v5 = vsel %vm2773_vm6, %v12687_v51, %v4769_v46  ;;  %v5013_v14 = vperm.slane %v2524_v47, 0  ;;  %v2096_v49 = vrot.slane %v2095_v50, 1 }
 0x335   : > { %v12792_v34 = vunpack.c.l.b16 %v4888_v4  ;;  %v4892_v3 = vperm.slane %v2523_v10, 0  ;;  %v12801_v32 = vunpack.c.l.b16 %v4890_v20  ;;  %v12803_v56 = vunpack.c.l.b16 %v4891_v53 }
 0x336   : > { %v3896_v57 = vpop.f32.mrf.mxu1  ;;  %v4765_v26 = vunpack.c.l.b16 %v4764_v58  ;;  %v4771_v45 = vsel %vm2775_vm7, %v12705_v36, %v4770_v5  ;;  %v12814_v4 = vunpack.c.l.b16 %v5013_v14  ;;  %v2097_v10 = vmax.f32 %v2095_v50, %v2096_v49  ;;  %v14102_v14 = vld [vmem:[#allocation35_spill] sm:$0xff] }
 0x337   : > { %v3907_v63 = vadd.f32 %v3896_v57, %v12606_v30  ;;  %v2102_v30 = vmax.f32 %v2100_v44, %v2101_v8  ;;  %v4131_v19 = vpop.f32.mrf.mxu3  ;;  %v12807_v8 = vunpack.c.l.b16 %v4892_v3  ;;  %v5243_v51 = vsel %vm2765_vm2, %v12794_v52, %v12792_v34 }
 0x338   : > { %v12797_v22 = vadd.f32 %v4131_v19, %v12722_v21  ;;  %v5244_v47 = vsel %vm2767_vm3, %v12801_v32, %v5243_v51  ;;  %v12822_v46 = vsel %vm2777_vm8, %v4765_v26, %v4771_v45  ;;  %v2373_v19 = vmax.f32 %v2097_v10, 0.0 }
 0x339   : > { %v4027_v37 = vadd.f32 %v4016_v60, %v3907_v63  ;;  %4618 = vmatmul.bf16.gmra.mxu1 %v12782_v38  ;;  %v4018_v7 = vpop.f32.mrf.mxu2  ;;  %v2087_v60 = vrot.slane %v2086_v31, 2  ;;  %v2103_v44 = vrot.slane %v2102_v30, 1  ;;  %v950_v21 = vpop.f32.mrf.mxu0  ;;  %v12837_v58 = vpack.c.b16 %v12822_v46, %v12292_v13  ;;  %v10131_v13 = vld [vmem:[%s13967_s3 + $0x4b8] sm:$0xff] }
 0x33a   : > { %5300 = vmatpush.bf16.msra.mxu1 %v10131_v13 }
 0x33b   : > { %v2088_v63 = vmax.f32 %v2086_v31, %v2087_v60  ;;  %v2104_v20 = vmax.f32 %v2102_v30, %v2103_v44  ;;  %v5245_v31 = vsel %vm2769_vm4, %v12803_v56, %v5244_v47  ;;  %14101 = vst [vmem:[#allocation20_spill] sm:$0xff] %v12837_v58 }
 0x33d   : > { %v2089_v53 = vrot.slane %v2088_v63, 1  ;;  %v2374_v60 = vmax.f32 %v2104_v20, 0.0 }
 0x33e   : > { %v3898_v48 = vpop.f32.mrf.mxu1  ;;  %5080 = vmatmul.bf16.vlgmr.msrb.gmra.mxu2 %v12200_v6  ;;  %v951_v6 = vadd.f32 %v12428_v62, %v950_v21 }
 0x33f   : > { %v3908_v57 = vadd.f32 %v3898_v48, %v12622_v2  ;;  %v943_v2 = vadd.f32 %v12428_v62, %v12689_v0  ;;  %v4133_v36 = vpop.f32.mrf.mxu3  ;;  %v5246_v0 = vsel %vm2771_vm5, %v12807_v8, %v5245_v31  ;;  %v2090_v49 = vmax.f32 %v2088_v63, %v2089_v53 }
 0x340   : > { %v12833_v50 = vsel %vm2773_vm6, %v12814_v4, %v5246_v0  ;;  %v2517_v48 = vpack.c.bf16 %v2373_v19, %v2373_v19  ;;  %v2518_v21 = vpack.c.bf16 %v2374_v60, %v2374_v60 }
 0x341   : > { %v4028_v39 = vadd.f32 %v4018_v7, %v3908_v57  ;;  %v4376_v15 = vpop.f32.mrf.mxu2  ;;  %v12827_v7 = vadd.f32 %v4133_v36, %v12763_v43  ;;  %v989_v30 = vmax.f32 %v943_v2, %v951_v6  ;;  %4846 = vmatmul.bf16.gmra.mxu3 %v12837_v58  ;;  %v952_v26 = vpop.f32.mrf.mxu0  ;;  %v2372_v2 = vmax.f32 %v2090_v49, 0.0 }
 0x342   : > { %v953_v10 = vadd.f32 %v12428_v62, %v952_v26  ;;  %v4886_v6 = vperm.slane %v2517_v48, 0  ;;  %v4887_v20 = vperm.slane %v2518_v21, 0 }
 0x343   : > { %v1129_v44 = vrot.slane %v989_v30, 2  ;;  %v2196_v63 = vsel %vm1243_vm1, %v989_v30, -inf  ;;  %v1130_v36 = vrot.slane %v989_v30, 4  ;;  %v1131_v0 = vrot.slane %v989_v30, 6 }
 0x344   : > { %v2516_v60 = vpack.c.bf16 %v2372_v2, %v2372_v2  ;;  %v12864_v49 = vunpack.c.l.b16 %v4887_v20 }
 0x345   : > { %v2217_v26 = vsel %vm1243_vm1, %v1131_v0, -inf }
 0x346   : > { %v4241_v3 = vpop.f32.mrf.mxu1 }
 0x347   : > { %v4261_v5 = vadd.f32 %v4241_v3, %v12659_v61  ;;  %v4136_v45 = vpop.f32.mrf.mxu3  ;;  %v946_v61 = vadd.f32 %v12428_v62, %v12731_v16  ;;  %v1124_v16 = vrot.slane %v12633_v55, 4  ;;  %v2197_v62 = vrot.slane %v2196_v63, 4 }
 0x348   : > { %v12844_v51 = vadd.f32 %v4136_v45, %v4027_v37  ;;  %v1123_v37 = vrot.slane %v12633_v55, 2  ;;  %v10130_v45 = vld [vmem:[%s13967_s3 + $0x4b0] sm:$0xff] }
 0x349   : > { %v12841_v43 = vadd.f32 %v4376_v15, %v4261_v5  ;;  %4966 = vmatmul.bf16.vlgmr.msrb.gmra.mxu1 %v14102_v14  ;;  %v4378_v57 = vpop.f32.mrf.mxu2  ;;  %v2203_v15 = vsel %vm1243_vm1, %v1129_v44, -inf  ;;  %v12858_v19 = vmax.f32 %v946_v61, %v953_v10  ;;  %v12862_v14 = vunpack.c.l.b16 %v4886_v6 }
 0x34a   : > { %v2204_v53 = vrot.slane %v2203_v15, 4  ;;  %v2147_v48 = vsel %vm1243_vm1, %v1123_v37, -inf  ;;  %v1125_v44 = vrot.slane %v12633_v55, 6  ;;  %v2154_v30 = vsel %vm1243_vm1, %v1124_v16, -inf  ;;  %5301 = vmatpush.bf16.msra.mxu1 %v10130_v45 }
 0x34b   : > { %v2198_v13 = vmax.f32 %v2196_v63, %v2197_v62  ;;  %v2224_v10 = vsel %vm1243_vm1, %v12858_v19, -inf  ;;  %v4885_v55 = vperm.slane %v2516_v60, 0  ;;  %v2148_v2 = vrot.slane %v2147_v48, 4 }
 0x34c   : > { %v2205_v61 = vmax.f32 %v2203_v15, %v2204_v53  ;;  %v2155_v20 = vrot.slane %v2154_v30, 4  ;;  %v2218_v37 = vrot.slane %v2217_v26, 4  ;;  %v2161_v63 = vsel %vm1243_vm1, %v1125_v44, -inf }
 0x34d   : > { %v2225_v15 = vrot.slane %v2224_v10, 4  ;;  %v5015_v16 = vsel %vm2765_vm2, %v12864_v49, %v12862_v14  ;;  %v2199_v0 = vrot.slane %v2198_v13, 2  ;;  %v2149_v60 = vmax.f32 %v2147_v48, %v2148_v2  ;;  %v10137_v48 = vld [vmem:[%s13967_s3 + $0x4e8] sm:$0xff] }
 0x34e   : > { %v4243_v47 = vpop.f32.mrf.mxu1  ;;  %5085 = vmatmul.bf16.gmra.mxu2 %v12296_v23  ;;  %v2206_v62 = vrot.slane %v2205_v61, 2  ;;  %v2219_v45 = vmax.f32 %v2217_v26, %v2218_v37  ;;  %v5016_v58 = vsel %vm2767_vm3, %v12792_v34, %v5015_v16  ;;  %v1132_v54 = vrot.slane %v12858_v19, 2 }
 0x34f   : > { %v4262_v31 = vadd.f32 %v4243_v47, %v12694_v9  ;;  %v2210_v9 = vsel %vm1243_vm1, %v1130_v36, -inf  ;;  %v4138_v23 = vpop.f32.mrf.mxu3  ;;  %v2200_v26 = vmax.f32 %v2198_v13, %v2199_v0  ;;  %v2150_v37 = vrot.slane %v2149_v60, 2 }
 0x350   : > { %v12871_v21 = vadd.f32 %v4138_v23, %v4028_v39  ;;  %v2211_v6 = vrot.slane %v2210_v9, 4  ;;  %v10138_v39 = vld [vmem:[%s13967_s3 + $0x4f0] sm:$0xff]  ;;  %v2231_v0 = vsel %vm1243_vm1, %v1132_v54, -inf }
 0x351   : > { %v12860_v3 = vadd.f32 %v4378_v57, %v4262_v31  ;;  %v4381_v5 = vpop.f32.mrf.mxu2  ;;  %v10139_v57 = vld [vmem:[%s13967_s3 + $0x4f8] sm:$0xff]  ;;  %5194 = vmatmul.bf16.vlgmr.msrb.gmra.mxu3 %v12177_v28  ;;  %v2156_v28 = vmax.f32 %v2154_v30, %v2155_v20  ;;  %v10129_v30 = vld [vmem:[%s13967_s3 + $0x4a8] sm:$0xff]  ;;  %v5017_v20 = vsel %vm2769_vm4, %v12794_v52, %v5016_v58 }
 0x352   : > { %5414 = vmatpush.bf16.msra.mxu2 %v10139_v57  ;;  %v10147_v31 = vld [vmem:[%s13967_s3 + $0x538] sm:$0xff]  ;;  %v2212_v23 = vmax.f32 %v2210_v9, %v2211_v6  ;;  %v2162_v57 = vrot.slane %v2161_v63, 4  ;;  %v10146_v9 = vld [vmem:[%s13967_s3 + $0x530] sm:$0xff]  ;;  %5302 = vmatpush.bf16.msra.mxu1 %v10129_v30 }
 0x353   : > { %5549 = vmatpush.bf16.msra.mxu3 %v10147_v31  ;;  %v2157_v31 = vrot.slane %v2156_v28, 2 }
 0x354   : > { %v2213_v2 = vrot.slane %v2212_v23, 2  ;;  %v2163_v13 = vmax.f32 %v2161_v63, %v2162_v57  ;;  %v5018_v63 = vsel %vm2771_vm5, %v12801_v32, %v5017_v20 }
 0x356   : > { %v4246_v47 = vpop.f32.mrf.mxu1  ;;  %5415 = vmatpush.bf16.msra.mxu2 %v10138_v39  ;;  %v10145_v39 = vld [vmem:[%s13967_s3 + $0x528] sm:$0xff] }
 0x357   : > { %v4263_v36 = vadd.f32 %v4246_v47, %v12734_v25  ;;  %v4893_v25 = vunpack.c.l.b16 %v4885_v55  ;;  %v4490_v47 = vpop.f32.mrf.mxu3  ;;  %v2207_v55 = vmax.f32 %v2205_v61, %v2206_v62  ;;  %5550 = vmatpush.bf16.msra.mxu3 %v10146_v9  ;;  %v2220_v61 = vrot.slane %v2219_v45, 2 }
 0x358   : > { %v2232_v9 = vrot.slane %v2231_v0, 4 }
 0x359   : > { %v12893_v53 = vadd.f32 %v4381_v5, %v4263_v36  ;;  %4971 = vmatmul.bf16.gmra.mxu1 %v12010_v42  ;;  %v4383_v44 = vpop.f32.mrf.mxu2  ;;  %v1133_v5 = vrot.slane %v12858_v19, 4  ;;  %v2226_v36 = vmax.f32 %v2224_v10, %v2225_v15  ;;  %v12901_v42 = vadd.f32 %v4490_v47, %v12841_v43  ;;  %v10136_v43 = vld [vmem:[%s13967_s3 + $0x4e0] sm:$0xff] }
 0x35a   : > { %v1134_v10 = vrot.slane %v12858_v19, 6  ;;  %5416 = vmatpush.bf16.msra.mxu2 %v10137_v48  ;;  %v4901_v19 = vsel %vm2765_vm2, %v12862_v14, %v4893_v25  ;;  %v2201_v47 = vrot.slane %v2200_v26, 1  ;;  %v2208_v48 = vrot.slane %v2207_v55, 1 }
 0x35b   : > { %v2227_v16 = vrot.slane %v2226_v36, 2  ;;  %v2238_v62 = vsel %vm1243_vm1, %v1133_v5, -inf  ;;  %5551 = vmatpush.bf16.msra.mxu3 %v10145_v39  ;;  %v4902_v14 = vsel %vm2767_vm3, %v12864_v49, %v4901_v19  ;;  %v2151_v25 = vmax.f32 %v2149_v60, %v2150_v37  ;;  %v10144_v60 = vld [vmem:[%s13967_s3 + $0x520] sm:$0xff] }
 0x35c   : > { %v2221_v54 = vmax.f32 %v2219_v45, %v2220_v61  ;;  %v2239_v5 = vrot.slane %v2238_v62, 4  ;;  %v2164_v45 = vrot.slane %v2163_v13, 2  ;;  %v4903_v20 = vsel %vm2769_vm4, %v12792_v34, %v4902_v14  ;;  %v10216_v14 = vld [vmem:[%s13969_s5 + $0x120] sm:$0xff] }
 0x35d   : > { %v2202_v37 = vmax.f32 %v2200_v26, %v2201_v47  ;;  %v2209_v61 = vmax.f32 %v2207_v55, %v2208_v48  ;;  %v4904_v48 = vsel %vm2771_vm5, %v12794_v52, %v4903_v20  ;;  %6611 = vmatpush.bf16.msrb.mxu0 %v10216_v14 }
 0x35e   : > { %v4248_v6 = vpop.f32.mrf.mxu1  ;;  %5090 = vmatmul.bf16.gmra.mxu2 %v12371_v35  ;;  %v2245_v35 = vsel %vm1243_vm1, %v1134_v10, -inf  ;;  %v10135_v10 = vld [vmem:[%s13967_s3 + $0x4d8] sm:$0xff]  ;;  %v2240_v47 = vmax.f32 %v2238_v62, %v2239_v5 }
 0x35f   : > { %v4264_v15 = vadd.f32 %v4248_v6, %v12772_v17  ;;  %v2214_v17 = vmax.f32 %v2212_v23, %v2213_v2  ;;  %5417 = vmatpush.bf16.msra.mxu2 %v10136_v43  ;;  %v4492_v30 = vpop.f32.mrf.mxu3  ;;  %v2228_v6 = vmax.f32 %v2226_v36, %v2227_v16  ;;  %v5019_v23 = vsel %vm2773_vm6, %v12803_v56, %v5018_v63  ;;  %v10128_v2 = vld [vmem:[%s13967_s3 + $0x4a0] sm:$0xff] }
 0x360   : > { %v2158_v36 = vmax.f32 %v2156_v28, %v2157_v31  ;;  %v2246_v39 = vrot.slane %v2245_v35, 4  ;;  %5303 = vmatpush.bf16.msra.mxu1 %v10128_v2  ;;  %v10127_v28 = vld [vmem:[%s13967_s3 + $0x498] sm:$0xff]  ;;  %v10134_v31 = vld [vmem:[%s13967_s3 + $0x4d0] sm:$0xff]  ;;  %v2222_v16 = vrot.slane %v2221_v54, 1  ;;  %v2233_v63 = vmax.f32 %v2231_v0, %v2232_v9  ;;  %5552 = vmatpush.bf16.msra.mxu3 %v10144_v60 }
 0x361   : > { %v12927_v58 = vadd.f32 %v4383_v44, %v4264_v15  ;;  %v4386_v57 = vpop.f32.mrf.mxu2  ;;  %v12935_v44 = vadd.f32 %v4492_v30, %v12860_v3  ;;  %v10374_v3 = vld [vmem:[%s13966_s2] ss:$0 sm:$0xff]  ;;  %v2215_v15 = vrot.slane %v2214_v17, 1  ;;  %v5020_v26 = vsel %vm2775_vm7, %v12807_v8, %v5019_v23  ;;  %5199 = vmatmul.bf16.gmra.mxu3 %v12256_v33  ;;  %v10143_v0 = vld [vmem:[%s13967_s3 + $0x518] sm:$0xff] }
 0x362   : > { %v12952_v43 = vadd.f32 %v10374_v3, %v12645_v29  ;;  %v2152_v29 = vrot.slane %v2151_v25, 1  ;;  %v2229_v55 = vrot.slane %v2228_v6, 1  ;;  %v12975_v9 = vadd.f32 %v10374_v3, %v12784_v59  ;;  %v10126_v3 = vld [vmem:[%s13967_s3 + $0x490] sm:$0xff] }
 0x363   : > { %5418 = vmatpush.bf16.msra.mxu2 %v10135_v10  ;;  %v2247_v23 = vmax.f32 %v2245_v35, %v2246_v39  ;;  %v2159_v33 = vrot.slane %v2158_v36, 1  ;;  %v2216_v62 = vmax.f32 %v2214_v17, %v2215_v15  ;;  %v2388_v5 = vmax.f32 %v2202_v37, 0.0 }
 0x364   : > { %v12982_v60 = vsel %vm2777_vm8, %v12814_v4, %v5020_v26  ;;  %5304 = vmatpush.bf16.msra.mxu1 %v10127_v28  ;;  %v2153_v20 = vmax.f32 %v2151_v25, %v2152_v29  ;;  %v4905_v35 = vsel %vm2773_vm6, %v12801_v32, %v4904_v48  ;;  %5553 = vmatpush.bf16.msra.mxu3 %v10143_v0  ;;  %v10133_v25 = vld [vmem:[%s13967_s3 + $0x4c8] sm:$0xff]  ;;  %v2241_v37 = vrot.slane %v2240_v47, 2 }
 0x365   : > { %v2248_v15 = vrot.slane %v2247_v23, 2  ;;  %v2532_v28 = vpack.c.bf16 %v2388_v5, %v2388_v5  ;;  %v4906_v0 = vsel %vm2775_vm7, %v12803_v56, %v4905_v35 }
 0x366   : > { %v4251_v19 = vpop.f32.mrf.mxu1  ;;  %v2381_v29 = vmax.f32 %v2153_v20, 0.0  ;;  %v2242_v26 = vmax.f32 %v2240_v47, %v2241_v37 }
 0x367   : > { %v4265_v30 = vadd.f32 %v4251_v19, %v12797_v22  ;;  %v2165_v22 = vmax.f32 %v2163_v13, %v2164_v45  ;;  %5419 = vmatpush.bf16.msra.mxu2 %v10134_v31  ;;  %v2223_v13 = vmax.f32 %v2221_v54, %v2222_v16  ;;  %v2389_v45 = vmax.f32 %v2209_v61, 0.0  ;;  %v4495_v59 = vpop.f32.mrf.mxu3  ;;  %v10142_v54 = vld [vmem:[%s13967_s3 + $0x510] sm:$0xff]  ;;  %v10125_v16 = vld [vmem:[%s13967_s3 + $0x488] sm:$0xff] }
 0x368   : > { %v12987_v17 = vadd.f32 %v4495_v59, %v12893_v53  ;;  %v2160_v61 = vmax.f32 %v2158_v36, %v2159_v33  ;;  %v2390_v19 = vmax.f32 %v2216_v62, 0.0  ;;  %5305 = vmatpush.bf16.msra.mxu1 %v10126_v3  ;;  %5554 = vmatpush.bf16.msra.mxu3 %v10142_v54  ;;  %v10141_v36 = vld [vmem:[%s13967_s3 + $0x508] sm:$0xff]  ;;  %v2249_v48 = vmax.f32 %v2247_v23, %v2248_v15  ;;  %v10140_v54 = vld [vmem:[%s13967_s3 + $0x500] sm:$0xff] }
 0x369   : > { %v12977_v2 = vadd.f32 %v4386_v57, %v4265_v30  ;;  %4976 = vmatmul.bf16.gmra.mxu1 %v12155_v12  ;;  %v4388_v10 = vpop.f32.mrf.mxu2  ;;  %v2234_v12 = vrot.slane %v2233_v63, 2  ;;  %v2230_v57 = vmax.f32 %v2228_v6, %v2229_v55  ;;  %v2166_v39 = vrot.slane %v2165_v22, 1  ;;  %v10132_v30 = vld [vmem:[%s13967_s3 + $0x4c0] sm:$0xff] }
 0x36a   : > { %v5022_v6 = vpack.c.b16 %v12982_v60, %v12589_v40  ;;  %v2533_v55 = vpack.c.bf16 %v2389_v45, %v2389_v45  ;;  %v2391_v14 = vmax.f32 %v2223_v13, 0.0  ;;  %v5129_v33 = vsel %vm2765_vm2, %v12792_v34, %v12864_v49 }
 0x36b   : > { %v2235_v53 = vmax.f32 %v2233_v63, %v2234_v12  ;;  %5420 = vmatpush.bf16.msra.mxu2 %v10133_v25  ;;  %v2167_v47 = vmax.f32 %v2165_v22, %v2166_v39  ;;  %v2392_v62 = vmax.f32 %v2230_v57, 0.0  ;;  %v2534_v45 = vpack.c.bf16 %v2390_v19, %v2390_v19  ;;  %v10124_v25 = vld [vmem:[%s13967_s3 + $0x480] sm:$0xff] }
 0x36c   : > { %v2525_v12 = vpack.c.bf16 %v2381_v29, %v2381_v29  ;;  %5306 = vmatpush.bf16.msra.mxu1 %v10125_v16  ;;  %v5357_v23 = vsel %vm2765_vm2, %v12801_v32, %v12794_v52  ;;  %v2243_v13 = vrot.slane %v2242_v26, 1  ;;  %v5480_v35 = vperm.slane %v2532_v28, 0  ;;  %5555 = vmatpush.bf16.msra.mxu3 %v10141_v36 }
 0x36d   : > { %v2236_v63 = vrot.slane %v2235_v53, 1  ;;  %v13022_v34 = vsel %vm2777_vm8, %v12807_v8, %v4906_v0  ;;  %v2250_v22 = vrot.slane %v2249_v48, 1  ;;  %v5130_v57 = vsel %vm2767_vm3, %v12794_v52, %v5129_v33 }
 0x36e   : > { %v4253_v31 = vpop.f32.mrf.mxu1  ;;  %5095 = vmatmul.bf16.gmra.mxu2 %v5022_v6  ;;  %v2383_v39 = vmax.f32 %v2167_v47, 0.0  ;;  %v2535_v37 = vpack.c.bf16 %v2391_v14, %v2391_v14  ;;  %v5481_v6 = vperm.slane %v2533_v55, 0  ;;  %v5482_v15 = vperm.slane %v2534_v45, 0 }
 0x36f   : > { %v4266_v40 = vadd.f32 %v4253_v31, %v12827_v7  ;;  %v2382_v7 = vmax.f32 %v2160_v61, 0.0  ;;  %v2237_v20 = vmax.f32 %v2235_v53, %v2236_v63  ;;  %5421 = vmatpush.bf16.msra.mxu2 %v10132_v30  ;;  %v4497_v3 = vpop.f32.mrf.mxu3  ;;  %v5358_v53 = vsel %vm2767_vm3, %v12803_v56, %v5357_v23 }
 0x370   : > { %v5127_v28 = vperm.slane %v2525_v12, 0  ;;  %5307 = vmatpush.bf16.msra.mxu1 %v10124_v25  ;;  %v2244_v31 = vmax.f32 %v2242_v26, %v2243_v13  ;;  %v4908_v16 = vpack.c.b16 %v13022_v34, %v12519_v41  ;;  %v5131_v30 = vsel %vm2769_vm4, %v12801_v32, %v5130_v57  ;;  %5556 = vmatpush.bf16.msra.mxu3 %v10140_v54 }
 0x371   : > { %v13015_v5 = vadd.f32 %v4388_v10, %v4266_v40  ;;  %v4391_v59 = vpop.f32.mrf.mxu2  ;;  %v2393_v49 = vmax.f32 %v2237_v20, 0.0  ;;  %v13025_v10 = vadd.f32 %v4497_v3, %v12927_v58  ;;  %v2526_v61 = vpack.c.bf16 %v2382_v7, %v2382_v7  ;;  %5204 = vmatmul.bf16.gmra.mxu3 %v12336_v11 }
 0x372   : > { %v2536_v58 = vpack.c.bf16 %v2392_v62, %v2392_v62  ;;  %v2251_v55 = vmax.f32 %v2249_v48, %v2250_v22  ;;  %v13042_v40 = vunpack.c.l.b16 %v5480_v35  ;;  %v2527_v36 = vpack.c.bf16 %v2383_v39, %v2383_v39 }
 0x373   : > { %v2537_v52 = vpack.c.bf16 %v2393_v49, %v2393_v49  ;;  %v5359_v63 = vsel %vm2769_vm4, %v12807_v8, %v5358_v53  ;;  %v5483_v14 = vperm.slane %v2535_v37, 0  ;;  %v13047_v26 = vunpack.c.l.b16 %v5481_v6 }
 0x374   : > { %v5241_v41 = vperm.slane %v2526_v61, 0  ;;  %v5604_v0 = vperm.slane %v2536_v58, 0  ;;  %v13051_v33 = vunpack.c.l.b16 %v5127_v28  ;;  %v5132_v32 = vsel %vm2771_vm5, %v12803_v56, %v5131_v30 }
 0x375   : > { %v5718_v47 = vperm.slane %v2537_v52, 0  ;;  %v2394_v11 = vmax.f32 %v2244_v31, 0.0  ;;  %v988_v62 = vmax.f32 %v12952_v43, %v12975_v9  ;;  %v13057_v7 = vunpack.c.l.b16 %v5482_v15 }
 0x376   : > { %v4256_v19 = vpop.f32.mrf.mxu1  ;;  %v5360_v45 = vsel %vm2771_vm5, %v12814_v4, %v5359_v63  ;;  %v5355_v23 = vperm.slane %v2527_v36, 0  ;;  %v13064_v13 = vunpack.c.l.b16 %v5483_v14  ;;  %v5133_v35 = vsel %vm2773_vm6, %v12807_v8, %v5132_v32 }
 0x377   : > { %v4267_v29 = vadd.f32 %v4256_v19, %v12844_v51  ;;  %v4500_v20 = vpop.f32.mrf.mxu3  ;;  %v2538_v56 = vpack.c.bf16 %v2394_v11, %v2394_v11  ;;  %v13068_v3 = vunpack.c.l.b16 %v5241_v41  ;;  %v13070_v43 = vunpack.c.l.b16 %v5604_v0 }
 0x378   : > { %v13062_v12 = vadd.f32 %v4500_v20, %v12977_v2  ;;  %v5361_v22 = vsel %vm2773_vm6, %v13051_v33, %v5360_v45  ;;  %v13074_v57 = vunpack.c.l.b16 %v5718_v47  ;;  %v5948_v25 = vsel %vm2765_vm2, %v13047_v26, %v13042_v40 }
 0x379   : > { %v13049_v51 = vadd.f32 %v4391_v59, %v4267_v29  ;;  %4981 = vmatmul.bf16.gmra.mxu1 %v4908_v16  ;;  %v4393_v48 = vpop.f32.mrf.mxu2  ;;  %v2395_v59 = vmax.f32 %v2251_v55, 0.0  ;;  %v5832_v2 = vperm.slane %v2538_v56, 0  ;;  %v5949_v39 = vsel %vm2767_vm3, %v13057_v7, %v5948_v25 }
 0x37a   : > { %v5134_v37 = vsel %vm2775_vm7, %v12814_v4, %v5133_v35  ;;  %v5356_v6 = vunpack.c.l.b16 %v5355_v23  ;;  %v5950_v53 = vsel %vm2769_vm4, %v13064_v13, %v5949_v39  ;;  %v5362_v15 = vsel %vm2775_vm7, %v13068_v3, %v5361_v22 }
 0x37b   : > { %v2539_v9 = vpack.c.bf16 %v2395_v59, %v2395_v59  ;;  %v13085_v61 = vunpack.c.l.b16 %v5832_v2  ;;  %v1126_v19 = vrot.slane %v988_v62, 2  ;;  %v13097_v31 = vsel %vm2777_vm8, %v13051_v33, %v5134_v37 }
 0x37c   : > { %v13105_v30 = vsel %vm2777_vm8, %v5356_v6, %v5362_v15  ;;  %v1127_v36 = vrot.slane %v988_v62, 4  ;;  %v2168_v14 = vsel %vm1243_vm1, %v988_v62, -inf  ;;  %v5136_v0 = vpack.c.b16 %v13097_v31, %v12769_v24  ;;  %v10155_v24 = vld [vmem:[%s13967_s3 + $0x578] sm:$0xff] }
 0x37d   : > { %v5946_v8 = vperm.slane %v2539_v9, 0  ;;  %v2175_v41 = vsel %vm1243_vm1, %v1126_v19, -inf  ;;  %v2169_v47 = vrot.slane %v2168_v14, 4  ;;  %5663 = vmatpush.bf16.msrb.mxu1 %v10155_v24 }
 0x37e   : > { %v4258_v49 = vpop.f32.mrf.mxu1  ;;  %5422 = vmatmul.bf16.vlgmr.msra.gmra.mxu2 %v14086_v1  ;;  %v5951_v1 = vsel %vm2771_vm5, %v13070_v43, %v5950_v53  ;;  %v2176_v11 = vrot.slane %v2175_v41, 4  ;;  %v2182_v20 = vsel %vm1243_vm1, %v1127_v36, -inf  ;;  %v14104_v36 = vld [vmem:[#allocation18_spill] sm:$0xff] }
 0x37f   : > { %v4268_v54 = vadd.f32 %v4258_v49, %v12871_v21  ;;  %v5947_v21 = vunpack.c.l.b16 %v5946_v8  ;;  %v5952_v52 = vsel %vm2773_vm6, %v13074_v57, %v5951_v1  ;;  %v4502_v4 = vpop.f32.mrf.mxu3  ;;  %v2183_v56 = vrot.slane %v2182_v20, 4 }
 0x380   : > { %v5953_v29 = vsel %vm2775_vm7, %v13085_v61, %v5952_v52  ;;  %v13102_v16 = vadd.f32 %v4502_v4, %v13015_v5  ;;  %v10162_v52 = vld [vmem:[%s13967_s3 + $0x5b0] sm:$0xff] }
 0x381   : > { %v4403_v58 = vadd.f32 %v4393_v48, %v4268_v54  ;;  %v4718_v28 = vpop.f32.mrf.mxu2  ;;  %v13108_v55 = vsel %vm2777_vm8, %v5947_v21, %v5953_v29  ;;  %v1128_v48 = vrot.slane %v988_v62, 6  ;;  %5209 = vmatmul.bf16.gmra.mxu3 %v5136_v0  ;;  %v2177_v62 = vmax.f32 %v2175_v41, %v2176_v11  ;;  %v10163_v21 = vld [vmem:[%s13967_s3 + $0x5b8] sm:$0xff] }
 0x382   : > { %v5955_v63 = vpack.c.b16 %v13108_v55, %v13105_v30  ;;  %v2184_v25 = vmax.f32 %v2182_v20, %v2183_v56  ;;  %5777 = vmatpush.bf16.msrb.mxu2 %v10163_v21  ;;  %v10153_v56 = vld [vmem:[%s13967_s3 + $0x568] sm:$0xff] }
 0x383   : > { %v2189_v35 = vsel %vm1243_vm1, %v1128_v48, -inf  ;;  %v2178_v8 = vrot.slane %v2177_v62, 2 }
 0x384   : > { %v2190_v22 = vrot.slane %v2189_v35, 4  ;;  %v2185_v53 = vrot.slane %v2184_v25, 2 }
 0x385   : > { %v2179_v19 = vmax.f32 %v2177_v62, %v2178_v8  ;;  %v10169_v62 = vld [vmem:[%s13967_s3 + $0x5e8] sm:$0xff] }
 0x386   : > { %v4604_v32 = vpop.f32.mrf.mxu1  ;;  %v2186_v29 = vmax.f32 %v2184_v25, %v2185_v53  ;;  %5778 = vmatpush.bf16.msrb.mxu2 %v10162_v52 }
 0x387   : > { %v4624_v5 = vadd.f32 %v4604_v32, %v12901_v42  ;;  %v4505_v23 = vpop.f32.mrf.mxu3  ;;  %v2170_v42 = vmax.f32 %v2168_v14, %v2169_v47  ;;  %v10171_v14 = vld [vmem:[%s13967_s3 + $0x5f8] sm:$0xff]  ;;  %v2180_v0 = vrot.slane %v2179_v19, 1 }
 0x388   : > { %v13121_v9 = vadd.f32 %v4505_v23, %v13049_v51  ;;  %v2191_v51 = vmax.f32 %v2189_v35, %v2190_v22  ;;  %5891 = vmatpush.bf16.msrb.mxu3 %v10171_v14  ;;  %v2187_v20 = vrot.slane %v2186_v29, 1  ;;  %v10170_v23 = vld [vmem:[%s13967_s3 + $0x5f0] sm:$0xff]  ;;  %v14107_v14 = vld [vmem:[#allocation29_spill] sm:$0xff] }
 0x389   : > { %v4738_v45 = vadd.f32 %v4718_v28, %v4624_v5  ;;  %5308 = vmatmul.bf16.vlgmr.msra.gmra.mxu1 %v14071_v27  ;;  %v4720_v59 = vpop.f32.mrf.mxu2  ;;  %v14103_v27 = vld [vmem:[#allocation17_spill] sm:$0xff]  ;;  %v2171_v54 = vrot.slane %v2170_v42, 2  ;;  %v2181_v24 = vmax.f32 %v2179_v19, %v2180_v0 }
 0x38a   : > { %v2192_v4 = vrot.slane %v2191_v51, 2  ;;  %v14105_v5 = vld [vmem:[#allocation5_spill] sm:$0xff] }
 0x38b   : > { %v2172_v1 = vmax.f32 %v2170_v42, %v2171_v54  ;;  %v2385_v54 = vmax.f32 %v2181_v24, 0.0  ;;  %v10166_v24 = vld [vmem:[%s13967_s3 + $0x5d0] sm:$0xff] }
 0x38c   : > { %v2193_v47 = vmax.f32 %v2191_v51, %v2192_v4  ;;  %5892 = vmatpush.bf16.msrb.mxu3 %v10170_v23  ;;  %v10158_v4 = vld [vmem:[%s13967_s3 + $0x590] sm:$0xff] }
 0x38d   : > { %v2173_v41 = vrot.slane %v2172_v1, 1 }
 0x38e   : > { %v4606_v49 = vpop.f32.mrf.mxu1  ;;  %5427 = vmatmul.bf16.gmra.mxu2 %v14103_v27  ;;  %v2188_v27 = vmax.f32 %v2186_v29, %v2187_v20 }
 0x38f   : > { %v4625_v2 = vadd.f32 %v4606_v49, %v12935_v44  ;;  %v4507_v6 = vpop.f32.mrf.mxu3  ;;  %v10154_v44 = vld [vmem:[%s13967_s3 + $0x570] sm:$0xff]  ;;  %v2174_v35 = vmax.f32 %v2172_v1, %v2173_v41  ;;  %v2194_v49 = vrot.slane %v2193_v47, 1  ;;  %v10168_v1 = vld [vmem:[%s13967_s3 + $0x5e0] sm:$0xff]  ;;  %v10167_v41 = vld [vmem:[%s13967_s3 + $0x5d8] sm:$0xff] }
 0x390   : > { %v13128_v15 = vadd.f32 %v4507_v6, %v4403_v58  ;;  %5664 = vmatpush.bf16.msrb.mxu1 %v10154_v44  ;;  %5893 = vmatpush.bf16.msrb.mxu3 %v10169_v62  ;;  %v2386_v53 = vmax.f32 %v2188_v27, 0.0  ;;  %v10159_v44 = vld [vmem:[%s13967_s3 + $0x598] sm:$0xff]  ;;  %v5364_v62 = vpack.c.b16 %v13105_v30, %v12822_v46  ;;  %v10165_v46 = vld [vmem:[%s13967_s3 + $0x5c8] sm:$0xff] }
 0x391   : > { %v4739_v39 = vadd.f32 %v4720_v59, %v4625_v2  ;;  %v4723_v37 = vpop.f32.mrf.mxu2  ;;  %5557 = vmatmul.bf16.vlgmr.msra.gmra.mxu3 %v14104_v36  ;;  %v14106_v2 = vld [vmem:[#allocation15_spill] sm:$0xff]  ;;  %v2384_v25 = vmax.f32 %v2174_v35, 0.0  ;;  %v2195_v51 = vmax.f32 %v2193_v47, %v2194_v49  ;;  %v14108_v47 = vld [vmem:[#allocation12_spill] sm:$0xff]  ;;  %v10157_v35 = vld [vmem:[%s13967_s3 + $0x588] sm:$0xff] }
 0x392   : > { %v2530_v36 = vpack.c.bf16 %v2386_v53, %v2386_v53  ;;  %v10187_v30 = vld [vmem:[%s13969_s5 + $0x38] sm:$0xff] }
 0x393   : > { %v2528_v19 = vpack.c.bf16 %v2384_v25, %v2384_v25 }
 0x394   : > { %5665 = vmatpush.bf16.msrb.mxu1 %v10153_v56  ;;  %5894 = vmatpush.bf16.msrb.mxu3 %v10168_v1  ;;  %v10150_v56 = vld [vmem:[%s13967_s3 + $0x550] sm:$0xff] }
 0x395   : > { %v5476_v0 = vperm.slane %v2528_v19, 0 }
 0x396   : > { %v4609_v28 = vpop.f32.mrf.mxu1 }
 0x397   : > { %v4626_v58 = vadd.f32 %v4609_v28, %v12987_v17  ;;  %v4832_v11 = vpop.f32.mrf.mxu3  ;;  %v10161_v17 = vld [vmem:[%s13967_s3 + $0x5a8] sm:$0xff]  ;;  %v2529_v28 = vpack.c.bf16 %v2385_v54, %v2385_v54 }
 0x398   : > { %v13145_v59 = vadd.f32 %v4832_v11, %v4738_v45  ;;  %5779 = vmatpush.bf16.msrb.mxu2 %v10161_v17  ;;  %v10160_v45 = vld [vmem:[%s13967_s3 + $0x5a0] sm:$0xff]  ;;  %5895 = vmatpush.bf16.msrb.mxu3 %v10167_v41 }
 0x399   : > { %v4740_v32 = vadd.f32 %v4723_v37, %v4626_v58  ;;  %5313 = vmatmul.bf16.gmra.mxu1 %v14105_v5  ;;  %v4725_v48 = vpop.f32.mrf.mxu2  ;;  %v2387_v58 = vmax.f32 %v2195_v51, 0.0  ;;  %v5477_v5 = vperm.slane %v2529_v28, 0  ;;  %v5248_v51 = vsel %vm2775_vm7, %v13051_v33, %v12833_v50  ;;  %v10148_v50 = vld [vmem:[%s13967_s3 + $0x540] sm:$0xff] }
 0x39a   : > { %v13229_v1 = vsel %vm2777_vm8, %v13068_v3, %v5248_v51  ;;  %v10164_v33 = vld [vmem:[%s13967_s3 + $0x5c0] sm:$0xff]  ;;  %v10178_v51 = vld [vmem:[%s13967_s3 + $0x630] sm:$0xff] }
 0x39b   : > { %v2531_v20 = vpack.c.bf16 %v2387_v58, %v2387_v58 }
 0x39c   : > { %5780 = vmatpush.bf16.msrb.mxu2 %v10160_v45  ;;  %v13200_v45 = vunpack.c.l.b16 %v5477_v5  ;;  %5896 = vmatpush.bf16.msrb.mxu3 %v10166_v24 }
 0x39d   : > { %v5479_v27 = vperm.slane %v2531_v20, 0 }
 0x39e   : > { %v4611_v42 = vpop.f32.mrf.mxu1  ;;  %5432 = vmatmul.bf16.gmra.mxu2 %v14106_v2  ;;  %v10156_v2 = vld [vmem:[%s13967_s3 + $0x580] sm:$0xff] }
 0x39f   : > { %v4627_v22 = vadd.f32 %v4611_v42, %v13025_v10  ;;  %v4834_v6 = vpop.f32.mrf.mxu3  ;;  %v10152_v10 = vld [vmem:[%s13967_s3 + $0x560] sm:$0xff]  ;;  %v5484_v42 = vunpack.c.l.b16 %v5476_v0 }
 0x3a0   : > { %v13166_v21 = vadd.f32 %v4834_v6, %v4739_v39  ;;  %5666 = vmatpush.bf16.msrb.mxu1 %v10152_v10  ;;  %5781 = vmatpush.bf16.msrb.mxu2 %v10159_v44  ;;  %v10151_v39 = vld [vmem:[%s13967_s3 + $0x558] sm:$0xff] }
 0x3a1   : > { %v13164_v8 = vadd.f32 %v4725_v48, %v4627_v22  ;;  %v4728_v37 = vpop.f32.mrf.mxu2  ;;  %5562 = vmatmul.bf16.gmra.mxu3 %v14107_v14  ;;  %v10149_v22 = vld [vmem:[%s13967_s3 + $0x548] sm:$0xff]  ;;  %v5492_v6 = vsel %vm2765_vm2, %v13200_v45, %v5484_v42 }
 0x3a2   : > { %5897 = vmatpush.bf16.msrb.mxu3 %v10165_v46 }
 0x3a4   : > { %5667 = vmatpush.bf16.msrb.mxu1 %v10151_v39  ;;  %5782 = vmatpush.bf16.msrb.mxu2 %v10158_v4  ;;  %v14110_v4 = vld [vmem:[#allocation8_spill] sm:$0xff] }
 0x3a6   : > { %v4614_v52 = vpop.f32.mrf.mxu1  ;;  %5898 = vmatpush.bf16.msrb.mxu3 %v10164_v33 }
 0x3a7   : > { %v4628_v29 = vadd.f32 %v4614_v52, %v13062_v12  ;;  %v4837_v17 = vpop.f32.mrf.mxu3  ;;  %v5478_v12 = vperm.slane %v2530_v36, 0 }
 0x3a8   : > { %v13189_v23 = vadd.f32 %v4837_v17, %v4740_v32  ;;  %v10215_v32 = vld [vmem:[%s13969_s5 + $0x118] sm:$0xff]  ;;  %5668 = vmatpush.bf16.msrb.mxu1 %v10150_v56  ;;  %5783 = vmatpush.bf16.msrb.mxu2 %v10157_v35 }
 0x3a9   : > { %v4742_v48 = vadd.f32 %v4728_v37, %v4628_v29  ;;  %5318 = vmatmul.bf16.gmra.mxu1 %v14108_v47  ;;  %v4730_v11 = vpop.f32.mrf.mxu2  ;;  %v13217_v54 = vunpack.c.l.b16 %v5478_v12  ;;  %6612 = vmatpush.bf16.msrb.mxu0 %v10215_v32  ;;  %v14111_v47 = vld [vmem:[#allocation24_spill] sm:$0xff] }
 0x3aa   : > { %6372 = vmatpush.bf16.msra.mxu3 %v10187_v30 }
 0x3ab   : > { %v5493_v19 = vsel %vm2767_vm3, %v13217_v54, %v5492_v6 }
 0x3ac   : > { %5669 = vmatpush.bf16.msrb.mxu1 %v10149_v22  ;;  %5784 = vmatpush.bf16.msrb.mxu2 %v10156_v2  ;;  %v10179_v2 = vld [vmem:[%s13967_s3 + $0x638] sm:$0xff] }
 0x3ae   : > { %v4616_v49 = vpop.f32.mrf.mxu1  ;;  %5437 = vmatmul.bf16.gmra.mxu2 %v5364_v62  ;;  %v14112_v62 = vld [vmem:[#allocation21_spill] sm:$0xff] }
 0x3af   : > { %v4629_v25 = vadd.f32 %v4616_v49, %v13102_v16  ;;  %v13224_v16 = vunpack.c.l.b16 %v5479_v27  ;;  %v4839_v10 = vpop.f32.mrf.mxu3 }
 0x3b0   : > { %v4855_v44 = vadd.f32 %v4839_v10, %v13164_v8  ;;  %5670 = vmatpush.bf16.msrb.mxu1 %v10148_v50  ;;  %v14109_v8 = vld [vmem:[#allocation23_spill] sm:$0xff]  ;;  %v14114_v10 = vld [vmem:[#allocation37_spill] sm:$0xff] }
 0x3b1   : > { %v4743_v37 = vadd.f32 %v4730_v11, %v4629_v25  ;;  %v4733_v53 = vpop.f32.mrf.mxu2  ;;  %v5250_v39 = vpack.c.b16 %v13229_v1, %v14109_v8  ;;  %v5494_v3 = vsel %vm2769_vm4, %v13224_v16, %v5493_v19  ;;  %5567 = vmatmul.bf16.gmra.mxu3 %v14110_v4  ;;  %v14113_v25 = vld [vmem:[#allocation32_spill] sm:$0xff]  ;;  %v14115_v50 = vld [vmem:[#allocation31_spill] sm:$0xff] }
 0x3b2   : > { %v5495_v29 = vsel %vm2771_vm5, %v13042_v40, %v5494_v3 }
 0x3b4   : > { %6005 = vmatpush.bf16.msra.mxu1 %v10179_v2  ;;  %v10173_v2 = vld [vmem:[%s13967_s3 + $0x608] sm:$0xff] }
 0x3b6   : > { %v4619_v28 = vpop.f32.mrf.mxu1 }
 0x3b7   : > { %v4630_v52 = vadd.f32 %v4619_v28, %v13121_v9  ;;  %v4842_v14 = vpop.f32.mrf.mxu3  ;;  %v5496_v9 = vsel %vm2773_vm6, %v13047_v26, %v5495_v29 }
 0x3b8   : > { %v4856_v41 = vadd.f32 %v4842_v14, %v4742_v48  ;;  %v5497_v11 = vsel %vm2775_vm7, %v13057_v7, %v5496_v9  ;;  %6006 = vmatpush.bf16.msra.mxu1 %v10178_v51 }
 0x3b9   : > { %v4744_v58 = vadd.f32 %v4733_v53, %v4630_v52  ;;  %5323 = vmatmul.bf16.gmra.mxu1 %v5250_v39  ;;  %v4735_v36 = vpop.f32.mrf.mxu2  ;;  %v5498_v56 = vsel %vm2777_vm8, %v13064_v13, %v5497_v11 }
 0x3ba   : > { %v5499_v48 = vpack.c.b16 %v5498_v56, %v13022_v34 }
 0x3be   : > { %v4621_v0 = vpop.f32.mrf.mxu1  ;;  %5785 = vmatmul.bf16.vlgmr.msrb.gmra.mxu2 %v14111_v47 }
 0x3bf   : > { %v4631_v5 = vadd.f32 %v4621_v0, %v13128_v15  ;;  %v4844_v12 = vpop.f32.mrf.mxu3 }
 0x3c0   : > { %v13255_v35 = vadd.f32 %v4844_v12, %v4743_v37 }
 0x3c1   : > { %v4745_v20 = vadd.f32 %v4735_v36, %v4631_v5  ;;  %v5081_v17 = vpop.f32.mrf.mxu2  ;;  %5572 = vmatmul.bf16.gmra.mxu3 %v5499_v48  ;;  %v5606_v36 = vsel %vm2765_vm2, %v13217_v54, %v13200_v45  ;;  %v10175_v5 = vld [vmem:[%s13967_s3 + $0x618] sm:$0xff] }
 0x3c6   : > { %v4967_v24 = vpop.f32.mrf.mxu1 }
 0x3c7   : > { %v4987_v42 = vadd.f32 %v4967_v24, %v13145_v59  ;;  %v4847_v49 = vpop.f32.mrf.mxu3 }
 0x3c8   : > { %v13262_v22 = vadd.f32 %v4847_v49, %v4744_v58 }
 0x3c9   : > { %v5101_v15 = vadd.f32 %v5081_v17, %v4987_v42  ;;  %5671 = vmatmul.bf16.vlgmr.msrb.gmra.mxu1 %v14112_v62  ;;  %v13260_v32 = vpop.f32.mrf.mxu2  ;;  %v14117_v17 = vld [vmem:[#allocation11_spill] sm:$0xff] }
 0x3ca   : > { %v10174_v42 = vld [vmem:[%s13967_s3 + $0x610] sm:$0xff] }
 0x3ce   : > { %v4969_v27 = vpop.f32.mrf.mxu1  ;;  %5790 = vmatmul.bf16.gmra.mxu2 %v14113_v25 }
 0x3cf   : > { %v13268_v34 = vadd.f32 %v4969_v27, %v13166_v21  ;;  %v4849_v46 = vpop.f32.mrf.mxu3  ;;  %v5720_v21 = vsel %vm2765_vm2, %v13224_v16, %v13217_v54  ;;  %v14116_v54 = vld [vmem:[#allocation39_spill] sm:$0xff] }
 0x3d0   : > { %v13271_v37 = vadd.f32 %v4849_v46, %v4745_v20  ;;  %v5721_v52 = vsel %vm2767_vm3, %v13042_v40, %v5720_v21 }
 0x3d1   : > { %v5086_v59 = vpop.f32.mrf.mxu2  ;;  %5899 = vmatmul.bf16.vlgmr.msrb.gmra.mxu3 %v14114_v10  ;;  %v5722_v3 = vsel %vm2769_vm4, %v13047_v26, %v5721_v52 }
 0x3d2   : > { %v5723_v58 = vsel %vm2771_vm5, %v13057_v7, %v5722_v3 }
 0x3d3   : > { %v5724_v9 = vsel %vm2773_vm6, %v13064_v13, %v5723_v58 }
 0x3d4   : > { %v5725_v45 = vsel %vm2775_vm7, %v13070_v43, %v5724_v9 }
 0x3d5   : > { %v5726_v56 = vsel %vm2777_vm8, %v13074_v57, %v5725_v45 }
 0x3d6   : > { %v4972_v6 = vpop.f32.mrf.mxu1 }
 0x3d7   : > { %v4989_v53 = vadd.f32 %v4972_v6, %v13189_v23  ;;  %v5195_v28 = vpop.f32.mrf.mxu3  ;;  %v10177_v23 = vld [vmem:[%s13967_s3 + $0x628] sm:$0xff] }
 0x3d8   : > { %v13286_v8 = vadd.f32 %v5195_v28, %v5101_v15  ;;  %6007 = vmatpush.bf16.msra.mxu1 %v10177_v23  ;;  %v5727_v15 = vpack.c.b16 %v5726_v56, %v13097_v31  ;;  %v5834_v31 = vsel %vm2765_vm2, %v13042_v40, %v13224_v16 }
 0x3d9   : > { %v5103_v19 = vadd.f32 %v5086_v59, %v4989_v53  ;;  %5676 = vmatmul.bf16.gmra.mxu1 %v14115_v50  ;;  %v13282_v33 = vpop.f32.mrf.mxu2  ;;  %v5835_v6 = vsel %vm2767_vm3, %v13047_v26, %v5834_v31  ;;  %v10214_v53 = vld [vmem:[%s13969_s5 + $0x110] sm:$0xff] }
 0x3da   : > { %6613 = vmatpush.bf16.msrb.mxu0 %v10214_v53  ;;  %v5836_v21 = vsel %vm2769_vm4, %v13057_v7, %v5835_v6  ;;  %v10213_v53 = vld [vmem:[%s13969_s5 + $0x108] sm:$0xff] }
 0x3de   : > { %v4974_v39 = vpop.f32.mrf.mxu1  ;;  %5795 = vmatmul.bf16.gmra.mxu2 %v12782_v38  ;;  %v5607_v38 = vsel %vm2767_vm3, %v13224_v16, %v5606_v36  ;;  %v14118_v36 = vld [vmem:[#allocation36_spill] sm:$0xff]  ;;  %6614 = vmatpush.bf16.msrb.mxu0 %v10213_v53  ;;  %v5102_v53 = vadd.f32 %v13260_v32, %v13268_v34 }
 0x3df   : > { %v13293_v4 = vadd.f32 %v4974_v39, %v4855_v44  ;;  %v13301_v14 = vpop.f32.mrf.mxu3  ;;  %v10176_v44 = vld [vmem:[%s13967_s3 + $0x620] sm:$0xff]  ;;  %v5608_v11 = vsel %vm2769_vm4, %v13042_v40, %v5607_v38  ;;  %v10251_v32 = vld [vmem:[%s13969_s5 + $0x238] sm:$0xff] }
 0x3e0   : > { %6008 = vmatpush.bf16.msra.mxu1 %v10176_v44  ;;  %v5216_v30 = vadd.f32 %v13301_v14, %v5102_v53  ;;  %v10201_v14 = vld [vmem:[%s13969_s5 + $0xa8] sm:$0xff] }
 0x3e1   : > { %v5091_v29 = vpop.f32.mrf.mxu2  ;;  %5904 = vmatmul.bf16.gmra.mxu3 %v14116_v54 }
 0x3e4   : > { %6009 = vmatpush.bf16.msra.mxu1 %v10175_v5 }
 0x3e6   : > { %v4977_v0 = vpop.f32.mrf.mxu1 }
 0x3e7   : > { %v4991_v47 = vadd.f32 %v4977_v0, %v4856_v41  ;;  %v5200_v48 = vpop.f32.mrf.mxu3  ;;  %v5609_v41 = vsel %vm2771_vm5, %v13047_v26, %v5608_v11 }
 0x3e8   : > { %v5217_v24 = vadd.f32 %v5200_v48, %v5103_v19  ;;  %v5610_v49 = vsel %vm2773_vm6, %v13057_v7, %v5609_v41  ;;  %6010 = vmatpush.bf16.msra.mxu1 %v10174_v42  ;;  %v5837_v19 = vsel %vm2771_vm5, %v13064_v13, %v5836_v21  ;;  %v14120_v42 = vld [vmem:[#allocation20_spill] sm:$0xff] }
 0x3e9   : > { %v5105_v20 = vadd.f32 %v5091_v29, %v4991_v47  ;;  %5681 = vmatmul.bf16.gmra.mxu1 %v14117_v17  ;;  %v13319_v12 = vpop.f32.mrf.mxu2  ;;  %v5611_v25 = vsel %vm2775_vm7, %v13064_v13, %v5610_v49  ;;  %v5838_v23 = vsel %vm2773_vm6, %v13070_v43, %v5837_v19 }
 0x3ea   : > { %v5612_v51 = vsel %vm2777_vm8, %v13070_v43, %v5611_v25  ;;  %v5839_v7 = vsel %vm2775_vm7, %v13074_v57, %v5838_v23  ;;  %v10186_v23 = vld [vmem:[%s13969_s5 + $0x30] sm:$0xff] }
 0x3eb   : > { %v5613_v16 = vpack.c.b16 %v5612_v51, %v12982_v60  ;;  %v5840_v13 = vsel %vm2777_vm8, %v13085_v61, %v5839_v7  ;;  %6373 = vmatpush.bf16.msra.mxu3 %v10186_v23  ;;  %v10194_v7 = vld [vmem:[%s13969_s5 + $0x70] sm:$0xff] }
 0x3ec   : > { %6011 = vmatpush.bf16.msra.mxu1 %v10173_v2  ;;  %v5841_v3 = vpack.c.b16 %v5840_v13, %v13229_v1  ;;  %v14119_v1 = vld [vmem:[#allocation38_spill] sm:$0xff] }
 0x3ed   : > { %v10193_v13 = vld [vmem:[%s13969_s5 + $0x68] sm:$0xff]  ;;  %v10222_v23 = vld [vmem:[%s13969_s5 + $0x150] sm:$0xff] }
 0x3ee   : > { %v4979_v62 = vpop.f32.mrf.mxu1  ;;  %5800 = vmatmul.bf16.gmra.mxu2 %v5727_v15 }
 0x3ef   : > { %v13335_v27 = vadd.f32 %v4979_v62, %v13255_v35  ;;  %v13342_v46 = vpop.f32.mrf.mxu3  ;;  %v10172_v35 = vld [vmem:[%s13967_s3 + $0x600] sm:$0xff] }
 0x3f0   : > { %6012 = vmatpush.bf16.msra.mxu1 %v10172_v35 }
 0x3f1   : > { %v5096_v59 = vpop.f32.mrf.mxu2  ;;  %5909 = vmatmul.bf16.gmra.mxu3 %v12747_v18 }
 0x3f6   : > { %v4982_v10 = vpop.f32.mrf.mxu1 }
 0x3f7   : > { %v4993_v40 = vadd.f32 %v4982_v10, %v13262_v22  ;;  %v5205_v28 = vpop.f32.mrf.mxu3 }
 0x3f8   : > { %v5219_v52 = vadd.f32 %v5205_v28, %v5105_v20 }
 0x3f9   : > { %v5107_v26 = vadd.f32 %v5096_v59, %v4993_v40  ;;  %5686 = vmatmul.bf16.gmra.mxu1 %v5613_v16  ;;  %v13361_v50 = vpop.f32.mrf.mxu2 }
 0x3fe   : > { %v4984_v22 = vpop.f32.mrf.mxu1 }
 0x3ff   : > { %v13366_v60 = vadd.f32 %v4984_v22, %v13271_v37  ;;  %v13370_v39 = vpop.f32.mrf.mxu3 }
 0x401   : > { %v5423_v18 = vpop.f32.mrf.mxu2  ;;  %5914 = vmatmul.bf16.gmra.mxu3 %v5841_v3  ;;  %v10184_v3 = vld [vmem:[%s13969_s5 + $0x20] sm:$0xff] }
 0x406   : > { %v5309_v58 = vpop.f32.mrf.mxu1 }
 0x407   : > { %v5329_v29 = vadd.f32 %v5309_v58, %v13286_v8  ;;  %v5210_v9 = vpop.f32.mrf.mxu3 }
 0x408   : > { %v5221_v44 = vadd.f32 %v5210_v9, %v5107_v26 }
 0x409   : > { %v5443_v43 = vadd.f32 %v5423_v18, %v5329_v29  ;;  %6013 = vmatmul.bf16.vlgmr.msra.gmra.mxu1 %v14118_v36  ;;  %v13377_v37 = vpop.f32.mrf.mxu2  ;;  %v10185_v18 = vld [vmem:[%s13969_s5 + $0x28] sm:$0xff]  ;;  %v10192_v29 = vld [vmem:[%s13969_s5 + $0x60] sm:$0xff] }
 0x40a   : > { %6374 = vmatpush.bf16.msra.mxu3 %v10185_v18  ;;  %v10208_v18 = vld [vmem:[%s13969_s5 + $0xe0] sm:$0xff] }
 0x40e   : > { %v13379_v57 = vpop.f32.mrf.mxu1  ;;  %6375 = vmatpush.bf16.msra.mxu3 %v10184_v3 }
 0x40f   : > { %v13381_v0 = vpop.f32.mrf.mxu3 }
 0x411   : > { %v5428_v38 = vpop.f32.mrf.mxu2 }
 0x416   : > { %v5314_v5 = vpop.f32.mrf.mxu1 }
 0x417   : > { %v5331_v61 = vadd.f32 %v5314_v5, %v5217_v24  ;;  %v5558_v8 = vpop.f32.mrf.mxu3  ;;  %v10227_v5 = vld [vmem:[%s13969_s5 + $0x178] sm:$0xff] }
 0x418   : > { %v5578_v54 = vadd.f32 %v5558_v8, %v5443_v43  ;;  %v10183_v43 = vld [vmem:[%s13969_s5 + $0x18] sm:$0xff]  ;;  %6687 = vmatpush.bf16.msrb.mxu1 %v10227_v5  ;;  %v10226_v8 = vld [vmem:[%s13969_s5 + $0x170] sm:$0xff] }
 0x419   : > { %v5445_v47 = vadd.f32 %v5428_v38, %v5331_v61  ;;  %6018 = vmatmul.bf16.gmra.mxu1 %v14119_v1  ;;  %v13384_v45 = vpop.f32.mrf.mxu2  ;;  %6376 = vmatpush.bf16.msra.mxu3 %v10183_v43  ;;  %v10191_v38 = vld [vmem:[%s13969_s5 + $0x58] sm:$0xff]  ;;  %v10182_v61 = vld [vmem:[%s13969_s5 + $0x10] sm:$0xff] }
 0x41a   : > { %v10190_v1 = vld [vmem:[%s13969_s5 + $0x50] sm:$0xff] }
 0x41c   : > { %6688 = vmatpush.bf16.msrb.mxu1 %v10226_v8  ;;  %v10206_v8 = vld [vmem:[%s13969_s5 + $0xd0] sm:$0xff] }
 0x41d   : > { %6377 = vmatpush.bf16.msra.mxu3 %v10182_v61  ;;  %v10199_v61 = vld [vmem:[%s13969_s5 + $0x98] sm:$0xff] }
 0x41e   : > { %v13386_v11 = vpop.f32.mrf.mxu1 }
 0x41f   : > { %v13388_v17 = vpop.f32.mrf.mxu3 }
 0x421   : > { %v5433_v20 = vpop.f32.mrf.mxu2 }
 0x426   : > { %v5319_v56 = vpop.f32.mrf.mxu1 }
 0x427   : > { %v5333_v48 = vadd.f32 %v5319_v56, %v5219_v52  ;;  %v5563_v15 = vpop.f32.mrf.mxu3  ;;  %v10195_v52 = vld [vmem:[%s13969_s5 + $0x78] sm:$0xff] }
 0x428   : > { %v5580_v62 = vadd.f32 %v5563_v15, %v5445_v47  ;;  %6311 = vmatpush.bf16.msra.mxu2 %v10195_v52  ;;  %v10211_v15 = vld [vmem:[%s13969_s5 + $0xf8] sm:$0xff] }
 0x429   : > { %v5447_v41 = vadd.f32 %v5433_v20, %v5333_v48  ;;  %6023 = vmatmul.bf16.gmra.mxu1 %v14120_v42  ;;  %v13391_v24 = vpop.f32.mrf.mxu2  ;;  %v10189_v48 = vld [vmem:[%s13969_s5 + $0x48] sm:$0xff]  ;;  %v10180_v42 = vld [vmem:[%s13969_s5] sm:$0xff] }
 0x42c   : > { %6312 = vmatpush.bf16.msra.mxu2 %v10194_v7  ;;  %v5330_v7 = vadd.f32 %v13379_v57, %v5216_v30  ;;  %v10200_v57 = vld [vmem:[%s13969_s5 + $0xa0] sm:$0xff] }
 0x42e   : > { %v13393_v49 = vpop.f32.mrf.mxu1  ;;  %v5444_v3 = vadd.f32 %v13377_v37, %v5330_v7  ;;  %v10220_v37 = vld [vmem:[%s13969_s5 + $0x140] sm:$0xff] }
 0x42f   : > { %v13395_v2 = vpop.f32.mrf.mxu3 }
 0x430   : > { %6313 = vmatpush.bf16.msra.mxu2 %v10193_v13  ;;  %v10221_v13 = vld [vmem:[%s13969_s5 + $0x148] sm:$0xff] }
 0x431   : > { %v5438_v31 = vpop.f32.mrf.mxu2 }
 0x434   : > { %6314 = vmatpush.bf16.msra.mxu2 %v10192_v29  ;;  %v5579_v29 = vadd.f32 %v13388_v17, %v5444_v3 }
 0x436   : > { %v5324_v25 = vpop.f32.mrf.mxu1 }
 0x437   : > { %v5335_v59 = vadd.f32 %v5324_v25, %v5221_v44  ;;  %v5568_v6 = vpop.f32.mrf.mxu3  ;;  %v10188_v25 = vld [vmem:[%s13969_s5 + $0x40] sm:$0xff] }
 0x438   : > { %v5582_v35 = vadd.f32 %v5568_v6, %v5447_v41  ;;  %6315 = vmatpush.bf16.msra.mxu2 %v10191_v38  ;;  %v10225_v41 = vld [vmem:[%s13969_s5 + $0x168] sm:$0xff]  ;;  %v10210_v6 = vld [vmem:[%s13969_s5 + $0xf0] sm:$0xff] }
 0x439   : > { %v5449_v51 = vadd.f32 %v5438_v31, %v5335_v59  ;;  %6028 = vmatmul.bf16.gmra.mxu1 %v5955_v63  ;;  %v13444_v9 = vpop.f32.mrf.mxu2  ;;  %v10224_v31 = vld [vmem:[%s13969_s5 + $0x160] sm:$0xff] }
 0x43a   : > { %6689 = vmatpush.bf16.msrb.mxu1 %v10225_v41 }
 0x43c   : > { %6316 = vmatpush.bf16.msra.mxu2 %v10190_v1  ;;  %v10259_v1 = vld [vmem:[%s13969_s5 + $0x278] sm:$0xff] }
 0x43e   : > { %v13403_v10 = vpop.f32.mrf.mxu1  ;;  %6690 = vmatpush.bf16.msrb.mxu1 %v10224_v31 }
 0x43f   : > { %v13405_v40 = vpop.f32.mrf.mxu3 }
 0x440   : > { %6317 = vmatpush.bf16.msra.mxu2 %v10189_v48  ;;  %v10250_v48 = vld [vmem:[%s13969_s5 + $0x230] sm:$0xff] }
 0x441   : > { %v5786_v20 = vpop.f32.mrf.mxu2 }
 0x444   : > { %6318 = vmatpush.bf16.msra.mxu2 %v10188_v25  ;;  %v13574_v25 = vld [vmem:[%s13968_s4] ss:$0 sm:$0xff] }
 0x446   : > { %v5672_v16 = vpop.f32.mrf.mxu1 }
 0x447   : > { %v13407_v21 = vadd.f32 %v5672_v16, %v5578_v54  ;;  %v5573_v26 = vpop.f32.mrf.mxu3  ;;  %v10181_v54 = vld [vmem:[%s13969_s5 + $0x8] sm:$0xff]  ;;  %v10202_v16 = vld [vmem:[%s13969_s5 + $0xb0] sm:$0xff] }
 0x448   : > { %v5584_v19 = vadd.f32 %v5573_v26, %v5449_v51  ;;  %6378 = vmatpush.bf16.msra.mxu3 %v10181_v54  ;;  %v10203_v51 = vld [vmem:[%s13969_s5 + $0xb8] sm:$0xff] }
 0x449   : > { %6450 = vmatpush.bf16.msrb.mxu2 %v10203_v51  ;;  %v5788_v26 = vpop.f32.mrf.mxu2  ;;  %v5806_v54 = vadd.f32 %v5786_v20, %v13407_v21  ;;  %v10258_v21 = vld [vmem:[%s13969_s5 + $0x270] sm:$0xff] }
 0x44c   : > { %6379 = vmatpush.bf16.msra.mxu3 %v10180_v42 }
 0x44d   : > { %6451 = vmatpush.bf16.msrb.mxu2 %v10202_v16  ;;  %v10204_v16 = vld [vmem:[%s13969_s5 + $0xc0] sm:$0xff] }
 0x44e   : > { %v13409_v28 = vpop.f32.mrf.mxu1 }
 0x44f   : > { %v13446_v44 = vpop.f32.mrf.mxu3  ;;  %v5693_v5 = vadd.f32 %v13409_v28, %v5579_v29  ;;  %v5104_v28 = vadd.f32 %v13282_v33, %v13293_v4  ;;  %v10205_v33 = vld [vmem:[%s13969_s5 + $0xc8] sm:$0xff] }
 0x450   : > { %6529 = vmatpush.bf16.msrb.mxu3 %v10211_v15  ;;  %v10198_v15 = vld [vmem:[%s13969_s5 + $0x90] sm:$0xff]  ;;  %v10249_v4 = vld [vmem:[%s13969_s5 + $0x228] sm:$0xff] }
 0x451   : > { %6452 = vmatpush.bf16.msrb.mxu2 %v10201_v14  ;;  %v13535_v43 = vpop.f32.mrf.mxu2  ;;  %v5807_v42 = vadd.f32 %v5788_v26, %v5693_v5  ;;  %v5218_v20 = vadd.f32 %v13342_v46, %v5104_v28  ;;  %v10255_v5 = vld [vmem:[%s13969_s5 + $0x258] sm:$0xff] }
 0x453   : > { %v5332_v31 = vadd.f32 %v13386_v11, %v5218_v20  ;;  %v10248_v11 = vld [vmem:[%s13969_s5 + $0x220] sm:$0xff] }
 0x454   : > { %6530 = vmatpush.bf16.msrb.mxu3 %v10210_v6  ;;  %v10197_v6 = vld [vmem:[%s13969_s5 + $0x88] sm:$0xff] }
 0x455   : > { %6453 = vmatpush.bf16.msrb.mxu2 %v10200_v57  ;;  %v5446_v30 = vadd.f32 %v13384_v45, %v5332_v31  ;;  %v10247_v45 = vld [vmem:[%s13969_s5 + $0x218] sm:$0xff] }
 0x456   : > { %v5677_v55 = vpop.f32.mrf.mxu1 }
 0x457   : > { %v13414_v63 = vadd.f32 %v5677_v55, %v5580_v62  ;;  %v5900_v56 = vpop.f32.mrf.mxu3  ;;  %v10212_v55 = vld [vmem:[%s13969_s5 + $0x100] sm:$0xff]  ;;  %v5581_v7 = vadd.f32 %v13395_v2, %v5446_v30 }
 0x458   : > { %6615 = vmatpush.bf16.msrb.mxu0 %v10212_v55  ;;  %v5920_v41 = vadd.f32 %v5900_v56, %v5806_v54 }
 0x459   : > { %6454 = vmatpush.bf16.msrb.mxu2 %v10199_v61  ;;  %v5793_v53 = vpop.f32.mrf.mxu2  ;;  %v5808_v54 = vadd.f32 %v13535_v43, %v13414_v63  ;;  %v10254_v63 = vld [vmem:[%s13969_s5 + $0x250] sm:$0xff] }
 0x45c   : > { %6924 = vmatpush.bf16.msra.mxu0 %v10251_v32 }
 0x45d   : > { %6455 = vmatpush.bf16.msrb.mxu2 %v10198_v15  ;;  %v10246_v15 = vld [vmem:[%s13969_s5 + $0x210] sm:$0xff] }
 0x45e   : > { %v13422_v22 = vpop.f32.mrf.mxu1 }
 0x45f   : > { %v5902_v34 = vpop.f32.mrf.mxu3  ;;  %v5695_v29 = vadd.f32 %v13422_v22, %v5581_v7  ;;  %v5106_v22 = vadd.f32 %v13319_v12, %v13335_v27 }
 0x460   : > { %6925 = vmatpush.bf16.msra.mxu0 %v10250_v48  ;;  %v5921_v56 = vadd.f32 %v5902_v34, %v5807_v42  ;;  %v10196_v34 = vld [vmem:[%s13969_s5 + $0x80] sm:$0xff] }
 0x461   : > { %6456 = vmatpush.bf16.msrb.mxu2 %v10197_v6  ;;  %v13614_v28 = vpop.f32.mrf.mxu2  ;;  %v5809_v20 = vadd.f32 %v5793_v53, %v5695_v29  ;;  %v5220_v12 = vadd.f32 %v13370_v39, %v5106_v22  ;;  %v10253_v39 = vld [vmem:[%s13969_s5 + $0x248] sm:$0xff] }
 0x463   : > { %v5334_v31 = vadd.f32 %v13393_v49, %v5220_v12 }
 0x464   : > { %6926 = vmatpush.bf16.msra.mxu0 %v10249_v4 }
 0x465   : > { %6457 = vmatpush.bf16.msrb.mxu2 %v10196_v34 }
 0x466   : > { %v5682_v58 = vpop.f32.mrf.mxu1 }
 0x467   : > { %v13442_v36 = vadd.f32 %v5682_v58, %v5582_v35  ;;  %v10223_v35 = vld [vmem:[%s13969_s5 + $0x158] sm:$0xff]  ;;  %v13547_v17 = vpop.f32.mrf.mxu3 }
 0x468   : > { %6691 = vmatpush.bf16.msrb.mxu1 %v10223_v35  ;;  %v10207_v58 = vld [vmem:[%s13969_s5 + $0xd8] sm:$0xff]  ;;  %v10257_v35 = vld [vmem:[%s13969_s5 + $0x268] sm:$0xff]  ;;  %6927 = vmatpush.bf16.msra.mxu0 %v10248_v11 }
 0x46c   : > { %6692 = vmatpush.bf16.msrb.mxu1 %v10222_v23  ;;  %v10256_v23 = vld [vmem:[%s13969_s5 + $0x260] sm:$0xff]  ;;  %6928 = vmatpush.bf16.msra.mxu0 %v10247_v45  ;;  %v10243_v45 = vld [vmem:[%s13969_s5 + $0x1f8] sm:$0xff] }
 0x46e   : > { %v13457_v47 = vpop.f32.mrf.mxu1 }
 0x46f   : > { %v5907_v55 = vpop.f32.mrf.mxu3 }
 0x470   : > { %6693 = vmatpush.bf16.msrb.mxu1 %v10221_v13  ;;  %6929 = vmatpush.bf16.msra.mxu0 %v10246_v15 }
 0x474   : > { %6694 = vmatpush.bf16.msrb.mxu1 %v10220_v37 }
 0x476   : > { %v5687_v62 = vpop.f32.mrf.mxu1 }
 0x477   : > { %v13486_v59 = vadd.f32 %v5687_v62, %v5584_v19  ;;  %v10209_v19 = vld [vmem:[%s13969_s5 + $0xe8] sm:$0xff]  ;;  %v13624_v27 = vpop.f32.mrf.mxu3 }
 0x478   : > { %6531 = vmatpush.bf16.msrb.mxu3 %v10209_v19  ;;  %7003 = vmatpush.bf16.msra.mxu1 %v10259_v1 }
 0x47c   : > { %6532 = vmatpush.bf16.msrb.mxu3 %v10208_v18  ;;  %7004 = vmatpush.bf16.msra.mxu1 %v10258_v21  ;;  %v5922_v21 = vadd.f32 %v13547_v17, %v5808_v54 }
 0x47e   : > { %v13512_v52 = vpop.f32.mrf.mxu1 }
 0x480   : > { %6533 = vmatpush.bf16.msrb.mxu3 %v10207_v58  ;;  %7005 = vmatpush.bf16.msra.mxu1 %v10257_v35 }
 0x484   : > { %6534 = vmatpush.bf16.msrb.mxu3 %v10206_v8  ;;  %7006 = vmatpush.bf16.msra.mxu1 %v10256_v23 }
 0x486   : > { %v6014_v38 = vpop.f32.mrf.mxu1 }
 0x487   : > { %v6034_v62 = vadd.f32 %v6014_v38, %v5920_v41 }
 0x488   : > { %6535 = vmatpush.bf16.msrb.mxu3 %v10205_v33  ;;  %7007 = vmatpush.bf16.msra.mxu1 %v10255_v5  ;;  %v5912_v5 = vpop.f32.mrf.mxu3 }
 0x489   : > { %v6046_v26 = vadd.f32 %v13574_v25, %v6034_v62  ;;  %v5923_v62 = vadd.f32 %v5907_v55, %v5809_v20  ;;  %v5448_v55 = vadd.f32 %v13391_v24, %v5334_v31 }
 0x48c   : > { %6536 = vmatpush.bf16.msrb.mxu3 %v10204_v16  ;;  %7008 = vmatpush.bf16.msra.mxu1 %v10254_v63  ;;  %v10234_v63 = vld [vmem:[%s13969_s5 + $0x1b0] sm:$0xff] }
 0x48e   : > { %v6016_v46 = vpop.f32.mrf.mxu1 }
 0x48f   : > { %v6035_v51 = vadd.f32 %v6016_v46, %v5921_v56  ;;  %v10245_v56 = vld [vmem:[%s13969_s5 + $0x208] sm:$0xff] }
 0x490   : > { %6930 = vmatpush.bf16.msra.mxu0 %v10245_v56  ;;  %7009 = vmatpush.bf16.msra.mxu1 %v10253_v39  ;;  %v5108_v56 = vadd.f32 %v13361_v50, %v13366_v60  ;;  %v10233_v50 = vld [vmem:[%s13969_s5 + $0x1a8] sm:$0xff] }
 0x491   : > { %v6047_v19 = vadd.f32 %v13574_v25, %v6035_v51 }
 0x493   : > { %v6054_v32 = vmax.f32 %v6046_v26, %v6047_v19  ;;  %v10244_v19 = vld [vmem:[%s13969_s5 + $0x200] sm:$0xff] }
 0x494   : > { %6931 = vmatpush.bf16.msra.mxu0 %v10244_v19 }
 0x495   : > { %v6062_v14 = vrot.slane %v6054_v32, 2  ;;  %v6063_v18 = vrot.slane %v6054_v32, 4  ;;  %v6064_v13 = vrot.slane %v6054_v32, 6  ;;  %v6086_v3 = vsel %vm1243_vm1, %v6054_v32, -inf }
 0x496   : > { %v6087_v57 = vrot.slane %v6086_v3, 4  ;;  %v6019_v58 = vpop.f32.mrf.mxu1 }
 0x497   : > { %v6093_v38 = vsel %vm1243_vm1, %v6062_v14, -inf  ;;  %v6100_v37 = vsel %vm1243_vm1, %v6063_v18, -inf  ;;  %v6107_v2 = vsel %vm1243_vm1, %v6064_v13, -inf  ;;  %v6036_v17 = vadd.f32 %v6019_v58, %v5922_v21  ;;  %v10252_v18 = vld [vmem:[%s13969_s5 + $0x240] sm:$0xff] }
 0x498   : > { %v6088_v61 = vmax.f32 %v6086_v3, %v6087_v57  ;;  %v6094_v1 = vrot.slane %v6093_v38, 4  ;;  %v6108_v8 = vrot.slane %v6107_v2, 4  ;;  %v6101_v42 = vrot.slane %v6100_v37, 4  ;;  %v5798_v3 = vpop.f32.mrf.mxu2  ;;  %7010 = vmatpush.bf16.msra.mxu1 %v10252_v18 }
 0x499   : > { %v6048_v49 = vadd.f32 %v13574_v25, %v6036_v17  ;;  %v5583_v13 = vadd.f32 %v13405_v40, %v5448_v55  ;;  %v5915_v55 = vpop.f32.mrf.mxu3 }
 0x49a   : > { %v6089_v48 = vrot.slane %v6088_v61, 2  ;;  %v6095_v41 = vmax.f32 %v6093_v38, %v6094_v1  ;;  %v6109_v33 = vmax.f32 %v6107_v2, %v6108_v8  ;;  %v6102_v46 = vmax.f32 %v6100_v37, %v6101_v42  ;;  %v10235_v2 = vld [vmem:[%s13969_s5 + $0x1b8] sm:$0xff] }
 0x49b   : > { %v5697_v40 = vadd.f32 %v13457_v47, %v5583_v13  ;;  %v5810_v47 = vadd.f32 %v13614_v28, %v13442_v36  ;;  %v10241_v36 = vld [vmem:[%s13969_s5 + $0x1e8] sm:$0xff] }
 0x49c   : > { %v6090_v43 = vmax.f32 %v6088_v61, %v6089_v48  ;;  %v6096_v4 = vrot.slane %v6095_v41, 2  ;;  %v6110_v16 = vrot.slane %v6109_v33, 2  ;;  %v6103_v23 = vrot.slane %v6102_v46, 2 }
 0x49d   : > { %v5811_v17 = vadd.f32 %v5798_v3, %v5697_v40  ;;  %v10291_v40 = vld [vmem:[%s13969_s5 + $0x378] sm:$0xff] }
 0x49e   : > { %v6021_v51 = vpop.f32.mrf.mxu1  ;;  %v6091_v6 = vrot.slane %v6090_v43, 1  ;;  %v6097_v35 = vmax.f32 %v6095_v41, %v6096_v4  ;;  %v6111_v14 = vmax.f32 %v6109_v33, %v6110_v16  ;;  %v6104_v54 = vmax.f32 %v6102_v46, %v6103_v23  ;;  %v10242_v41 = vld [vmem:[%s13969_s5 + $0x1f0] sm:$0xff] }
 0x49f   : > { %v6037_v53 = vadd.f32 %v6021_v51, %v5923_v62  ;;  %v5924_v62 = vadd.f32 %v13624_v27, %v5810_v47 }
 0x4a0   : > { %v6092_v11 = vmax.f32 %v6090_v43, %v6091_v6  ;;  %v6098_v26 = vrot.slane %v6097_v35, 1  ;;  %v6112_v42 = vrot.slane %v6111_v14, 1  ;;  %v6105_v4 = vrot.slane %v6104_v54, 1  ;;  %v5801_v60 = vpop.f32.mrf.mxu2 }
 0x4a1   : > { %v6049_v30 = vadd.f32 %v13574_v25, %v6037_v53  ;;  %v5925_v53 = vadd.f32 %v5912_v5, %v5811_v17 }
 0x4a2   : > { %v6198_v32 = vmax.f32 %v6092_v11, 0.0  ;;  %v6099_v34 = vmax.f32 %v6097_v35, %v6098_v26  ;;  %v6113_v46 = vmax.f32 %v6111_v14, %v6112_v42  ;;  %v5222_v35 = vadd.f32 %v13381_v0, %v5108_v56  ;;  %v10240_v0 = vld [vmem:[%s13969_s5 + $0x1e0] sm:$0xff]  ;;  %v10290_v56 = vld [vmem:[%s13969_s5 + $0x370] sm:$0xff] }
 0x4a3   : > { %v6055_v7 = vmax.f32 %v6048_v49, %v6049_v30  ;;  %v6106_v11 = vmax.f32 %v6104_v54, %v6105_v4  ;;  %v10231_v54 = vld [vmem:[%s13969_s5 + $0x198] sm:$0xff]  ;;  %v10230_v4 = vld [vmem:[%s13969_s5 + $0x190] sm:$0xff] }
 0x4a4   : > { %v6214_v57 = vpack.c.bf16 %v6198_v32, %v6198_v32  ;;  %v6199_v58 = vmax.f32 %v6099_v34, 0.0  ;;  %v5336_v19 = vadd.f32 %v13403_v10, %v5222_v35  ;;  %v6201_v32 = vmax.f32 %v6113_v46, 0.0  ;;  %v10232_v10 = vld [vmem:[%s13969_s5 + $0x1a0] sm:$0xff]  ;;  %v10281_v46 = vld [vmem:[%s13969_s5 + $0x328] sm:$0xff] }
 0x4a5   : > { %v6065_v24 = vrot.slane %v6055_v7, 2  ;;  %v6066_v29 = vrot.slane %v6055_v7, 4  ;;  %v6067_v38 = vrot.slane %v6055_v7, 6  ;;  %v6114_v37 = vsel %vm1243_vm1, %v6055_v7, -inf }
 0x4a6   : > { %v6115_v61 = vrot.slane %v6114_v37, 4  ;;  %v6024_v1 = vpop.f32.mrf.mxu1  ;;  %6380 = vmatmul.bf16.vlgmr.msra.gmra.mxu3 %v6214_v57  ;;  %v6215_v8 = vpack.c.bf16 %v6199_v58, %v6199_v58  ;;  %v6200_v13 = vmax.f32 %v6106_v11, 0.0  ;;  %v5450_v57 = vadd.f32 %v13444_v9, %v5336_v19 }
 0x4a7   : > { %v6121_v22 = vsel %vm1243_vm1, %v6065_v24, -inf  ;;  %v6135_v48 = vsel %vm1243_vm1, %v6067_v38, -inf  ;;  %6845 = vmatpush.bf16.msra.mxu3 %v10243_v45  ;;  %v6128_v21 = vsel %vm1243_vm1, %v6066_v29, -inf  ;;  %v6038_v39 = vadd.f32 %v6024_v1, %v5924_v62  ;;  %v10239_v24 = vld [vmem:[%s13969_s5 + $0x1d8] sm:$0xff]  ;;  %v5917_v62 = vpop.f32.mrf.mxu3 }
 0x4a8   : > { %v6122_v15 = vrot.slane %v6121_v22, 4  ;;  %v6136_v20 = vrot.slane %v6135_v48, 4  ;;  %6319 = vmatmul.bf16.vlgmr.msra.gmra.mxu2 %v6215_v8  ;;  %v6116_v33 = vmax.f32 %v6114_v37, %v6115_v61  ;;  %v6129_v31 = vrot.slane %v6128_v21, 4  ;;  %v10283_v29 = vld [vmem:[%s13969_s5 + $0x338] sm:$0xff]  ;;  %v5803_v47 = vpop.f32.mrf.mxu2 }
 0x4a9   : > { %6766 = vmatpush.bf16.msra.mxu2 %v10235_v2  ;;  %v6050_v45 = vadd.f32 %v13574_v25, %v6038_v39  ;;  %v6217_v37 = vpack.c.bf16 %v6201_v32, %v6201_v32  ;;  %v5585_v1 = vadd.f32 %v13446_v44, %v5450_v57  ;;  %v10267_v57 = vld [vmem:[%s13969_s5 + $0x2b8] sm:$0xff] }
 0x4aa   : > { %v6123_v12 = vmax.f32 %v6121_v22, %v6122_v15  ;;  %v6117_v43 = vrot.slane %v6116_v33, 2  ;;  %v6137_v28 = vmax.f32 %v6135_v48, %v6136_v20  ;;  %v6130_v49 = vmax.f32 %v6128_v21, %v6129_v31  ;;  %v10238_v21 = vld [vmem:[%s13969_s5 + $0x1d0] sm:$0xff] }
 0x4ab   : > { %6846 = vmatpush.bf16.msra.mxu3 %v10242_v41  ;;  %v6216_v41 = vpack.c.bf16 %v6200_v13, %v6200_v13  ;;  %v5699_v42 = vadd.f32 %v13512_v52, %v5585_v1  ;;  %v10282_v20 = vld [vmem:[%s13969_s5 + $0x330] sm:$0xff]  ;;  %v5812_v52 = vadd.f32 %v5801_v60, %v13486_v59  ;;  %v10237_v59 = vld [vmem:[%s13969_s5 + $0x1c8] sm:$0xff]  ;;  %v10288_v13 = vld [vmem:[%s13969_s5 + $0x360] sm:$0xff] }
 0x4ac   : > { %v6118_v51 = vmax.f32 %v6116_v33, %v6117_v43  ;;  %v6124_v6 = vrot.slane %v6123_v12, 2  ;;  %v6138_v7 = vrot.slane %v6137_v28, 2  ;;  %v6131_v38 = vrot.slane %v6130_v49, 2  ;;  %v10229_v60 = vld [vmem:[%s13969_s5 + $0x188] sm:$0xff] }
 0x4ad   : > { %6767 = vmatpush.bf16.msra.mxu2 %v10234_v63 }
 0x4ae   : > { %v6026_v27 = vpop.f32.mrf.mxu1  ;;  %v6119_v16 = vrot.slane %v6118_v51, 1  ;;  %v6125_v26 = vmax.f32 %v6123_v12, %v6124_v6  ;;  %v6139_v61 = vmax.f32 %v6137_v28, %v6138_v7  ;;  %v6132_v33 = vmax.f32 %v6130_v49, %v6131_v38 }
 0x4af   : > { %v6039_v30 = vadd.f32 %v6026_v27, %v5925_v53  ;;  %6847 = vmatpush.bf16.msra.mxu3 %v10241_v36  ;;  %v5926_v36 = vadd.f32 %v5915_v55, %v5812_v52  ;;  %v5813_v28 = vadd.f32 %v5803_v47, %v5699_v42  ;;  %v10289_v27 = vld [vmem:[%s13969_s5 + $0x368] sm:$0xff]  ;;  %v10278_v47 = vld [vmem:[%s13969_s5 + $0x310] sm:$0xff] }
 0x4b0   : > { %v6120_v34 = vmax.f32 %v6118_v51, %v6119_v16  ;;  %v6126_v23 = vrot.slane %v6125_v26, 1  ;;  %v6140_v43 = vrot.slane %v6139_v61, 1  ;;  %v6133_v51 = vrot.slane %v6132_v33, 1  ;;  %v10265_v52 = vld [vmem:[%s13969_s5 + $0x2a8] sm:$0xff] }
 0x4b1   : > { %v6051_v14 = vadd.f32 %v13574_v25, %v6039_v30  ;;  %6768 = vmatpush.bf16.msra.mxu2 %v10233_v50  ;;  %v5927_v39 = vadd.f32 %v5917_v62, %v5813_v28  ;;  %v10236_v30 = vld [vmem:[%s13969_s5 + $0x1c0] sm:$0xff] }
 0x4b2   : > { %v6202_v18 = vmax.f32 %v6120_v34, 0.0  ;;  %v6127_v3 = vmax.f32 %v6125_v26, %v6126_v23  ;;  %v6141_v6 = vmax.f32 %v6139_v61, %v6140_v43  ;;  %v6134_v55 = vmax.f32 %v6132_v33, %v6133_v51  ;;  %v10275_v34 = vld [vmem:[%s13969_s5 + $0x2f8] sm:$0xff]  ;;  %v10273_v33 = vld [vmem:[%s13969_s5 + $0x2e8] sm:$0xff]  ;;  %v10272_v62 = vld [vmem:[%s13969_s5 + $0x2e0] sm:$0xff] }
 0x4b3   : > { %v13682_v58 = vmax.f32 %v6050_v45, %v6051_v14  ;;  %6848 = vmatpush.bf16.msra.mxu3 %v10240_v0  ;;  %v10280_v0 = vld [vmem:[%s13969_s5 + $0x320] sm:$0xff]  ;;  %v10279_v61 = vld [vmem:[%s13969_s5 + $0x318] sm:$0xff] }
 0x4b4   : > { %v6218_v2 = vpack.c.bf16 %v6202_v18, %v6202_v18  ;;  %v6203_v5 = vmax.f32 %v6127_v3, 0.0  ;;  %v6205_v23 = vmax.f32 %v6141_v6, 0.0  ;;  %v10228_v18 = vld [vmem:[%s13969_s5 + $0x180] sm:$0xff] }
 0x4b5   : > { %v6068_v9 = vrot.slane %v13682_v58, 2  ;;  %v6142_v8 = vsel %vm1243_vm1, %v13682_v58, -inf  ;;  %6769 = vmatpush.bf16.msra.mxu2 %v10232_v10  ;;  %v6070_v16 = vrot.slane %v13682_v58, 6  ;;  %v6069_v32 = vrot.slane %v13682_v58, 4 }
 0x4b6   : > { %v6143_v22 = vrot.slane %v6142_v8, 4  ;;  %v6029_v48 = vpop.f32.mrf.mxu1  ;;  %6537 = vmatmul.bf16.vlgmr.msrb.gmra.mxu3 %v6217_v37  ;;  %6616 = vmatmul.bf16.vlgmr.msrb.gmra.mxu0 %v6218_v2  ;;  %v6219_v44 = vpack.c.bf16 %v6203_v5, %v6203_v5  ;;  %v6221_v37 = vpack.c.bf16 %v6205_v23, %v6205_v23  ;;  %v10274_v5 = vld [vmem:[%s13969_s5 + $0x2f0] sm:$0xff] }
 0x4b7   : > { %v6149_v15 = vsel %vm1243_vm1, %v6068_v9, -inf  ;;  %6849 = vmatpush.bf16.msra.mxu3 %v10239_v24  ;;  %7240 = vmatpush.bf16.msrb.mxu0 %v10283_v29  ;;  %v6040_v50 = vadd.f32 %v6029_v48, %v5926_v36  ;;  %v6163_v3 = vsel %vm1243_vm1, %v6070_v16, -inf  ;;  %v6156_v38 = vsel %vm1243_vm1, %v6069_v32, -inf  ;;  %v10266_v48 = vld [vmem:[%s13969_s5 + $0x2b0] sm:$0xff]  ;;  %v10263_v16 = vld [vmem:[%s13969_s5 + $0x298] sm:$0xff] }
 0x4b8   : > { %v6144_v63 = vmax.f32 %v6142_v8, %v6143_v22  ;;  %v6150_v12 = vrot.slane %v6149_v15, 4  ;;  %6458 = vmatmul.bf16.vlgmr.msrb.gmra.mxu2 %v6216_v41  ;;  %6695 = vmatmul.bf16.vlgmr.msrb.gmra.mxu1 %v6219_v44  ;;  %v6164_v9 = vrot.slane %v6163_v3, 4  ;;  %v10287_v41 = vld [vmem:[%s13969_s5 + $0x358] sm:$0xff]  ;;  %v6157_v44 = vrot.slane %v6156_v38, 4  ;;  %v10262_v23 = vld [vmem:[%s13969_s5 + $0x290] sm:$0xff] }
 0x4b9   : > { %6770 = vmatpush.bf16.msra.mxu2 %v10231_v54  ;;  %7319 = vmatpush.bf16.msrb.mxu1 %v10291_v40  ;;  %v6052_v14 = vadd.f32 %v13574_v25, %v6040_v50 }
 0x4ba   : > { %v6145_v17 = vrot.slane %v6144_v63, 2  ;;  %v6151_v31 = vmax.f32 %v6149_v15, %v6150_v12 }
 0x4bb   : > { %6850 = vmatpush.bf16.msra.mxu3 %v10238_v21  ;;  %7241 = vmatpush.bf16.msrb.mxu0 %v10282_v20 }
 0x4bc   : > { %v6146_v35 = vmax.f32 %v6144_v63, %v6145_v17  ;;  %v6152_v53 = vrot.slane %v6151_v31, 2  ;;  %v6165_v63 = vmax.f32 %v6163_v3, %v6164_v9  ;;  %v10277_v17 = vld [vmem:[%s13969_s5 + $0x308] sm:$0xff]  ;;  %v10268_v3 = vld [vmem:[%s13969_s5 + $0x2c0] sm:$0xff] }
 0x4bd   : > { %6771 = vmatpush.bf16.msra.mxu2 %v10230_v4  ;;  %7320 = vmatpush.bf16.msrb.mxu1 %v10290_v56  ;;  %v10286_v4 = vld [vmem:[%s13969_s5 + $0x350] sm:$0xff]  ;;  %v6158_v56 = vmax.f32 %v6156_v38, %v6157_v44  ;;  %v10304_v44 = vld [vmem:[%s13969_s5 + $0x3e0] sm:$0xff] }
 0x4be   : > { %v6031_v11 = vpop.f32.mrf.mxu1  ;;  %v6147_v26 = vrot.slane %v6146_v35, 1  ;;  %v6153_v19 = vmax.f32 %v6151_v31, %v6152_v53  ;;  %v6166_v28 = vrot.slane %v6165_v63, 2  ;;  %v10271_v53 = vld [vmem:[%s13969_s5 + $0x2d8] sm:$0xff] }
 0x4bf   : > { %v6041_v49 = vadd.f32 %v6031_v11, %v5927_v39  ;;  %6851 = vmatpush.bf16.msra.mxu3 %v10237_v59  ;;  %7242 = vmatpush.bf16.msrb.mxu0 %v10281_v46  ;;  %v10264_v59 = vld [vmem:[%s13969_s5 + $0x2a0] sm:$0xff]  ;;  %v10285_v46 = vld [vmem:[%s13969_s5 + $0x348] sm:$0xff] }
 0x4c0   : > { %v6148_v7 = vmax.f32 %v6146_v35, %v6147_v26  ;;  %v6154_v45 = vrot.slane %v6153_v19, 1  ;;  %v6159_v35 = vrot.slane %v6158_v56, 2  ;;  %v10276_v39 = vld [vmem:[%s13969_s5 + $0x300] sm:$0xff] }
 0x4c1   : > { %v6053_v10 = vadd.f32 %v13574_v25, %v6041_v49  ;;  %6772 = vmatpush.bf16.msra.mxu2 %v10229_v60  ;;  %7321 = vmatpush.bf16.msrb.mxu1 %v10289_v27  ;;  %v6204_v25 = vmax.f32 %v6134_v55, 0.0  ;;  %v6167_v27 = vmax.f32 %v6165_v63, %v6166_v28  ;;  %v10284_v11 = vld [vmem:[%s13969_s5 + $0x340] sm:$0xff] }
 0x4c2   : > { %v6206_v58 = vmax.f32 %v6148_v7, 0.0  ;;  %v6155_v24 = vmax.f32 %v6153_v19, %v6154_v45  ;;  %v6160_v49 = vmax.f32 %v6158_v56, %v6159_v35  ;;  %v10269_v45 = vld [vmem:[%s13969_s5 + $0x2c8] sm:$0xff] }
 0x4c3   : > { %v13750_v29 = vmax.f32 %v6052_v14, %v6053_v10  ;;  %6852 = vmatpush.bf16.msra.mxu3 %v10236_v30  ;;  %7243 = vmatpush.bf16.msrb.mxu0 %v10280_v0  ;;  %v6220_v15 = vpack.c.bf16 %v6204_v25, %v6204_v25  ;;  %v10270_v0 = vld [vmem:[%s13969_s5 + $0x2d0] sm:$0xff]  ;;  %v6168_v32 = vrot.slane %v6167_v27, 1  ;;  %v10261_v10 = vld [vmem:[%s13969_s5 + $0x288] sm:$0xff]  ;;  %v10260_v25 = vld [vmem:[%s13969_s5 + $0x280] sm:$0xff] }
 0x4c4   : > { %v6222_v2 = vpack.c.bf16 %v6206_v58, %v6206_v58  ;;  %v6207_v1 = vmax.f32 %v6155_v24, 0.0  ;;  %v6161_v7 = vrot.slane %v6160_v49, 1  ;;  %v10307_v58 = vld [vmem:[%s13969_s5 + $0x3f8] sm:$0xff]  ;;  %v10301_v56 = vld [vmem:[%s13969_s5 + $0x3c8] sm:$0xff] }
 0x4c5   : > { %v6071_v8 = vrot.slane %v13750_v29, 2  ;;  %v6170_v54 = vsel %vm1243_vm1, %v13750_v29, -inf  ;;  %6773 = vmatpush.bf16.msra.mxu2 %v10228_v18  ;;  %7322 = vmatpush.bf16.msrb.mxu1 %v10288_v13  ;;  %v6169_v14 = vmax.f32 %v6167_v27, %v6168_v32  ;;  %v6073_v18 = vrot.slane %v13750_v29, 6 }
 0x4c6   : > { %v6171_v40 = vrot.slane %v6170_v54, 4  ;;  %6853 = vmatmul.bf16.vlgmr.msra.gmra.mxu3 %v6221_v37  ;;  %v6223_v22 = vpack.c.bf16 %v6207_v1, %v6207_v1  ;;  %6932 = vmatmul.bf16.vlgmr.msra.gmra.mxu0 %v6222_v2  ;;  %v6162_v13 = vmax.f32 %v6160_v49, %v6161_v7  ;;  %v10299_v37 = vld [vmem:[%s13969_s5 + $0x3b8] sm:$0xff] }
 0x4c7   : > { %7161 = vmatpush.bf16.msrb.mxu3 %v10275_v34  ;;  %v6177_v42 = vsel %vm1243_vm1, %v6071_v8, -inf  ;;  %7244 = vmatpush.bf16.msrb.mxu0 %v10279_v61  ;;  %v6209_v24 = vmax.f32 %v6169_v14, 0.0  ;;  %v6191_v38 = vsel %vm1243_vm1, %v6073_v18, -inf  ;;  %v10306_v61 = vld [vmem:[%s13969_s5 + $0x3f0] sm:$0xff]  ;;  %v10315_v14 = vld [vmem:[%s13971_s7 + $0x38] sm:$0xff] }
 0x4c8   : > { %v6172_v21 = vmax.f32 %v6170_v54, %v6171_v40  ;;  %v6178_v20 = vrot.slane %v6177_v42, 4  ;;  %6774 = vmatmul.bf16.vlgmr.msra.gmra.mxu2 %v6220_v15  ;;  %7011 = vmatmul.bf16.vlgmr.msra.gmra.mxu1 %v6223_v22  ;;  %v6208_v2 = vmax.f32 %v6162_v13, 0.0  ;;  %v6192_v1 = vrot.slane %v6191_v38, 4  ;;  %v10298_v8 = vld [vmem:[%s13969_s5 + $0x3b0] sm:$0xff]  ;;  %v10305_v40 = vld [vmem:[%s13969_s5 + $0x3e8] sm:$0xff]  ;;  %v10296_v15 = vld [vmem:[%s13969_s5 + $0x3a0] sm:$0xff] }
 0x4c9   : > { %7082 = vmatpush.bf16.msrb.mxu2 %v10267_v57  ;;  %7323 = vmatpush.bf16.msrb.mxu1 %v10287_v41  ;;  %v6072_v57 = vrot.slane %v13750_v29, 4  ;;  %v10314_v18 = vld [vmem:[%s13971_s7 + $0x30] sm:$0xff] }
 0x4ca   : > { %v6173_v12 = vrot.slane %v6172_v21, 2  ;;  %v6179_v43 = vmax.f32 %v6177_v42, %v6178_v20  ;;  %v6224_v9 = vpack.c.bf16 %v6208_v2, %v6208_v2  ;;  %v6193_v22 = vmax.f32 %v6191_v38, %v6192_v1  ;;  %v10303_v20 = vld [vmem:[%s13969_s5 + $0x3d8] sm:$0xff] }
 0x4cb   : > { %7162 = vmatpush.bf16.msrb.mxu3 %v10274_v5  ;;  %7245 = vmatpush.bf16.msrb.mxu0 %v10278_v47  ;;  %v6184_v29 = vsel %vm1243_vm1, %v6072_v57, -inf  ;;  %v6225_v5 = vpack.c.bf16 %v6209_v24, %v6209_v24  ;;  %v10295_v47 = vld [vmem:[%s13969_s5 + $0x398] sm:$0xff]  ;;  %v10312_v24 = vld [vmem:[%s13971_s7 + $0x20] sm:$0xff] }
 0x4cc   : > { %v6174_v31 = vmax.f32 %v6172_v21, %v6173_v12  ;;  %v6180_v36 = vrot.slane %v6179_v43, 2  ;;  %v6185_v54 = vrot.slane %v6184_v29, 4  ;;  %v6194_v42 = vrot.slane %v6193_v22, 2  ;;  %v10302_v12 = vld [vmem:[%s13969_s5 + $0x3d0] sm:$0xff]  ;;  %v10311_v2 = vld [vmem:[%s13971_s7 + $0x18] sm:$0xff] }
 0x4cd   : > { %7083 = vmatpush.bf16.msrb.mxu2 %v10266_v48  ;;  %7324 = vmatpush.bf16.msrb.mxu1 %v10286_v4  ;;  %v10297_v48 = vld [vmem:[%s13969_s5 + $0x3a8] sm:$0xff] }
 0x4ce   : > { %v6175_v51 = vrot.slane %v6174_v31, 1  ;;  %v6181_v6 = vmax.f32 %v6179_v43, %v6180_v36  ;;  %v6186_v41 = vmax.f32 %v6184_v29, %v6185_v54  ;;  %v10300_v36 = vld [vmem:[%s13969_s5 + $0x3c0] sm:$0xff] }
 0x4cf   : > { %7163 = vmatpush.bf16.msrb.mxu3 %v10273_v33  ;;  %7246 = vmatpush.bf16.msrb.mxu0 %v10277_v17  ;;  %v6195_v33 = vmax.f32 %v6193_v22, %v6194_v42  ;;  %v10293_v17 = vld [vmem:[%s13969_s5 + $0x388] sm:$0xff]  ;;  %v10310_v22 = vld [vmem:[%s13971_s7 + $0x10] sm:$0xff] }
 0x4d0   : > { %v6176_v50 = vmax.f32 %v6174_v31, %v6175_v51  ;;  %v6182_v60 = vrot.slane %v6181_v6, 1  ;;  %v6187_v21 = vrot.slane %v6186_v41, 2 }
 0x4d1   : > { %7084 = vmatpush.bf16.msrb.mxu2 %v10265_v52  ;;  %7325 = vmatpush.bf16.msrb.mxu1 %v10285_v46  ;;  %v6196_v43 = vrot.slane %v6195_v33, 1  ;;  %v10294_v52 = vld [vmem:[%s13969_s5 + $0x390] sm:$0xff] }
 0x4d2   : > { %v6210_v26 = vmax.f32 %v6176_v50, 0.0  ;;  %v6183_v19 = vmax.f32 %v6181_v6, %v6182_v60  ;;  %v6188_v63 = vmax.f32 %v6186_v41, %v6187_v21  ;;  %v10309_v41 = vld [vmem:[%s13971_s7 + $0x8] sm:$0xff]  ;;  %v10308_v21 = vld [vmem:[%s13971_s7] sm:$0xff] }
 0x4d3   : > { %7164 = vmatpush.bf16.msrb.mxu3 %v10272_v62  ;;  %7247 = vmatpush.bf16.msrb.mxu0 %v10276_v39  ;;  %v6197_v62 = vmax.f32 %v6195_v33, %v6196_v43  ;;  %v10321_v33 = vld [vmem:[%s13973_s9 + $0x28] sm:$0xff]  ;;  %v10319_v43 = vld [vmem:[%s13973_s9 + $0x18] sm:$0xff] }
 0x4d4   : > { %v6226_v30 = vpack.c.bf16 %v6210_v26, %v6210_v26  ;;  %v6211_v55 = vmax.f32 %v6183_v19, 0.0  ;;  %v6189_v4 = vrot.slane %v6188_v63, 1 }
 0x4d5   : > { %7085 = vmatpush.bf16.msrb.mxu2 %v10264_v59  ;;  %7326 = vmatpush.bf16.msrb.mxu1 %v10284_v11  ;;  %v6213_v28 = vmax.f32 %v6197_v62, 0.0  ;;  %v10292_v59 = vld [vmem:[%s13969_s5 + $0x380] sm:$0xff] }
 0x4d6   : > { %v6227_v34 = vpack.c.bf16 %v6211_v55, %v6211_v55  ;;  %7248 = vmatmul.bf16.vlgmr.msrb.gmra.mxu0 %v6226_v30  ;;  %v6190_v31 = vmax.f32 %v6188_v63, %v6189_v4  ;;  %v10320_v63 = vld [vmem:[%s13973_s9 + $0x20] sm:$0xff]  ;;  %v10318_v4 = vld [vmem:[%s13973_s9 + $0x10] sm:$0xff] }
 0x4d7   : > { %7165 = vmatpush.bf16.msrb.mxu3 %v10271_v53  ;;  %v6229_v51 = vpack.c.bf16 %v6213_v28, %v6213_v28  ;;  %7560 = vmatpush.bf16.msra.mxu0 %v10315_v14 }
 0x4d8   : > { %7327 = vmatmul.bf16.vlgmr.msrb.gmra.mxu1 %v6227_v34  ;;  %v6212_v46 = vmax.f32 %v6190_v31, 0.0 }
 0x4d9   : > { %7086 = vmatpush.bf16.msrb.mxu2 %v10263_v16 }
 0x4da   : > { %v6228_v6 = vpack.c.bf16 %v6212_v46, %v6212_v46 }
 0x4db   : > { %7166 = vmatpush.bf16.msrb.mxu3 %v10270_v0  ;;  %7561 = vmatpush.bf16.msra.mxu0 %v10314_v18 }
 0x4dd   : > { %7087 = vmatpush.bf16.msrb.mxu2 %v10262_v23 }
 0x4df   : > { %7167 = vmatpush.bf16.msrb.mxu3 %v10269_v45 }
 0x4e1   : > { %7088 = vmatpush.bf16.msrb.mxu2 %v10261_v10 }
 0x4e3   : > { %7168 = vmatpush.bf16.msrb.mxu3 %v10268_v3 }
 0x4e5   : > { %7089 = vmatpush.bf16.msrb.mxu2 %v10260_v25 }
 0x4e6   : > { %7169 = vmatmul.bf16.vlgmr.msrb.gmra.mxu3 %v6225_v5 }
 0x4e7   : > { %7477 = vmatpush.bf16.msra.mxu3 %v10307_v58  ;;  %v10313_v58 = vld [vmem:[%s13971_s7 + $0x28] sm:$0xff] }
 0x4e8   : > { %7090 = vmatmul.bf16.vlgmr.msrb.gmra.mxu2 %v6224_v9  ;;  %7562 = vmatpush.bf16.msra.mxu0 %v10313_v58 }
 0x4e9   : > { %7398 = vmatpush.bf16.msra.mxu2 %v10299_v37 }
 0x4eb   : > { %7478 = vmatpush.bf16.msra.mxu3 %v10306_v61 }
 0x4ec   : > { %7563 = vmatpush.bf16.msra.mxu0 %v10312_v24 }
 0x4ed   : > { %7399 = vmatpush.bf16.msra.mxu2 %v10298_v8 }
 0x4ef   : > { %7479 = vmatpush.bf16.msra.mxu3 %v10305_v40 }
 0x4f0   : > { %7564 = vmatpush.bf16.msra.mxu0 %v10311_v2 }
 0x4f1   : > { %7400 = vmatpush.bf16.msra.mxu2 %v10297_v48 }
 0x4f3   : > { %7480 = vmatpush.bf16.msra.mxu3 %v10304_v44  ;;  %v10323_v44 = vld [vmem:[%s13973_s9 + $0x38] sm:$0xff] }
 0x4f4   : > { %7565 = vmatpush.bf16.msra.mxu0 %v10310_v22  ;;  %7640 = vmatpush.bf16.msra.mxu1 %v10323_v44 }
 0x4f5   : > { %7401 = vmatpush.bf16.msra.mxu2 %v10296_v15  ;;  %v10322_v15 = vld [vmem:[%s13973_s9 + $0x30] sm:$0xff] }
 0x4f7   : > { %7481 = vmatpush.bf16.msra.mxu3 %v10303_v20 }
 0x4f8   : > { %7566 = vmatpush.bf16.msra.mxu0 %v10309_v41  ;;  %7641 = vmatpush.bf16.msra.mxu1 %v10322_v15 }
 0x4f9   : > { %7402 = vmatpush.bf16.msra.mxu2 %v10295_v47 }
 0x4fb   : > { %7482 = vmatpush.bf16.msra.mxu3 %v10302_v12 }
 0x4fc   : > { %7567 = vmatpush.bf16.msra.mxu0 %v10308_v21  ;;  %7642 = vmatpush.bf16.msra.mxu1 %v10321_v33 }
 0x4fd   : > { %7403 = vmatpush.bf16.msra.mxu2 %v10294_v52 }
 0x4ff   : > { %7483 = vmatpush.bf16.msra.mxu3 %v10301_v56 }
 0x500   : > { %7643 = vmatpush.bf16.msra.mxu1 %v10320_v63 }
 0x501   : > { %7404 = vmatpush.bf16.msra.mxu2 %v10293_v17 }
 0x503   : > { %7484 = vmatpush.bf16.msra.mxu3 %v10300_v36  ;;  %v7491_v36 = vld [vmem:[%s13970_s6] sm:$0x1] }
 0x504   : > { %7644 = vmatpush.bf16.msra.mxu1 %v10319_v43 }
 0x505   : > { %7405 = vmatpush.bf16.msra.mxu2 %v10292_v59 }
 0x506   : > { %7485 = vmatmul.bf16.vlgmr.msra.gmra.mxu3 %v6229_v51 }
 0x508   : > { %7406 = vmatmul.bf16.vlgmr.msra.gmra.mxu2 %v6228_v6  ;;  %7645 = vmatpush.bf16.msra.mxu1 %v10318_v4 }
 0x529   : > { %v6381_v35 = vpop.f32.mrf.mxu3 }
 0x52b   : > { %v6320_v53 = vpop.f32.mrf.mxu2 }
 0x52c   : > { %v6382_v39 = vadd.f32 %v6381_v35, %v6320_v53  ;;  %v10317_v53 = vld [vmem:[%s13973_s9 + $0x8] sm:$0xff] }
 0x52d   : > { %7646 = vmatpush.bf16.msra.mxu1 %v10317_v53 }
 0x531   : > { %v6383_v50 = vpop.f32.mrf.mxu3 }
 0x532   : > { %v7511_v50 = vld [vmem:[%s13972_s8] sm:$0x1] }
 0x533   : > { %v6322_v60 = vpop.f32.mrf.mxu2  ;;  %v6617_v27 = vpop.f32.mrf.mxu0 }
 0x535   : > { %v6696_v16 = vpop.f32.mrf.mxu1 }
 0x539   : > { %v6538_v11 = vpop.f32.mrf.mxu3 }
 0x53b   : > { %v6459_v26 = vpop.f32.mrf.mxu2  ;;  %v6619_v19 = vpop.f32.mrf.mxu0 }
 0x53c   : > { %v6463_v25 = vadd.f32 %v6459_v26, %v6382_v39  ;;  %v10316_v39 = vld [vmem:[%s13973_s9] sm:$0xff] }
 0x53d   : > { %v6698_v49 = vpop.f32.mrf.mxu1  ;;  %7647 = vmatpush.bf16.msra.mxu1 %v10316_v39  ;;  %v7591_v19 = vld [vmem:[%s13974_s10] sm:$0x1] }
 0x53e   : > { %v6542_v29 = vadd.f32 %v6538_v11, %v6463_v25 }
 0x540   : > { %v6621_v5 = vadd.f32 %v6617_v27, %v6542_v29 }
 0x541   : > { %v6540_v30 = vpop.f32.mrf.mxu3 }
 0x542   : > { %v6700_v1 = vadd.f32 %v6696_v16, %v6621_v5 }
 0x543   : > { %v6461_v0 = vpop.f32.mrf.mxu2  ;;  %v6933_v55 = vpop.f32.mrf.mxu0 }
 0x545   : > { %v7012_v32 = vpop.f32.mrf.mxu1 }
 0x549   : > { %v6854_v34 = vpop.f32.mrf.mxu3 }
 0x54b   : > { %v6775_v23 = vpop.f32.mrf.mxu2  ;;  %v6935_v7 = vpop.f32.mrf.mxu0 }
 0x54c   : > { %v6779_v8 = vadd.f32 %v6775_v23, %v6700_v1 }
 0x54d   : > { %v7014_v45 = vpop.f32.mrf.mxu1 }
 0x54e   : > { %v6858_v54 = vadd.f32 %v6854_v34, %v6779_v8 }
 0x550   : > { %v6937_v42 = vadd.f32 %v6933_v55, %v6858_v54 }
 0x551   : > { %v6856_v10 = vpop.f32.mrf.mxu3 }
 0x552   : > { %v7016_v20 = vadd.f32 %v7012_v32, %v6937_v42 }
 0x553   : > { %v6777_v13 = vpop.f32.mrf.mxu2  ;;  %v7249_v3 = vpop.f32.mrf.mxu0 }
 0x555   : > { %v7328_v57 = vpop.f32.mrf.mxu1 }
 0x55b   : > { %v7251_v38 = vpop.f32.mrf.mxu0 }
 0x55d   : > { %v7330_v37 = vpop.f32.mrf.mxu1 }
 0x569   : > { %v7170_v61 = vpop.f32.mrf.mxu3 }
 0x56b   : > { %v7091_v9 = vpop.f32.mrf.mxu2 }
 0x56c   : > { %v7095_v47 = vadd.f32 %v7091_v9, %v7016_v20 }
 0x56e   : > { %v7174_v12 = vadd.f32 %v7170_v61, %v7095_v47 }
 0x570   : > { %v7253_v52 = vadd.f32 %v7249_v3, %v7174_v12 }
 0x571   : > { %v7172_v40 = vpop.f32.mrf.mxu3 }
 0x572   : > { %v7332_v62 = vadd.f32 %v7328_v57, %v7253_v52 }
 0x573   : > { %v7093_v48 = vpop.f32.mrf.mxu2 }
 0x589   : > { %v7486_v56 = vpop.f32.mrf.mxu3 }
 0x58b   : > { %v7407_v17 = vpop.f32.mrf.mxu2 }
 0x58c   : > { %v7411_v31 = vadd.f32 %v7407_v17, %v7332_v62 }
 0x58e   : > { %v7490_v28 = vadd.f32 %v7486_v56, %v7411_v31 }
 0x590   : > { %v7492_v59 = vadd.f32 %v7491_v36, %v7490_v28 }
 0x591   : > { %v7488_v46 = vpop.f32.mrf.mxu3 }
 0x592   : > { %v7493_v51 = vmax.f32 %v7492_v59, 0.0 }
 0x593   : > { %v7409_v6 = vpop.f32.mrf.mxu2 }
 0x594   : > { %v7494_v35 = vpack.c.bf16 %v7493_v51, %v7493_v51 }
 0x596   : > { %7568 = vmatmul.bf16.vlgmr.msra.gmra.mxu0 %v7494_v35 }
 0x613   : > { %v7569_v60 = vpop.f32.mrf.mxu0 }
 0x614   : > { %v7570_v27 = vadd.f32 %v7569_v60, %v7511_v50 }
 0x616   : > { %v7573_v16 = vmax.f32 %v7570_v27, 0.0 }
 0x618   : > { %v7574_v11 = vpack.c.bf16 %v7573_v16, %v7573_v16 }
 0x61a   : > { %7648 = vmatmul.bf16.vlgmr.msra.gmra.mxu1 %v7574_v11 }
 0x61b   : > { %v7571_v26 = vpop.f32.mrf.mxu0 }
 0x697   : > { %v7649_v49 = vpop.f32.mrf.mxu1 }
 0x698   : > { %v7650_v30 = vadd.f32 %v7649_v49, %v7591_v19 }
 0x69a   : > { %v7654_v0 = vsel %vm7653_vm9, %v7650_v30, -inf }
 0x69b   : > { %7655 = vmax.xlane.f32.xlu0 %v7654_v0 }
 0x69f   : > { %v7651_v55 = vpop.f32.mrf.mxu1 }
 0x70e   : > { %v7656_v32 = vpop.xlane.xlu0 %7655 }
 0x70f   : > { %v7657_v34 = vsub.f32 %v7650_v30, %v7656_v32 }
 0x711   : > { %v7658_v23 = vmul.f32 1.442695, %v7657_v34 }
 0x713   : > { %10366 = vpow2.f32 %v7658_v23 }
 0x719   : > { %v10367_v7 = vpop.eup %10366 }
 0x71a   : > { %v7660_v45 = vsel %vm7653_vm9, %v10367_v7, 0.0 }
 0x71b   : > { %7661 = vadd.xlane.f32.xlu0 %v7660_v45 }
 0x78e   : > { %v7662_v14 = vpop.xlane.xlu0 %7661 }
 0x78f   : > { %10368 = vrcp.f32 %v7662_v14  ;;  %v7674_v3 = vand.u32 2147483648, %v7662_v14  ;;  %v7672_v58 = vand.u32 2147483647, %v7662_v14  ;;  %vm7668_vm11 = vweird.f32 %v7662_v14 }
 0x791   : > { %v7675_v25 = vor.u32 1.1754944e-38, %v7674_v3  ;;  %vm7673_vm13 = vcmp.eq.f32.partialorder %v7672_v58, 8.507059e+37 }
 0x795   : > { %v10369_v10 = vpop.eup %10368 }
 0x796   : > { %v7664_v18 = vmul.f32 %v10369_v10, %v7662_v14  ;;  %vm7669_vm10 = vweird.f32 %v10369_v10 }
 0x797   : > { %vm7670_vm12 = vmor %vm7668_vm11, %vm7669_vm10 }
 0x798   : > { %v7665_v13 = vsub.f32 1.0, %v7664_v18 }
 0x79a   : > { %v7666_v57 = vmul.f32 %v10369_v10, %v7665_v13 }
 0x79c   : > { %v7667_v24 = vadd.f32 %v10369_v10, %v7666_v57 }
 0x79e   : > { %v7671_v38 = vsel %vm7670_vm12, %v10369_v10, %v7667_v24 }
 0x79f   : > { %v7676_v37 = vsel %vm7673_vm13, %v7675_v25, %v7671_v38 }
 0x7a0   : > { %v7677_v2 = vmul.f32 %v10367_v7, %v7676_v37 }
 0x7a2   : > { %7678 = vst [vmem:[%s378_s25] sm:$0x1] %v7677_v2 }
 0x7a3   : > { %10402 = shalt.err (!%p10399_p3)
}
 0x7a4   : > { %10325 = dma.vmem_to_hbm [thread:$0]  (%p10537_p5), %s7691_s29, 16, %s7693_s30, %s7680_s12  }
 0x7a5 PF: > { %p10331_p4 = scmp.ge.s32.totalorder %s10437_s20, 2  ;;  %s7704_s24 = sand.u32 1, %s10425_s17  }
 0x7a6   : > { %s7705_s25 = scalar_lea.sflag [#allocation3], %s7704_s24 }
 0x7a7   : > { %p10328_p7 = pnand %p10331_p4, %p10541_p6 }
 0x7a9   : > { %p10329_p8 = pneg %p10328_p7 }
 0x7ab   : > { %10420 = dma.done.wait (%p10329_p8), %s7705_s25, 16  }
 0x7ac   : > { %10422 = vsyncadd (%p10329_p8), %s7705_s25, 4294967280  ;;  %p21_p9 = scmp.ge.s32.totalorder %s10524_s23, 4   ;;  %s14121_s17 = smov %s10429_s18 }
 0x7ad   : > { %s14122_s18 = smov %s10433_s19  ;;  %s14123_s19 = smov %s10535_s26 }
 0x7ae   : > { %s14124_s20 = smov %s10524_s23  ;;  %23 = sbr.rel (!%p21_p9) target bundleno = 5 (0x5), region = 138 }
 0x7b3   :  { %7710 = vsyncpa [#allocation3], 1 }
 0x7b4   :  { %7712 = vsyncpa [#allocation3 + $0x1], 1 }

</bundles_post_ra>
